<compile_context>
chip_gen: v6e
topology: v6e:2x2x1
jax: 0.10.0
libtpu: 0.0.40
codegen_flags: <defaults>
</compile_context>

<pallas_src>
import functools

import jax
import jax.numpy as jnp
from jax.experimental import pallas as pl
from jax.experimental.pallas import tpu as pltpu

N_FEATURES = 64
N_LAYERS = 3


def _relu(x):
    return jnp.maximum(x, 0.0)


def _const_spec(shape):
    zeros = (0,) * len(shape)
    return pl.BlockSpec(shape, lambda g, _z=zeros: _z)


def _pick_tb(batch, n):
    """Graphs per grid step: target >=128 stacked node rows, cap the bf16 adj
    block (double-buffered) at ~8 MiB, keep >=2 grid steps for v7x's 2 TCs."""
    tb = 1 if n >= 128 else max(1, 128 // n)
    vmem_cap = max(1, (8 << 20) // max(1, 2 * n * n * 2))
    tb = min(tb, vmem_cap, batch)
    if batch < 2 * tb and batch >= 2:
        tb = max(1, batch // 2)
    return tb


def _pick_tj(tb, n):
    """Neighbour-axis chunk for the edge embedding: keep the [R, tj/2, 2F] f32
    intermediate around ~2 MiB so it never threatens VMEM even at large N."""
    r = tb * n
    tj = max(2, min(n, (2 << 20) // max(1, r * 256)))
    if tj >= 2:
        tj -= tj % 2
    return max(1, tj)


# ----------------------------------------------------------------------------
# Pallas kernel: full MPNN forward for TB graphs per grid step.
# ----------------------------------------------------------------------------
def mpnn_kernel(adj_ref, srow_ref, scol_ref, invn_ref, nsc_ref,
                w_init_ref, we0_ref, we1_ref, w_efm_ref, w_efn_ref,
                wm_ref, wu_ref, wp_ref, wra_ref, wrb_ref, br_ref,
                out_ref, *, tj):
    TB, N, _ = adj_ref.shape
    F = N_FEATURES
    R = TB * N
    f32 = jnp.float32
    bf16 = jnp.bfloat16

    adj_bf = adj_ref[...]                         # [TB, N, N] bf16, A = adj^T
    s_row = srow_ref[...]                         # [TB, 1, N] f32
    inv_norm = invn_ref[...].reshape(R, 1)        # [R, 1]  (host-precomputed 1/norm)
    nsc = nsc_ref[...].reshape(R, 1)              # [R, 1]  (host-precomputed norm/nmax)

    # ---- node init embedding: relu(state * W_init)  (K == 1 -> outer product)
    h = _relu(scol_ref[...].reshape(R, 1) * w_init_ref[...])          # [R, F] f32

    # ---- edge embedding: chunked over neighbour axis j, two j-slices packed
    #      side by side along lanes (2*F = 128) to fill the vregs.
    we0_2 = we0_ref[...].reshape(1, 1, 2 * F)
    we1_2 = we1_ref[...].reshape(1, 1, 2 * F)

    def _edge_slices(a0, w):
        a_c = adj_bf[:, :, a0:a0 + w].reshape(R, w).astype(f32)
        s_c = jnp.broadcast_to(s_row[:, :, a0:a0 + w], (TB, N, w)).reshape(R, w)
        s_c = jnp.where(a_c != 0.0, s_c, 0.0)     # mask node feature of non-edges
        return a_c, s_c

    acc2 = jnp.zeros((R, 2 * F), f32)
    extra = None
    j0 = 0
    while j0 < N:                                 # static (trace-time) chunk loop
        w = min(tj, N - j0)
        if w % 2 == 0:
            hw = w // 2
            a_a, s_a = _edge_slices(j0, hw)
            a_b, s_b = _edge_slices(j0 + hw, hw)
            pa = jnp.concatenate(
                [jnp.broadcast_to(a_a[:, :, None], (R, hw, F)),
                 jnp.broadcast_to(a_b[:, :, None], (R, hw, F))], axis=-1)
            ps = jnp.concatenate(
                [jnp.broadcast_to(s_a[:, :, None], (R, hw, F)),
                 jnp.broadcast_to(s_b[:, :, None], (R, hw, F))], axis=-1)
            acc2 = acc2 + jnp.sum(_relu(pa * we0_2 + ps * we1_2), axis=1)
        else:                                     # odd remainder chunk (rare)
            a_c, s_c = _edge_slices(j0, w)
            t = jnp.sum(_relu(a_c[:, :, None] * we0_2[:, :, :F]
                              + s_c[:, :, None] * we1_2[:, :, :F]), axis=1)
            extra = t if extra is None else extra + t
        j0 += w
    emb_sum = acc2[:, :F] + acc2[:, F:]
    if extra is not None:
        emb_sum = emb_sum + extra
    emb_e = emb_sum * inv_norm                                        # [R, F]
    edge_emb = _relu(
        jnp.dot(emb_e.astype(bf16), w_efm_ref[...], preferred_element_type=f32)
        + nsc * w_efn_ref[...])                                       # [R, F]

    # ---- message passing: 3 untied layers, K=128 concat matmuls, bf16 MXU inputs
    for l in range(N_LAYERS):
        h3 = h.reshape(TB, N, F).astype(bf16)
        agg = jnp.einsum('gij,gjf->gif', adj_bf, h3,
                         preferred_element_type=f32).reshape(R, F) * inv_norm
        cat_m = jnp.concatenate([agg, edge_emb], axis=-1).astype(bf16)   # [R, 2F]
        msg = _relu(jnp.dot(cat_m, wm_ref[l], preferred_element_type=f32))
        cat_u = jnp.concatenate([h, msg], axis=-1).astype(bf16)          # [R, 2F]
        h = _relu(jnp.dot(cat_u, wu_ref[l], preferred_element_type=f32))

    # ---- readout (h >= 0 already, so relu(h) == h)
    h3 = h.reshape(TB, N, F)
    pooled = jnp.sum(h3, axis=1) * (1.0 / N)                          # [TB, F]
    hp = _relu(jnp.dot(pooled.astype(bf16), wp_ref[...],
                       preferred_element_type=f32))                   # [TB, F]
    c = jnp.sum(hp * wra_ref[...], axis=-1, keepdims=True)            # [TB, 1]
    wrb3 = jnp.broadcast_to(wrb_ref[...][None].astype(bf16), (TB, 1, F))
    local3 = jnp.einsum('gkf,gnf->gkn', wrb3, h3.astype(bf16),
                        preferred_element_type=f32)                   # [TB, 1, N]
    out_ref[...] = local3 + c[:, :, None] + br_ref[...]               # lane-dense over nodes


# ----------------------------------------------------------------------------
# Wrapper: host-side glue (norms, transpose, weight packing) + pallas_call.
# ----------------------------------------------------------------------------
def maxcut_context_pallas(state, adj, params, *, tb=None, tj=None):
    f32 = jnp.float32
    bf16 = jnp.bfloat16
    state = state.astype(f32)
    adj = adj.astype(f32)
    B, N = state.shape
    F = N_FEATURES

    # Host-side glue (XLA): degrees / norm, the global cross-batch nmax scalar,
    # and the adjacency transpose (MPNN operates on A = adj^T).
    deg = jnp.sum((adj != 0).astype(f32), axis=-1)                    # [B, N]
    norm = jnp.where(deg == 0, 1.0, deg)
    nmax = jnp.max(norm)
    inv_norm = (1.0 / norm)[..., None]                                # [B, N, 1]
    nscaled = (norm / nmax)[..., None]                                # [B, N, 1]

    adj_t = jnp.swapaxes(adj, -1, -2).astype(bf16)
    state_row = state.reshape(B, 1, N)
    state_col = state.reshape(B, N, 1)

    if tb is None:
        tb = _pick_tb(B, N)
    grid = -(-B // tb)
    b_pad = grid * tb
    if b_pad != B:
        pad = b_pad - B

        def _padz(x, fill=0.0):
            return jnp.concatenate(
                [x, jnp.full((pad,) + x.shape[1:], fill, x.dtype)], axis=0)

        adj_t = _padz(adj_t)
        state_row = _padz(state_row)
        state_col = _padz(state_col)
        inv_norm = _padz(inv_norm, 1.0)
        nscaled = _padz(nscaled, 1.0)
    if tj is None:
        tj = _pick_tj(tb, N)

    # Weight splitting / packing so that concat-linears become plain matmuls.
    we0 = jnp.pad(params['w_edge'][0:1, :], ((0, 0), (0, 1)))          # [1, F]
    we1 = jnp.pad(params['w_edge'][1:2, :], ((0, 0), (0, 1)))          # [1, F]
    we0_2 = jnp.concatenate([we0, we0], axis=-1)                       # [1, 2F] lane-doubled
    we1_2 = jnp.concatenate([we1, we1], axis=-1)
    w_efm = jnp.concatenate([params['w_ef'][:F - 1, :],
                             jnp.zeros((1, F), f32)], axis=0).astype(bf16)   # [F, F]
    w_efn = params['w_ef'][F - 1:, :]                                  # [1, F] f32
    w_m = params['w_m'].astype(bf16)                                   # [3, 2F, F]
    w_u = params['w_u'].astype(bf16)
    w_p = params['w_p'].astype(bf16)
    wr_a = params['w_r'][:F, 0].reshape(1, F)
    wr_b = params['w_r'][F:, 0].reshape(1, F)
    br = params['b_r'].reshape(1, 1)

    grid_spec = pltpu.PrefetchScalarGridSpec(
        num_scalar_prefetch=0,
        grid=(grid,),
        in_specs=[
            pl.BlockSpec((tb, N, N), lambda g: (g, 0, 0)),     # adj^T (bf16)
            pl.BlockSpec((tb, 1, N), lambda g: (g, 0, 0)),     # state, row layout
            pl.BlockSpec((tb, N, 1), lambda g: (g, 0, 0)),     # state, col layout
            pl.BlockSpec((tb, N, 1), lambda g: (g, 0, 0)),     # 1 / norm
            pl.BlockSpec((tb, N, 1), lambda g: (g, 0, 0)),     # norm / nmax
            _const_spec((1, F)),                               # w_init
            _const_spec((1, 2 * F)), _const_spec((1, 2 * F)),  # we0, we1 (lane-doubled)
            _const_spec((F, F)), _const_spec((1, F)),          # w_efm, w_efn
            _const_spec((N_LAYERS, 2 * F, F)),                 # w_m
            _const_spec((N_LAYERS, 2 * F, F)),                 # w_u
            _const_spec((F, F)),                               # w_p
            _const_spec((1, F)), _const_spec((1, F)),          # wr_a, wr_b
            _const_spec((1, 1)),                               # b_r
        ],
        out_specs=pl.BlockSpec((tb, 1, N), lambda g: (g, 0, 0)),
    )

    out = pl.pallas_call(
        functools.partial(mpnn_kernel, tj=tj),
        out_shape=jax.ShapeDtypeStruct((b_pad, 1, N), f32),
        grid_spec=grid_spec,
        compiler_params=pltpu.CompilerParams(
            dimension_semantics=("parallel",),
            vmem_limit_bytes=48 * 1024 * 1024),
    )(adj_t, state_row, state_col, inv_norm, nscaled,
      params['w_init'], we0_2, we1_2, w_efm, w_efn,
      w_m, w_u, w_p, wr_a, wr_b, br)

    return out.reshape(b_pad, N)[:B]   # matches torch .squeeze() for B>1, N>1


# ----------------------------------------------------------------------------
# Pure-JAX f32 reference (mirrors the PyTorch code path with explicit concats).
# ----------------------------------------------------------------------------
def mpnn_reference(state, adj, p):
    B, N = state.shape
    F = N_FEATURES
    obs = jnp.concatenate([state[:, None, :], adj], axis=1)        # [B, 1+N, N]
    obs = jnp.swapaxes(obs, -1, -2)                                # [B, N, 1+N]
    nf = obs[:, :, 0:1]                                            # [B, N, 1]
    A = obs[:, :, 1:]                                              # [B, N, N]
    norm = jnp.sum((A != 0), axis=1)[..., None].astype(jnp.float32)
    norm = jnp.where(norm == 0, 1.0, norm)
    h = jax.nn.relu(nf @ p['w_init'])
    nf_j = jnp.broadcast_to(nf[:, None, :, :], (B, N, N, 1))
    ef = jnp.concatenate([A[..., None], nf_j], axis=-1)
    ef = ef * (A[..., None] != 0).astype(jnp.float32)
    emb = jax.nn.relu(ef @ p['w_edge'])
    emb_e = jnp.sum(emb, axis=2) / norm
    nmax = jnp.max(norm)
    edge_emb = jax.nn.relu(jnp.concatenate([emb_e, norm / nmax], axis=-1) @ p['w_ef'])
    for l in range(N_LAYERS):
        agg = (A @ h) / norm
        msg = jax.nn.relu(jnp.concatenate([agg, edge_emb], axis=-1) @ p['w_m'][l])
        h = jax.nn.relu(jnp.concatenate([h, msg], axis=-1) @ p['w_u'][l])
    h_pooled = (jnp.sum(h, axis=1) / N) @ p['w_p']
    f_pooled = jnp.broadcast_to(h_pooled[:, None, :], (B, N, F))
    feats = jax.nn.relu(jnp.concatenate([f_pooled, h], axis=-1))
    out = feats @ p['w_r'] + p['b_r']
    return jnp.squeeze(out)


# ----------------------------------------------------------------------------
# Deterministic synthetic parameters (stored as [in, out], i.e. transposed
# w.r.t. nn.Linear's [out, in]; equivalent forward math).
# ----------------------------------------------------------------------------
def init_params(key, F=N_FEATURES):
    ks = jax.random.split(key, 8)

    def u(k, shape, scale=0.2):
        return jax.random.uniform(k, shape, jnp.float32, -scale, scale)

    return {
        'w_init': u(ks[0], (1, F)),                # Linear(1, 64, bias=False)
        'w_edge': u(ks[1], (2, F - 1)),            # Linear(2, 63, bias=False)
        'w_ef':   u(ks[2], (F, F)),                # Linear(64, 64, bias=False)
        'w_m':    u(ks[3], (N_LAYERS, 2 * F, F)),  # 3x Linear(128, 64, bias=False)
        'w_u':    u(ks[4], (N_LAYERS, 2 * F, F)),  # 3x Linear(128, 64, bias=False)
        'w_p':    u(ks[5], (F, F)),                # Linear(64, 64, bias=False)  (pool)
        'w_r':    u(ks[6], (2 * F, 1)),            # Linear(128, 1, bias=True)   (readout)
        'b_r':    u(ks[7], (1,)),
    }


if __name__ == "__main__":
    key = jax.random.PRNGKey(0)
    B, N = 16, 16
    k_adj, k_mask, k_state, k_params = jax.random.split(key, 4)

    # Deterministic weighted, symmetric, zero-diagonal adjacency.
    dense = jax.random.uniform(k_adj, (B, N, N), jnp.float32, 0.1, 1.0)
    conn = (jax.random.uniform(k_mask, (B, N, N)) > 0.5).astype(jnp.float32)
    adj = dense * conn
    adj = 0.5 * (adj + jnp.swapaxes(adj, -1, -2))
    adj = adj * (1.0 - jnp.eye(N, dtype=jnp.float32))[None]

    # Node "state" (spins +-1), i.e. td['state'].
    state = jnp.where(jax.random.uniform(k_state, (B, N)) > 0.5, 1.0, -1.0).astype(jnp.float32)

    params = init_params(k_params)

    out = maxcut_context_pallas(state, adj, params)
    out = jax.block_until_ready(out)
    assert out.shape == (B, N), out.shape

    with jax.default_matmul_precision("float32"):
        ref = jax.jit(mpnn_reference)(state, adj, params)
    ref = jax.block_until_ready(ref)

    # bf16 MXU operands (f32 accumulation) -> allow a few % numerical drift.
    if not bool(jnp.allclose(out, ref, atol=3e-2, rtol=3e-2)):
        err = float(jnp.max(jnp.abs(out - ref)))
        raise AssertionError(f"Pallas MPNN diverges from reference (max abs err {err:.4g})")

    print("KERNEL_OK")
</pallas_src>

<mosaic_0001>
module attributes {stable_mosaic.version = 11 : i64} {
  func.func @mpnn_kernel(%arg0: i32, %arg1: memref<8x16x16xbf16, #tpu.memory_space<vmem>>, %arg2: memref<8x1x16xf32, #tpu.memory_space<vmem>>, %arg3: memref<8x16x1xf32, #tpu.memory_space<vmem>>, %arg4: memref<8x16x1xf32, #tpu.memory_space<vmem>>, %arg5: memref<8x16x1xf32, #tpu.memory_space<vmem>>, %arg6: memref<1x64xf32, #tpu.memory_space<vmem>>, %arg7: memref<1x128xf32, #tpu.memory_space<vmem>>, %arg8: memref<1x128xf32, #tpu.memory_space<vmem>>, %arg9: memref<64x64xbf16, #tpu.memory_space<vmem>>, %arg10: memref<1x64xf32, #tpu.memory_space<vmem>>, %arg11: memref<3x128x64xbf16, #tpu.memory_space<vmem>>, %arg12: memref<3x128x64xbf16, #tpu.memory_space<vmem>>, %arg13: memref<64x64xbf16, #tpu.memory_space<vmem>>, %arg14: memref<1x64xf32, #tpu.memory_space<vmem>>, %arg15: memref<1x64xf32, #tpu.memory_space<vmem>>, %arg16: memref<1x1xf32, #tpu.memory_space<vmem>>, %arg17: memref<8x1x16xf32, #tpu.memory_space<vmem>>) attributes {dimension_semantics = [#tpu.dimension_semantics<parallel>], iteration_bounds = array<i64: 2>, scalar_prefetch = 0 : i64, scratch_operands = 0 : i64, tpu.core_type = #tpu.core_type<tc>, window_params = [{transform_indices = @transform_0, window_bounds = array<i64: 8, 16, 16>}, {transform_indices = @transform_1, window_bounds = array<i64: 8, 1, 16>}, {transform_indices = @transform_2, window_bounds = array<i64: 8, 16, 1>}, {transform_indices = @transform_3, window_bounds = array<i64: 8, 16, 1>}, {transform_indices = @transform_4, window_bounds = array<i64: 8, 16, 1>}, {pipeline_mode = #tpu.pipeline_mode<synchronous>, transform_indices = @transform_5, window_bounds = array<i64: 1, 64>}, {pipeline_mode = #tpu.pipeline_mode<synchronous>, transform_indices = @transform_6, window_bounds = array<i64: 1, 128>}, {pipeline_mode = #tpu.pipeline_mode<synchronous>, transform_indices = @transform_7, window_bounds = array<i64: 1, 128>}, {pipeline_mode = #tpu.pipeline_mode<synchronous>, transform_indices = @transform_8, window_bounds = array<i64: 64, 64>}, {pipeline_mode = #tpu.pipeline_mode<synchronous>, transform_indices = @transform_9, window_bounds = array<i64: 1, 64>}, {pipeline_mode = #tpu.pipeline_mode<synchronous>, transform_indices = @transform_10, window_bounds = array<i64: 3, 128, 64>}, {pipeline_mode = #tpu.pipeline_mode<synchronous>, transform_indices = @transform_11, window_bounds = array<i64: 3, 128, 64>}, {pipeline_mode = #tpu.pipeline_mode<synchronous>, transform_indices = @transform_12, window_bounds = array<i64: 64, 64>}, {pipeline_mode = #tpu.pipeline_mode<synchronous>, transform_indices = @transform_13, window_bounds = array<i64: 1, 64>}, {pipeline_mode = #tpu.pipeline_mode<synchronous>, transform_indices = @transform_14, window_bounds = array<i64: 1, 64>}, {pipeline_mode = #tpu.pipeline_mode<synchronous>, transform_indices = @transform_15, window_bounds = array<i64: 1, 1>}, {transform_indices = @transform_16, window_bounds = array<i64: 8, 1, 16>}]} {
    %c0 = arith.constant 0 : index
    %c0_0 = arith.constant 0 : index
    %c0_1 = arith.constant 0 : index
    %0 = vector.load %arg1[%c0, %c0_0, %c0_1] : memref<8x16x16xbf16, #tpu.memory_space<vmem>>, vector<8x16x16xbf16>
    %c0_2 = arith.constant 0 : index
    %c0_3 = arith.constant 0 : index
    %c0_4 = arith.constant 0 : index
    %1 = vector.load %arg2[%c0_2, %c0_3, %c0_4] : memref<8x1x16xf32, #tpu.memory_space<vmem>>, vector<8x1x16xf32>
    %c0_5 = arith.constant 0 : index
    %c0_6 = arith.constant 0 : index
    %c0_7 = arith.constant 0 : index
    %2 = vector.load %arg4[%c0_5, %c0_6, %c0_7] : memref<8x16x1xf32, #tpu.memory_space<vmem>>, vector<8x16x1xf32>
    %3 = vector.shape_cast %2 : vector<8x16x1xf32> to vector<128x1xf32>
    %c0_8 = arith.constant 0 : index
    %c0_9 = arith.constant 0 : index
    %c0_10 = arith.constant 0 : index
    %4 = vector.load %arg5[%c0_8, %c0_9, %c0_10] : memref<8x16x1xf32, #tpu.memory_space<vmem>>, vector<8x16x1xf32>
    %5 = vector.shape_cast %4 : vector<8x16x1xf32> to vector<128x1xf32>
    %c0_11 = arith.constant 0 : index
    %c0_12 = arith.constant 0 : index
    %c0_13 = arith.constant 0 : index
    %6 = vector.load %arg3[%c0_11, %c0_12, %c0_13] : memref<8x16x1xf32, #tpu.memory_space<vmem>>, vector<8x16x1xf32>
    %7 = vector.shape_cast %6 : vector<8x16x1xf32> to vector<128x1xf32>
    %c0_14 = arith.constant 0 : index
    %c0_15 = arith.constant 0 : index
    %8 = vector.load %arg6[%c0_14, %c0_15] : memref<1x64xf32, #tpu.memory_space<vmem>>, vector<1x64xf32>
    %9 = vector.broadcast %7 : vector<128x1xf32> to vector<128x64xf32>
    %10 = vector.broadcast %8 : vector<1x64xf32> to vector<128x64xf32>
    %11 = arith.mulf %9, %10 : vector<128x64xf32>
    %cst = arith.constant 0.000000e+00 : f32
    %12 = vector.broadcast %cst : f32 to vector<128x64xf32>
    %13 = arith.maximumf %11, %12 : vector<128x64xf32>
    %c0_16 = arith.constant 0 : index
    %c0_17 = arith.constant 0 : index
    %14 = vector.load %arg7[%c0_16, %c0_17] : memref<1x128xf32, #tpu.memory_space<vmem>>, vector<1x128xf32>
    %15 = vector.shape_cast %14 : vector<1x128xf32> to vector<1x1x128xf32>
    %c0_18 = arith.constant 0 : index
    %c0_19 = arith.constant 0 : index
    %16 = vector.load %arg8[%c0_18, %c0_19] : memref<1x128xf32, #tpu.memory_space<vmem>>, vector<1x128xf32>
    %17 = vector.shape_cast %16 : vector<1x128xf32> to vector<1x1x128xf32>
    %cst_20 = arith.constant 0.000000e+00 : f32
    %18 = vector.broadcast %cst_20 : f32 to vector<128x128xf32>
    %19 = vector.extract_strided_slice %0 {offsets = [0, 0, 0], sizes = [8, 16, 8], strides = [1, 1, 1]} : vector<8x16x16xbf16> to vector<8x16x8xbf16>
    %20 = vector.shape_cast %19 : vector<8x16x8xbf16> to vector<128x8xbf16>
    %21 = arith.extf %20 : vector<128x8xbf16> to vector<128x8xf32>
    %22 = vector.extract_strided_slice %1 {offsets = [0, 0, 0], sizes = [8, 1, 8], strides = [1, 1, 1]} : vector<8x1x16xf32> to vector<8x1x8xf32>
    %23 = vector.shape_cast %22 : vector<8x1x8xf32> to vector<8x1x8xf32>
    %24 = vector.broadcast %23 : vector<8x1x8xf32> to vector<8x16x8xf32>
    %25 = vector.shape_cast %24 : vector<8x16x8xf32> to vector<128x8xf32>
    %cst_21 = arith.constant 0.000000e+00 : f32
    %26 = vector.broadcast %cst_21 : f32 to vector<128x8xf32>
    %27 = arith.cmpf one, %21, %26 : vector<128x8xf32>
    %cst_22 = arith.constant 0.000000e+00 : f32
    %28 = vector.broadcast %cst_22 : f32 to vector<128x8xf32>
    %29 = arith.select %27, %25, %28 : vector<128x8xi1>, vector<128x8xf32>
    %30 = vector.extract_strided_slice %0 {offsets = [0, 0, 8], sizes = [8, 16, 8], strides = [1, 1, 1]} : vector<8x16x16xbf16> to vector<8x16x8xbf16>
    %31 = vector.shape_cast %30 : vector<8x16x8xbf16> to vector<128x8xbf16>
    %32 = arith.extf %31 : vector<128x8xbf16> to vector<128x8xf32>
    %33 = vector.extract_strided_slice %1 {offsets = [0, 0, 8], sizes = [8, 1, 8], strides = [1, 1, 1]} : vector<8x1x16xf32> to vector<8x1x8xf32>
    %34 = vector.shape_cast %33 : vector<8x1x8xf32> to vector<8x1x8xf32>
    %35 = vector.broadcast %34 : vector<8x1x8xf32> to vector<8x16x8xf32>
    %36 = vector.shape_cast %35 : vector<8x16x8xf32> to vector<128x8xf32>
    %cst_23 = arith.constant 0.000000e+00 : f32
    %37 = vector.broadcast %cst_23 : f32 to vector<128x8xf32>
    %38 = arith.cmpf one, %32, %37 : vector<128x8xf32>
    %cst_24 = arith.constant 0.000000e+00 : f32
    %39 = vector.broadcast %cst_24 : f32 to vector<128x8xf32>
    %40 = arith.select %38, %36, %39 : vector<128x8xi1>, vector<128x8xf32>
    %41 = vector.shape_cast %21 : vector<128x8xf32> to vector<128x8x1xf32>
    %42 = vector.shape_cast %41 : vector<128x8x1xf32> to vector<128x8x1xf32>
    %43 = vector.broadcast %42 : vector<128x8x1xf32> to vector<128x8x64xf32>
    %44 = vector.shape_cast %32 : vector<128x8xf32> to vector<128x8x1xf32>
    %45 = vector.shape_cast %44 : vector<128x8x1xf32> to vector<128x8x1xf32>
    %46 = vector.broadcast %45 : vector<128x8x1xf32> to vector<128x8x64xf32>
    %47 = tpu.concatenate %43, %46 in 2 : vector<128x8x64xf32>, vector<128x8x64xf32> -> vector<128x8x128xf32>
    %48 = vector.shape_cast %29 : vector<128x8xf32> to vector<128x8x1xf32>
    %49 = vector.shape_cast %48 : vector<128x8x1xf32> to vector<128x8x1xf32>
    %50 = vector.broadcast %49 : vector<128x8x1xf32> to vector<128x8x64xf32>
    %51 = vector.shape_cast %40 : vector<128x8xf32> to vector<128x8x1xf32>
    %52 = vector.shape_cast %51 : vector<128x8x1xf32> to vector<128x8x1xf32>
    %53 = vector.broadcast %52 : vector<128x8x1xf32> to vector<128x8x64xf32>
    %54 = tpu.concatenate %50, %53 in 2 : vector<128x8x64xf32>, vector<128x8x64xf32> -> vector<128x8x128xf32>
    %55 = vector.broadcast %15 : vector<1x1x128xf32> to vector<128x8x128xf32>
    %56 = arith.mulf %47, %55 : vector<128x8x128xf32>
    %57 = vector.broadcast %17 : vector<1x1x128xf32> to vector<128x8x128xf32>
    %58 = arith.mulf %54, %57 : vector<128x8x128xf32>
    %59 = arith.addf %56, %58 : vector<128x8x128xf32>
    %cst_25 = arith.constant 0.000000e+00 : f32
    %60 = vector.broadcast %cst_25 : f32 to vector<128x8x128xf32>
    %61 = arith.maximumf %59, %60 : vector<128x8x128xf32>
    %cst_26 = arith.constant dense<0.000000e+00> : vector<128x128xf32>
    %62 = vector.multi_reduction <add>, %61, %cst_26 [1] : vector<128x8x128xf32> to vector<128x128xf32>
    %63 = arith.addf %18, %62 : vector<128x128xf32>
    %64 = vector.extract_strided_slice %63 {offsets = [0, 0], sizes = [128, 64], strides = [1, 1]} : vector<128x128xf32> to vector<128x64xf32>
    %65 = vector.extract_strided_slice %63 {offsets = [0, 64], sizes = [128, 64], strides = [1, 1]} : vector<128x128xf32> to vector<128x64xf32>
    %66 = arith.addf %64, %65 : vector<128x64xf32>
    %67 = vector.broadcast %3 : vector<128x1xf32> to vector<128x64xf32>
    %68 = arith.mulf %66, %67 : vector<128x64xf32>
    %69 = arith.truncf %68 : vector<128x64xf32> to vector<128x64xbf16>
    %c0_27 = arith.constant 0 : index
    %c0_28 = arith.constant 0 : index
    %70 = vector.load %arg9[%c0_27, %c0_28] : memref<64x64xbf16, #tpu.memory_space<vmem>>, vector<64x64xbf16>
    %cst_29 = arith.constant dense<0.000000e+00> : vector<128x64xf32>
    %71 = tpu.matmul %69, %70, %cst_29 {dimension_numbers = #tpu.dot_dimension_numbers<[1], [0], [0], [1], [0, 0, 1, 1], [], []>} : vector<128x64xbf16>, vector<64x64xbf16>, vector<128x64xf32> -> vector<128x64xf32>
    %c0_30 = arith.constant 0 : index
    %c0_31 = arith.constant 0 : index
    %72 = vector.load %arg10[%c0_30, %c0_31] : memref<1x64xf32, #tpu.memory_space<vmem>>, vector<1x64xf32>
    %73 = vector.broadcast %5 : vector<128x1xf32> to vector<128x64xf32>
    %74 = vector.broadcast %72 : vector<1x64xf32> to vector<128x64xf32>
    %75 = arith.mulf %73, %74 : vector<128x64xf32>
    %76 = arith.addf %71, %75 : vector<128x64xf32>
    %cst_32 = arith.constant 0.000000e+00 : f32
    %77 = vector.broadcast %cst_32 : f32 to vector<128x64xf32>
    %78 = arith.maximumf %76, %77 : vector<128x64xf32>
    %79 = vector.shape_cast %13 : vector<128x64xf32> to vector<8x16x64xf32>
    %80 = arith.truncf %79 : vector<8x16x64xf32> to vector<8x16x64xbf16>
    "tpu.trace_start"() <{level = 10 : i32, message = "gij,gjf->gif"}> : () -> ()
    %cst_33 = arith.constant dense<0.000000e+00> : vector<8x16x64xf32>
    %81 = tpu.matmul %0, %80, %cst_33 {dimension_numbers = #tpu.dot_dimension_numbers<[2], [1], [1], [2], [0, 0, 0, 1, 1, 2], [0], [0]>} : vector<8x16x16xbf16>, vector<8x16x64xbf16>, vector<8x16x64xf32> -> vector<8x16x64xf32>
    "tpu.trace_stop"() : () -> ()
    %82 = vector.shape_cast %81 : vector<8x16x64xf32> to vector<128x64xf32>
    %83 = vector.broadcast %3 : vector<128x1xf32> to vector<128x64xf32>
    %84 = arith.mulf %82, %83 : vector<128x64xf32>
    %85 = tpu.concatenate %84, %78 in 1 : vector<128x64xf32>, vector<128x64xf32> -> vector<128x128xf32>
    %86 = arith.truncf %85 : vector<128x128xf32> to vector<128x128xbf16>
    %c0_34 = arith.constant 0 : index
    %c0_35 = arith.constant 0 : index
    %c0_36 = arith.constant 0 : index
    %87 = vector.load %arg11[%c0_34, %c0_35, %c0_36] : memref<3x128x64xbf16, #tpu.memory_space<vmem>>, vector<1x128x64xbf16>
    %88 = vector.shape_cast %87 : vector<1x128x64xbf16> to vector<128x64xbf16>
    %cst_37 = arith.constant dense<0.000000e+00> : vector<128x64xf32>
    %89 = tpu.matmul %86, %88, %cst_37 {dimension_numbers = #tpu.dot_dimension_numbers<[1], [0], [0], [1], [0, 0, 1, 1], [], []>} : vector<128x128xbf16>, vector<128x64xbf16>, vector<128x64xf32> -> vector<128x64xf32>
    %cst_38 = arith.constant 0.000000e+00 : f32
    %90 = vector.broadcast %cst_38 : f32 to vector<128x64xf32>
    %91 = arith.maximumf %89, %90 : vector<128x64xf32>
    %92 = tpu.concatenate %13, %91 in 1 : vector<128x64xf32>, vector<128x64xf32> -> vector<128x128xf32>
    %93 = arith.truncf %92 : vector<128x128xf32> to vector<128x128xbf16>
    %c0_39 = arith.constant 0 : index
    %c0_40 = arith.constant 0 : index
    %c0_41 = arith.constant 0 : index
    %94 = vector.load %arg12[%c0_39, %c0_40, %c0_41] : memref<3x128x64xbf16, #tpu.memory_space<vmem>>, vector<1x128x64xbf16>
    %95 = vector.shape_cast %94 : vector<1x128x64xbf16> to vector<128x64xbf16>
    %cst_42 = arith.constant dense<0.000000e+00> : vector<128x64xf32>
    %96 = tpu.matmul %93, %95, %cst_42 {dimension_numbers = #tpu.dot_dimension_numbers<[1], [0], [0], [1], [0, 0, 1, 1], [], []>} : vector<128x128xbf16>, vector<128x64xbf16>, vector<128x64xf32> -> vector<128x64xf32>
    %cst_43 = arith.constant 0.000000e+00 : f32
    %97 = vector.broadcast %cst_43 : f32 to vector<128x64xf32>
    %98 = arith.maximumf %96, %97 : vector<128x64xf32>
    %99 = vector.shape_cast %98 : vector<128x64xf32> to vector<8x16x64xf32>
    %100 = arith.truncf %99 : vector<8x16x64xf32> to vector<8x16x64xbf16>
    "tpu.trace_start"() <{level = 10 : i32, message = "gij,gjf->gif"}> : () -> ()
    %cst_44 = arith.constant dense<0.000000e+00> : vector<8x16x64xf32>
    %101 = tpu.matmul %0, %100, %cst_44 {dimension_numbers = #tpu.dot_dimension_numbers<[2], [1], [1], [2], [0, 0, 0, 1, 1, 2], [0], [0]>} : vector<8x16x16xbf16>, vector<8x16x64xbf16>, vector<8x16x64xf32> -> vector<8x16x64xf32>
    "tpu.trace_stop"() : () -> ()
    %102 = vector.shape_cast %101 : vector<8x16x64xf32> to vector<128x64xf32>
    %103 = vector.broadcast %3 : vector<128x1xf32> to vector<128x64xf32>
    %104 = arith.mulf %102, %103 : vector<128x64xf32>
    %105 = tpu.concatenate %104, %78 in 1 : vector<128x64xf32>, vector<128x64xf32> -> vector<128x128xf32>
    %106 = arith.truncf %105 : vector<128x128xf32> to vector<128x128xbf16>
    %c1 = arith.constant 1 : index
    %c0_45 = arith.constant 0 : index
    %c0_46 = arith.constant 0 : index
    %107 = vector.load %arg11[%c1, %c0_45, %c0_46] : memref<3x128x64xbf16, #tpu.memory_space<vmem>>, vector<1x128x64xbf16>
    %108 = vector.shape_cast %107 : vector<1x128x64xbf16> to vector<128x64xbf16>
    %cst_47 = arith.constant dense<0.000000e+00> : vector<128x64xf32>
    %109 = tpu.matmul %106, %108, %cst_47 {dimension_numbers = #tpu.dot_dimension_numbers<[1], [0], [0], [1], [0, 0, 1, 1], [], []>} : vector<128x128xbf16>, vector<128x64xbf16>, vector<128x64xf32> -> vector<128x64xf32>
    %cst_48 = arith.constant 0.000000e+00 : f32
    %110 = vector.broadcast %cst_48 : f32 to vector<128x64xf32>
    %111 = arith.maximumf %109, %110 : vector<128x64xf32>
    %112 = tpu.concatenate %98, %111 in 1 : vector<128x64xf32>, vector<128x64xf32> -> vector<128x128xf32>
    %113 = arith.truncf %112 : vector<128x128xf32> to vector<128x128xbf16>
    %c1_49 = arith.constant 1 : index
    %c0_50 = arith.constant 0 : index
    %c0_51 = arith.constant 0 : index
    %114 = vector.load %arg12[%c1_49, %c0_50, %c0_51] : memref<3x128x64xbf16, #tpu.memory_space<vmem>>, vector<1x128x64xbf16>
    %115 = vector.shape_cast %114 : vector<1x128x64xbf16> to vector<128x64xbf16>
    %cst_52 = arith.constant dense<0.000000e+00> : vector<128x64xf32>
    %116 = tpu.matmul %113, %115, %cst_52 {dimension_numbers = #tpu.dot_dimension_numbers<[1], [0], [0], [1], [0, 0, 1, 1], [], []>} : vector<128x128xbf16>, vector<128x64xbf16>, vector<128x64xf32> -> vector<128x64xf32>
    %cst_53 = arith.constant 0.000000e+00 : f32
    %117 = vector.broadcast %cst_53 : f32 to vector<128x64xf32>
    %118 = arith.maximumf %116, %117 : vector<128x64xf32>
    %119 = vector.shape_cast %118 : vector<128x64xf32> to vector<8x16x64xf32>
    %120 = arith.truncf %119 : vector<8x16x64xf32> to vector<8x16x64xbf16>
    "tpu.trace_start"() <{level = 10 : i32, message = "gij,gjf->gif"}> : () -> ()
    %cst_54 = arith.constant dense<0.000000e+00> : vector<8x16x64xf32>
    %121 = tpu.matmul %0, %120, %cst_54 {dimension_numbers = #tpu.dot_dimension_numbers<[2], [1], [1], [2], [0, 0, 0, 1, 1, 2], [0], [0]>} : vector<8x16x16xbf16>, vector<8x16x64xbf16>, vector<8x16x64xf32> -> vector<8x16x64xf32>
    "tpu.trace_stop"() : () -> ()
    %122 = vector.shape_cast %121 : vector<8x16x64xf32> to vector<128x64xf32>
    %123 = vector.broadcast %3 : vector<128x1xf32> to vector<128x64xf32>
    %124 = arith.mulf %122, %123 : vector<128x64xf32>
    %125 = tpu.concatenate %124, %78 in 1 : vector<128x64xf32>, vector<128x64xf32> -> vector<128x128xf32>
    %126 = arith.truncf %125 : vector<128x128xf32> to vector<128x128xbf16>
    %c2 = arith.constant 2 : index
    %c0_55 = arith.constant 0 : index
    %c0_56 = arith.constant 0 : index
    %127 = vector.load %arg11[%c2, %c0_55, %c0_56] : memref<3x128x64xbf16, #tpu.memory_space<vmem>>, vector<1x128x64xbf16>
    %128 = vector.shape_cast %127 : vector<1x128x64xbf16> to vector<128x64xbf16>
    %cst_57 = arith.constant dense<0.000000e+00> : vector<128x64xf32>
    %129 = tpu.matmul %126, %128, %cst_57 {dimension_numbers = #tpu.dot_dimension_numbers<[1], [0], [0], [1], [0, 0, 1, 1], [], []>} : vector<128x128xbf16>, vector<128x64xbf16>, vector<128x64xf32> -> vector<128x64xf32>
    %cst_58 = arith.constant 0.000000e+00 : f32
    %130 = vector.broadcast %cst_58 : f32 to vector<128x64xf32>
    %131 = arith.maximumf %129, %130 : vector<128x64xf32>
    %132 = tpu.concatenate %118, %131 in 1 : vector<128x64xf32>, vector<128x64xf32> -> vector<128x128xf32>
    %133 = arith.truncf %132 : vector<128x128xf32> to vector<128x128xbf16>
    %c2_59 = arith.constant 2 : index
    %c0_60 = arith.constant 0 : index
    %c0_61 = arith.constant 0 : index
    %134 = vector.load %arg12[%c2_59, %c0_60, %c0_61] : memref<3x128x64xbf16, #tpu.memory_space<vmem>>, vector<1x128x64xbf16>
    %135 = vector.shape_cast %134 : vector<1x128x64xbf16> to vector<128x64xbf16>
    %cst_62 = arith.constant dense<0.000000e+00> : vector<128x64xf32>
    %136 = tpu.matmul %133, %135, %cst_62 {dimension_numbers = #tpu.dot_dimension_numbers<[1], [0], [0], [1], [0, 0, 1, 1], [], []>} : vector<128x128xbf16>, vector<128x64xbf16>, vector<128x64xf32> -> vector<128x64xf32>
    %cst_63 = arith.constant 0.000000e+00 : f32
    %137 = vector.broadcast %cst_63 : f32 to vector<128x64xf32>
    %138 = arith.maximumf %136, %137 : vector<128x64xf32>
    %139 = vector.shape_cast %138 : vector<128x64xf32> to vector<8x16x64xf32>
    %cst_64 = arith.constant dense<0.000000e+00> : vector<8x64xf32>
    %140 = vector.multi_reduction <add>, %139, %cst_64 [1] : vector<8x16x64xf32> to vector<8x64xf32>
    %cst_65 = arith.constant 6.250000e-02 : f32
    %141 = vector.broadcast %cst_65 : f32 to vector<8x64xf32>
    %142 = arith.mulf %140, %141 : vector<8x64xf32>
    %143 = arith.truncf %142 : vector<8x64xf32> to vector<8x64xbf16>
    %c0_66 = arith.constant 0 : index
    %c0_67 = arith.constant 0 : index
    %144 = vector.load %arg13[%c0_66, %c0_67] : memref<64x64xbf16, #tpu.memory_space<vmem>>, vector<64x64xbf16>
    %cst_68 = arith.constant dense<0.000000e+00> : vector<8x64xf32>
    %145 = tpu.matmul %143, %144, %cst_68 {dimension_numbers = #tpu.dot_dimension_numbers<[1], [0], [0], [1], [0, 0, 1, 1], [], []>} : vector<8x64xbf16>, vector<64x64xbf16>, vector<8x64xf32> -> vector<8x64xf32>
    %cst_69 = arith.constant 0.000000e+00 : f32
    %146 = vector.broadcast %cst_69 : f32 to vector<8x64xf32>
    %147 = arith.maximumf %145, %146 : vector<8x64xf32>
    %c0_70 = arith.constant 0 : index
    %c0_71 = arith.constant 0 : index
    %148 = vector.load %arg14[%c0_70, %c0_71] : memref<1x64xf32, #tpu.memory_space<vmem>>, vector<1x64xf32>
    %149 = vector.broadcast %148 : vector<1x64xf32> to vector<8x64xf32>
    %150 = arith.mulf %147, %149 : vector<8x64xf32>
    %cst_72 = arith.constant dense<0.000000e+00> : vector<8xf32>
    %151 = vector.multi_reduction <add>, %150, %cst_72 [1] : vector<8x64xf32> to vector<8xf32>
    %152 = vector.shape_cast %151 : vector<8xf32> to vector<8x1xf32>
    %c0_73 = arith.constant 0 : index
    %c0_74 = arith.constant 0 : index
    %153 = vector.load %arg15[%c0_73, %c0_74] : memref<1x64xf32, #tpu.memory_space<vmem>>, vector<1x64xf32>
    %154 = vector.shape_cast %153 : vector<1x64xf32> to vector<1x1x64xf32>
    %155 = arith.truncf %154 : vector<1x1x64xf32> to vector<1x1x64xbf16>
    %156 = vector.shape_cast %155 : vector<1x1x64xbf16> to vector<1x1x64xbf16>
    %157 = vector.broadcast %156 : vector<1x1x64xbf16> to vector<8x1x64xbf16>
    %158 = arith.truncf %139 : vector<8x16x64xf32> to vector<8x16x64xbf16>
    "tpu.trace_start"() <{level = 10 : i32, message = "gkf,gnf->gkn"}> : () -> ()
    %cst_75 = arith.constant dense<0.000000e+00> : vector<8x1x16xf32>
    %159 = tpu.matmul %157, %158, %cst_75 {dimension_numbers = #tpu.dot_dimension_numbers<[2], [2], [1], [1], [0, 0, 0, 1, 1, 1], [0], [0]>} : vector<8x1x64xbf16>, vector<8x16x64xbf16>, vector<8x1x16xf32> -> vector<8x1x16xf32>
    "tpu.trace_stop"() : () -> ()
    %160 = vector.shape_cast %152 : vector<8x1xf32> to vector<8x1x1xf32>
    %161 = vector.broadcast %160 : vector<8x1x1xf32> to vector<8x1x16xf32>
    %162 = arith.addf %159, %161 : vector<8x1x16xf32>
    %c0_76 = arith.constant 0 : index
    %c0_77 = arith.constant 0 : index
    %163 = vector.load %arg16[%c0_76, %c0_77] : memref<1x1xf32, #tpu.memory_space<vmem>>, vector<1x1xf32>
    %164 = vector.shape_cast %163 : vector<1x1xf32> to vector<1x1x1xf32>
    %165 = vector.broadcast %164 : vector<1x1x1xf32> to vector<8x1x16xf32>
    %166 = arith.addf %162, %165 : vector<8x1x16xf32>
    %c0_78 = arith.constant 0 : index
    %c0_79 = arith.constant 0 : index
    %c0_80 = arith.constant 0 : index
    %167 = vector.load %arg17[%c0_78, %c0_79, %c0_80] : memref<8x1x16xf32, #tpu.memory_space<vmem>>, vector<8x1x16xf32>
    tpu.vector_store %arg17[%c0_78, %c0_79, %c0_80], %166 {strides = array<i32>} : memref<8x1x16xf32, #tpu.memory_space<vmem>>, vector<8x1x16xf32>,
    return
  }
  func.func @transform_0(%arg0: i32) -> (i32, i32, i32) {
    %c0_i32 = arith.constant 0 : i32
    %c0_i32_0 = arith.constant 0 : i32
    %c0_i32_1 = arith.constant 0 : i32
    return %arg0, %c0_i32, %c0_i32_0 : i32, i32, i32
  }
  func.func @transform_1(%arg0: i32) -> (i32, i32, i32) {
    %c0_i32 = arith.constant 0 : i32
    %c0_i32_0 = arith.constant 0 : i32
    %c0_i32_1 = arith.constant 0 : i32
    return %arg0, %c0_i32, %c0_i32_0 : i32, i32, i32
  }
  func.func @transform_2(%arg0: i32) -> (i32, i32, i32) {
    %c0_i32 = arith.constant 0 : i32
    %c0_i32_0 = arith.constant 0 : i32
    %c0_i32_1 = arith.constant 0 : i32
    return %arg0, %c0_i32, %c0_i32_0 : i32, i32, i32
  }
  func.func @transform_3(%arg0: i32) -> (i32, i32, i32) {
    %c0_i32 = arith.constant 0 : i32
    %c0_i32_0 = arith.constant 0 : i32
    %c0_i32_1 = arith.constant 0 : i32
    return %arg0, %c0_i32, %c0_i32_0 : i32, i32, i32
  }
  func.func @transform_4(%arg0: i32) -> (i32, i32, i32) {
    %c0_i32 = arith.constant 0 : i32
    %c0_i32_0 = arith.constant 0 : i32
    %c0_i32_1 = arith.constant 0 : i32
    return %arg0, %c0_i32, %c0_i32_0 : i32, i32, i32
  }
  func.func @transform_5(%arg0: i32) -> (i32, i32) {
    %c0_i32 = arith.constant 0 : i32
    %c0_i32_0 = arith.constant 0 : i32
    %c0_i32_1 = arith.constant 0 : i32
    return %c0_i32, %c0_i32_0 : i32, i32
  }
  func.func @transform_6(%arg0: i32) -> (i32, i32) {
    %c0_i32 = arith.constant 0 : i32
    %c0_i32_0 = arith.constant 0 : i32
    %c0_i32_1 = arith.constant 0 : i32
    return %c0_i32, %c0_i32_0 : i32, i32
  }
  func.func @transform_7(%arg0: i32) -> (i32, i32) {
    %c0_i32 = arith.constant 0 : i32
    %c0_i32_0 = arith.constant 0 : i32
    %c0_i32_1 = arith.constant 0 : i32
    return %c0_i32, %c0_i32_0 : i32, i32
  }
  func.func @transform_8(%arg0: i32) -> (i32, i32) {
    %c0_i32 = arith.constant 0 : i32
    %c0_i32_0 = arith.constant 0 : i32
    %c0_i32_1 = arith.constant 0 : i32
    return %c0_i32, %c0_i32_0 : i32, i32
  }
  func.func @transform_9(%arg0: i32) -> (i32, i32) {
    %c0_i32 = arith.constant 0 : i32
    %c0_i32_0 = arith.constant 0 : i32
    %c0_i32_1 = arith.constant 0 : i32
    return %c0_i32, %c0_i32_0 : i32, i32
  }
  func.func @transform_10(%arg0: i32) -> (i32, i32, i32) {
    %c0_i32 = arith.constant 0 : i32
    %c0_i32_0 = arith.constant 0 : i32
    %c0_i32_1 = arith.constant 0 : i32
    %c0_i32_2 = arith.constant 0 : i32
    return %c0_i32, %c0_i32_0, %c0_i32_1 : i32, i32, i32
  }
  func.func @transform_11(%arg0: i32) -> (i32, i32, i32) {
    %c0_i32 = arith.constant 0 : i32
    %c0_i32_0 = arith.constant 0 : i32
    %c0_i32_1 = arith.constant 0 : i32
    %c0_i32_2 = arith.constant 0 : i32
    return %c0_i32, %c0_i32_0, %c0_i32_1 : i32, i32, i32
  }
  func.func @transform_12(%arg0: i32) -> (i32, i32) {
    %c0_i32 = arith.constant 0 : i32
    %c0_i32_0 = arith.constant 0 : i32
    %c0_i32_1 = arith.constant 0 : i32
    return %c0_i32, %c0_i32_0 : i32, i32
  }
  func.func @transform_13(%arg0: i32) -> (i32, i32) {
    %c0_i32 = arith.constant 0 : i32
    %c0_i32_0 = arith.constant 0 : i32
    %c0_i32_1 = arith.constant 0 : i32
    return %c0_i32, %c0_i32_0 : i32, i32
  }
  func.func @transform_14(%arg0: i32) -> (i32, i32) {
    %c0_i32 = arith.constant 0 : i32
    %c0_i32_0 = arith.constant 0 : i32
    %c0_i32_1 = arith.constant 0 : i32
    return %c0_i32, %c0_i32_0 : i32, i32
  }
  func.func @transform_15(%arg0: i32) -> (i32, i32) {
    %c0_i32 = arith.constant 0 : i32
    %c0_i32_0 = arith.constant 0 : i32
    %c0_i32_1 = arith.constant 0 : i32
    return %c0_i32, %c0_i32_0 : i32, i32
  }
  func.func @transform_16(%arg0: i32) -> (i32, i32, i32) {
    %c0_i32 = arith.constant 0 : i32
    %c0_i32_0 = arith.constant 0 : i32
    %c0_i32_1 = arith.constant 0 : i32
    return %arg0, %c0_i32, %c0_i32_0 : i32, i32, i32
  }
}

</mosaic_0001>

<bundles_post_ra>
// kernel: tpu_custom_call.1
= control target key start
LH: loop header
LB: loop body
LE: loop exit
PB: predicated region body
PF: predicated region fallthrough
CT: control target
= control target key end

     0   :  { %s17807_s0 = inlined_call_operand.vmem [shape: bf16[16,16,16], index: 0, kind: input, shape index: {}]   ;;  %s17808_s1 = inlined_call_operand.vmem [shape: f32[16,1,16], index: 1, kind: input, shape index: {}]   ;;  %s17809_s2 = inlined_call_operand.vmem [shape: f32[16,16,1], index: 2, kind: input, shape index: {}]   ;;  %s17810_s3 = inlined_call_operand.vmem [shape: f32[16,16,1], index: 3, kind: input, shape index: {}]   ;;  %s17811_s4 = inlined_call_operand.vmem [shape: f32[16,16,1], index: 4, kind: input, shape index: {}]   ;;  %s17812_s5 = inlined_call_operand.vmem [shape: f32[1,64], index: 5, kind: input, shape index: {}]   ;;  %s17813_s6 = inlined_call_operand.vmem [shape: f32[1,128], index: 6, kind: input, shape index: {}]   ;;  %s17814_s7 = inlined_call_operand.vmem [shape: f32[1,128], index: 7, kind: input, shape index: {}]   ;;  %s17815_s8 = inlined_call_operand.vmem [shape: bf16[64,64], index: 8, kind: input, shape index: {}]   ;;  %s17816_s9 = inlined_call_operand.vmem [shape: f32[1,64], index: 9, kind: input, shape index: {}]   ;;  %s17817_s10 = inlined_call_operand.vmem [shape: bf16[3,128,64], index: 10, kind: input, shape index: {}]   ;;  %s17818_s11 = inlined_call_operand.vmem [shape: bf16[3,128,64], index: 11, kind: input, shape index: {}]   ;;  %s17819_s12 = inlined_call_operand.vmem [shape: bf16[64,64], index: 12, kind: input, shape index: {}]   ;;  %s17820_s13 = inlined_call_operand.vmem [shape: f32[1,64], index: 13, kind: input, shape index: {}]   ;;  %s17821_s14 = inlined_call_operand.vmem [shape: f32[1,64], index: 14, kind: input, shape index: {}]   ;;  %s17822_s15 = inlined_call_operand.<no memory space> [shape: f32[1,1], index: 15, kind: input, shape index: {}]   ;;  %s17823_s16 = inlined_call_operand.hbm [shape: f32[16,1,16], index: 16, kind: output, shape index: {}]  }
   0x1   :  { %18029 = sst [smem:[#allocation328_spill]] %s17807_s0  ;;  %v21_v0 = vstv %s17822_s15 }
   0x2   :  { %18030 = sst [smem:[#allocation329_spill]] %s17808_s1  ;;  %22 = vst [vmem:[#allocation2] sm:$0x1] %v21_v0 }
   0x3   :  { %18031 = sst [smem:[#allocation330_spill]] %s17809_s2 }
   0x4   :  { %23 = vsyncpa [#allocation4], 0 }
   0x5   :  { %25 = vsyncpa [#allocation4 + $0x1], 0  ;;  %s11962_s23 = smov 0   ;;  %s11964_s24 = smov 0  }
   0x6   :  { %s11966_s25 = smov 0   ;;  %s11968_s26 = smov 0  }
   0x7 LB: > { %18032 = sst [smem:[#allocation6_spill]] %s11861_s25  ;;  %s11983_s15 = sadd.s32 4294967295, %s11865_s26   ;;  %s11865_s26 = sphi %s11968_s26, %s19461_s26   ;;  %s11861_s25 = sphi %s11966_s25, %s19458_s25   ;;  %s11857_s24 = sphi %s11964_s24, %s19460_s24   ;;  %s11853_s23 = sphi %s11962_s23, %s19459_s23  }
   0x8   : > { %s10704_s27 = sadd.s32 4294967294, %s11865_s26   ;;  %s11987_s28 = sadd.s32 1, %s11865_s26  }
   0x9   : > { %s399_s29 = sadd.s32 1, %s11861_s25  ;;  %s396_s30 = ssub.s32 %s11865_s26, %s11987_s28 }
   0xa   : > { %p409_p0 = scmp.ne.s32.totalorder %s11861_s25, %s11857_s24  ;;  %p397_p1 = scmp.eq.s32.totalorder %s396_s30, 0 }
   0xb   : > { %p410_p2 = scmp.eq.s32.totalorder %s11983_s15, 1  ;;  %p415_p3 = scmp.ne.s32.totalorder %s11857_s24, %s11853_s23 }
   0xc   : > { %p416_p4 = scmp.eq.s32.totalorder %s10704_s27, 1  ;;  %p10707_p7 = scmp.ge.s32.totalorder %s11865_s26, 1 }
   0xd   : > { %s11998_s0 = scalar_select %p397_p1, %s11861_s25, %s399_s29  }
   0xe   : > { %p12000_p5 = por %p410_p2, %p409_p0  ;;  %p12004_p6 = por %p416_p4, %p415_p3 }
   0xf   : > { %18033 = sst [smem:[#allocation7_spill]] %s11998_s0  ;;  %p515_p8 = scmp.lt.s32.totalorder %s11865_s26, 3 }
  0x11   : > { %p516_p9 = pnand %p10707_p7, %p515_p8 }
  0x13   : > { %519 = sbr.rel (%p516_p9) target bundleno = 4193 (0x1061), region = 84 }
  0x18   : > { %s10709_s19 = sshll.u32 %s11983_s15, 3  ;;  %v912_v1 = vlaneseq  ;;  %s18036_s1 = sld [smem:[#allocation329_spill]]  ;;  %vm2320_vm14 = vcmask 523264  }
  0x19   : > { %p589_p10 = scmp.lt.s32.totalorder %s10709_s19, 15  ;;  %s18037_s0 = sld [smem:[#allocation328_spill]] }
  0x1a   : > { %v12011_v2 = vshrl.u32 %v912_v1, 7  ;;  %s19290_s2 = sld [smem:[#allocation330_spill]] }
  0x1b   : > { %s19463_s19 = smov (!%p589_p10, %s10709_s19), 15 }
  0x1c   : > { %s10909_s20 = sshll.u32 %s19463_s19, 3  ;;  %v12028_v3 = vsub.s32 1, %v12011_v2  ;;  %v12052_v15 = vsub.s32 2, %v12011_v2  ;;  %v12082_v29 = vsub.s32 3, %v12011_v2  ;;  %v12085_v30 = vsub.s32 0, %v12011_v2  ;;  %s14561_s22 = sshll.u32 %s19463_s19, 4 }
  0x1d   : > { %v12112_v43 = vsub.s32 4, %v12011_v2  ;;  %s16426_s29 = scalar_lea.vmem %s17811_s4, %s14561_s22 }
  0x1e   : > { %s12020_s27 = scalar_lea.vmem %s18036_s1, %s19463_s19  ;;  %18038 = vst [vmem:[#allocation8_spill] sm:$0xff] %v12028_v3  ;;  %18039 = vst [vmem:[#allocation9_spill] sm:$0xff] %v12052_v15  ;;  %s10913_s19 = sshll.u32 %s11983_s15, 7 }
  0x1f   : > { %s12025_s25 = scalar_lea.vmem %s18037_s0, %s10909_s20  ;;  %v10723_v7 = vld [vmem:[%s12020_s27] ss:$0 sm:$0xff]  ;;  %v10724_v18 = vld [vmem:[%s12020_s27 + $0x1] ss:$0 sm:$0xff]  ;;  %18040 = vst [vmem:[#allocation10_spill] sm:$0xff] %v12082_v29  ;;  %18041 = vst [vmem:[#allocation11_spill] sm:$0xff] %v12085_v30  ;;  %s14579_s0 = scalar_lea.vmem %s17810_s3, %s14561_s22 }
  0x20   : > { %v623_v4 = vld [vmem:[%s12025_s25] sm:$0xff]   ;;  %v626_v8 = vld [vmem:[%s12025_s25 + $0x8] sm:$0xff]   ;;  %18042 = vst [vmem:[#allocation12_spill] sm:$0xff] %v12112_v43  ;;  %s11868_s20 = smov 64   ;;  %s16319_s21 = scalar_lea.vmem %s19290_s2, %s14561_s22 }
  0x21   : > { %v12031_v5 = vunpack.c.l.bf16 %v623_v4  ;;  %v12033_v6 = vunpack.c.h.bf16 %v623_v4  ;;  %v12047_v13 = vunpack.c.h.bf16 %v626_v8  ;;  %v12049_v14 = vunpack.c.l.bf16 %v626_v8 }
  0x22   : > { %v12163_v8 = vsub.s32 5, %v12011_v2 }
  0x23   : > { %v922_v9 = vrot.slane %v12031_v5, %v12028_v3  ;;  %vm881_vm0 = vcmp.ne.f32.partialorder %v12033_v6, 0.0  ;;  %vm880_vm1 = vcmp.ne.f32.partialorder %v12031_v5, 0.0  ;;  %v978_v10 = vrot.slane %v12033_v6, %v12028_v3 }
  0x24   : > { %v12043_v11 = vsel %vm881_vm0, %v10723_v7, 0.0  ;;  %v12045_v12 = vsel %vm880_vm1, %v10723_v7, 0.0  ;;  %vm883_vm2 = vcmp.ne.f32.partialorder %v12047_v13, 0.0  ;;  %vm882_vm3 = vcmp.ne.f32.partialorder %v12049_v14, 0.0  ;;  %18043 = vst [vmem:[#allocation13_spill] sm:$0xff] %v12163_v8 }
  0x25   : > { %1814 = vbcast.lane.b32.xlu1 %v922_v9, 264  ;;  %924 = vbcast.lane.b32.xlu0 %v922_v9, 256  ;;  %v2515_v16 = vrot.slane %v12043_v11, %v12028_v3  ;;  %v2459_v17 = vrot.slane %v12045_v12, %v12028_v3  ;;  %v985_v19 = vrot.slane %v12033_v6, %v12052_v15  ;;  %v12065_v21 = vsel %vm883_vm2, %v10724_v18, 0.0 }
  0x26   : > { %v929_v20 = vrot.slane %v12031_v5, %v12052_v15  ;;  %v12067_v22 = vsel %vm882_vm3, %v10724_v18, 0.0  ;;  %v1090_v23 = vrot.slane %v12047_v13, %v12028_v3  ;;  %v1034_v24 = vrot.slane %v12049_v14, %v12028_v3 }
  0x27   : > { %v2522_v25 = vrot.slane %v12043_v11, %v12052_v15  ;;  %v2466_v26 = vrot.slane %v12045_v12, %v12052_v15  ;;  %v2627_v27 = vrot.slane %v12065_v21, %v12028_v3  ;;  %v2571_v28 = vrot.slane %v12067_v22, %v12028_v3 }
  0x28   : > { %v936_v31 = vrot.slane %v12031_v5, %v12082_v29  ;;  %v915_v32 = vrot.slane %v12031_v5, %v12085_v30  ;;  %v992_v33 = vrot.slane %v12033_v6, %v12082_v29  ;;  %v971_v34 = vrot.slane %v12033_v6, %v12085_v30 }
  0x29   : > { %1846 = vbcast.lane.b32.xlu1 %v978_v10, 264  ;;  %980 = vbcast.lane.b32.xlu0 %v978_v10, 256  ;;  %v1097_v35 = vrot.slane %v12047_v13, %v12052_v15  ;;  %v1041_v36 = vrot.slane %v12049_v14, %v12052_v15  ;;  %v2473_v37 = vrot.slane %v12045_v12, %v12082_v29  ;;  %vm6973_vm1 = vcmask 1041409  }
  0x2a   : > { %v2452_v38 = vrot.slane %v12045_v12, %v12085_v30  ;;  %v2529_v39 = vrot.slane %v12043_v11, %v12082_v29  ;;  %v2508_v40 = vrot.slane %v12043_v11, %v12085_v30  ;;  %v2634_v41 = vrot.slane %v12065_v21, %v12052_v15 }
  0x2b   : > { %v2578_v42 = vrot.slane %v12067_v22, %v12052_v15  ;;  %v999_v44 = vrot.slane %v12033_v6, %v12112_v43  ;;  %v943_v45 = vrot.slane %v12031_v5, %v12112_v43  ;;  %v1048_v46 = vrot.slane %v12049_v14, %v12082_v29 }
  0x2c   : > { %v1027_v47 = vrot.slane %v12049_v14, %v12085_v30  ;;  %v1104_v48 = vrot.slane %v12047_v13, %v12082_v29  ;;  %v1083_v49 = vrot.slane %v12047_v13, %v12085_v30  ;;  %v2536_v52 = vrot.slane %v12043_v11, %v12112_v43 }
  0x2d   : > { %2517 = vbcast.lane.b32.xlu1 %v2515_v16, 256  ;;  %2461 = vbcast.lane.b32.xlu0 %v2459_v17, 256  ;;  %v2480_v53 = vrot.slane %v12045_v12, %v12112_v43  ;;  %v2585_v56 = vrot.slane %v12067_v22, %v12082_v29  ;;  %v2564_v57 = vrot.slane %v12067_v22, %v12085_v30  ;;  %vm6976_vm2 = vcmask 1042434  }
  0x2e   : > { %v2641_v60 = vrot.slane %v12065_v21, %v12082_v29  ;;  %v2620_v61 = vrot.slane %v12065_v21, %v12085_v30  ;;  %vm6979_vm3 = vcmask 1043459  }
  0x31   : > { %3383 = vbcast.lane.b32.xlu1 %v2515_v16, 264  ;;  %3351 = vbcast.lane.b32.xlu0 %v2459_v17, 264  ;;  %v1006_v16 = vrot.slane %v12033_v6, %v12163_v8  ;;  %v950_v17 = vrot.slane %v12031_v5, %v12163_v8 }
  0x35   : > { %987 = vbcast.lane.b32.xlu1 %v985_v19, 256  ;;  %931 = vbcast.lane.b32.xlu0 %v929_v20, 256 }
  0x39   : > { %1092 = vbcast.lane.b32.xlu1 %v1090_v23, 256  ;;  %1036 = vbcast.lane.b32.xlu0 %v1034_v24, 256 }
  0x3d   : > { %1850 = vbcast.lane.b32.xlu1 %v985_v19, 264  ;;  %1818 = vbcast.lane.b32.xlu0 %v929_v20, 264  ;;  %v1111_v20 = vrot.slane %v12047_v13, %v12112_v43 }
  0x41   : > { %1910 = vbcast.lane.b32.xlu1 %v1090_v23, 264  ;;  %1878 = vbcast.lane.b32.xlu0 %v1034_v24, 264  ;;  %v1055_v23 = vrot.slane %v12049_v14, %v12112_v43 }
  0x45   : > { %2524 = vbcast.lane.b32.xlu1 %v2522_v25, 256  ;;  %2468 = vbcast.lane.b32.xlu0 %v2466_v26, 256 }
  0x49   : > { %2629 = vbcast.lane.b32.xlu1 %v2627_v27, 256  ;;  %2573 = vbcast.lane.b32.xlu0 %v2571_v28, 256 }
  0x4d   : > { %3387 = vbcast.lane.b32.xlu1 %v2522_v25, 264  ;;  %3355 = vbcast.lane.b32.xlu0 %v2466_v26, 264 }
  0x51   : > { %3447 = vbcast.lane.b32.xlu1 %v2627_v27, 264  ;;  %3415 = vbcast.lane.b32.xlu0 %v2571_v28, 264 }
  0x55   : > { %938 = vbcast.lane.b32.xlu1 %v936_v31, 256  ;;  %917 = vbcast.lane.b32.xlu0 %v915_v32, 256 }
  0x59   : > { %994 = vbcast.lane.b32.xlu1 %v992_v33, 256  ;;  %973 = vbcast.lane.b32.xlu0 %v971_v34, 256 }
  0x5d   : > { %1099 = vbcast.lane.b32.xlu1 %v1097_v35, 256  ;;  %1043 = vbcast.lane.b32.xlu0 %v1041_v36, 256 }
  0x61   : > { %1822 = vbcast.lane.b32.xlu1 %v936_v31, 264  ;;  %1810 = vbcast.lane.b32.xlu0 %v915_v32, 264  ;;  %v2543_v32 = vrot.slane %v12043_v11, %v12163_v8 }
  0x65   : > { %1854 = vbcast.lane.b32.xlu1 %v992_v33, 264  ;;  %1842 = vbcast.lane.b32.xlu0 %v971_v34, 264  ;;  %v2487_v33 = vrot.slane %v12045_v12, %v12163_v8 }
  0x69   : > { %1914 = vbcast.lane.b32.xlu1 %v1097_v35, 264  ;;  %1882 = vbcast.lane.b32.xlu0 %v1041_v36, 264  ;;  %v2648_v36 = vrot.slane %v12065_v21, %v12112_v43 }
  0x6d   : > { %2475 = vbcast.lane.b32.xlu1 %v2473_v37, 256  ;;  %2454 = vbcast.lane.b32.xlu0 %v2452_v38, 256 }
  0x71   : > { %2531 = vbcast.lane.b32.xlu1 %v2529_v39, 256  ;;  %2510 = vbcast.lane.b32.xlu0 %v2508_v40, 256 }
  0x75   : > { %2636 = vbcast.lane.b32.xlu1 %v2634_v41, 256  ;;  %2580 = vbcast.lane.b32.xlu0 %v2578_v42, 256 }
  0x79   : > { %3359 = vbcast.lane.b32.xlu1 %v2473_v37, 264  ;;  %3347 = vbcast.lane.b32.xlu0 %v2452_v38, 264  ;;  %v2592_v37 = vrot.slane %v12067_v22, %v12112_v43 }
  0x7d   : > { %3391 = vbcast.lane.b32.xlu1 %v2529_v39, 264  ;;  %3379 = vbcast.lane.b32.xlu0 %v2508_v40, 264 }
  0x81   : > { %3451 = vbcast.lane.b32.xlu1 %v2634_v41, 264  ;;  %3419 = vbcast.lane.b32.xlu0 %v2578_v42, 264  ;;  %v12214_v42 = vsub.s32 6, %v12011_v2 }
  0x83   : > { %18046 = vst [vmem:[#allocation16_spill] sm:$0xff] %v12214_v42 }
  0x85   : > { %1001 = vbcast.lane.b32.xlu1 %v999_v44, 256  ;;  %945 = vbcast.lane.b32.xlu0 %v943_v45, 256 }
  0x89   : > { %1050 = vbcast.lane.b32.xlu1 %v1048_v46, 256  ;;  %1029 = vbcast.lane.b32.xlu0 %v1027_v47, 256 }
  0x8d   : > { %1106 = vbcast.lane.b32.xlu1 %v1104_v48, 256  ;;  %1085 = vbcast.lane.b32.xlu0 %v1083_v49, 256 }
  0x91   : > { %1858 = vbcast.lane.b32.xlu1 %v999_v44, 264  ;;  %1826 = vbcast.lane.b32.xlu0 %v943_v45, 264 }
  0x95   : > { %1886 = vbcast.lane.b32.xlu1 %v1048_v46, 264  ;;  %1874 = vbcast.lane.b32.xlu0 %v1027_v47, 264  ;;  %v1013_v46 = vrot.slane %v12033_v6, %v12214_v42  ;;  %v957_v47 = vrot.slane %v12031_v5, %v12214_v42 }
  0x97   : > { %v12126_v50 = vpop.permute.xlu1 %1814  ;;  %v12128_v51 = vpop.permute.xlu0 %924 }
  0x99   : > { %1918 = vbcast.lane.b32.xlu1 %v1104_v48, 264  ;;  %1906 = vbcast.lane.b32.xlu0 %v1083_v49, 264 }
  0x9b   : > { %v12134_v54 = vpop.permute.xlu1 %1846  ;;  %v12136_v55 = vpop.permute.xlu0 %980 }
  0x9d   : > { %2538 = vbcast.lane.b32.xlu1 %v2536_v52, 256  ;;  %2482 = vbcast.lane.b32.xlu0 %v2480_v53, 256 }
  0x9f   : > { %v12142_v58 = vpop.permute.xlu1 %2517  ;;  %v12144_v59 = vpop.permute.xlu0 %2461 }
  0xa1   : > { %2587 = vbcast.lane.b32.xlu1 %v2585_v56, 256  ;;  %2566 = vbcast.lane.b32.xlu0 %v2564_v57, 256 }
  0xa3   : > { %v12150_v62 = vpop.permute.xlu1 %3383  ;;  %v12152_v63 = vpop.permute.xlu0 %3351 }
  0xa5   : > { %2643 = vbcast.lane.b32.xlu1 %v2641_v60, 256  ;;  %2622 = vbcast.lane.b32.xlu0 %v2620_v61, 256 }
  0xa7   : > { %v12154_v0 = vpop.permute.xlu1 %987  ;;  %v12156_v1 = vpop.permute.xlu0 %931 }
  0xa9   : > { %3395 = vbcast.lane.b32.xlu1 %v2536_v52, 264  ;;  %3363 = vbcast.lane.b32.xlu0 %v2480_v53, 264  ;;  %v1118_v52 = vrot.slane %v12047_v13, %v12163_v8  ;;  %v1062_v53 = vrot.slane %v12049_v14, %v12163_v8 }
  0xab   : > { %v12158_v4 = vpop.permute.xlu1 %1092  ;;  %v12160_v7 = vpop.permute.xlu0 %1036 }
  0xad   : > { %3423 = vbcast.lane.b32.xlu1 %v2585_v56, 264  ;;  %3411 = vbcast.lane.b32.xlu0 %v2564_v57, 264 }
  0xaf   : > { %v12165_v9 = vpop.permute.xlu1 %1850  ;;  %v12167_v10 = vpop.permute.xlu0 %1818 }
  0xb1   : > { %3455 = vbcast.lane.b32.xlu1 %v2641_v60, 264  ;;  %3443 = vbcast.lane.b32.xlu0 %v2620_v61, 264 }
  0xb3   : > { %v12173_v18 = vpop.permute.xlu1 %1910  ;;  %v12175_v19 = vpop.permute.xlu0 %1878 }
  0xb5   : > { %1008 = vbcast.lane.b32.xlu1 %v1006_v16, 256  ;;  %952 = vbcast.lane.b32.xlu0 %v950_v17, 256 }
  0xb7   : > { %v12181_v24 = vpop.permute.xlu1 %2524  ;;  %v12183_v25 = vpop.permute.xlu0 %2468 }
  0xb9   : > { %1113 = vbcast.lane.b32.xlu1 %v1111_v20, 256  ;;  %1057 = vbcast.lane.b32.xlu0 %v1055_v23, 256 }
  0xbb   : > { %v12185_v26 = vpop.permute.xlu1 %2629  ;;  %v12187_v27 = vpop.permute.xlu0 %2573 }
  0xbd   : > { %1862 = vbcast.lane.b32.xlu1 %v1006_v16, 264  ;;  %1830 = vbcast.lane.b32.xlu0 %v950_v17, 264 }
  0xbf   : > { %v12189_v28 = vpop.permute.xlu1 %3387  ;;  %v12191_v31 = vpop.permute.xlu0 %3355 }
  0xc1   : > { %1922 = vbcast.lane.b32.xlu1 %v1111_v20, 264  ;;  %1890 = vbcast.lane.b32.xlu0 %v1055_v23, 264  ;;  %v2550_v20 = vrot.slane %v12043_v11, %v12214_v42  ;;  %v2494_v23 = vrot.slane %v12045_v12, %v12214_v42 }
  0xc3   : > { %v12197_v34 = vpop.permute.xlu1 %3447  ;;  %v12199_v35 = vpop.permute.xlu0 %3415 }
  0xc5   : > { %2545 = vbcast.lane.b32.xlu1 %v2543_v32, 256  ;;  %2489 = vbcast.lane.b32.xlu0 %v2487_v33, 256 }
  0xc7   : > { %v12205_v38 = vpop.permute.xlu1 %938  ;;  %v12207_v39 = vpop.permute.xlu0 %917 }
  0xc9   : > { %2650 = vbcast.lane.b32.xlu1 %v2648_v36, 256  ;;  %2594 = vbcast.lane.b32.xlu0 %v2592_v37, 256 }
  0xcb   : > { %v12209_v40 = vpop.permute.xlu1 %994  ;;  %v12211_v41 = vpop.permute.xlu0 %973 }
  0xcc   : > { %18044 = vst [vmem:[#allocation14_spill] sm:$0xff] %v12209_v40  ;;  %18045 = vst [vmem:[#allocation15_spill] sm:$0xff] %v12211_v41 }
  0xcd   : > { %3399 = vbcast.lane.b32.xlu1 %v2543_v32, 264  ;;  %3367 = vbcast.lane.b32.xlu0 %v2487_v33, 264 }
  0xcf   : > { %v12216_v44 = vpop.permute.xlu1 %1099  ;;  %v12218_v45 = vpop.permute.xlu0 %1043 }
  0xd0   : > { %18047 = vst [vmem:[#allocation17_spill] sm:$0xff] %v12216_v44  ;;  %18048 = vst [vmem:[#allocation18_spill] sm:$0xff] %v12218_v45  ;;  %v12265_v44 = vsub.s32 7, %v12011_v2  ;;  %v1125_v2 = vrot.slane %v12047_v13, %v12214_v42 }
  0xd1   : > { %3459 = vbcast.lane.b32.xlu1 %v2648_v36, 264  ;;  %3427 = vbcast.lane.b32.xlu0 %v2592_v37, 264  ;;  %v2655_v36 = vrot.slane %v12065_v21, %v12163_v8  ;;  %v2599_v37 = vrot.slane %v12067_v22, %v12163_v8 }
  0xd2   : > { %18056 = vst [vmem:[#allocation26_spill] sm:$0xff] %v12265_v44 }
  0xd3   : > { %v12224_v48 = vpop.permute.xlu1 %1822  ;;  %v12226_v49 = vpop.permute.xlu0 %1810 }
  0xd5   : > { %1015 = vbcast.lane.b32.xlu1 %v1013_v46, 256  ;;  %959 = vbcast.lane.b32.xlu0 %v957_v47, 256 }
  0xd7   : > { %v12232_v56 = vpop.permute.xlu1 %1854  ;;  %v12234_v57 = vpop.permute.xlu0 %1842 }
  0xd8   : > { %18049 = vst [vmem:[#allocation19_spill] sm:$0xff] %v12232_v56  ;;  %18050 = vst [vmem:[#allocation20_spill] sm:$0xff] %v12234_v57 }
  0xd9   : > { %1120 = vbcast.lane.b32.xlu1 %v1118_v52, 256  ;;  %1064 = vbcast.lane.b32.xlu0 %v1062_v53, 256 }
  0xdb   : > { %v12236_v60 = vpop.permute.xlu1 %1914  ;;  %v12238_v61 = vpop.permute.xlu0 %1882 }
  0xdc   : > { %18051 = vst [vmem:[#allocation21_spill] sm:$0xff] %v12236_v60  ;;  %18052 = vst [vmem:[#allocation22_spill] sm:$0xff] %v12238_v61  ;;  %v964_v61 = vrot.slane %v12031_v5, %v12265_v44 }
  0xdd   : > { %1866 = vbcast.lane.b32.xlu1 %v1013_v46, 264  ;;  %1834 = vbcast.lane.b32.xlu0 %v957_v47, 264 }
  0xdf   : > { %v12240_v16 = vpop.permute.xlu1 %2475  ;;  %v12242_v17 = vpop.permute.xlu0 %2454 }
  0xe1   : > { %1926 = vbcast.lane.b32.xlu1 %v1118_v52, 264  ;;  %1894 = vbcast.lane.b32.xlu0 %v1062_v53, 264 }
  0xe3   : > { %v12248_v32 = vpop.permute.xlu1 %2531  ;;  %v12250_v33 = vpop.permute.xlu0 %2510 }
  0xe4   : > { %18053 = vst [vmem:[#allocation23_spill] sm:$0xff] %v12250_v33 }
  0xe5   : > { %2552 = vbcast.lane.b32.xlu1 %v2550_v20, 256  ;;  %2496 = vbcast.lane.b32.xlu0 %v2494_v23, 256 }
  0xe7   : > { %v12256_v46 = vpop.permute.xlu1 %2636  ;;  %v12258_v47 = vpop.permute.xlu0 %2580 }
  0xe8   : > { %18054 = vst [vmem:[#allocation24_spill] sm:$0xff] %v12256_v46  ;;  %18055 = vst [vmem:[#allocation25_spill] sm:$0xff] %v12258_v47  ;;  %v1020_v46 = vrot.slane %v12033_v6, %v12265_v44 }
  0xe9   : > { %2657 = vbcast.lane.b32.xlu1 %v2655_v36, 256  ;;  %2601 = vbcast.lane.b32.xlu0 %v2599_v37, 256 }
  0xeb   : > { %v12260_v52 = vpop.permute.xlu1 %3359  ;;  %v12262_v53 = vpop.permute.xlu0 %3347 }
  0xed   : > { %3403 = vbcast.lane.b32.xlu1 %v2550_v20, 264  ;;  %3371 = vbcast.lane.b32.xlu0 %v2494_v23, 264  ;;  %v1069_v20 = vrot.slane %v12049_v14, %v12214_v42 }
  0xef   : > { %v12267_v60 = vpop.permute.xlu1 %3391  ;;  %v12269_v45 = vpop.permute.xlu0 %3379 }
  0xf0   : > { %18057 = vst [vmem:[#allocation27_spill] sm:$0xff] %v12269_v45 }
  0xf1   : > { %3463 = vbcast.lane.b32.xlu1 %v2655_v36, 264  ;;  %3431 = vbcast.lane.b32.xlu0 %v2599_v37, 264 }
  0xf3   : > { %v12275_v47 = vpop.permute.xlu1 %3451  ;;  %v12277_v41 = vpop.permute.xlu0 %3419 }
  0xf4   : > { %18058 = vst [vmem:[#allocation28_spill] sm:$0xff] %v12275_v47  ;;  %18059 = vst [vmem:[#allocation29_spill] sm:$0xff] %v12277_v41  ;;  %v2557_v41 = vrot.slane %v12043_v11, %v12265_v44 }
  0xf5   : > { %1022 = vbcast.lane.b32.xlu1 %v1020_v46, 256  ;;  %966 = vbcast.lane.b32.xlu0 %v964_v61, 256 }
  0xf7   : > { %v12283_v23 = vpop.permute.xlu1 %1001  ;;  %v12285_v36 = vpop.permute.xlu0 %945 }
  0xf8   : > { %18060 = vst [vmem:[#allocation30_spill] sm:$0xff] %v12283_v23  ;;  %18061 = vst [vmem:[#allocation31_spill] sm:$0xff] %v12285_v36  ;;  %v2501_v36 = vrot.slane %v12045_v12, %v12265_v44 }
  0xf9   : > { %1127 = vbcast.lane.b32.xlu1 %v1125_v2, 256  ;;  %1071 = vbcast.lane.b32.xlu0 %v1069_v20, 256 }
  0xfb   : > { %v12287_v6 = vpop.permute.xlu1 %1050  ;;  %v12289_v5 = vpop.permute.xlu0 %1029 }
  0xfc   : > { %18062 = vst [vmem:[#allocation32_spill] sm:$0xff] %v12287_v6  ;;  %18063 = vst [vmem:[#allocation33_spill] sm:$0xff] %v12289_v5  ;;  %v1132_v6 = vrot.slane %v12047_v13, %v12265_v44  ;;  %v2613_v13 = vrot.slane %v12067_v22, %v12265_v44 }
  0xfd   : > { %1870 = vbcast.lane.b32.xlu1 %v1020_v46, 264  ;;  %1838 = vbcast.lane.b32.xlu0 %v964_v61, 264  ;;  %v2662_v61 = vrot.slane %v12065_v21, %v12214_v42  ;;  %v2606_v46 = vrot.slane %v12067_v22, %v12214_v42 }
  0xff   : > { %v12291_v37 = vpop.permute.xlu1 %1106  ;;  %v12293_v47 = vpop.permute.xlu0 %1085 }
 0x100   : > { %18064 = vst [vmem:[#allocation34_spill] sm:$0xff] %v12291_v37  ;;  %18065 = vst [vmem:[#allocation35_spill] sm:$0xff] %v12293_v47 }
 0x101   : > { %1930 = vbcast.lane.b32.xlu1 %v1125_v2, 264  ;;  %1898 = vbcast.lane.b32.xlu0 %v1069_v20, 264 }
 0x103   : > { %v12299_v23 = vpop.permute.xlu1 %1858  ;;  %v12301_v57 = vpop.permute.xlu0 %1826 }
 0x104   : > { %18066 = vst [vmem:[#allocation36_spill] sm:$0xff] %v12299_v23  ;;  %18067 = vst [vmem:[#allocation37_spill] sm:$0xff] %v12301_v57  ;;  %v630_v23 = vld [vmem:[%s12025_s25 + $0x18] sm:$0xff]  }
 0x105   : > { %2559 = vbcast.lane.b32.xlu1 %v2557_v41, 256  ;;  %2503 = vbcast.lane.b32.xlu0 %v2501_v36, 256 }
 0x107   : > { %v12307_v2 = vpop.permute.xlu1 %1886  ;;  %v12309_v47 = vpop.permute.xlu0 %1874 }
 0x108   : > { %18068 = vst [vmem:[#allocation38_spill] sm:$0xff] %v12307_v2  ;;  %18069 = vst [vmem:[#allocation39_spill] sm:$0xff] %v12309_v47  ;;  %v1076_v2 = vrot.slane %v12049_v14, %v12265_v44  ;;  %v628_v14 = vld [vmem:[%s12025_s25 + $0x10] sm:$0xff]   ;;  %v10725_v47 = vld [vmem:[%s12020_s27 + $0x2] ss:$0 sm:$0xff] }
 0x109   : > { %2664 = vbcast.lane.b32.xlu1 %v2662_v61, 256  ;;  %2608 = vbcast.lane.b32.xlu0 %v2606_v46, 256 }
 0x10b   : > { %v12311_v11 = vpop.permute.xlu1 %1918  ;;  %v12313_v12 = vpop.permute.xlu0 %1906 }
 0x10c   : > { %18070 = vst [vmem:[#allocation40_spill] sm:$0xff] %v12311_v11  ;;  %18071 = vst [vmem:[#allocation41_spill] sm:$0xff] %v12313_v12 }
 0x10d   : > { %3407 = vbcast.lane.b32.xlu1 %v2557_v41, 264  ;;  %3375 = vbcast.lane.b32.xlu0 %v2501_v36, 264 }
 0x10f   : > { %v12315_v20 = vpop.permute.xlu1 %2538  ;;  %v12317_v37 = vpop.permute.xlu0 %2482 }
 0x110   : > { %18072 = vst [vmem:[#allocation42_spill] sm:$0xff] %v12315_v20  ;;  %18073 = vst [vmem:[#allocation43_spill] sm:$0xff] %v12317_v37 }
 0x111   : > { %3467 = vbcast.lane.b32.xlu1 %v2662_v61, 264  ;;  %3435 = vbcast.lane.b32.xlu0 %v2606_v46, 264  ;;  %v2669_v61 = vrot.slane %v12065_v21, %v12265_v44 }
 0x113   : > { %v12323_v5 = vpop.permute.xlu1 %2587  ;;  %v12325_v11 = vpop.permute.xlu0 %2566 }
 0x114   : > { %18074 = vst [vmem:[#allocation44_spill] sm:$0xff] %v12323_v5  ;;  %18075 = vst [vmem:[#allocation45_spill] sm:$0xff] %v12325_v11  ;;  %v12340_v5 = vunpack.c.h.bf16 %v628_v14 }
 0x115   : > { %1134 = vbcast.lane.b32.xlu1 %v1132_v6, 256  ;;  %1078 = vbcast.lane.b32.xlu0 %v1076_v2, 256 }
 0x116   : > { %v1202_v21 = vrot.slane %v12340_v5, %v12028_v3  ;;  %vm885_vm4 = vcmp.ne.f32.partialorder %v12340_v5, 0.0 }
 0x117   : > { %v12327_v41 = vpop.permute.xlu1 %2643  ;;  %v12329_v36 = vpop.permute.xlu0 %2622 }
 0x118   : > { %18076 = vst [vmem:[#allocation46_spill] sm:$0xff] %v12327_v41  ;;  %18077 = vst [vmem:[#allocation47_spill] sm:$0xff] %v12329_v36  ;;  %v12342_v41 = vunpack.c.l.bf16 %v628_v14 }
 0x119   : > { %1934 = vbcast.lane.b32.xlu1 %v1132_v6, 264  ;;  %1902 = vbcast.lane.b32.xlu0 %v1076_v2, 264 }
 0x11a   : > { %v1146_v22 = vrot.slane %v12342_v41, %v12028_v3  ;;  %vm884_vm5 = vcmp.ne.f32.partialorder %v12342_v41, 0.0  ;;  %v1160_v40 = vrot.slane %v12342_v41, %v12082_v29 }
 0x11b   : > { %v12336_v46 = vpop.permute.xlu1 %3395  ;;  %v12338_v12 = vpop.permute.xlu0 %3363 }
 0x11c   : > { %18078 = vst [vmem:[#allocation48_spill] sm:$0xff] %v12336_v46  ;;  %18079 = vst [vmem:[#allocation49_spill] sm:$0xff] %v12338_v12 }
 0x11d   : > { %2671 = vbcast.lane.b32.xlu1 %v2669_v61, 256  ;;  %2615 = vbcast.lane.b32.xlu0 %v2613_v13, 256 }
 0x11f   : > { %v12344_v6 = vpop.permute.xlu1 %3423  ;;  %v12346_v36 = vpop.permute.xlu0 %3411 }
 0x120   : > { %18080 = vst [vmem:[#allocation50_spill] sm:$0xff] %v12344_v6  ;;  %18081 = vst [vmem:[#allocation51_spill] sm:$0xff] %v12346_v36 }
 0x121   : > { %3471 = vbcast.lane.b32.xlu1 %v2669_v61, 264  ;;  %3439 = vbcast.lane.b32.xlu0 %v2613_v13, 264  ;;  %v12359_v61 = vsel %vm885_vm4, %v10725_v47, 0.0  ;;  %v12363_v13 = vsel %vm884_vm5, %v10725_v47, 0.0  ;;  %vm6982_vm4 = vcmask 1044484   ;;  %vm6985_vm5 = vcmask 1045509  }
 0x123   : > { %v12352_v2 = vpop.permute.xlu1 %3455  ;;  %v12356_v11 = vpop.permute.xlu0 %3443 }
 0x124   : > { %18082 = vst [vmem:[#allocation52_spill] sm:$0xff] %v12352_v2  ;;  %18083 = vst [vmem:[#allocation53_spill] sm:$0xff] %v12356_v11  ;;  %v2739_v2 = vrot.slane %v12359_v61, %v12028_v3  ;;  %v2683_v11 = vrot.slane %v12363_v13, %v12028_v3 }
 0x125   : > { %1204 = vbcast.lane.b32.xlu1 %v1202_v21, 256  ;;  %1148 = vbcast.lane.b32.xlu0 %v1146_v22, 256 }
 0x127   : > { %v12361_v14 = vpop.permute.xlu1 %1008  ;;  %v12365_v6 = vpop.permute.xlu0 %952 }
 0x128   : > { %18084 = vst [vmem:[#allocation54_spill] sm:$0xff] %v12361_v14  ;;  %18085 = vst [vmem:[#allocation55_spill] sm:$0xff] %v12365_v6  ;;  %v12382_v6 = vunpack.c.h.bf16 %v630_v23 }
 0x129   : > { %1974 = vbcast.lane.b32.xlu1 %v1202_v21, 264  ;;  %1942 = vbcast.lane.b32.xlu0 %v1146_v22, 264  ;;  %v1209_v21 = vrot.slane %v12340_v5, %v12052_v15  ;;  %v1153_v22 = vrot.slane %v12342_v41, %v12052_v15 }
 0x12a   : > { %vm887_vm6 = vcmp.ne.f32.partialorder %v12382_v6, 0.0 }
 0x12b   : > { %v12371_v36 = vpop.permute.xlu1 %1113  ;;  %v12373_v57 = vpop.permute.xlu0 %1057 }
 0x12c   : > { %18086 = vst [vmem:[#allocation56_spill] sm:$0xff] %v12371_v36  ;;  %18087 = vst [vmem:[#allocation57_spill] sm:$0xff] %v12373_v57  ;;  %v12386_v36 = vunpack.c.l.bf16 %v630_v23 }
 0x12d   : > { %2741 = vbcast.lane.b32.xlu1 %v2739_v2, 256  ;;  %2685 = vbcast.lane.b32.xlu0 %v2683_v11, 256 }
 0x12e   : > { %vm886_vm7 = vcmp.ne.f32.partialorder %v12386_v36, 0.0 }
 0x12f   : > { %v12376_v14 = vpop.permute.xlu1 %1862  ;;  %v12378_v47 = vpop.permute.xlu0 %1830 }
 0x130   : > { %18088 = vst [vmem:[#allocation58_spill] sm:$0xff] %v12376_v14  ;;  %18089 = vst [vmem:[#allocation59_spill] sm:$0xff] %v12378_v47  ;;  %v1258_v47 = vrot.slane %v12386_v36, %v12028_v3 }
 0x131   : > { %3511 = vbcast.lane.b32.xlu1 %v2739_v2, 264  ;;  %3479 = vbcast.lane.b32.xlu0 %v2683_v11, 264  ;;  %v1314_v2 = vrot.slane %v12382_v6, %v12028_v3 }
 0x133   : > { %v12388_v57 = vpop.permute.xlu1 %1922  ;;  %v12390_v37 = vpop.permute.xlu0 %1890 }
 0x134   : > { %18090 = vst [vmem:[#allocation60_spill] sm:$0xff] %v12388_v57  ;;  %18091 = vst [vmem:[#allocation61_spill] sm:$0xff] %v12390_v37  ;;  %v10726_v57 = vld [vmem:[%s12020_s27 + $0x3] ss:$0 sm:$0xff] }
 0x135   : > { %1211 = vbcast.lane.b32.xlu1 %v1209_v21, 256  ;;  %1155 = vbcast.lane.b32.xlu0 %v1153_v22, 256 }
 0x137   : > { %v12396_v14 = vpop.permute.xlu1 %2545  ;;  %v12398_v11 = vpop.permute.xlu0 %2489 }
 0x138   : > { %18092 = vst [vmem:[#allocation62_spill] sm:$0xff] %v12396_v14  ;;  %18093 = vst [vmem:[#allocation63_spill] sm:$0xff] %v12398_v11  ;;  %v2746_v11 = vrot.slane %v12359_v61, %v12052_v15 }
 0x139   : > { %1316 = vbcast.lane.b32.xlu1 %v1314_v2, 256  ;;  %1260 = vbcast.lane.b32.xlu0 %v1258_v47, 256 }
 0x13b   : > { %v12400_v23 = vpop.permute.xlu1 %2650  ;;  %v12402_v12 = vpop.permute.xlu0 %2594 }
 0x13c   : > { %18094 = vst [vmem:[#allocation64_spill] sm:$0xff] %v12400_v23  ;;  %18095 = vst [vmem:[#allocation65_spill] sm:$0xff] %v12402_v12  ;;  %v2690_v23 = vrot.slane %v12363_v13, %v12052_v15  ;;  %v12415_v12 = vsel %vm887_vm6, %v10726_v57, 0.0  ;;  %vm6988_vm6 = vcmask 1046534  }
 0x13d   : > { %1978 = vbcast.lane.b32.xlu1 %v1209_v21, 264  ;;  %1946 = vbcast.lane.b32.xlu0 %v1153_v22, 264  ;;  %v12419_v22 = vsel %vm886_vm7, %v10726_v57, 0.0  ;;  %vm6991_vm7 = vcmask 1047559  }
 0x13f   : > { %v12404_v37 = vpop.permute.xlu1 %3399  ;;  %v12408_v20 = vpop.permute.xlu0 %3367 }
 0x140   : > { %18096 = vst [vmem:[#allocation66_spill] sm:$0xff] %v12404_v37  ;;  %18097 = vst [vmem:[#allocation67_spill] sm:$0xff] %v12408_v20  ;;  %v2851_v20 = vrot.slane %v12415_v12, %v12028_v3 }
 0x141   : > { %2038 = vbcast.lane.b32.xlu1 %v1314_v2, 264  ;;  %2006 = vbcast.lane.b32.xlu0 %v1258_v47, 264  ;;  %v2795_v2 = vrot.slane %v12419_v22, %v12028_v3 }
 0x143   : > { %v12417_v21 = vpop.permute.xlu1 %3459  ;;  %v12421_v14 = vpop.permute.xlu0 %3427 }
 0x144   : > { %18098 = vst [vmem:[#allocation68_spill] sm:$0xff] %v12417_v21  ;;  %18099 = vst [vmem:[#allocation69_spill] sm:$0xff] %v12421_v14 }
 0x145   : > { %2748 = vbcast.lane.b32.xlu1 %v2746_v11, 256  ;;  %2692 = vbcast.lane.b32.xlu0 %v2690_v23, 256 }
 0x147   : > { %v12427_v47 = vpop.permute.xlu1 %1015  ;;  %v12429_v37 = vpop.permute.xlu0 %959 }
 0x148   : > { %18100 = vst [vmem:[#allocation70_spill] sm:$0xff] %v12427_v47  ;;  %18101 = vst [vmem:[#allocation71_spill] sm:$0xff] %v12429_v37  ;;  %v1139_v37 = vrot.slane %v12342_v41, %v12085_v30 }
 0x149   : > { %2853 = vbcast.lane.b32.xlu1 %v2851_v20, 256  ;;  %2797 = vbcast.lane.b32.xlu0 %v2795_v2, 256 }
 0x14b   : > { %v12431_v46 = vpop.permute.xlu1 %1120  ;;  %v12433_v57 = vpop.permute.xlu0 %1064 }
 0x14c   : > { %18102 = vst [vmem:[#allocation72_spill] sm:$0xff] %v12431_v46  ;;  %18103 = vst [vmem:[#allocation73_spill] sm:$0xff] %v12433_v57 }
 0x14d   : > { %3515 = vbcast.lane.b32.xlu1 %v2746_v11, 264  ;;  %3483 = vbcast.lane.b32.xlu0 %v2690_v23, 264  ;;  %v1216_v11 = vrot.slane %v12340_v5, %v12082_v29  ;;  %v1195_v23 = vrot.slane %v12340_v5, %v12085_v30 }
 0x14f   : > { %v12435_v14 = vpop.permute.xlu1 %1866  ;;  %v12437_v21 = vpop.permute.xlu0 %1834 }
 0x150   : > { %18104 = vst [vmem:[#allocation74_spill] sm:$0xff] %v12435_v14  ;;  %18105 = vst [vmem:[#allocation75_spill] sm:$0xff] %v12437_v21 }
 0x151   : > { %3575 = vbcast.lane.b32.xlu1 %v2851_v20, 264  ;;  %3543 = vbcast.lane.b32.xlu0 %v2795_v2, 264  ;;  %v1321_v2 = vrot.slane %v12382_v6, %v12052_v15 }
 0x153   : > { %v12443_v47 = vpop.permute.xlu1 %1926  ;;  %v12445_v56 = vpop.permute.xlu0 %1894 }
 0x154   : > { %18106 = vst [vmem:[#allocation76_spill] sm:$0xff] %v12443_v47  ;;  %18107 = vst [vmem:[#allocation77_spill] sm:$0xff] %v12445_v56  ;;  %v1265_v56 = vrot.slane %v12386_v36, %v12052_v15 }
 0x155   : > { %1162 = vbcast.lane.b32.xlu1 %v1160_v40, 256  ;;  %1141 = vbcast.lane.b32.xlu0 %v1139_v37, 256 }
 0x157   : > { %v12451_v20 = vpop.permute.xlu1 %2552  ;;  %v12453_v57 = vpop.permute.xlu0 %2496 }
 0x158   : > { %18108 = vst [vmem:[#allocation78_spill] sm:$0xff] %v12451_v20  ;;  %18109 = vst [vmem:[#allocation79_spill] sm:$0xff] %v12453_v57 }
 0x159   : > { %1218 = vbcast.lane.b32.xlu1 %v1216_v11, 256  ;;  %1197 = vbcast.lane.b32.xlu0 %v1195_v23, 256 }
 0x15b   : > { %v12459_v46 = vpop.permute.xlu1 %2657  ;;  %v12461_v47 = vpop.permute.xlu0 %2601 }
 0x15c   : > { %18110 = vst [vmem:[#allocation80_spill] sm:$0xff] %v12459_v46  ;;  %18111 = vst [vmem:[#allocation81_spill] sm:$0xff] %v12461_v47  ;;  %v2697_v47 = vrot.slane %v12363_v13, %v12082_v29  ;;  %v2676_v46 = vrot.slane %v12363_v13, %v12085_v30 }
 0x15d   : > { %1323 = vbcast.lane.b32.xlu1 %v1321_v2, 256  ;;  %1267 = vbcast.lane.b32.xlu0 %v1265_v56, 256 }
 0x15f   : > { %v12463_v21 = vpop.permute.xlu1 %3403  ;;  %v12465_v14 = vpop.permute.xlu0 %3371 }
 0x160   : > { %18112 = vst [vmem:[#allocation82_spill] sm:$0xff] %v12463_v21  ;;  %18113 = vst [vmem:[#allocation83_spill] sm:$0xff] %v12465_v14 }
 0x161   : > { %1950 = vbcast.lane.b32.xlu1 %v1160_v40, 264  ;;  %1938 = vbcast.lane.b32.xlu0 %v1139_v37, 264 }
 0x163   : > { %v12467_v57 = vpop.permute.xlu1 %3463  ;;  %v12469_v20 = vpop.permute.xlu0 %3431 }
 0x164   : > { %18114 = vst [vmem:[#allocation84_spill] sm:$0xff] %v12467_v57  ;;  %18115 = vst [vmem:[#allocation85_spill] sm:$0xff] %v12469_v20 }
 0x165   : > { %1982 = vbcast.lane.b32.xlu1 %v1216_v11, 264  ;;  %1970 = vbcast.lane.b32.xlu0 %v1195_v23, 264  ;;  %v2753_v11 = vrot.slane %v12359_v61, %v12082_v29  ;;  %v2732_v23 = vrot.slane %v12359_v61, %v12085_v30 }
 0x167   : > { %v12471_v33 = vpop.permute.xlu1 %1022  ;;  %v12473_v45 = vpop.permute.xlu0 %966 }
 0x168   : > { %18116 = vst [vmem:[#allocation86_spill] sm:$0xff] %v12471_v33  ;;  %18117 = vst [vmem:[#allocation87_spill] sm:$0xff] %v12473_v45 }
 0x169   : > { %2042 = vbcast.lane.b32.xlu1 %v1321_v2, 264  ;;  %2010 = vbcast.lane.b32.xlu0 %v1265_v56, 264  ;;  %v2858_v56 = vrot.slane %v12415_v12, %v12052_v15 }
 0x16b   : > { %v12479_v40 = vpop.permute.xlu1 %1127  ;;  %v12481_v37 = vpop.permute.xlu0 %1071 }
 0x16c   : > { %18118 = vst [vmem:[#allocation88_spill] sm:$0xff] %v12479_v40  ;;  %18119 = vst [vmem:[#allocation89_spill] sm:$0xff] %v12481_v37  ;;  %v2802_v37 = vrot.slane %v12419_v22, %v12052_v15 }
 0x16d   : > { %2699 = vbcast.lane.b32.xlu1 %v2697_v47, 256  ;;  %2678 = vbcast.lane.b32.xlu0 %v2676_v46, 256 }
 0x16f   : > { %v12487_v2 = vpop.permute.xlu1 %1870  ;;  %v12489_v45 = vpop.permute.xlu0 %1838 }
 0x170   : > { %18120 = vst [vmem:[#allocation90_spill] sm:$0xff] %v12487_v2  ;;  %18121 = vst [vmem:[#allocation91_spill] sm:$0xff] %v12489_v45 }
 0x171   : > { %2755 = vbcast.lane.b32.xlu1 %v2753_v11, 256  ;;  %2734 = vbcast.lane.b32.xlu0 %v2732_v23, 256 }
 0x173   : > { %v12495_v40 = vpop.permute.xlu1 %1930  ;;  %v12497_v33 = vpop.permute.xlu0 %1898 }
 0x174   : > { %18122 = vst [vmem:[#allocation92_spill] sm:$0xff] %v12495_v40  ;;  %18123 = vst [vmem:[#allocation93_spill] sm:$0xff] %v12497_v33  ;;  %v1223_v33 = vrot.slane %v12340_v5, %v12112_v43  ;;  %v1167_v40 = vrot.slane %v12342_v41, %v12112_v43 }
 0x175   : > { %2860 = vbcast.lane.b32.xlu1 %v2858_v56, 256  ;;  %2804 = vbcast.lane.b32.xlu0 %v2802_v37, 256 }
 0x177   : > { %v12499_v20 = vpop.permute.xlu1 %2559  ;;  %v12501_v57 = vpop.permute.xlu0 %2503 }
 0x178   : > { %18124 = vst [vmem:[#allocation94_spill] sm:$0xff] %v12499_v20  ;;  %18125 = vst [vmem:[#allocation95_spill] sm:$0xff] %v12501_v57 }
 0x179   : > { %3487 = vbcast.lane.b32.xlu1 %v2697_v47, 264  ;;  %3475 = vbcast.lane.b32.xlu0 %v2676_v46, 264 }
 0x17b   : > { %v12503_v45 = vpop.permute.xlu1 %2664  ;;  %v12505_v2 = vpop.permute.xlu0 %2608 }
 0x17c   : > { %18126 = vst [vmem:[#allocation96_spill] sm:$0xff] %v12503_v45  ;;  %18127 = vst [vmem:[#allocation97_spill] sm:$0xff] %v12505_v2 }
 0x17d   : > { %3519 = vbcast.lane.b32.xlu1 %v2753_v11, 264  ;;  %3507 = vbcast.lane.b32.xlu0 %v2732_v23, 264  ;;  %v1272_v11 = vrot.slane %v12386_v36, %v12082_v29  ;;  %v1251_v23 = vrot.slane %v12386_v36, %v12085_v30 }
 0x17f   : > { %v12507_v14 = vpop.permute.xlu1 %3407  ;;  %v12509_v21 = vpop.permute.xlu0 %3375 }
 0x180   : > { %18128 = vst [vmem:[#allocation98_spill] sm:$0xff] %v12507_v14  ;;  %18129 = vst [vmem:[#allocation99_spill] sm:$0xff] %v12509_v21 }
 0x181   : > { %3579 = vbcast.lane.b32.xlu1 %v2858_v56, 264  ;;  %3547 = vbcast.lane.b32.xlu0 %v2802_v37, 264  ;;  %v1328_v37 = vrot.slane %v12382_v6, %v12082_v29 }
 0x183   : > { %v12515_v47 = vpop.permute.xlu1 %3467  ;;  %v12517_v46 = vpop.permute.xlu0 %3435 }
 0x184   : > { %18130 = vst [vmem:[#allocation100_spill] sm:$0xff] %v12515_v47  ;;  %18131 = vst [vmem:[#allocation101_spill] sm:$0xff] %v12517_v46  ;;  %v1307_v46 = vrot.slane %v12382_v6, %v12085_v30 }
 0x185   : > { %1225 = vbcast.lane.b32.xlu1 %v1223_v33, 256  ;;  %1169 = vbcast.lane.b32.xlu0 %v1167_v40, 256 }
 0x187   : > { %v12523_v56 = vpop.permute.xlu1 %1134  ;;  %v12525_v2 = vpop.permute.xlu0 %1078 }
 0x188   : > { %18132 = vst [vmem:[#allocation102_spill] sm:$0xff] %v12523_v56  ;;  %18133 = vst [vmem:[#allocation103_spill] sm:$0xff] %v12525_v2 }
 0x189   : > { %1274 = vbcast.lane.b32.xlu1 %v1272_v11, 256  ;;  %1253 = vbcast.lane.b32.xlu0 %v1251_v23, 256 }
 0x18b   : > { %v12531_v45 = vpop.permute.xlu1 %1934  ;;  %v12533_v47 = vpop.permute.xlu0 %1902 }
 0x18c   : > { %18134 = vst [vmem:[#allocation104_spill] sm:$0xff] %v12531_v45  ;;  %18135 = vst [vmem:[#allocation105_spill] sm:$0xff] %v12533_v47  ;;  %v2760_v47 = vrot.slane %v12359_v61, %v12112_v43  ;;  %v2704_v45 = vrot.slane %v12363_v13, %v12112_v43 }
 0x18d   : > { %1330 = vbcast.lane.b32.xlu1 %v1328_v37, 256  ;;  %1309 = vbcast.lane.b32.xlu0 %v1307_v46, 256 }
 0x18f   : > { %v12535_v57 = vpop.permute.xlu1 %2671  ;;  %v12537_v21 = vpop.permute.xlu0 %2615 }
 0x190   : > { %18136 = vst [vmem:[#allocation106_spill] sm:$0xff] %v12535_v57  ;;  %18137 = vst [vmem:[#allocation107_spill] sm:$0xff] %v12537_v21 }
 0x191   : > { %1986 = vbcast.lane.b32.xlu1 %v1223_v33, 264  ;;  %1954 = vbcast.lane.b32.xlu0 %v1167_v40, 264 }
 0x193   : > { %v12539_v2 = vpop.permute.xlu1 %3471  ;;  %v12541_v56 = vpop.permute.xlu0 %3439 }
 0x194   : > { %18138 = vst [vmem:[#allocation108_spill] sm:$0xff] %v12539_v2  ;;  %18139 = vst [vmem:[#allocation109_spill] sm:$0xff] %v12541_v56 }
 0x195   : > { %2014 = vbcast.lane.b32.xlu1 %v1272_v11, 264  ;;  %2002 = vbcast.lane.b32.xlu0 %v1251_v23, 264  ;;  %v2809_v11 = vrot.slane %v12419_v22, %v12082_v29  ;;  %v2788_v23 = vrot.slane %v12419_v22, %v12085_v30 }
 0x197   : > { %v12543_v20 = vpop.permute.xlu1 %1204  ;;  %v12545_v14 = vpop.permute.xlu0 %1148 }
 0x198   : > { %18140 = vst [vmem:[#allocation110_spill] sm:$0xff] %v12543_v20  ;;  %18141 = vst [vmem:[#allocation111_spill] sm:$0xff] %v12545_v14 }
 0x199   : > { %2046 = vbcast.lane.b32.xlu1 %v1328_v37, 264  ;;  %2034 = vbcast.lane.b32.xlu0 %v1307_v46, 264  ;;  %v2865_v46 = vrot.slane %v12415_v12, %v12082_v29 }
 0x19b   : > { %v12551_v33 = vpop.permute.xlu1 %1974  ;;  %v12553_v40 = vpop.permute.xlu0 %1942 }
 0x19c   : > { %18142 = vst [vmem:[#allocation112_spill] sm:$0xff] %v12551_v33  ;;  %18143 = vst [vmem:[#allocation113_spill] sm:$0xff] %v12553_v40  ;;  %v2844_v40 = vrot.slane %v12415_v12, %v12085_v30 }
 0x19d   : > { %2762 = vbcast.lane.b32.xlu1 %v2760_v47, 256  ;;  %2706 = vbcast.lane.b32.xlu0 %v2704_v45, 256 }
 0x19f   : > { %v12559_v37 = vpop.permute.xlu1 %2741  ;;  %v12561_v14 = vpop.permute.xlu0 %2685 }
 0x1a0   : > { %18144 = vst [vmem:[#allocation114_spill] sm:$0xff] %v12559_v37  ;;  %18145 = vst [vmem:[#allocation115_spill] sm:$0xff] %v12561_v14 }
 0x1a1   : > { %2811 = vbcast.lane.b32.xlu1 %v2809_v11, 256  ;;  %2790 = vbcast.lane.b32.xlu0 %v2788_v23, 256 }
 0x1a3   : > { %v12567_v20 = vpop.permute.xlu1 %3511  ;;  %v12569_v33 = vpop.permute.xlu0 %3479 }
 0x1a4   : > { %18146 = vst [vmem:[#allocation116_spill] sm:$0xff] %v12567_v20  ;;  %18147 = vst [vmem:[#allocation117_spill] sm:$0xff] %v12569_v33  ;;  %v1230_v33 = vrot.slane %v12340_v5, %v12163_v8 }
 0x1a5   : > { %2867 = vbcast.lane.b32.xlu1 %v2865_v46, 256  ;;  %2846 = vbcast.lane.b32.xlu0 %v2844_v40, 256 }
 0x1a7   : > { %v12571_v21 = vpop.permute.xlu1 %1211  ;;  %v12573_v56 = vpop.permute.xlu0 %1155 }
 0x1a8   : > { %18148 = vst [vmem:[#allocation118_spill] sm:$0xff] %v12571_v21  ;;  %18149 = vst [vmem:[#allocation119_spill] sm:$0xff] %v12573_v56  ;;  %v1174_v56 = vrot.slane %v12342_v41, %v12163_v8  ;;  %v2711_v21 = vrot.slane %v12363_v13, %v12163_v8 }
 0x1a9   : > { %3523 = vbcast.lane.b32.xlu1 %v2760_v47, 264  ;;  %3491 = vbcast.lane.b32.xlu0 %v2704_v45, 264 }
 0x1ab   : > { %v12575_v14 = vpop.permute.xlu1 %1316  ;;  %v12577_v37 = vpop.permute.xlu0 %1260 }
 0x1ac   : > { %18150 = vst [vmem:[#allocation120_spill] sm:$0xff] %v12575_v14  ;;  %18151 = vst [vmem:[#allocation121_spill] sm:$0xff] %v12577_v37 }
 0x1ad   : > { %3551 = vbcast.lane.b32.xlu1 %v2809_v11, 264  ;;  %3539 = vbcast.lane.b32.xlu0 %v2788_v23, 264  ;;  %v1335_v11 = vrot.slane %v12382_v6, %v12112_v43  ;;  %v1279_v23 = vrot.slane %v12386_v36, %v12112_v43 }
 0x1af   : > { %v12579_v57 = vpop.permute.xlu1 %1978  ;;  %v12581_v2 = vpop.permute.xlu0 %1946 }
 0x1b0   : > { %18152 = vst [vmem:[#allocation122_spill] sm:$0xff] %v12579_v57  ;;  %18153 = vst [vmem:[#allocation123_spill] sm:$0xff] %v12581_v2  ;;  %v2767_v2 = vrot.slane %v12359_v61, %v12163_v8 }
 0x1b1   : > { %3583 = vbcast.lane.b32.xlu1 %v2865_v46, 264  ;;  %3571 = vbcast.lane.b32.xlu0 %v2844_v40, 264 }
 0x1b3   : > { %v12587_v47 = vpop.permute.xlu1 %2038  ;;  %v12589_v45 = vpop.permute.xlu0 %2006 }
 0x1b4   : > { %18154 = vst [vmem:[#allocation124_spill] sm:$0xff] %v12587_v47  ;;  %18155 = vst [vmem:[#allocation125_spill] sm:$0xff] %v12589_v45 }
 0x1b5   : > { %1232 = vbcast.lane.b32.xlu1 %v1230_v33, 256  ;;  %1176 = vbcast.lane.b32.xlu0 %v1174_v56, 256 }
 0x1b7   : > { %v12595_v46 = vpop.permute.xlu1 %2748  ;;  %v12597_v37 = vpop.permute.xlu0 %2692 }
 0x1b8   : > { %18156 = vst [vmem:[#allocation126_spill] sm:$0xff] %v12595_v46  ;;  %18157 = vst [vmem:[#allocation127_spill] sm:$0xff] %v12597_v37 }
 0x1b9   : > { %1337 = vbcast.lane.b32.xlu1 %v1335_v11, 256  ;;  %1281 = vbcast.lane.b32.xlu0 %v1279_v23, 256 }
 0x1bb   : > { %v12599_v40 = vpop.permute.xlu1 %2853  ;;  %v12601_v14 = vpop.permute.xlu0 %2797 }
 0x1bc   : > { %18158 = vst [vmem:[#allocation128_spill] sm:$0xff] %v12599_v40  ;;  %18159 = vst [vmem:[#allocation129_spill] sm:$0xff] %v12601_v14 }
 0x1bd   : > { %1990 = vbcast.lane.b32.xlu1 %v1230_v33, 264  ;;  %1958 = vbcast.lane.b32.xlu0 %v1174_v56, 264  ;;  %v2872_v56 = vrot.slane %v12415_v12, %v12112_v43  ;;  %v2816_v33 = vrot.slane %v12419_v22, %v12112_v43 }
 0x1bf   : > { %v12603_v45 = vpop.permute.xlu1 %3515  ;;  %v12605_v47 = vpop.permute.xlu0 %3483 }
 0x1c0   : > { %18160 = vst [vmem:[#allocation130_spill] sm:$0xff] %v12603_v45  ;;  %18161 = vst [vmem:[#allocation131_spill] sm:$0xff] %v12605_v47  ;;  %v1237_v47 = vrot.slane %v12340_v5, %v12214_v42 }
 0x1c1   : > { %2050 = vbcast.lane.b32.xlu1 %v1335_v11, 264  ;;  %2018 = vbcast.lane.b32.xlu0 %v1279_v23, 264 }
 0x1c3   : > { %v12611_v57 = vpop.permute.xlu1 %3575  ;;  %v12613_v37 = vpop.permute.xlu0 %3543 }
 0x1c4   : > { %18162 = vst [vmem:[#allocation132_spill] sm:$0xff] %v12611_v57  ;;  %18163 = vst [vmem:[#allocation133_spill] sm:$0xff] %v12613_v37 }
 0x1c5   : > { %2769 = vbcast.lane.b32.xlu1 %v2767_v2, 256  ;;  %2713 = vbcast.lane.b32.xlu0 %v2711_v21, 256 }
 0x1c7   : > { %v12619_v11 = vpop.permute.xlu1 %1162  ;;  %v12621_v14 = vpop.permute.xlu0 %1141 }
 0x1c8   : > { %18164 = vst [vmem:[#allocation134_spill] sm:$0xff] %v12619_v11  ;;  %18165 = vst [vmem:[#allocation135_spill] sm:$0xff] %v12621_v14  ;;  %v1181_v14 = vrot.slane %v12342_v41, %v12214_v42 }
 0x1c9   : > { %2874 = vbcast.lane.b32.xlu1 %v2872_v56, 256  ;;  %2818 = vbcast.lane.b32.xlu0 %v2816_v33, 256 }
 0x1cb   : > { %v12623_v23 = vpop.permute.xlu1 %1218  ;;  %v12625_v40 = vpop.permute.xlu0 %1197 }
 0x1cc   : > { %18166 = vst [vmem:[#allocation136_spill] sm:$0xff] %v12623_v23  ;;  %18167 = vst [vmem:[#allocation137_spill] sm:$0xff] %v12625_v40 }
 0x1cd   : > { %3527 = vbcast.lane.b32.xlu1 %v2767_v2, 264  ;;  %3495 = vbcast.lane.b32.xlu0 %v2711_v21, 264  ;;  %v1342_v21 = vrot.slane %v12382_v6, %v12163_v8  ;;  %v1286_v2 = vrot.slane %v12386_v36, %v12163_v8 }
 0x1cf   : > { %v12627_v37 = vpop.permute.xlu1 %1323  ;;  %v12629_v57 = vpop.permute.xlu0 %1267 }
 0x1d0   : > { %18168 = vst [vmem:[#allocation138_spill] sm:$0xff] %v12627_v37  ;;  %18169 = vst [vmem:[#allocation139_spill] sm:$0xff] %v12629_v57 }
 0x1d1   : > { %3587 = vbcast.lane.b32.xlu1 %v2872_v56, 264  ;;  %3555 = vbcast.lane.b32.xlu0 %v2816_v33, 264 }
 0x1d3   : > { %v12635_v11 = vpop.permute.xlu1 %1950  ;;  %v12637_v46 = vpop.permute.xlu0 %1938 }
 0x1d4   : > { %18170 = vst [vmem:[#allocation140_spill] sm:$0xff] %v12635_v11  ;;  %18171 = vst [vmem:[#allocation141_spill] sm:$0xff] %v12637_v46  ;;  %v2774_v46 = vrot.slane %v12359_v61, %v12214_v42 }
 0x1d5   : > { %1239 = vbcast.lane.b32.xlu1 %v1237_v47, 256  ;;  %1183 = vbcast.lane.b32.xlu0 %v1181_v14, 256 }
 0x1d7   : > { %v12643_v56 = vpop.permute.xlu1 %1982  ;;  %v12645_v57 = vpop.permute.xlu0 %1970 }
 0x1d8   : > { %18172 = vst [vmem:[#allocation142_spill] sm:$0xff] %v12643_v56  ;;  %18173 = vst [vmem:[#allocation143_spill] sm:$0xff] %v12645_v57  ;;  %v2718_v57 = vrot.slane %v12363_v13, %v12214_v42 }
 0x1d9   : > { %1344 = vbcast.lane.b32.xlu1 %v1342_v21, 256  ;;  %1288 = vbcast.lane.b32.xlu0 %v1286_v2, 256 }
 0x1db   : > { %v12647_v33 = vpop.permute.xlu1 %2042  ;;  %v12649_v37 = vpop.permute.xlu0 %2010 }
 0x1dc   : > { %18174 = vst [vmem:[#allocation144_spill] sm:$0xff] %v12647_v33  ;;  %18175 = vst [vmem:[#allocation145_spill] sm:$0xff] %v12649_v37 }
 0x1dd   : > { %1994 = vbcast.lane.b32.xlu1 %v1237_v47, 264  ;;  %1962 = vbcast.lane.b32.xlu0 %v1181_v14, 264  ;;  %v2879_v14 = vrot.slane %v12415_v12, %v12163_v8  ;;  %v2823_v47 = vrot.slane %v12419_v22, %v12163_v8 }
 0x1df   : > { %v12651_v40 = vpop.permute.xlu1 %2699  ;;  %v12653_v23 = vpop.permute.xlu0 %2678 }
 0x1e0   : > { %18176 = vst [vmem:[#allocation146_spill] sm:$0xff] %v12651_v40  ;;  %18177 = vst [vmem:[#allocation147_spill] sm:$0xff] %v12653_v23  ;;  %v1244_v23 = vrot.slane %v12340_v5, %v12265_v44 }
 0x1e1   : > { %2054 = vbcast.lane.b32.xlu1 %v1342_v21, 264  ;;  %2022 = vbcast.lane.b32.xlu0 %v1286_v2, 264 }
 0x1e3   : > { %v12659_v56 = vpop.permute.xlu1 %2755  ;;  %v12661_v11 = vpop.permute.xlu0 %2734 }
 0x1e4   : > { %18178 = vst [vmem:[#allocation148_spill] sm:$0xff] %v12659_v56  ;;  %18179 = vst [vmem:[#allocation149_spill] sm:$0xff] %v12661_v11 }
 0x1e5   : > { %2776 = vbcast.lane.b32.xlu1 %v2774_v46, 256  ;;  %2720 = vbcast.lane.b32.xlu0 %v2718_v57, 256 }
 0x1e7   : > { %v12667_v21 = vpop.permute.xlu1 %2860  ;;  %v12669_v37 = vpop.permute.xlu0 %2804 }
 0x1e8   : > { %18180 = vst [vmem:[#allocation150_spill] sm:$0xff] %v12667_v21  ;;  %18181 = vst [vmem:[#allocation151_spill] sm:$0xff] %v12669_v37  ;;  %v1188_v37 = vrot.slane %v12342_v41, %v12265_v44 }
 0x1e9   : > { %2881 = vbcast.lane.b32.xlu1 %v2879_v14, 256  ;;  %2825 = vbcast.lane.b32.xlu0 %v2823_v47, 256 }
 0x1eb   : > { %v12671_v2 = vpop.permute.xlu1 %3487  ;;  %v12673_v33 = vpop.permute.xlu0 %3475 }
 0x1ec   : > { %18182 = vst [vmem:[#allocation152_spill] sm:$0xff] %v12671_v2  ;;  %18183 = vst [vmem:[#allocation153_spill] sm:$0xff] %v12673_v33 }
 0x1ed   : > { %3531 = vbcast.lane.b32.xlu1 %v2774_v46, 264  ;;  %3499 = vbcast.lane.b32.xlu0 %v2718_v57, 264  ;;  %v1349_v57 = vrot.slane %v12382_v6, %v12214_v42  ;;  %v1293_v46 = vrot.slane %v12386_v36, %v12214_v42 }
 0x1ef   : > { %v12675_v11 = vpop.permute.xlu1 %3519  ;;  %v12677_v56 = vpop.permute.xlu0 %3507 }
 0x1f0   : > { %18184 = vst [vmem:[#allocation154_spill] sm:$0xff] %v12675_v11  ;;  %18185 = vst [vmem:[#allocation155_spill] sm:$0xff] %v12677_v56 }
 0x1f1   : > { %3591 = vbcast.lane.b32.xlu1 %v2879_v14, 264  ;;  %3559 = vbcast.lane.b32.xlu0 %v2823_v47, 264 }
 0x1f3   : > { %v12683_v21 = vpop.permute.xlu1 %3579  ;;  %v12685_v40 = vpop.permute.xlu0 %3547 }
 0x1f4   : > { %18186 = vst [vmem:[#allocation156_spill] sm:$0xff] %v12683_v21  ;;  %18187 = vst [vmem:[#allocation157_spill] sm:$0xff] %v12685_v40  ;;  %v2781_v21 = vrot.slane %v12359_v61, %v12265_v44 }
 0x1f5   : > { %1246 = vbcast.lane.b32.xlu1 %v1244_v23, 256  ;;  %1190 = vbcast.lane.b32.xlu0 %v1188_v37, 256 }
 0x1f7   : > { %v12691_v14 = vpop.permute.xlu1 %1225  ;;  %v12693_v56 = vpop.permute.xlu0 %1169 }
 0x1f8   : > { %18188 = vst [vmem:[#allocation158_spill] sm:$0xff] %v12691_v14  ;;  %18189 = vst [vmem:[#allocation159_spill] sm:$0xff] %v12693_v56  ;;  %v2725_v56 = vrot.slane %v12363_v13, %v12265_v44 }
 0x1f9   : > { %1351 = vbcast.lane.b32.xlu1 %v1349_v57, 256  ;;  %1295 = vbcast.lane.b32.xlu0 %v1293_v46, 256 }
 0x1fb   : > { %v12695_v5 = vpop.permute.xlu1 %1274  ;;  %v12697_v41 = vpop.permute.xlu0 %1253 }
 0x1fc   : > { %18190 = vst [vmem:[#allocation160_spill] sm:$0xff] %v12695_v5  ;;  %18191 = vst [vmem:[#allocation161_spill] sm:$0xff] %v12697_v41  ;;  %v1356_v41 = vrot.slane %v12382_v6, %v12265_v44  ;;  %v2837_v6 = vrot.slane %v12419_v22, %v12265_v44 }
 0x1fd   : > { %1998 = vbcast.lane.b32.xlu1 %v1244_v23, 264  ;;  %1966 = vbcast.lane.b32.xlu0 %v1188_v37, 264  ;;  %v2886_v37 = vrot.slane %v12415_v12, %v12214_v42  ;;  %v2830_v23 = vrot.slane %v12419_v22, %v12214_v42 }
 0x1ff   : > { %v12699_v47 = vpop.permute.xlu1 %1330  ;;  %v12701_v40 = vpop.permute.xlu0 %1309 }
 0x200   : > { %18192 = vst [vmem:[#allocation162_spill] sm:$0xff] %v12699_v47  ;;  %18193 = vst [vmem:[#allocation163_spill] sm:$0xff] %v12701_v40 }
 0x201   : > { %2058 = vbcast.lane.b32.xlu1 %v1349_v57, 264  ;;  %2026 = vbcast.lane.b32.xlu0 %v1293_v46, 264 }
 0x203   : > { %v12707_v14 = vpop.permute.xlu1 %1986  ;;  %v12709_v11 = vpop.permute.xlu0 %1954 }
 0x204   : > { %18194 = vst [vmem:[#allocation164_spill] sm:$0xff] %v12707_v14  ;;  %18195 = vst [vmem:[#allocation165_spill] sm:$0xff] %v12709_v11  ;;  %v634_v14 = vld [vmem:[%s12025_s25 + $0x28] sm:$0xff]  }
 0x205   : > { %2783 = vbcast.lane.b32.xlu1 %v2781_v21, 256  ;;  %2727 = vbcast.lane.b32.xlu0 %v2725_v56, 256 }
 0x207   : > { %v12715_v57 = vpop.permute.xlu1 %2014  ;;  %v12717_v40 = vpop.permute.xlu0 %2002 }
 0x208   : > { %18196 = vst [vmem:[#allocation166_spill] sm:$0xff] %v12715_v57  ;;  %18197 = vst [vmem:[#allocation167_spill] sm:$0xff] %v12717_v40  ;;  %v1300_v40 = vrot.slane %v12386_v36, %v12265_v44  ;;  %v632_v36 = vld [vmem:[%s12025_s25 + $0x20] sm:$0xff]  }
 0x209   : > { %2888 = vbcast.lane.b32.xlu1 %v2886_v37, 256  ;;  %2832 = vbcast.lane.b32.xlu0 %v2830_v23, 256  ;;  %v10727_v57 = vld [vmem:[%s12020_s27 + $0x4] ss:$0 sm:$0xff] }
 0x20b   : > { %v12719_v61 = vpop.permute.xlu1 %2046  ;;  %v12721_v13 = vpop.permute.xlu0 %2034 }
 0x20c   : > { %18198 = vst [vmem:[#allocation168_spill] sm:$0xff] %v12719_v61  ;;  %18199 = vst [vmem:[#allocation169_spill] sm:$0xff] %v12721_v13 }
 0x20d   : > { %3535 = vbcast.lane.b32.xlu1 %v2781_v21, 264  ;;  %3503 = vbcast.lane.b32.xlu0 %v2725_v56, 264 }
 0x20f   : > { %v12723_v46 = vpop.permute.xlu1 %2762  ;;  %v12725_v47 = vpop.permute.xlu0 %2706 }
 0x210   : > { %18200 = vst [vmem:[#allocation170_spill] sm:$0xff] %v12723_v46  ;;  %18201 = vst [vmem:[#allocation171_spill] sm:$0xff] %v12725_v47 }
 0x211   : > { %3595 = vbcast.lane.b32.xlu1 %v2886_v37, 264  ;;  %3563 = vbcast.lane.b32.xlu0 %v2830_v23, 264  ;;  %v2893_v37 = vrot.slane %v12415_v12, %v12265_v44 }
 0x213   : > { %v12731_v5 = vpop.permute.xlu1 %2811  ;;  %v12733_v61 = vpop.permute.xlu0 %2790 }
 0x214   : > { %18202 = vst [vmem:[#allocation172_spill] sm:$0xff] %v12731_v5  ;;  %18203 = vst [vmem:[#allocation173_spill] sm:$0xff] %v12733_v61  ;;  %v12748_v61 = vunpack.c.h.bf16 %v632_v36 }
 0x215   : > { %1358 = vbcast.lane.b32.xlu1 %v1356_v41, 256  ;;  %1302 = vbcast.lane.b32.xlu0 %v1300_v40, 256 }
 0x216   : > { %v1426_v12 = vrot.slane %v12748_v61, %v12028_v3  ;;  %vm889_vm8 = vcmp.ne.f32.partialorder %v12748_v61, 0.0 }
 0x217   : > { %v12735_v56 = vpop.permute.xlu1 %2867  ;;  %v12737_v21 = vpop.permute.xlu0 %2846 }
 0x218   : > { %18204 = vst [vmem:[#allocation174_spill] sm:$0xff] %v12735_v56  ;;  %18205 = vst [vmem:[#allocation175_spill] sm:$0xff] %v12737_v21  ;;  %v12750_v56 = vunpack.c.l.bf16 %v632_v36 }
 0x219   : > { %2062 = vbcast.lane.b32.xlu1 %v1356_v41, 264  ;;  %2030 = vbcast.lane.b32.xlu0 %v1300_v40, 264 }
 0x21a   : > { %v1370_v22 = vrot.slane %v12750_v56, %v12028_v3  ;;  %vm888_vm9 = vcmp.ne.f32.partialorder %v12750_v56, 0.0  ;;  %v1384_v33 = vrot.slane %v12750_v56, %v12082_v29 }
 0x21b   : > { %v12744_v23 = vpop.permute.xlu1 %3523  ;;  %v12746_v13 = vpop.permute.xlu0 %3491 }
 0x21c   : > { %18206 = vst [vmem:[#allocation176_spill] sm:$0xff] %v12744_v23  ;;  %18207 = vst [vmem:[#allocation177_spill] sm:$0xff] %v12746_v13 }
 0x21d   : > { %2895 = vbcast.lane.b32.xlu1 %v2893_v37, 256  ;;  %2839 = vbcast.lane.b32.xlu0 %v2837_v6, 256 }
 0x21f   : > { %v12752_v41 = vpop.permute.xlu1 %3551  ;;  %v12754_v21 = vpop.permute.xlu0 %3539 }
 0x220   : > { %18208 = vst [vmem:[#allocation178_spill] sm:$0xff] %v12752_v41  ;;  %18209 = vst [vmem:[#allocation179_spill] sm:$0xff] %v12754_v21 }
 0x221   : > { %3599 = vbcast.lane.b32.xlu1 %v2893_v37, 264  ;;  %3567 = vbcast.lane.b32.xlu0 %v2837_v6, 264  ;;  %v12767_v37 = vsel %vm889_vm8, %v10727_v57, 0.0  ;;  %v12771_v6 = vsel %vm888_vm9, %v10727_v57, 0.0  ;;  %vm11870_vm8 = vmmov 0   ;;  %vm7385_vm9 = vcmask 130048  }
 0x223   : > { %v12760_v40 = vpop.permute.xlu1 %3583  ;;  %v12764_v5 = vpop.permute.xlu0 %3571 }
 0x224   : > { %18210 = vst [vmem:[#allocation180_spill] sm:$0xff] %v12760_v40  ;;  %18211 = vst [vmem:[#allocation181_spill] sm:$0xff] %v12764_v5  ;;  %v2963_v40 = vrot.slane %v12767_v37, %v12028_v3  ;;  %v2907_v5 = vrot.slane %v12771_v6, %v12028_v3 }
 0x225   : > { %1428 = vbcast.lane.b32.xlu1 %v1426_v12, 256  ;;  %1372 = vbcast.lane.b32.xlu0 %v1370_v22, 256 }
 0x227   : > { %v12769_v36 = vpop.permute.xlu1 %1232  ;;  %v12773_v21 = vpop.permute.xlu0 %1176 }
 0x228   : > { %18212 = vst [vmem:[#allocation182_spill] sm:$0xff] %v12769_v36  ;;  %18213 = vst [vmem:[#allocation183_spill] sm:$0xff] %v12773_v21  ;;  %v12790_v21 = vunpack.c.h.bf16 %v634_v14 }
 0x229   : > { %2102 = vbcast.lane.b32.xlu1 %v1426_v12, 264  ;;  %2070 = vbcast.lane.b32.xlu0 %v1370_v22, 264  ;;  %v1433_v12 = vrot.slane %v12748_v61, %v12052_v15  ;;  %v1377_v22 = vrot.slane %v12750_v56, %v12052_v15 }
 0x22a   : > { %vm891_vm10 = vcmp.ne.f32.partialorder %v12790_v21, 0.0 }
 0x22b   : > { %v12779_v41 = vpop.permute.xlu1 %1337  ;;  %v12781_v11 = vpop.permute.xlu0 %1281 }
 0x22c   : > { %18214 = vst [vmem:[#allocation184_spill] sm:$0xff] %v12779_v41  ;;  %18215 = vst [vmem:[#allocation185_spill] sm:$0xff] %v12781_v11  ;;  %v12794_v41 = vunpack.c.l.bf16 %v634_v14 }
 0x22d   : > { %2965 = vbcast.lane.b32.xlu1 %v2963_v40, 256  ;;  %2909 = vbcast.lane.b32.xlu0 %v2907_v5, 256 }
 0x22e   : > { %vm890_vm11 = vcmp.ne.f32.partialorder %v12794_v41, 0.0 }
 0x22f   : > { %v12784_v36 = vpop.permute.xlu1 %1990  ;;  %v12786_v57 = vpop.permute.xlu0 %1958 }
 0x230   : > { %18216 = vst [vmem:[#allocation186_spill] sm:$0xff] %v12784_v36  ;;  %18217 = vst [vmem:[#allocation187_spill] sm:$0xff] %v12786_v57  ;;  %v1482_v57 = vrot.slane %v12794_v41, %v12028_v3 }
 0x231   : > { %3639 = vbcast.lane.b32.xlu1 %v2963_v40, 264  ;;  %3607 = vbcast.lane.b32.xlu0 %v2907_v5, 264  ;;  %v1538_v40 = vrot.slane %v12790_v21, %v12028_v3 }
 0x233   : > { %v12796_v11 = vpop.permute.xlu1 %2050  ;;  %v12798_v47 = vpop.permute.xlu0 %2018 }
 0x234   : > { %18218 = vst [vmem:[#allocation188_spill] sm:$0xff] %v12796_v11  ;;  %18219 = vst [vmem:[#allocation189_spill] sm:$0xff] %v12798_v47  ;;  %v10728_v11 = vld [vmem:[%s12020_s27 + $0x5] ss:$0 sm:$0xff] }
 0x235   : > { %1435 = vbcast.lane.b32.xlu1 %v1433_v12, 256  ;;  %1379 = vbcast.lane.b32.xlu0 %v1377_v22, 256 }
 0x237   : > { %v12804_v36 = vpop.permute.xlu1 %2769  ;;  %v12806_v5 = vpop.permute.xlu0 %2713 }
 0x238   : > { %18220 = vst [vmem:[#allocation190_spill] sm:$0xff] %v12804_v36  ;;  %18221 = vst [vmem:[#allocation191_spill] sm:$0xff] %v12806_v5  ;;  %v2970_v5 = vrot.slane %v12767_v37, %v12052_v15 }
 0x239   : > { %1540 = vbcast.lane.b32.xlu1 %v1538_v40, 256  ;;  %1484 = vbcast.lane.b32.xlu0 %v1482_v57, 256 }
 0x23b   : > { %v12808_v14 = vpop.permute.xlu1 %2874  ;;  %v12810_v13 = vpop.permute.xlu0 %2818 }
 0x23c   : > { %18222 = vst [vmem:[#allocation192_spill] sm:$0xff] %v12808_v14  ;;  %18223 = vst [vmem:[#allocation193_spill] sm:$0xff] %v12810_v13  ;;  %v2914_v14 = vrot.slane %v12771_v6, %v12052_v15  ;;  %v12823_v13 = vsel %vm891_vm10, %v10728_v11, 0.0  ;;  %vm10574_vm10 = vcmask 122880  }
 0x23d   : > { %2106 = vbcast.lane.b32.xlu1 %v1433_v12, 264  ;;  %2074 = vbcast.lane.b32.xlu0 %v1377_v22, 264  ;;  %v12827_v22 = vsel %vm890_vm11, %v10728_v11, 0.0 }
 0x23f   : > { %v12812_v47 = vpop.permute.xlu1 %3527  ;;  %v12816_v46 = vpop.permute.xlu0 %3495 }
 0x240   : > { %18224 = vst [vmem:[#allocation194_spill] sm:$0xff] %v12812_v47  ;;  %18225 = vst [vmem:[#allocation195_spill] sm:$0xff] %v12816_v46  ;;  %v3075_v46 = vrot.slane %v12823_v13, %v12028_v3 }
 0x241   : > { %2166 = vbcast.lane.b32.xlu1 %v1538_v40, 264  ;;  %2134 = vbcast.lane.b32.xlu0 %v1482_v57, 264  ;;  %v3019_v40 = vrot.slane %v12827_v22, %v12028_v3 }
 0x243   : > { %v12825_v12 = vpop.permute.xlu1 %3587  ;;  %v12829_v36 = vpop.permute.xlu0 %3555 }
 0x244   : > { %18226 = vst [vmem:[#allocation196_spill] sm:$0xff] %v12825_v12  ;;  %18227 = vst [vmem:[#allocation197_spill] sm:$0xff] %v12829_v36 }
 0x245   : > { %2972 = vbcast.lane.b32.xlu1 %v2970_v5, 256  ;;  %2916 = vbcast.lane.b32.xlu0 %v2914_v14, 256 }
 0x247   : > { %v12835_v57 = vpop.permute.xlu1 %1239  ;;  %v12837_v47 = vpop.permute.xlu0 %1183 }
 0x248   : > { %18228 = vst [vmem:[#allocation198_spill] sm:$0xff] %v12835_v57  ;;  %18229 = vst [vmem:[#allocation199_spill] sm:$0xff] %v12837_v47  ;;  %v1363_v47 = vrot.slane %v12750_v56, %v12085_v30 }
 0x249   : > { %3077 = vbcast.lane.b32.xlu1 %v3075_v46, 256  ;;  %3021 = vbcast.lane.b32.xlu0 %v3019_v40, 256 }
 0x24b   : > { %v12839_v23 = vpop.permute.xlu1 %1344  ;;  %v12841_v11 = vpop.permute.xlu0 %1288 }
 0x24c   : > { %18230 = vst [vmem:[#allocation200_spill] sm:$0xff] %v12839_v23  ;;  %18231 = vst [vmem:[#allocation201_spill] sm:$0xff] %v12841_v11 }
 0x24d   : > { %3643 = vbcast.lane.b32.xlu1 %v2970_v5, 264  ;;  %3611 = vbcast.lane.b32.xlu0 %v2914_v14, 264  ;;  %v1440_v5 = vrot.slane %v12748_v61, %v12082_v29  ;;  %v1419_v14 = vrot.slane %v12748_v61, %v12085_v30 }
 0x24f   : > { %v12843_v36 = vpop.permute.xlu1 %1994  ;;  %v12845_v12 = vpop.permute.xlu0 %1962 }
 0x250   : > { %18232 = vst [vmem:[#allocation202_spill] sm:$0xff] %v12843_v36  ;;  %18233 = vst [vmem:[#allocation203_spill] sm:$0xff] %v12845_v12 }
 0x251   : > { %3703 = vbcast.lane.b32.xlu1 %v3075_v46, 264  ;;  %3671 = vbcast.lane.b32.xlu0 %v3019_v40, 264  ;;  %v1545_v40 = vrot.slane %v12790_v21, %v12052_v15 }
 0x253   : > { %v12851_v57 = vpop.permute.xlu1 %2054  ;;  %v12853_v2 = vpop.permute.xlu0 %2022 }
 0x254   : > { %18234 = vst [vmem:[#allocation204_spill] sm:$0xff] %v12851_v57  ;;  %18235 = vst [vmem:[#allocation205_spill] sm:$0xff] %v12853_v2  ;;  %v1489_v2 = vrot.slane %v12794_v41, %v12052_v15 }
 0x255   : > { %1386 = vbcast.lane.b32.xlu1 %v1384_v33, 256  ;;  %1365 = vbcast.lane.b32.xlu0 %v1363_v47, 256 }
 0x257   : > { %v12859_v46 = vpop.permute.xlu1 %2776  ;;  %v12861_v11 = vpop.permute.xlu0 %2720 }
 0x258   : > { %18236 = vst [vmem:[#allocation206_spill] sm:$0xff] %v12859_v46  ;;  %18237 = vst [vmem:[#allocation207_spill] sm:$0xff] %v12861_v11 }
 0x259   : > { %1442 = vbcast.lane.b32.xlu1 %v1440_v5, 256  ;;  %1421 = vbcast.lane.b32.xlu0 %v1419_v14, 256 }
 0x25b   : > { %v12867_v23 = vpop.permute.xlu1 %2881  ;;  %v12869_v57 = vpop.permute.xlu0 %2825 }
 0x25c   : > { %18238 = vst [vmem:[#allocation208_spill] sm:$0xff] %v12867_v23  ;;  %18239 = vst [vmem:[#allocation209_spill] sm:$0xff] %v12869_v57  ;;  %v2921_v57 = vrot.slane %v12771_v6, %v12082_v29  ;;  %v2900_v23 = vrot.slane %v12771_v6, %v12085_v30 }
 0x25d   : > { %1547 = vbcast.lane.b32.xlu1 %v1545_v40, 256  ;;  %1491 = vbcast.lane.b32.xlu0 %v1489_v2, 256 }
 0x25f   : > { %v12871_v12 = vpop.permute.xlu1 %3531  ;;  %v12873_v36 = vpop.permute.xlu0 %3499 }
 0x260   : > { %18240 = vst [vmem:[#allocation210_spill] sm:$0xff] %v12871_v12  ;;  %18241 = vst [vmem:[#allocation211_spill] sm:$0xff] %v12873_v36 }
 0x261   : > { %2078 = vbcast.lane.b32.xlu1 %v1384_v33, 264  ;;  %2066 = vbcast.lane.b32.xlu0 %v1363_v47, 264 }
 0x263   : > { %v12875_v11 = vpop.permute.xlu1 %3591  ;;  %v12877_v46 = vpop.permute.xlu0 %3559 }
 0x264   : > { %18242 = vst [vmem:[#allocation212_spill] sm:$0xff] %v12875_v11  ;;  %18243 = vst [vmem:[#allocation213_spill] sm:$0xff] %v12877_v46 }
 0x265   : > { %2110 = vbcast.lane.b32.xlu1 %v1440_v5, 264  ;;  %2098 = vbcast.lane.b32.xlu0 %v1419_v14, 264  ;;  %v2977_v5 = vrot.slane %v12767_v37, %v12082_v29  ;;  %v2956_v14 = vrot.slane %v12767_v37, %v12085_v30 }
 0x267   : > { %v12879_v45 = vpop.permute.xlu1 %1246  ;;  %v12881_v20 = vpop.permute.xlu0 %1190 }
 0x268   : > { %18244 = vst [vmem:[#allocation214_spill] sm:$0xff] %v12879_v45  ;;  %18245 = vst [vmem:[#allocation215_spill] sm:$0xff] %v12881_v20 }
 0x269   : > { %2170 = vbcast.lane.b32.xlu1 %v1545_v40, 264  ;;  %2138 = vbcast.lane.b32.xlu0 %v1489_v2, 264  ;;  %v3082_v2 = vrot.slane %v12823_v13, %v12052_v15 }
 0x26b   : > { %v12887_v33 = vpop.permute.xlu1 %1351  ;;  %v12889_v47 = vpop.permute.xlu0 %1295 }
 0x26c   : > { %18246 = vst [vmem:[#allocation216_spill] sm:$0xff] %v12887_v33  ;;  %18247 = vst [vmem:[#allocation217_spill] sm:$0xff] %v12889_v47  ;;  %v3026_v47 = vrot.slane %v12827_v22, %v12052_v15 }
 0x26d   : > { %2923 = vbcast.lane.b32.xlu1 %v2921_v57, 256  ;;  %2902 = vbcast.lane.b32.xlu0 %v2900_v23, 256 }
 0x26f   : > { %v12895_v40 = vpop.permute.xlu1 %1998  ;;  %v12897_v20 = vpop.permute.xlu0 %1966 }
 0x270   : > { %18248 = vst [vmem:[#allocation218_spill] sm:$0xff] %v12895_v40  ;;  %18249 = vst [vmem:[#allocation219_spill] sm:$0xff] %v12897_v20 }
 0x271   : > { %2979 = vbcast.lane.b32.xlu1 %v2977_v5, 256  ;;  %2958 = vbcast.lane.b32.xlu0 %v2956_v14, 256 }
 0x273   : > { %v12903_v33 = vpop.permute.xlu1 %2058  ;;  %v12905_v45 = vpop.permute.xlu0 %2026 }
 0x274   : > { %18250 = vst [vmem:[#allocation220_spill] sm:$0xff] %v12903_v33  ;;  %18251 = vst [vmem:[#allocation221_spill] sm:$0xff] %v12905_v45  ;;  %v1447_v45 = vrot.slane %v12748_v61, %v12112_v43  ;;  %v1391_v33 = vrot.slane %v12750_v56, %v12112_v43 }
 0x275   : > { %3084 = vbcast.lane.b32.xlu1 %v3082_v2, 256  ;;  %3028 = vbcast.lane.b32.xlu0 %v3026_v47, 256 }
 0x277   : > { %v12907_v46 = vpop.permute.xlu1 %2783  ;;  %v12909_v11 = vpop.permute.xlu0 %2727 }
 0x278   : > { %18252 = vst [vmem:[#allocation222_spill] sm:$0xff] %v12907_v46  ;;  %18253 = vst [vmem:[#allocation223_spill] sm:$0xff] %v12909_v11 }
 0x279   : > { %3615 = vbcast.lane.b32.xlu1 %v2921_v57, 264  ;;  %3603 = vbcast.lane.b32.xlu0 %v2900_v23, 264 }
 0x27b   : > { %v12911_v20 = vpop.permute.xlu1 %2888  ;;  %v12913_v40 = vpop.permute.xlu0 %2832 }
 0x27c   : > { %18254 = vst [vmem:[#allocation224_spill] sm:$0xff] %v12911_v20  ;;  %18255 = vst [vmem:[#allocation225_spill] sm:$0xff] %v12913_v40 }
 0x27d   : > { %3647 = vbcast.lane.b32.xlu1 %v2977_v5, 264  ;;  %3635 = vbcast.lane.b32.xlu0 %v2956_v14, 264  ;;  %v1496_v5 = vrot.slane %v12794_v41, %v12082_v29  ;;  %v1475_v14 = vrot.slane %v12794_v41, %v12085_v30 }
 0x27f   : > { %v12915_v36 = vpop.permute.xlu1 %3535  ;;  %v12917_v12 = vpop.permute.xlu0 %3503 }
 0x280   : > { %18256 = vst [vmem:[#allocation226_spill] sm:$0xff] %v12915_v36  ;;  %18257 = vst [vmem:[#allocation227_spill] sm:$0xff] %v12917_v12 }
 0x281   : > { %3707 = vbcast.lane.b32.xlu1 %v3082_v2, 264  ;;  %3675 = vbcast.lane.b32.xlu0 %v3026_v47, 264  ;;  %v1552_v47 = vrot.slane %v12790_v21, %v12082_v29 }
 0x283   : > { %v12923_v57 = vpop.permute.xlu1 %3595  ;;  %v12925_v23 = vpop.permute.xlu0 %3563 }
 0x284   : > { %18258 = vst [vmem:[#allocation228_spill] sm:$0xff] %v12923_v57  ;;  %18259 = vst [vmem:[#allocation229_spill] sm:$0xff] %v12925_v23  ;;  %v1531_v23 = vrot.slane %v12790_v21, %v12085_v30 }
 0x285   : > { %1449 = vbcast.lane.b32.xlu1 %v1447_v45, 256  ;;  %1393 = vbcast.lane.b32.xlu0 %v1391_v33, 256 }
 0x287   : > { %v12931_v2 = vpop.permute.xlu1 %1358  ;;  %v12933_v40 = vpop.permute.xlu0 %1302 }
 0x288   : > { %18260 = vst [vmem:[#allocation230_spill] sm:$0xff] %v12931_v2  ;;  %18261 = vst [vmem:[#allocation231_spill] sm:$0xff] %v12933_v40 }
 0x289   : > { %1498 = vbcast.lane.b32.xlu1 %v1496_v5, 256  ;;  %1477 = vbcast.lane.b32.xlu0 %v1475_v14, 256 }
 0x28b   : > { %v12939_v20 = vpop.permute.xlu1 %2062  ;;  %v12941_v57 = vpop.permute.xlu0 %2030 }
 0x28c   : > { %18262 = vst [vmem:[#allocation232_spill] sm:$0xff] %v12939_v20  ;;  %18263 = vst [vmem:[#allocation233_spill] sm:$0xff] %v12941_v57  ;;  %v2984_v57 = vrot.slane %v12767_v37, %v12112_v43 }
 0x28d   : > { %1554 = vbcast.lane.b32.xlu1 %v1552_v47, 256  ;;  %1533 = vbcast.lane.b32.xlu0 %v1531_v23, 256 }
 0x28f   : > { %v12943_v11 = vpop.permute.xlu1 %2895  ;;  %v12945_v12 = vpop.permute.xlu0 %2839 }
 0x290   : > { %18264 = vst [vmem:[#allocation234_spill] sm:$0xff] %v12943_v11  ;;  %18265 = vst [vmem:[#allocation235_spill] sm:$0xff] %v12945_v12  ;;  %v2928_v12 = vrot.slane %v12771_v6, %v12112_v43 }
 0x291   : > { %2114 = vbcast.lane.b32.xlu1 %v1447_v45, 264  ;;  %2082 = vbcast.lane.b32.xlu0 %v1391_v33, 264 }
 0x293   : > { %v12947_v40 = vpop.permute.xlu1 %3599  ;;  %v12949_v2 = vpop.permute.xlu0 %3567 }
 0x294   : > { %18266 = vst [vmem:[#allocation236_spill] sm:$0xff] %v12947_v40  ;;  %18267 = vst [vmem:[#allocation237_spill] sm:$0xff] %v12949_v2 }
 0x295   : > { %2142 = vbcast.lane.b32.xlu1 %v1496_v5, 264  ;;  %2130 = vbcast.lane.b32.xlu0 %v1475_v14, 264  ;;  %v3033_v5 = vrot.slane %v12827_v22, %v12082_v29  ;;  %v3012_v14 = vrot.slane %v12827_v22, %v12085_v30 }
 0x297   : > { %v12951_v46 = vpop.permute.xlu1 %1428  ;;  %v12953_v36 = vpop.permute.xlu0 %1372 }
 0x298   : > { %18268 = vst [vmem:[#allocation238_spill] sm:$0xff] %v12951_v46  ;;  %18269 = vst [vmem:[#allocation239_spill] sm:$0xff] %v12953_v36 }
 0x299   : > { %2174 = vbcast.lane.b32.xlu1 %v1552_v47, 264  ;;  %2162 = vbcast.lane.b32.xlu0 %v1531_v23, 264  ;;  %v3089_v23 = vrot.slane %v12823_v13, %v12082_v29 }
 0x29b   : > { %v12959_v45 = vpop.permute.xlu1 %2102  ;;  %v12961_v33 = vpop.permute.xlu0 %2070 }
 0x29c   : > { %18270 = vst [vmem:[#allocation240_spill] sm:$0xff] %v12959_v45  ;;  %18271 = vst [vmem:[#allocation241_spill] sm:$0xff] %v12961_v33  ;;  %v3068_v33 = vrot.slane %v12823_v13, %v12085_v30 }
 0x29d   : > { %2986 = vbcast.lane.b32.xlu1 %v2984_v57, 256  ;;  %2930 = vbcast.lane.b32.xlu0 %v2928_v12, 256 }
 0x29f   : > { %v12967_v47 = vpop.permute.xlu1 %2965  ;;  %v12969_v36 = vpop.permute.xlu0 %2909 }
 0x2a0   : > { %18272 = vst [vmem:[#allocation242_spill] sm:$0xff] %v12967_v47  ;;  %18273 = vst [vmem:[#allocation243_spill] sm:$0xff] %v12969_v36 }
 0x2a1   : > { %3035 = vbcast.lane.b32.xlu1 %v3033_v5, 256  ;;  %3014 = vbcast.lane.b32.xlu0 %v3012_v14, 256 }
 0x2a3   : > { %v12975_v46 = vpop.permute.xlu1 %3639  ;;  %v12977_v45 = vpop.permute.xlu0 %3607 }
 0x2a4   : > { %18274 = vst [vmem:[#allocation244_spill] sm:$0xff] %v12977_v45  ;;  %v1454_v45 = vrot.slane %v12748_v61, %v12163_v8 }
 0x2a5   : > { %3091 = vbcast.lane.b32.xlu1 %v3089_v23, 256  ;;  %3070 = vbcast.lane.b32.xlu0 %v3068_v33, 256 }
 0x2a7   : > { %v12979_v2 = vpop.permute.xlu1 %1435  ;;  %v12981_v20 = vpop.permute.xlu0 %1379 }
 0x2a8   : > { %18275 = vst [vmem:[#allocation245_spill] sm:$0xff] %v12979_v2  ;;  %18276 = vst [vmem:[#allocation246_spill] sm:$0xff] %v12981_v20  ;;  %v1398_v20 = vrot.slane %v12750_v56, %v12163_v8  ;;  %v2935_v2 = vrot.slane %v12771_v6, %v12163_v8 }
 0x2a9   : > { %3651 = vbcast.lane.b32.xlu1 %v2984_v57, 264  ;;  %3619 = vbcast.lane.b32.xlu0 %v2928_v12, 264 }
 0x2ab   : > { %v12983_v36 = vpop.permute.xlu1 %1540  ;;  %v12985_v47 = vpop.permute.xlu0 %1484 }
 0x2ac   : > { %18277 = vst [vmem:[#allocation247_spill] sm:$0xff] %v12983_v36  ;;  %18278 = vst [vmem:[#allocation248_spill] sm:$0xff] %v12985_v47 }
 0x2ad   : > { %3679 = vbcast.lane.b32.xlu1 %v3033_v5, 264  ;;  %3667 = vbcast.lane.b32.xlu0 %v3012_v14, 264  ;;  %v1559_v5 = vrot.slane %v12790_v21, %v12112_v43  ;;  %v1503_v14 = vrot.slane %v12794_v41, %v12112_v43 }
 0x2af   : > { %v12987_v11 = vpop.permute.xlu1 %2106  ;;  %v12989_v40 = vpop.permute.xlu0 %2074 }
 0x2b0   : > { %18279 = vst [vmem:[#allocation249_spill] sm:$0xff] %v12987_v11  ;;  %18280 = vst [vmem:[#allocation250_spill] sm:$0xff] %v12989_v40  ;;  %v2991_v40 = vrot.slane %v12767_v37, %v12163_v8 }
 0x2b1   : > { %3711 = vbcast.lane.b32.xlu1 %v3089_v23, 264  ;;  %3699 = vbcast.lane.b32.xlu0 %v3068_v33, 264 }
 0x2b3   : > { %v12995_v57 = vpop.permute.xlu1 %2166  ;;  %v12997_v12 = vpop.permute.xlu0 %2134 }
 0x2b4   : > { %18281 = vst [vmem:[#allocation251_spill] sm:$0xff] %v12995_v57  ;;  %18282 = vst [vmem:[#allocation252_spill] sm:$0xff] %v12997_v12 }
 0x2b5   : > { %1456 = vbcast.lane.b32.xlu1 %v1454_v45, 256  ;;  %1400 = vbcast.lane.b32.xlu0 %v1398_v20, 256 }
 0x2b7   : > { %v13003_v23 = vpop.permute.xlu1 %2972  ;;  %v13005_v47 = vpop.permute.xlu0 %2916 }
 0x2b8   : > { %18283 = vst [vmem:[#allocation253_spill] sm:$0xff] %v13003_v23  ;;  %18284 = vst [vmem:[#allocation254_spill] sm:$0xff] %v13005_v47 }
 0x2b9   : > { %1561 = vbcast.lane.b32.xlu1 %v1559_v5, 256  ;;  %1505 = vbcast.lane.b32.xlu0 %v1503_v14, 256 }
 0x2bb   : > { %v13007_v33 = vpop.permute.xlu1 %3077  ;;  %v13009_v36 = vpop.permute.xlu0 %3021 }
 0x2bc   : > { %18285 = vst [vmem:[#allocation255_spill] sm:$0xff] %v13007_v33  ;;  %18286 = vst [vmem:[#allocation256_spill] sm:$0xff] %v13009_v36 }
 0x2bd   : > { %2118 = vbcast.lane.b32.xlu1 %v1454_v45, 264  ;;  %2086 = vbcast.lane.b32.xlu0 %v1398_v20, 264  ;;  %v3096_v20 = vrot.slane %v12823_v13, %v12112_v43  ;;  %v3040_v45 = vrot.slane %v12827_v22, %v12112_v43 }
 0x2bf   : > { %v13011_v12 = vpop.permute.xlu1 %3643  ;;  %v13013_v57 = vpop.permute.xlu0 %3611 }
 0x2c0   : > { %18287 = vst [vmem:[#allocation257_spill] sm:$0xff] %v13013_v57  ;;  %v1461_v57 = vrot.slane %v12748_v61, %v12214_v42 }
 0x2c1   : > { %2178 = vbcast.lane.b32.xlu1 %v1559_v5, 264  ;;  %2146 = vbcast.lane.b32.xlu0 %v1503_v14, 264 }
 0x2c3   : > { %v13019_v11 = vpop.permute.xlu1 %3703  ;;  %v13021_v47 = vpop.permute.xlu0 %3671 }
 0x2c4   : > { %18288 = vst [vmem:[#allocation258_spill] sm:$0xff] %v13019_v11  ;;  %18289 = vst [vmem:[#allocation259_spill] sm:$0xff] %v13021_v47 }
 0x2c5   : > { %2993 = vbcast.lane.b32.xlu1 %v2991_v40, 256  ;;  %2937 = vbcast.lane.b32.xlu0 %v2935_v2, 256 }
 0x2c7   : > { %v13027_v5 = vpop.permute.xlu1 %1386  ;;  %v13029_v36 = vpop.permute.xlu0 %1365 }
 0x2c8   : > { %18290 = vst [vmem:[#allocation260_spill] sm:$0xff] %v13027_v5  ;;  %18291 = vst [vmem:[#allocation261_spill] sm:$0xff] %v13029_v36  ;;  %v1405_v36 = vrot.slane %v12750_v56, %v12214_v42 }
 0x2c9   : > { %3098 = vbcast.lane.b32.xlu1 %v3096_v20, 256  ;;  %3042 = vbcast.lane.b32.xlu0 %v3040_v45, 256 }
 0x2cb   : > { %v13031_v14 = vpop.permute.xlu1 %1442  ;;  %v13033_v33 = vpop.permute.xlu0 %1421 }
 0x2cc   : > { %18292 = vst [vmem:[#allocation262_spill] sm:$0xff] %v13031_v14  ;;  %18293 = vst [vmem:[#allocation263_spill] sm:$0xff] %v13033_v33 }
 0x2cd   : > { %3655 = vbcast.lane.b32.xlu1 %v2991_v40, 264  ;;  %3623 = vbcast.lane.b32.xlu0 %v2935_v2, 264  ;;  %v1566_v40 = vrot.slane %v12790_v21, %v12163_v8  ;;  %v1510_v2 = vrot.slane %v12794_v41, %v12163_v8 }
 0x2cf   : > { %v13035_v47 = vpop.permute.xlu1 %1547  ;;  %v13037_v11 = vpop.permute.xlu0 %1491 }
 0x2d0   : > { %18294 = vst [vmem:[#allocation264_spill] sm:$0xff] %v13035_v47  ;;  %18295 = vst [vmem:[#allocation265_spill] sm:$0xff] %v13037_v11 }
 0x2d1   : > { %3715 = vbcast.lane.b32.xlu1 %v3096_v20, 264  ;;  %3683 = vbcast.lane.b32.xlu0 %v3040_v45, 264 }
 0x2d3   : > { %v13043_v5 = vpop.permute.xlu1 %2078  ;;  %v13045_v23 = vpop.permute.xlu0 %2066 }
 0x2d4   : > { %18296 = vst [vmem:[#allocation266_spill] sm:$0xff] %v13043_v5  ;;  %18297 = vst [vmem:[#allocation267_spill] sm:$0xff] %v13045_v23  ;;  %v2998_v23 = vrot.slane %v12767_v37, %v12214_v42 }
 0x2d5   : > { %1463 = vbcast.lane.b32.xlu1 %v1461_v57, 256  ;;  %1407 = vbcast.lane.b32.xlu0 %v1405_v36, 256 }
 0x2d7   : > { %v13051_v20 = vpop.permute.xlu1 %2110  ;;  %v13053_v11 = vpop.permute.xlu0 %2098 }
 0x2d8   : > { %18298 = vst [vmem:[#allocation268_spill] sm:$0xff] %v13051_v20  ;;  %18299 = vst [vmem:[#allocation269_spill] sm:$0xff] %v13053_v11  ;;  %v2942_v11 = vrot.slane %v12771_v6, %v12214_v42 }
 0x2d9   : > { %1568 = vbcast.lane.b32.xlu1 %v1566_v40, 256  ;;  %1512 = vbcast.lane.b32.xlu0 %v1510_v2, 256 }
 0x2db   : > { %v13055_v45 = vpop.permute.xlu1 %2170  ;;  %v13057_v47 = vpop.permute.xlu0 %2138 }
 0x2dc   : > { %18300 = vst [vmem:[#allocation270_spill] sm:$0xff] %v13055_v45  ;;  %18301 = vst [vmem:[#allocation271_spill] sm:$0xff] %v13057_v47 }
 0x2dd   : > { %2122 = vbcast.lane.b32.xlu1 %v1461_v57, 264  ;;  %2090 = vbcast.lane.b32.xlu0 %v1405_v36, 264  ;;  %v3103_v36 = vrot.slane %v12823_v13, %v12163_v8  ;;  %v3047_v57 = vrot.slane %v12827_v22, %v12163_v8 }
 0x2df   : > { %v13059_v33 = vpop.permute.xlu1 %2923  ;;  %v13061_v14 = vpop.permute.xlu0 %2902 }
 0x2e0   : > { %18302 = vst [vmem:[#allocation272_spill] sm:$0xff] %v13059_v33  ;;  %18303 = vst [vmem:[#allocation273_spill] sm:$0xff] %v13061_v14  ;;  %v1468_v14 = vrot.slane %v12748_v61, %v12265_v44 }
 0x2e1   : > { %2182 = vbcast.lane.b32.xlu1 %v1566_v40, 264  ;;  %2150 = vbcast.lane.b32.xlu0 %v1510_v2, 264 }
 0x2e3   : > { %v13067_v20 = vpop.permute.xlu1 %2979  ;;  %v13069_v5 = vpop.permute.xlu0 %2958 }
 0x2e4   : > { %18304 = vst [vmem:[#allocation274_spill] sm:$0xff] %v13067_v20  ;;  %18305 = vst [vmem:[#allocation275_spill] sm:$0xff] %v13069_v5 }
 0x2e5   : > { %3000 = vbcast.lane.b32.xlu1 %v2998_v23, 256  ;;  %2944 = vbcast.lane.b32.xlu0 %v2942_v11, 256 }
 0x2e7   : > { %v13075_v40 = vpop.permute.xlu1 %3084  ;;  %v13077_v47 = vpop.permute.xlu0 %3028 }
 0x2e8   : > { %18306 = vst [vmem:[#allocation276_spill] sm:$0xff] %v13075_v40  ;;  %18307 = vst [vmem:[#allocation277_spill] sm:$0xff] %v13077_v47  ;;  %v1412_v47 = vrot.slane %v12750_v56, %v12265_v44 }
 0x2e9   : > { %3105 = vbcast.lane.b32.xlu1 %v3103_v36, 256  ;;  %3049 = vbcast.lane.b32.xlu0 %v3047_v57, 256 }
 0x2eb   : > { %v13079_v2 = vpop.permute.xlu1 %3615  ;;  %v13081_v45 = vpop.permute.xlu0 %3603 }
 0x2ed   : > { %3659 = vbcast.lane.b32.xlu1 %v2998_v23, 264  ;;  %3627 = vbcast.lane.b32.xlu0 %v2942_v11, 264  ;;  %v1573_v11 = vrot.slane %v12790_v21, %v12214_v42  ;;  %v1517_v23 = vrot.slane %v12794_v41, %v12214_v42 }
 0x2ef   : > { %v13083_v5 = vpop.permute.xlu1 %3647  ;;  %v13085_v20 = vpop.permute.xlu0 %3635 }
 0x2f0   : > { %18308 = vst [vmem:[#allocation278_spill] sm:$0xff] %v13083_v5  ;;  %18309 = vst [vmem:[#allocation279_spill] sm:$0xff] %v13085_v20 }
 0x2f1   : > { %3719 = vbcast.lane.b32.xlu1 %v3103_v36, 264  ;;  %3687 = vbcast.lane.b32.xlu0 %v3047_v57, 264 }
 0x2f3   : > { %v13091_v40 = vpop.permute.xlu1 %3707  ;;  %v13093_v33 = vpop.permute.xlu0 %3675 }
 0x2f4   : > { %18310 = vst [vmem:[#allocation280_spill] sm:$0xff] %v13091_v40  ;;  %18311 = vst [vmem:[#allocation281_spill] sm:$0xff] %v13093_v33  ;;  %v3005_v40 = vrot.slane %v12767_v37, %v12265_v44 }
 0x2f5   : > { %1470 = vbcast.lane.b32.xlu1 %v1468_v14, 256  ;;  %1414 = vbcast.lane.b32.xlu0 %v1412_v47, 256 }
 0x2f7   : > { %v13099_v36 = vpop.permute.xlu1 %1449  ;;  %v13101_v20 = vpop.permute.xlu0 %1393 }
 0x2f8   : > { %18312 = vst [vmem:[#allocation282_spill] sm:$0xff] %v13099_v36  ;;  %18313 = vst [vmem:[#allocation283_spill] sm:$0xff] %v13101_v20  ;;  %v2949_v20 = vrot.slane %v12771_v6, %v12265_v44 }
 0x2f9   : > { %1575 = vbcast.lane.b32.xlu1 %v1573_v11, 256  ;;  %1519 = vbcast.lane.b32.xlu0 %v1517_v23, 256 }
 0x2fb   : > { %v13103_v61 = vpop.permute.xlu1 %1498  ;;  %v13105_v56 = vpop.permute.xlu0 %1477 }
 0x2fc   : > { %18314 = vst [vmem:[#allocation284_spill] sm:$0xff] %v13103_v61  ;;  %18315 = vst [vmem:[#allocation285_spill] sm:$0xff] %v13105_v56  ;;  %v1580_v56 = vrot.slane %v12790_v21, %v12265_v44  ;;  %v3061_v21 = vrot.slane %v12827_v22, %v12265_v44 }
 0x2fd   : > { %2126 = vbcast.lane.b32.xlu1 %v1468_v14, 264  ;;  %2094 = vbcast.lane.b32.xlu0 %v1412_v47, 264  ;;  %v3110_v47 = vrot.slane %v12823_v13, %v12214_v42  ;;  %v3054_v14 = vrot.slane %v12827_v22, %v12214_v42 }
 0x2ff   : > { %v13107_v57 = vpop.permute.xlu1 %1554  ;;  %v13109_v33 = vpop.permute.xlu0 %1533 }
 0x300   : > { %18316 = vst [vmem:[#allocation286_spill] sm:$0xff] %v13107_v57  ;;  %18317 = vst [vmem:[#allocation287_spill] sm:$0xff] %v13109_v33 }
 0x301   : > { %2186 = vbcast.lane.b32.xlu1 %v1573_v11, 264  ;;  %2154 = vbcast.lane.b32.xlu0 %v1517_v23, 264 }
 0x303   : > { %v13115_v36 = vpop.permute.xlu1 %2114  ;;  %v13117_v5 = vpop.permute.xlu0 %2082 }
 0x304   : > { %18318 = vst [vmem:[#allocation288_spill] sm:$0xff] %v13115_v36  ;;  %18319 = vst [vmem:[#allocation289_spill] sm:$0xff] %v13117_v5 }
 0x305   : > { %3007 = vbcast.lane.b32.xlu1 %v3005_v40, 256  ;;  %2951 = vbcast.lane.b32.xlu0 %v2949_v20, 256 }
 0x307   : > { %v13123_v11 = vpop.permute.xlu1 %2142  ;;  %v13125_v33 = vpop.permute.xlu0 %2130 }
 0x308   : > { %18320 = vst [vmem:[#allocation290_spill] sm:$0xff] %v13123_v11  ;;  %18321 = vst [vmem:[#allocation291_spill] sm:$0xff] %v13125_v33  ;;  %v1524_v33 = vrot.slane %v12794_v41, %v12265_v44  ;;  %v636_v41 = vld [vmem:[%s12025_s25 + $0x30] sm:$0xff]  }
 0x309   : > { %3112 = vbcast.lane.b32.xlu1 %v3110_v47, 256  ;;  %3056 = vbcast.lane.b32.xlu0 %v3054_v14, 256  ;;  %v13156_v11 = vunpack.c.h.bf16 %v636_v41 }
 0x30b   : > { %v13127_v37 = vpop.permute.xlu1 %2174  ;;  %v13129_v6 = vpop.permute.xlu0 %2162  ;;  %vm893_vm12 = vcmp.ne.f32.partialorder %v13156_v11, 0.0 }
 0x30c   : > { %18322 = vst [vmem:[#allocation292_spill] sm:$0xff] %v13127_v37  ;;  %18323 = vst [vmem:[#allocation293_spill] sm:$0xff] %v13129_v6 }
 0x30d   : > { %3663 = vbcast.lane.b32.xlu1 %v3005_v40, 264  ;;  %3631 = vbcast.lane.b32.xlu0 %v2949_v20, 264 }
 0x30f   : > { %v13131_v23 = vpop.permute.xlu1 %2986  ;;  %v13133_v57 = vpop.permute.xlu0 %2930 }
 0x310   : > { %18324 = vst [vmem:[#allocation294_spill] sm:$0xff] %v13131_v23  ;;  %18325 = vst [vmem:[#allocation295_spill] sm:$0xff] %v13133_v57  ;;  %v638_v57 = vld [vmem:[%s12025_s25 + $0x38] sm:$0xff]  }
 0x311   : > { %3723 = vbcast.lane.b32.xlu1 %v3110_v47, 264  ;;  %3691 = vbcast.lane.b32.xlu0 %v3054_v14, 264  ;;  %v3117_v47 = vrot.slane %v12823_v13, %v12265_v44  ;;  %v1650_v13 = vrot.slane %v13156_v11, %v12028_v3 }
 0x313   : > { %v13139_v61 = vpop.permute.xlu1 %3035  ;;  %v13141_v37 = vpop.permute.xlu0 %3014 }
 0x314   : > { %18326 = vst [vmem:[#allocation296_spill] sm:$0xff] %v13139_v61  ;;  %18327 = vst [vmem:[#allocation297_spill] sm:$0xff] %v13141_v37  ;;  %v10729_v37 = vld [vmem:[%s12020_s27 + $0x6] ss:$0 sm:$0xff] }
 0x315   : > { %1582 = vbcast.lane.b32.xlu1 %v1580_v56, 256  ;;  %1526 = vbcast.lane.b32.xlu0 %v1524_v33, 256 }
 0x317   : > { %v13143_v20 = vpop.permute.xlu1 %3091  ;;  %v13145_v40 = vpop.permute.xlu0 %3070 }
 0x318   : > { %18328 = vst [vmem:[#allocation298_spill] sm:$0xff] %v13143_v20  ;;  %18329 = vst [vmem:[#allocation299_spill] sm:$0xff] %v13145_v40  ;;  %v13158_v20 = vunpack.c.l.bf16 %v636_v41 }
 0x319   : > { %2190 = vbcast.lane.b32.xlu1 %v1580_v56, 264  ;;  %2158 = vbcast.lane.b32.xlu0 %v1524_v33, 264 }
 0x31a   : > { %v1594_v22 = vrot.slane %v13158_v20, %v12028_v3  ;;  %vm892_vm13 = vcmp.ne.f32.partialorder %v13158_v20, 0.0 }
 0x31b   : > { %v13152_v14 = vpop.permute.xlu1 %3651  ;;  %v13154_v6 = vpop.permute.xlu0 %3619 }
 0x31c   : > { %18330 = vst [vmem:[#allocation300_spill] sm:$0xff] %v13152_v14  ;;  %18331 = vst [vmem:[#allocation301_spill] sm:$0xff] %v13154_v6  ;;  %v10730_v14 = vld [vmem:[%s12020_s27 + $0x7] ss:$0 sm:$0xff]  ;;  %s17753_s27 = scalar_lea.hbm %s17823_s16, %s10913_s19 }
 0x31d   : > { %3119 = vbcast.lane.b32.xlu1 %v3117_v47, 256  ;;  %3063 = vbcast.lane.b32.xlu0 %v3061_v21, 256 }
 0x31f   : > { %v13160_v56 = vpop.permute.xlu1 %3679  ;;  %v13162_v40 = vpop.permute.xlu0 %3667 }
 0x320   : > { %18332 = vst [vmem:[#allocation302_spill] sm:$0xff] %v13160_v56  ;;  %18333 = vst [vmem:[#allocation303_spill] sm:$0xff] %v13162_v40 }
 0x321   : > { %3727 = vbcast.lane.b32.xlu1 %v3117_v47, 264  ;;  %3695 = vbcast.lane.b32.xlu0 %v3061_v21, 264  ;;  %v13175_v47 = vsel %vm893_vm12, %v10729_v37, 0.0  ;;  %v13179_v21 = vsel %vm892_vm13, %v10729_v37, 0.0 }
 0x323   : > { %v13168_v33 = vpop.permute.xlu1 %3711  ;;  %v13172_v5 = vpop.permute.xlu0 %3699 }
 0x324   : > { %18334 = vst [vmem:[#allocation304_spill] sm:$0xff] %v13168_v33  ;;  %18335 = vst [vmem:[#allocation305_spill] sm:$0xff] %v13172_v5  ;;  %v3187_v33 = vrot.slane %v13175_v47, %v12028_v3  ;;  %v3131_v5 = vrot.slane %v13179_v21, %v12028_v3 }
 0x325   : > { %1652 = vbcast.lane.b32.xlu1 %v1650_v13, 256  ;;  %1596 = vbcast.lane.b32.xlu0 %v1594_v22, 256 }
 0x327   : > { %v13177_v41 = vpop.permute.xlu1 %1456  ;;  %v13181_v40 = vpop.permute.xlu0 %1400 }
 0x328   : > { %18336 = vst [vmem:[#allocation306_spill] sm:$0xff] %v13177_v41  ;;  %18337 = vst [vmem:[#allocation307_spill] sm:$0xff] %v13181_v40  ;;  %v13198_v40 = vunpack.c.h.bf16 %v638_v57 }
 0x329   : > { %2230 = vbcast.lane.b32.xlu1 %v1650_v13, 264  ;;  %2198 = vbcast.lane.b32.xlu0 %v1594_v22, 264  ;;  %v1657_v13 = vrot.slane %v13156_v11, %v12052_v15  ;;  %v1601_v22 = vrot.slane %v13158_v20, %v12052_v15 }
 0x32a   : > { %vm895_vm15 = vcmp.ne.f32.partialorder %v13198_v40, 0.0 }
 0x32b   : > { %v13187_v61 = vpop.permute.xlu1 %1561  ;;  %v13189_v56 = vpop.permute.xlu0 %1505 }
 0x32c   : > { %18338 = vst [vmem:[#allocation308_spill] sm:$0xff] %v13187_v61  ;;  %18339 = vst [vmem:[#allocation309_spill] sm:$0xff] %v13189_v56  ;;  %v13202_v61 = vunpack.c.l.bf16 %v638_v57  ;;  %v13219_v57 = vld [vmem:[%s17814_s7] ss:$0 sm:$0xff] }
 0x32d   : > { %3189 = vbcast.lane.b32.xlu1 %v3187_v33, 256  ;;  %3133 = vbcast.lane.b32.xlu0 %v3131_v5, 256 }
 0x32e   : > { %vm894_vm0 = vcmp.ne.f32.partialorder %v13202_v61, 0.0 }
 0x32f   : > { %v13192_v41 = vpop.permute.xlu1 %2118  ;;  %v13194_v37 = vpop.permute.xlu0 %2086 }
 0x330   : > { %18340 = vst [vmem:[#allocation310_spill] sm:$0xff] %v13192_v41  ;;  %18341 = vst [vmem:[#allocation311_spill] sm:$0xff] %v13194_v37  ;;  %v1762_v37 = vrot.slane %v13198_v40, %v12028_v3 }
 0x331   : > { %3767 = vbcast.lane.b32.xlu1 %v3187_v33, 264  ;;  %3735 = vbcast.lane.b32.xlu0 %v3131_v5, 264  ;;  %v1706_v33 = vrot.slane %v13202_v61, %v12028_v3 }
 0x333   : > { %v13204_v56 = vpop.permute.xlu1 %2178  ;;  %v13206_v6 = vpop.permute.xlu0 %2146 }
 0x334   : > { %18342 = vst [vmem:[#allocation312_spill] sm:$0xff] %v13204_v56  ;;  %18343 = vst [vmem:[#allocation313_spill] sm:$0xff] %v13206_v6  ;;  %v3858_v6 = vsel %vm2320_vm14, %v12144_v59, %v12152_v63  ;;  %v3866_v59 = vsel %vm2320_vm14, %v12142_v58, %v12150_v62 }
 0x335   : > { %1659 = vbcast.lane.b32.xlu1 %v1657_v13, 256  ;;  %1603 = vbcast.lane.b32.xlu0 %v1601_v22, 256  ;;  %v4126_v23 = vmul.f32 %v13219_v57, %v3858_v6  ;;  %v4134_v58 = vmul.f32 %v13219_v57, %v3866_v59 }
 0x337   : > { %v13212_v41 = vpop.permute.xlu1 %2993  ;;  %v13214_v5 = vpop.permute.xlu0 %2937 }
 0x338   : > { %18344 = vst [vmem:[#allocation314_spill] sm:$0xff] %v13212_v41  ;;  %18345 = vst [vmem:[#allocation315_spill] sm:$0xff] %v13214_v5  ;;  %v13229_v41 = vld [vmem:[%s17813_s6] ss:$0 sm:$0xff]  ;;  %v2322_v5 = vsel %vm2320_vm14, %v12128_v51, %v12126_v50  ;;  %v2330_v50 = vsel %vm2320_vm14, %v12136_v55, %v12134_v54  ;;  %v3859_v51 = vsel %vm2320_vm14, %v12183_v25, %v12191_v31  ;;  %v13268_v31 = vsel %vm895_vm15, %v10730_v14, 0.0 }
 0x339   : > { %1764 = vbcast.lane.b32.xlu1 %v1762_v37, 256  ;;  %1708 = vbcast.lane.b32.xlu0 %v1706_v33, 256  ;;  %v3992_v63 = vmul.f32 %v13229_v41, %v2322_v5  ;;  %v2323_v54 = vsel %vm2320_vm14, %v12156_v1, %v12167_v10  ;;  %v3874_v55 = vsel %vm2320_vm14, %v12187_v27, %v12199_v35  ;;  %v13277_v1 = vsel %vm894_vm0, %v10730_v14, 0.0 }
 0x33a   : > { %v3138_v25 = vrot.slane %v13179_v21, %v12052_v15  ;;  %v2338_v10 = vsel %vm2320_vm14, %v12160_v7, %v12175_v19  ;;  %v3882_v35 = vsel %vm2320_vm14, %v12185_v26, %v12197_v34  ;;  %v3299_v14 = vrot.slane %v13268_v31, %v12028_v3 }
 0x33b   : > { %v13224_v56 = vpop.permute.xlu1 %3098  ;;  %v13234_v36 = vpop.permute.xlu0 %3042  ;;  %v4254_v62 = vadd.f32 %v4126_v23, %v3992_v63  ;;  %v4127_v23 = vmul.f32 %v13219_v57, %v3859_v51  ;;  %v2346_v19 = vsel %vm2320_vm14, %v12158_v4, %v12173_v18  ;;  %v3243_v26 = vrot.slane %v13277_v1, %v12028_v3  ;;  %v18363_v3 = vld [vmem:[#allocation14_spill] sm:$0xff] }
 0x33c   : > { %18346 = vst [vmem:[#allocation316_spill] sm:$0xff] %v13224_v56  ;;  %18347 = vst [vmem:[#allocation317_spill] sm:$0xff] %v13234_v36  ;;  %v4008_v34 = vmul.f32 %v13229_v41, %v2338_v10  ;;  %v18387_v36 = vld [vmem:[#allocation36_spill] sm:$0xff] }
 0x33d   : > { %2234 = vbcast.lane.b32.xlu1 %v1657_v13, 264  ;;  %2202 = vbcast.lane.b32.xlu0 %v1601_v22, 264  ;;  %v3867_v13 = vsel %vm2320_vm14, %v12181_v24, %v12189_v28  ;;  %v3194_v22 = vrot.slane %v13175_v47, %v12052_v15  ;;  %v4000_v24 = vmul.f32 %v13229_v41, %v2330_v50  ;;  %v4382_v59 = vmax.f32 %v4254_v62, 0.0 }
 0x33e   : > { %v2331_v28 = vsel %vm2320_vm14, %v12154_v0, %v12165_v9  ;;  %v4135_v27 = vmul.f32 %v13219_v57, %v3867_v13  ;;  %v3993_v0 = vmul.f32 %v13229_v41, %v2323_v54  ;;  %v4142_v9 = vmul.f32 %v13219_v57, %v3874_v55 }
 0x33f   : > { %v13241_v56 = vpop.permute.xlu1 %3655  ;;  %v13251_v6 = vpop.permute.xlu0 %3623  ;;  %v4262_v5 = vadd.f32 %v4134_v58, %v4000_v24  ;;  %v4001_v7 = vmul.f32 %v13229_v41, %v2331_v28  ;;  %v4150_v50 = vmul.f32 %v13219_v57, %v3882_v35  ;;  %v4016_v54 = vmul.f32 %v13229_v41, %v2346_v19 }
 0x340   : > { %18348 = vst [vmem:[#allocation318_spill] sm:$0xff] %v13241_v56  ;;  %18349 = vst [vmem:[#allocation319_spill] sm:$0xff] %v13251_v6  ;;  %v4255_v63 = vadd.f32 %v4127_v23, %v3993_v0  ;;  %v4270_v55 = vadd.f32 %v4142_v9, %v4008_v34  ;;  %v4515_v4 = vrot.slane %v4382_v59, 4  ;;  %v2324_v34 = vsel %vm2320_vm14, %v12205_v38, %v12224_v48 }
 0x341   : > { %2294 = vbcast.lane.b32.xlu1 %v1762_v37, 264  ;;  %2262 = vbcast.lane.b32.xlu0 %v1706_v33, 264  ;;  %v4263_v58 = vadd.f32 %v4135_v27, %v4001_v7  ;;  %v4390_v62 = vmax.f32 %v4262_v5, 0.0  ;;  %v4278_v24 = vadd.f32 %v4150_v50, %v4016_v54  ;;  %v3860_v27 = vsel %vm2320_vm14, %v12240_v16, %v12260_v52 }
 0x342   : > { %v4383_v18 = vmax.f32 %v4255_v63, 0.0  ;;  %v4398_v0 = vmax.f32 %v4270_v55, 0.0  ;;  %v3857_v5 = vsel %vm2320_vm14, %v12242_v17, %v12262_v53  ;;  %v4516_v9 = vadd.f32 %v4515_v4, %v4382_v59  ;;  %v18359_v55 = vld [vmem:[#allocation23_spill] sm:$0xff] }
 0x343   : > { %v13275_v37 = vpop.permute.xlu1 %3715  ;;  %v13286_v33 = vpop.permute.xlu0 %3683  ;;  %v4391_v10 = vmax.f32 %v4263_v58, 0.0  ;;  %v4563_v35 = vrot.slane %v4390_v62, 4  ;;  %v4406_v19 = vmax.f32 %v4278_v24, 0.0  ;;  %v2321_v63 = vsel %vm2320_vm14, %v12207_v39, %v12226_v49 }
 0x344   : > { %18350 = vst [vmem:[#allocation320_spill] sm:$0xff] %v13275_v37  ;;  %18351 = vst [vmem:[#allocation321_spill] sm:$0xff] %v13286_v33  ;;  %v4521_v7 = vrot.slane %v4383_v18, 4  ;;  %v4128_v52 = vmul.f32 %v13219_v57, %v3860_v27  ;;  %v4125_v17 = vmul.f32 %v13219_v57, %v3857_v5  ;;  %v13329_v59 = vrot.slane %v13158_v20, %v12082_v29  ;;  %v18388_v33 = vld [vmem:[#allocation30_spill] sm:$0xff]  ;;  %v18390_v37 = vld [vmem:[#allocation31_spill] sm:$0xff] }
 0x345   : > { %3196 = vbcast.lane.b32.xlu1 %v3194_v22, 256  ;;  %3140 = vbcast.lane.b32.xlu0 %v3138_v25, 256  ;;  %v4569_v16 = vrot.slane %v4391_v10, 4  ;;  %v4517_v38 = vrot.slane %v4516_v9, 2  ;;  %v3994_v48 = vmul.f32 %v13229_v41, %v2324_v34  ;;  %v3991_v39 = vmul.f32 %v13229_v41, %v2321_v63  ;;  %v18362_v63 = vld [vmem:[#allocation19_spill] sm:$0xff] }
 0x346   : > { %v13335_v49 = vrot.slane %v13158_v20, %v12085_v30  ;;  %v4522_v58 = vadd.f32 %v4521_v7, %v4383_v18  ;;  %v4659_v54 = vrot.slane %v4406_v19, 4  ;;  %v2332_v18 = vsel %vm2320_vm14, %v18363_v3, %v18362_v63  ;;  %v18364_v7 = vld [vmem:[#allocation20_spill] sm:$0xff] }
 0x347   : > { %v13300_v51 = vpop.permute.xlu1 %1463  ;;  %v13302_v13 = vpop.permute.xlu0 %1407  ;;  %v4256_v27 = vadd.f32 %v4128_v52, %v3994_v48  ;;  %v4253_v5 = vadd.f32 %v4125_v17, %v3991_v39  ;;  %v4518_v52 = vadd.f32 %v4517_v38, %v4516_v9  ;;  %v4002_v48 = vmul.f32 %v13229_v41, %v2332_v18 }
 0x348   : > { %18352 = vst [vmem:[#allocation322_spill] sm:$0xff] %v13300_v51  ;;  %18353 = vst [vmem:[#allocation323_spill] sm:$0xff] %v13302_v13  ;;  %v4523_v17 = vrot.slane %v4522_v58, 2  ;;  %v13379_v38 = vrot.slane %v13202_v61, %v12052_v15  ;;  %v18370_v13 = vld [vmem:[#allocation25_spill] sm:$0xff]  ;;  %v18373_v51 = vld [vmem:[#allocation18_spill] sm:$0xff] }
 0x349   : > { %3301 = vbcast.lane.b32.xlu1 %v3299_v14, 256  ;;  %3245 = vbcast.lane.b32.xlu0 %v3243_v26, 256  ;;  %v4519_v18 = vrot.slane %v4518_v52, 1 }
 0x34b   : > { %v13305_v28 = vpop.permute.xlu1 %1568  ;;  %v13307_v23 = vpop.permute.xlu0 %1512 }
 0x34c   : > { %18354 = vst [vmem:[#allocation324_spill] sm:$0xff] %v13305_v28  ;;  %18355 = vst [vmem:[#allocation325_spill] sm:$0xff] %v13307_v23  ;;  %v18365_v23 = vld [vmem:[#allocation15_spill] sm:$0xff] }
 0x34d   : > { %3771 = vbcast.lane.b32.xlu1 %v3194_v22, 264  ;;  %3739 = vbcast.lane.b32.xlu0 %v3138_v25, 264  ;;  %v4564_v22 = vadd.f32 %v4563_v35, %v4390_v62  ;;  %v4611_v25 = vrot.slane %v4398_v0, 4  ;;  %v18358_v62 = vld [vmem:[#allocation27_spill] sm:$0xff]  ;;  %v4570_v35 = vadd.f32 %v4569_v16, %v4391_v10 }
 0x34e   : > { %v3865_v4 = vsel %vm2320_vm14, %v18359_v55, %v18358_v62  ;;  %v4384_v62 = vmax.f32 %v4256_v27, 0.0 }
 0x34f   : > { %v13321_v50 = vpop.permute.xlu1 %2122  ;;  %v13325_v53 = vpop.permute.xlu0 %2090  ;;  %v4612_v34 = vadd.f32 %v4611_v25, %v4398_v0  ;;  %v4133_v16 = vmul.f32 %v13219_v57, %v3865_v4  ;;  %v13363_v0 = vrot.slane %v13156_v11, %v12085_v30  ;;  %v4565_v3 = vrot.slane %v4564_v22, 2 }
 0x350   : > { %18356 = vst [vmem:[#allocation326_spill] sm:$0xff] %v13321_v50  ;;  %18357 = vst [vmem:[#allocation327_spill] sm:$0xff] %v13325_v53  ;;  %v4571_v4 = vrot.slane %v4570_v35, 2  ;;  %v18374_v50 = vld [vmem:[#allocation28_spill] sm:$0xff] }
 0x351   : > { %3831 = vbcast.lane.b32.xlu1 %v3299_v14, 264  ;;  %3799 = vbcast.lane.b32.xlu0 %v3243_v26, 264  ;;  %v3868_v14 = vsel %vm2320_vm14, %v12248_v32, %v12267_v60  ;;  %v2329_v60 = vsel %vm2320_vm14, %v18365_v23, %v18364_v7  ;;  %v13356_v32 = vrot.slane %v13156_v11, %v12082_v29  ;;  %v4613_v63 = vrot.slane %v4612_v34, 2 }
 0x352   : > { %v4136_v10 = vmul.f32 %v13219_v57, %v3868_v14  ;;  %v4660_v23 = vadd.f32 %v4659_v54, %v4406_v19  ;;  %v3999_v39 = vmul.f32 %v13229_v41, %v2329_v60  ;;  %v4381_v14 = vmax.f32 %v4253_v5, 0.0 }
 0x353   : > { %v13343_v24 = vpop.permute.xlu1 %2182  ;;  %v13345_v26 = vpop.permute.xlu0 %2150  ;;  %v13374_v7 = vrot.slane %v13198_v40, %v12052_v15  ;;  %v4566_v54 = vadd.f32 %v4565_v3, %v4564_v22  ;;  %v4524_v60 = vadd.f32 %v4523_v17, %v4522_v58  ;;  %v18375_v58 = vld [vmem:[#allocation24_spill] sm:$0xff] }
 0x354   : > { %18360 = vst [vmem:[#allocation27_spill] sm:$0xff] %v13343_v24  ;;  %18361 = vst [vmem:[#allocation23_spill] sm:$0xff] %v13345_v26  ;;  %v4264_v9 = vadd.f32 %v4136_v10, %v4002_v48  ;;  %v4261_v19 = vadd.f32 %v4133_v16, %v3999_v39  ;;  %v4661_v27 = vrot.slane %v4660_v23, 2  ;;  %v4527_v26 = vrot.slane %v4384_v62, 4  ;;  %v18369_v24 = vld [vmem:[#allocation29_spill] sm:$0xff]  ;;  %v18372_v39 = vld [vmem:[#allocation22_spill] sm:$0xff] }
 0x355   : > { %1610 = vbcast.lane.b32.xlu1 %v13329_v59, 256  ;;  %1589 = vbcast.lane.b32.xlu0 %v13335_v49, 256  ;;  %v4509_v28 = vrot.slane %v4381_v14, 4  ;;  %v3875_v53 = vsel %vm2320_vm14, %v18370_v13, %v18369_v24  ;;  %v4572_v16 = vadd.f32 %v4571_v4, %v4570_v35  ;;  %v4614_v48 = vadd.f32 %v4613_v63, %v4612_v34  ;;  %v18378_v4 = vld [vmem:[#allocation21_spill] sm:$0xff] }
 0x356   : > { %v2339_v22 = vsel %vm2320_vm14, %v18373_v51, %v18372_v39  ;;  %v4392_v3 = vmax.f32 %v4264_v9, 0.0  ;;  %v3883_v17 = vsel %vm2320_vm14, %v18375_v58, %v18374_v50  ;;  %v4143_v13 = vmul.f32 %v13219_v57, %v3875_v53  ;;  %v18379_v63 = vld [vmem:[#allocation17_spill] sm:$0xff]  ;;  %v18381_v58 = vld [vmem:[#allocation48_spill] sm:$0xff] }
 0x357   : > { %v13365_v25 = vpop.permute.xlu1 %3000  ;;  %v13369_v55 = vpop.permute.xlu0 %2944  ;;  %v13399_v35 = vadd.f32 %v4519_v18, %v4518_v52  ;;  %v4567_v34 = vrot.slane %v4566_v54, 1  ;;  %v2347_v51 = vsel %vm2320_vm14, %v18379_v63, %v18378_v4  ;;  %v4528_v9 = vadd.f32 %v4527_v26, %v4384_v62  ;;  %v18383_v4 = vld [vmem:[#allocation49_spill] sm:$0xff]  ;;  %v18384_v26 = vld [vmem:[#allocation43_spill] sm:$0xff] }
 0x358   : > { %18366 = vst [vmem:[#allocation19_spill] sm:$0xff] %v13365_v25  ;;  %18367 = vst [vmem:[#allocation14_spill] sm:$0xff] %v13369_v55  ;;  %v4662_v55 = vadd.f32 %v4661_v27, %v4660_v23  ;;  %v4009_v50 = vmul.f32 %v13229_v41, %v2339_v22  ;;  %v4151_v23 = vmul.f32 %v13219_v57, %v3883_v17  ;;  %v4573_v53 = vrot.slane %v4572_v16, 1  ;;  %v18382_v25 = vld [vmem:[#allocation42_spill] sm:$0xff] }
 0x359   : > { %1666 = vbcast.lane.b32.xlu1 %v13356_v32, 256  ;;  %1645 = vbcast.lane.b32.xlu0 %v13363_v0, 256  ;;  %18377 = vst [vmem:[#allocation25_spill] sm:$0xff] %v13399_v35  ;;  %v4615_v27 = vrot.slane %v4614_v48, 1  ;;  %v4575_v52 = vrot.slane %v4392_v3, 4  ;;  %v4017_v62 = vmul.f32 %v13229_v41, %v2347_v51  ;;  %v4529_v63 = vrot.slane %v4528_v9, 2 }
 0x35a   : > { %v4663_v17 = vrot.slane %v4662_v55, 1 }
 0x35b   : > { %v13381_v5 = vpop.permute.xlu1 %3105  ;;  %v13386_v10 = vpop.permute.xlu0 %3049  ;;  %v13436_v51 = vadd.f32 %v4575_v52, %v4392_v3  ;;  %v13452_v3 = vadd.f32 %v4529_v63, %v4528_v9  ;;  %v13469_v9 = vrot.slane %v13179_v21, %v12082_v29 }
 0x35c   : > { %18368 = vst [vmem:[#allocation20_spill] sm:$0xff] %v13381_v5  ;;  %18371 = vst [vmem:[#allocation15_spill] sm:$0xff] %v13386_v10  ;;  %v4389_v5 = vmax.f32 %v4261_v19, 0.0  ;;  %v4510_v19 = vadd.f32 %v4509_v28, %v4381_v14  ;;  %v4525_v10 = vrot.slane %v4524_v60, 1  ;;  %v3861_v28 = vsel %vm2320_vm14, %v18384_v26, %v18383_v4 }
 0x35d   : > { %1771 = vbcast.lane.b32.xlu1 %v13374_v7, 256  ;;  %1715 = vbcast.lane.b32.xlu0 %v13379_v38, 256  ;;  %v4271_v14 = vadd.f32 %v4143_v13, %v4009_v50  ;;  %v4129_v13 = vmul.f32 %v13219_v57, %v3861_v28 }
 0x35e   : > { %v4557_v18 = vrot.slane %v4389_v5, 4 }
 0x35f   : > { %v13397_v24 = vpop.permute.xlu1 %3659  ;;  %v13404_v39 = vpop.permute.xlu0 %3627 }
 0x360   : > { %18376 = vst [vmem:[#allocation29_spill] sm:$0xff] %v13397_v24  ;;  %18380 = vst [vmem:[#allocation22_spill] sm:$0xff] %v13404_v39  ;;  %v3869_v24 = vsel %vm2320_vm14, %v18382_v25, %v18381_v58  ;;  %v4511_v39 = vrot.slane %v4510_v19, 2  ;;  %v2333_v25 = vsel %vm2320_vm14, %v18388_v33, %v18387_v36  ;;  %v18389_v58 = vld [vmem:[#allocation37_spill] sm:$0xff]  ;;  %v13438_v50 = vadd.f32 %v4557_v18, %v4389_v5 }
 0x361   : > { %2206 = vbcast.lane.b32.xlu1 %v13329_v59, 264  ;;  %2194 = vbcast.lane.b32.xlu0 %v13335_v49, 264  ;;  %v13419_v59 = vadd.f32 %v4567_v34, %v4566_v54  ;;  %v2325_v4 = vsel %vm2320_vm14, %v18390_v37, %v18389_v58  ;;  %v4137_v49 = vmul.f32 %v13219_v57, %v3869_v24  ;;  %v4399_v33 = vmax.f32 %v4271_v14, 0.0  ;;  %v18403_v14 = vld [vmem:[#allocation44_spill] sm:$0xff] }
 0x362   : > { %v13432_v54 = vadd.f32 %v4525_v10, %v4524_v60  ;;  %v13434_v34 = vadd.f32 %v4573_v53, %v4572_v16  ;;  %v13440_v36 = vadd.f32 %v4151_v23, %v4017_v62  ;;  %v13443_v37 = vadd.f32 %v4615_v27, %v4614_v48  ;;  %v18396_v60 = vld [vmem:[#allocation45_spill] sm:$0xff]  ;;  %v18398_v23 = vld [vmem:[#allocation39_spill] sm:$0xff]  ;;  %v18402_v62 = vld [vmem:[#allocation50_spill] sm:$0xff] }
 0x363   : > { %v13417_v22 = vpop.permute.xlu1 %3719  ;;  %18386 = vst [vmem:[#allocation28_spill] sm:$0xff] %v13419_v59  ;;  %v13427_v26 = vpop.permute.xlu0 %3687  ;;  %v4003_v24 = vmul.f32 %v13229_v41, %v2333_v25  ;;  %v3995_v28 = vmul.f32 %v13229_v41, %v2325_v4  ;;  %v13454_v5 = vadd.f32 %v4511_v39, %v4510_v19  ;;  %v18399_v53 = vld [vmem:[#allocation33_spill] sm:$0xff]  ;;  %v13461_v27 = vadd.f32 %v4663_v17, %v4662_v55  ;;  %v18405_v4 = vld [vmem:[#allocation32_spill] sm:$0xff] }
 0x364   : > { %18385 = vst [vmem:[#allocation18_spill] sm:$0xff] %v13417_v22  ;;  %18391 = vst [vmem:[#allocation24_spill] sm:$0xff] %v13427_v26  ;;  %v3876_v25 = vsel %vm2320_vm14, %v18403_v14, %v18402_v62  ;;  %v4407_v39 = vmax.f32 %v13440_v36, 0.0  ;;  %v13477_v55 = vrot.slane %v13179_v21, %v12085_v30  ;;  %v4559_v17 = vrot.slane %v13438_v50, 2  ;;  %v18412_v62 = vld [vmem:[#allocation47_spill] sm:$0xff] }
 0x365   : > { %2238 = vbcast.lane.b32.xlu1 %v13356_v32, 264  ;;  %18392 = vst [vmem:[#allocation21_spill] sm:$0xff] %v13432_v54  ;;  %18393 = vst [vmem:[#allocation17_spill] sm:$0xff] %v13434_v34  ;;  %2226 = vbcast.lane.b32.xlu0 %v13363_v0, 264  ;;  %v18395_v32 = vld [vmem:[#allocation51_spill] sm:$0xff]  ;;  %v2337_v0 = vsel %vm2320_vm14, %v18399_v53, %v18398_v23  ;;  %v4265_v52 = vadd.f32 %v4137_v49, %v4003_v24  ;;  %v4617_v58 = vrot.slane %v4399_v33, 4 }
 0x366   : > { %18394 = vst [vmem:[#allocation48_spill] sm:$0xff] %v13443_v37  ;;  %v3873_v10 = vsel %vm2320_vm14, %v18396_v60, %v18395_v32  ;;  %18401 = vst [vmem:[#allocation43_spill] sm:$0xff] %v13461_v27  ;;  %v4257_v18 = vadd.f32 %v4129_v13, %v3995_v28  ;;  %v18406_v13 = vld [vmem:[#allocation52_spill] sm:$0xff]  ;;  %v18407_v24 = vld [vmem:[#allocation46_spill] sm:$0xff]  ;;  %v4007_v32 = vmul.f32 %v13229_v41, %v2337_v0 }
 0x367   : > { %v13450_v16 = vpop.permute.xlu1 %1470  ;;  %v13459_v48 = vpop.permute.xlu0 %1414  ;;  %v4141_v63 = vmul.f32 %v13219_v57, %v3873_v10  ;;  %v3884_v28 = vsel %vm2320_vm14, %v18407_v24, %v18406_v13  ;;  %v18410_v60 = vld [vmem:[#allocation34_spill] sm:$0xff]  ;;  %v4144_v23 = vmul.f32 %v13219_v57, %v3876_v25  ;;  %v18411_v53 = vld [vmem:[#allocation53_spill] sm:$0xff]  ;;  %v4393_v24 = vmax.f32 %v4265_v52, 0.0 }
 0x368   : > { %18397 = vst [vmem:[#allocation42_spill] sm:$0xff] %v13450_v16  ;;  %18400 = vst [vmem:[#allocation49_spill] sm:$0xff] %v13459_v48  ;;  %v3881_v14 = vsel %vm2320_vm14, %v18412_v62, %v18411_v53  ;;  %v13504_v0 = vrot.slane %v13175_v47, %v12082_v29  ;;  %v13511_v53 = vrot.slane %v13175_v47, %v12085_v30  ;;  %v4665_v62 = vrot.slane %v4407_v39, 4 }
 0x369   : > { %2298 = vbcast.lane.b32.xlu1 %v13374_v7, 264  ;;  %2266 = vbcast.lane.b32.xlu0 %v13379_v38, 264  ;;  %v18404_v7 = vld [vmem:[#allocation38_spill] sm:$0xff]  ;;  %v18409_v38 = vld [vmem:[#allocation40_spill] sm:$0xff]  ;;  %v4618_v52 = vadd.f32 %v4617_v58, %v4399_v33  ;;  %v4581_v26 = vrot.slane %v4393_v24, 4  ;;  %v18420_v33 = vld [vmem:[#allocation67_spill] sm:$0xff] }
 0x36a   : > { %v2340_v49 = vsel %vm2320_vm14, %v18405_v4, %v18404_v7  ;;  %v2348_v10 = vsel %vm2320_vm14, %v18410_v60, %v18409_v38  ;;  %v18414_v7 = vld [vmem:[#allocation41_spill] sm:$0xff]  ;;  %v18415_v4 = vld [vmem:[#allocation35_spill] sm:$0xff]  ;;  %v4269_v38 = vadd.f32 %v4141_v63, %v4007_v32  ;;  %v4152_v60 = vmul.f32 %v13219_v57, %v3884_v28  ;;  %v18417_v28 = vld [vmem:[#allocation66_spill] sm:$0xff] }
 0x36b   : > { %v13486_v36 = vpop.permute.xlu1 %1575  ;;  %v13496_v19 = vpop.permute.xlu0 %1519  ;;  %v2345_v13 = vsel %vm2320_vm14, %v18415_v4, %v18414_v7  ;;  %v4010_v25 = vmul.f32 %v13229_v41, %v2340_v49  ;;  %v4513_v4 = vrot.slane %v13454_v5, 1  ;;  %v18418_v32 = vld [vmem:[#allocation62_spill] sm:$0xff]  ;;  %v18421_v58 = vld [vmem:[#allocation63_spill] sm:$0xff] }
 0x36c   : > { %18408 = vst [vmem:[#allocation36_spill] sm:$0xff] %v13486_v36  ;;  %18413 = vst [vmem:[#allocation30_spill] sm:$0xff] %v13496_v19  ;;  %v4385_v36 = vmax.f32 %v4257_v18, 0.0  ;;  %v4149_v18 = vmul.f32 %v13219_v57, %v3881_v14  ;;  %v4018_v19 = vmul.f32 %v13229_v41, %v2348_v10  ;;  %v4015_v63 = vmul.f32 %v13229_v41, %v2345_v13 }
 0x36d   : > { %3147 = vbcast.lane.b32.xlu1 %v13469_v9, 256  ;;  %3126 = vbcast.lane.b32.xlu0 %v13477_v55, 256  ;;  %v4272_v49 = vadd.f32 %v4144_v23, %v4010_v25  ;;  %v3870_v48 = vsel %vm2320_vm14, %v18418_v32, %v18417_v28  ;;  %v3862_v14 = vsel %vm2320_vm14, %v18421_v58, %v18420_v33  ;;  %v4397_v13 = vmax.f32 %v4269_v38, 0.0  ;;  %v18422_v25 = vld [vmem:[#allocation58_spill] sm:$0xff]  ;;  %v18424_v58 = vld [vmem:[#allocation59_spill] sm:$0xff] }
 0x36e   : > { %v4533_v22 = vrot.slane %v4385_v36, 4  ;;  %v13530_v10 = vrot.slane %v13268_v31, %v12052_v15  ;;  %v13532_v23 = vadd.f32 %v4152_v60, %v4018_v19  ;;  %v13540_v32 = vrot.slane %v13277_v1, %v12052_v15 }
 0x36f   : > { %v13514_v7 = vpop.permute.xlu1 %2126  ;;  %v13522_v16 = vpop.permute.xlu0 %2094  ;;  %v4277_v33 = vadd.f32 %v4149_v18, %v4015_v63  ;;  %v4138_v56 = vmul.f32 %v13219_v57, %v3870_v48  ;;  %v4531_v19 = vrot.slane %v13452_v3, 1  ;;  %v4560_v60 = vadd.f32 %v4559_v17, %v13438_v50  ;;  %v18429_v50 = vld [vmem:[#allocation64_spill] sm:$0xff] }
 0x370   : > { %18416 = vst [vmem:[#allocation37_spill] sm:$0xff] %v13514_v7  ;;  %18419 = vst [vmem:[#allocation31_spill] sm:$0xff] %v13522_v16  ;;  %v18423_v7 = vld [vmem:[#allocation54_spill] sm:$0xff]  ;;  %v18425_v16 = vld [vmem:[#allocation55_spill] sm:$0xff]  ;;  %v4130_v27 = vmul.f32 %v13219_v57, %v3862_v14  ;;  %v4619_v15 = vrot.slane %v4618_v52, 2  ;;  %v4582_v18 = vadd.f32 %v4581_v26, %v4393_v24  ;;  %v4534_v63 = vadd.f32 %v4533_v22, %v4385_v36 }
 0x371   : > { %3203 = vbcast.lane.b32.xlu1 %v13504_v0, 256  ;;  %v2334_v28 = vsel %vm2320_vm14, %v18423_v7, %v18422_v25  ;;  %3182 = vbcast.lane.b32.xlu0 %v13511_v53, 256  ;;  %v2326_v6 = vsel %vm2320_vm14, %v18425_v16, %v18424_v58  ;;  %v4666_v7 = vadd.f32 %v4665_v62, %v4407_v39  ;;  %v4400_v25 = vmax.f32 %v4272_v49, 0.0 }
 0x372   : > { %v4004_v34 = vmul.f32 %v13229_v41, %v2334_v28  ;;  %v4605_v16 = vrot.slane %v4397_v13, 4  ;;  %v4408_v48 = vmax.f32 %v13532_v23, 0.0  ;;  %v3996_v58 = vmul.f32 %v13229_v41, %v2326_v6  ;;  %v18433_v6 = vld [vmem:[#allocation60_spill] sm:$0xff] }
 0x373   : > { %v13546_v38 = vpop.permute.xlu1 %2186  ;;  %v13551_v37 = vpop.permute.xlu0 %2154  ;;  %v18430_v17 = vrot.slane %v13436_v51, 2  ;;  %v4405_v22 = vmax.f32 %v4277_v33, 0.0  ;;  %v13567_v62 = vadd.f32 %v4513_v4, %v13454_v5  ;;  %v4667_v49 = vrot.slane %v4666_v7, 2  ;;  %v18434_v23 = vld [vmem:[#allocation56_spill] sm:$0xff]  ;;  %v18437_v33 = vld [vmem:[#allocation65_spill] sm:$0xff] }
 0x374   : > { %18426 = vst [vmem:[#allocation51_spill] sm:$0xff] %v13546_v38  ;;  %18427 = vst [vmem:[#allocation45_spill] sm:$0xff] %v13551_v37  ;;  %v18428_v38 = vld [vmem:[#allocation68_spill] sm:$0xff]  ;;  %v4266_v36 = vadd.f32 %v4138_v56, %v4004_v34  ;;  %v4623_v14 = vrot.slane %v4400_v25, 4  ;;  %v2349_v28 = vsel %vm2320_vm14, %v18434_v23, %v18433_v6  ;;  %v4535_v37 = vrot.slane %v4534_v63, 2  ;;  %v18439_v23 = vld [vmem:[#allocation57_spill] sm:$0xff] }
 0x375   : > { %3308 = vbcast.lane.b32.xlu1 %v13530_v10, 256  ;;  %v3885_v39 = vsel %vm2320_vm14, %v18429_v50, %v18428_v38  ;;  %3252 = vbcast.lane.b32.xlu0 %v13540_v32, 256  ;;  %v4578_v26 = vadd.f32 %v18430_v17, %v13436_v51  ;;  %18432 = vst [vmem:[#allocation33_spill] sm:$0xff] %v13567_v62  ;;  %v18436_v51 = vld [vmem:[#allocation69_spill] sm:$0xff]  ;;  %v4561_v34 = vrot.slane %v4560_v60, 1  ;;  %v4583_v4 = vrot.slane %v4582_v18, 2 }
 0x376   : > { %v4258_v38 = vadd.f32 %v4130_v27, %v3996_v58  ;;  %v4153_v54 = vmul.f32 %v13219_v57, %v3885_v39  ;;  %v3877_v56 = vsel %vm2320_vm14, %v18437_v33, %v18436_v51  ;;  %v4620_v5 = vadd.f32 %v4619_v15, %v4618_v52  ;;  %v18438_v58 = vld [vmem:[#allocation61_spill] sm:$0xff] }
 0x377   : > { %v13564_v24 = vpop.permute.xlu1 %3007  ;;  %v13572_v50 = vpop.permute.xlu0 %2951  ;;  %v4606_v17 = vadd.f32 %v4605_v16, %v4397_v13  ;;  %v4653_v6 = vrot.slane %v4405_v22, 4  ;;  %v4019_v27 = vmul.f32 %v13229_v41, %v2349_v28  ;;  %v2341_v39 = vsel %vm2320_vm14, %v18439_v23, %v18438_v58  ;;  %v18449_v23 = vld [vmem:[#allocation78_spill] sm:$0xff] }
 0x378   : > { %18431 = vst [vmem:[#allocation39_spill] sm:$0xff] %v13564_v24  ;;  %18435 = vst [vmem:[#allocation50_spill] sm:$0xff] %v13572_v50  ;;  %v4671_v24 = vrot.slane %v4408_v48, 4  ;;  %v4394_v50 = vmax.f32 %v4266_v36, 0.0  ;;  %v4668_v51 = vadd.f32 %v4667_v49, %v4666_v7  ;;  %v4624_v33 = vadd.f32 %v4623_v14, %v4400_v25 }
 0x379   : > { %3743 = vbcast.lane.b32.xlu1 %v13469_v9, 264  ;;  %3731 = vbcast.lane.b32.xlu0 %v13477_v55, 264  ;;  %v4386_v9 = vmax.f32 %v4258_v38, 0.0  ;;  %v4145_v15 = vmul.f32 %v13219_v57, %v3877_v56  ;;  %v4536_v13 = vadd.f32 %v4535_v37, %v4534_v63  ;;  %v4281_v16 = vadd.f32 %v4153_v54, %v4019_v27  ;;  %v18448_v27 = vld [vmem:[#allocation82_spill] sm:$0xff] }
 0x37a   : > { %v13591_v55 = vadd.f32 %v4531_v19, %v13452_v3  ;;  %v4579_v28 = vrot.slane %v4578_v26, 1  ;;  %v4584_v59 = vadd.f32 %v4583_v4, %v4582_v18  ;;  %v4607_v58 = vrot.slane %v4606_v17, 2 }
 0x37b   : > { %v13584_v62 = vpop.permute.xlu1 %3112  ;;  %v13587_v52 = vpop.permute.xlu0 %3056  ;;  %v4011_v36 = vmul.f32 %v13229_v41, %v2341_v39  ;;  %v4621_v7 = vrot.slane %v4620_v5, 1  ;;  %v4672_v25 = vadd.f32 %v4671_v24, %v4408_v48  ;;  %v4654_v49 = vadd.f32 %v4653_v6, %v4405_v22 }
 0x37c   : > { %18440 = vst [vmem:[#allocation44_spill] sm:$0xff] %v13584_v62  ;;  %18441 = vst [vmem:[#allocation38_spill] sm:$0xff] %v13587_v52  ;;  %v4587_v14 = vrot.slane %v4394_v50, 4  ;;  %v13597_v37 = vadd.f32 %v4561_v34, %v4560_v60  ;;  %v4625_v54 = vrot.slane %v4624_v33, 2  ;;  %v4669_v19 = vrot.slane %v4668_v51, 1 }
 0x37d   : > { %3775 = vbcast.lane.b32.xlu1 %v13504_v0, 264  ;;  %18442 = vst [vmem:[#allocation32_spill] sm:$0xff] %v13591_v55  ;;  %3763 = vbcast.lane.b32.xlu0 %v13511_v53, 264  ;;  %v4539_v0 = vrot.slane %v4386_v9, 4  ;;  %v13599_v63 = vadd.f32 %v4145_v15, %v4011_v36  ;;  %v4409_v18 = vmax.f32 %v4281_v16, 0.0  ;;  %v13606_v53 = vrot.slane %v13156_v11, %v12112_v43  ;;  %v18454_v36 = vld [vmem:[#allocation70_spill] sm:$0xff] }
 0x37e   : > { %18444 = vst [vmem:[#allocation46_spill] sm:$0xff] %v13597_v37  ;;  %v13608_v48 = vadd.f32 %v4579_v28, %v4578_v26  ;;  %v4537_v22 = vrot.slane %v4536_v13, 1  ;;  %v4608_v24 = vadd.f32 %v4607_v58, %v4606_v17  ;;  %v13613_v60 = vrot.slane %v13158_v20, %v12112_v43  ;;  %v18453_v58 = vld [vmem:[#allocation74_spill] sm:$0xff] }
 0x37f   : > { %v13595_v38 = vpop.permute.xlu1 %3663  ;;  %v13601_v3 = vpop.permute.xlu0 %3631  ;;  %v13615_v56 = vadd.f32 %v4621_v7, %v4620_v5  ;;  %v4585_v34 = vrot.slane %v4584_v59, 1  ;;  %v4673_v4 = vrot.slane %v4672_v25, 2  ;;  %v4655_v6 = vrot.slane %v4654_v49, 2 }
 0x380   : > { %18443 = vst [vmem:[#allocation52_spill] sm:$0xff] %v13595_v38  ;;  %18445 = vst [vmem:[#allocation40_spill] sm:$0xff] %v13601_v3  ;;  %v3871_v39 = vsel %vm2320_vm14, %v18449_v23, %v18448_v27  ;;  %v4626_v15 = vadd.f32 %v4625_v54, %v4624_v33  ;;  %v4540_v17 = vadd.f32 %v4539_v0, %v4386_v9  ;;  %v4677_v5 = vrot.slane %v4409_v18, 4  ;;  %v18457_v27 = vld [vmem:[#allocation83_spill] sm:$0xff] }
 0x381   : > { %3835 = vbcast.lane.b32.xlu1 %v13530_v10, 264  ;;  %18446 = vst [vmem:[#allocation34_spill] sm:$0xff] %v13608_v48  ;;  %3803 = vbcast.lane.b32.xlu0 %v13540_v32, 264  ;;  %18447 = vst [vmem:[#allocation53_spill] sm:$0xff] %v13615_v56  ;;  %v4588_v10 = vadd.f32 %v4587_v14, %v4394_v50  ;;  %v4401_v32 = vmax.f32 %v13599_v63, 0.0  ;;  %v13625_v28 = vadd.f32 %v4669_v19, %v4668_v51  ;;  %v18458_v23 = vld [vmem:[#allocation79_spill] sm:$0xff] }
 0x382   : > { %v2335_v7 = vsel %vm2320_vm14, %v18454_v36, %v18453_v58  ;;  %v13633_v50 = vrot.slane %v13202_v61, %v12082_v29  ;;  %v13635_v14 = vadd.f32 %v4537_v22, %v4536_v13  ;;  %v4139_v33 = vmul.f32 %v13219_v57, %v3871_v39 }
 0x383   : > { %v13620_v26 = vpop.permute.xlu1 %3723  ;;  %v13623_v16 = vpop.permute.xlu0 %3691  ;;  %18452 = vst [vmem:[#allocation35_spill] sm:$0xff] %v13625_v28  ;;  %v13641_v51 = vrot.slane %v13202_v61, %v12085_v30  ;;  %v13643_v9 = vadd.f32 %v4585_v34, %v4584_v59  ;;  %v4609_v54 = vrot.slane %v4608_v24, 1  ;;  %v4674_v0 = vadd.f32 %v4673_v4, %v4672_v25  ;;  %v18461_v59 = vld [vmem:[#allocation75_spill] sm:$0xff]  ;;  %v18464_v4 = vld [vmem:[#allocation80_spill] sm:$0xff] }
 0x384   : > { %18450 = vst [vmem:[#allocation47_spill] sm:$0xff] %v13620_v26  ;;  %18451 = vst [vmem:[#allocation41_spill] sm:$0xff] %v13623_v16  ;;  %v4656_v63 = vadd.f32 %v4655_v6, %v4654_v49  ;;  %v4589_v19 = vrot.slane %v4588_v10, 2  ;;  %v3863_v58 = vsel %vm2320_vm14, %v18458_v23, %v18457_v27  ;;  %v4541_v22 = vrot.slane %v4540_v17, 2  ;;  %v18462_v34 = vld [vmem:[#allocation71_spill] sm:$0xff]  ;;  %v18463_v49 = vld [vmem:[#allocation84_spill] sm:$0xff] }
 0x385   : > { %1673 = vbcast.lane.b32.xlu1 %v13606_v53, 256  ;;  %18455 = vst [vmem:[#allocation66_spill] sm:$0xff] %v13635_v14  ;;  %1617 = vbcast.lane.b32.xlu0 %v13613_v60, 256  ;;  %18456 = vst [vmem:[#allocation62_spill] sm:$0xff] %v13643_v9  ;;  %v4629_v39 = vrot.slane %v4401_v32, 4  ;;  %v4005_v36 = vmul.f32 %v13229_v41, %v2335_v7  ;;  %v4627_v16 = vrot.slane %v4626_v15, 1 }
 0x386   : > { %v4678_v62 = vadd.f32 %v4677_v5, %v4409_v18  ;;  %v2327_v25 = vsel %vm2320_vm14, %v18462_v34, %v18461_v59  ;;  %v3886_v6 = vsel %vm2320_vm14, %v18464_v4, %v18463_v49  ;;  %v13662_v27 = vrot.slane %v13198_v40, %v12082_v29  ;;  %v18465_v23 = vld [vmem:[#allocation76_spill] sm:$0xff]  ;;  %v18484_v9 = vld [vmem:[#allocation91_spill] sm:$0xff] }
 0x387   : > { %v13648_v13 = vpop.permute.xlu1 %1582  ;;  %v13651_v52 = vpop.permute.xlu0 %1526  ;;  %v18466_v7 = vld [vmem:[#allocation72_spill] sm:$0xff]  ;;  %v4131_v18 = vmul.f32 %v13219_v57, %v3863_v58  ;;  %v13671_v5 = vrot.slane %v13198_v40, %v12085_v30  ;;  %v13673_v59 = vadd.f32 %v4589_v19, %v4588_v10  ;;  %v13677_v49 = vadd.f32 %v4609_v54, %v4608_v24  ;;  %v18472_v54 = vld [vmem:[#allocation77_spill] sm:$0xff] }
 0x388   : > { %18459 = vst [vmem:[#allocation67_spill] sm:$0xff] %v13648_v13  ;;  %18460 = vst [vmem:[#allocation63_spill] sm:$0xff] %v13651_v52  ;;  %v2350_v52 = vsel %vm2320_vm14, %v18466_v7, %v18465_v23  ;;  %v4267_v13 = vadd.f32 %v4139_v33, %v4005_v36  ;;  %v4657_v4 = vrot.slane %v4656_v63, 1  ;;  %v4675_v26 = vrot.slane %v4674_v0, 1  ;;  %v18469_v36 = vld [vmem:[#allocation85_spill] sm:$0xff] }
 0x389   : > { %1722 = vbcast.lane.b32.xlu1 %v13633_v50, 256  ;;  %1701 = vbcast.lane.b32.xlu0 %v13641_v51, 256  ;;  %18468 = vst [vmem:[#allocation54_spill] sm:$0xff] %v13677_v49  ;;  %v13679_v3 = vadd.f32 %v4541_v22, %v4540_v17  ;;  %v3997_v33 = vmul.f32 %v13229_v41, %v2327_v25  ;;  %v18470_v23 = vld [vmem:[#allocation81_spill] sm:$0xff]  ;;  %v4679_v10 = vrot.slane %v4678_v62, 2  ;;  %v18475_v49 = vld [vmem:[#allocation94_spill] sm:$0xff] }
 0x38a   : > { %v4154_v58 = vmul.f32 %v13219_v57, %v3886_v6  ;;  %v3878_v7 = vsel %vm2320_vm14, %v18470_v23, %v18469_v36  ;;  %v13688_v19 = vadd.f32 %v4629_v39, %v4401_v32  ;;  %v4020_v24 = vmul.f32 %v13229_v41, %v2350_v52  ;;  %v18474_v6 = vld [vmem:[#allocation98_spill] sm:$0xff]  ;;  %v18476_v23 = vld [vmem:[#allocation99_spill] sm:$0xff] }
 0x38b   : > { %v13675_v34 = vpop.permute.xlu1 %2190  ;;  %v13686_v38 = vpop.permute.xlu0 %2158  ;;  %v4395_v22 = vmax.f32 %v4267_v13, 0.0  ;;  %v13695_v25 = vadd.f32 %v4131_v18, %v3997_v33  ;;  %v3872_v36 = vsel %vm2320_vm14, %v18475_v49, %v18474_v6  ;;  %v4146_v52 = vmul.f32 %v13219_v57, %v3878_v7  ;;  %v18482_v33 = vld [vmem:[#allocation90_spill] sm:$0xff] }
 0x38c   : > { %18467 = vst [vmem:[#allocation58_spill] sm:$0xff] %v13675_v34  ;;  %18471 = vst [vmem:[#allocation59_spill] sm:$0xff] %v13686_v38  ;;  %v18473_v34 = vld [vmem:[#allocation73_spill] sm:$0xff]  ;;  %v18477_v38 = vld [vmem:[#allocation95_spill] sm:$0xff]  ;;  %v13711_v13 = vadd.f32 %v4675_v26, %v4674_v0  ;;  %v13713_v18 = vadd.f32 %v4154_v58, %v4020_v24  ;;  %v4140_v26 = vmul.f32 %v13219_v57, %v3872_v36 }
 0x38d   : > { %v2342_v17 = vsel %vm2320_vm14, %v18473_v34, %v18472_v54  ;;  %1778 = vbcast.lane.b32.xlu1 %v13662_v27, 256  ;;  %v3864_v32 = vsel %vm2320_vm14, %v18477_v38, %v18476_v23  ;;  %1757 = vbcast.lane.b32.xlu0 %v13671_v5, 256  ;;  %v13707_v34 = vadd.f32 %v4627_v16, %v4626_v15  ;;  %v18483_v49 = vld [vmem:[#allocation86_spill] sm:$0xff]  ;;  %v18485_v38 = vld [vmem:[#allocation87_spill] sm:$0xff]  ;;  %v4631_v15 = vrot.slane %v13688_v19, 2  ;;  %v18487_v36 = vld [vmem:[#allocation100_spill] sm:$0xff] }
 0x38e   : > { %v13709_v54 = vadd.f32 %v4657_v4, %v4656_v63  ;;  %18481 = vst [vmem:[#allocation60_spill] sm:$0xff] %v13711_v13  ;;  %v2336_v6 = vsel %vm2320_vm14, %v18483_v49, %v18482_v33  ;;  %v2328_v23 = vsel %vm2320_vm14, %v18485_v38, %v18484_v9  ;;  %v4012_v16 = vmul.f32 %v13229_v41, %v2342_v17  ;;  %v18488_v49 = vld [vmem:[#allocation96_spill] sm:$0xff]  ;;  %v18492_v38 = vld [vmem:[#allocation101_spill] sm:$0xff] }
 0x38f   : > { %v13705_v39 = vpop.permute.xlu1 %3119  ;;  %18479 = vst [vmem:[#allocation68_spill] sm:$0xff] %v13707_v34  ;;  %v13721_v14 = vpop.permute.xlu0 %3063  ;;  %v4132_v0 = vmul.f32 %v13219_v57, %v3864_v32  ;;  %v13729_v63 = vadd.f32 %v4679_v10, %v4678_v62  ;;  %v4593_v4 = vrot.slane %v4395_v22, 4  ;;  %v4387_v58 = vmax.f32 %v13695_v25, 0.0  ;;  %v18490_v10 = vld [vmem:[#allocation92_spill] sm:$0xff]  ;;  %v18493_v9 = vld [vmem:[#allocation97_spill] sm:$0xff] }
 0x390   : > { %18478 = vst [vmem:[#allocation55_spill] sm:$0xff] %v13705_v39  ;;  %18480 = vst [vmem:[#allocation64_spill] sm:$0xff] %v13709_v54  ;;  %v13734_v24 = vadd.f32 %v4146_v52, %v4012_v16  ;;  %v4006_v33 = vmul.f32 %v13229_v41, %v2336_v6  ;;  %v3998_v17 = vmul.f32 %v13229_v41, %v2328_v23  ;;  %v4410_v62 = vmax.f32 %v13713_v18, 0.0  ;;  %v18491_v25 = vld [vmem:[#allocation88_spill] sm:$0xff]  ;;  %v18495_v6 = vld [vmem:[#allocation106_spill] sm:$0xff] }
 0x391   : > { %18486 = vst [vmem:[#allocation56_spill] sm:$0xff] %v13721_v14  ;;  %2242 = vbcast.lane.b32.xlu1 %v13606_v53, 264  ;;  %2210 = vbcast.lane.b32.xlu0 %v13613_v60, 264  ;;  %v3887_v32 = vsel %vm2320_vm14, %v18488_v49, %v18487_v36  ;;  %v2351_v60 = vsel %vm2320_vm14, %v18491_v25, %v18490_v10  ;;  %v18494_v16 = vld [vmem:[#allocation108_spill] sm:$0xff]  ;;  %v18497_v14 = vld [vmem:[#allocation93_spill] sm:$0xff]  ;;  %v18500_v10 = vld [vmem:[#allocation107_spill] sm:$0xff] }
 0x392   : > { %v3879_v52 = vsel %vm2320_vm14, %v18493_v9, %v18492_v38  ;;  %v3888_v23 = vsel %vm2320_vm14, %v18495_v6, %v18494_v16  ;;  %v18498_v36 = vld [vmem:[#allocation89_spill] sm:$0xff]  ;;  %v13758_v39 = vadd.f32 %v4140_v26, %v4006_v33  ;;  %v13760_v18 = vadd.f32 %v4132_v0, %v3998_v17  ;;  %v18501_v6 = vld [vmem:[#allocation104_spill] sm:$0xff]  ;;  %v18504_v33 = vld [vmem:[#allocation103_spill] sm:$0xff] }
 0x393   : > { %v13741_v53 = vpop.permute.xlu1 %3727  ;;  %v13753_v7 = vpop.permute.xlu0 %3695  ;;  %v2343_v49 = vsel %vm2320_vm14, %v18498_v36, %v18497_v14  ;;  %v4594_v9 = vadd.f32 %v4593_v4, %v4395_v22  ;;  %v4545_v38 = vrot.slane %v4387_v58, 4  ;;  %v4155_v16 = vmul.f32 %v13219_v57, %v3887_v32  ;;  %v18503_v0 = vld [vmem:[#allocation105_spill] sm:$0xff] }
 0x394   : > { %18489 = vst [vmem:[#allocation69_spill] sm:$0xff] %v13741_v53  ;;  %18496 = vst [vmem:[#allocation65_spill] sm:$0xff] %v13753_v7  ;;  %v18499_v53 = vld [vmem:[#allocation109_spill] sm:$0xff]  ;;  %v18502_v7 = vld [vmem:[#allocation102_spill] sm:$0xff]  ;;  %v4402_v14 = vmax.f32 %v13734_v24, 0.0  ;;  %v4147_v26 = vmul.f32 %v13219_v57, %v3879_v52  ;;  %v2344_v17 = vsel %vm2320_vm14, %v18504_v33, %v18503_v0  ;;  %v4683_v4 = vrot.slane %v4410_v62, 4 }
 0x395   : > { %v3880_v25 = vsel %vm2320_vm14, %v18500_v10, %v18499_v53  ;;  %2270 = vbcast.lane.b32.xlu1 %v13633_v50, 264  ;;  %v2352_v13 = vsel %vm2320_vm14, %v18502_v7, %v18501_v6  ;;  %2258 = vbcast.lane.b32.xlu0 %v13641_v51, 264  ;;  %v4156_v50 = vmul.f32 %v13219_v57, %v3888_v23  ;;  %v4396_v24 = vmax.f32 %v13758_v39, 0.0  ;;  %v18513_v34 = vld [vmem:[#allocation117_spill] sm:$0xff] }
 0x396   : > { %v4021_v32 = vmul.f32 %v13229_v41, %v2351_v60  ;;  %v4013_v53 = vmul.f32 %v13229_v41, %v2343_v49  ;;  %v4148_v7 = vmul.f32 %v13219_v57, %v3880_v25  ;;  %v4388_v52 = vmax.f32 %v13760_v18, 0.0  ;;  %v18507_v49 = vld [vmem:[#allocation116_spill] sm:$0xff]  ;;  %v18508_v25 = vld [vmem:[#allocation114_spill] sm:$0xff] }
 0x397   : > { %v13777_v22 = vpop.permute.xlu1 %1652  ;;  %v13782_v51 = vpop.permute.xlu0 %1596  ;;  %v4022_v36 = vmul.f32 %v13229_v41, %v2352_v13  ;;  %v13790_v23 = vrot.slane %v13175_v47, %v12112_v43  ;;  %v4014_v60 = vmul.f32 %v13229_v41, %v2344_v17  ;;  %v3898_v6 = vsel %vm2320_vm14, %v18508_v25, %v18507_v49 }
 0x398   : > { %18505 = vst [vmem:[#allocation61_spill] sm:$0xff] %v13777_v22  ;;  %18506 = vst [vmem:[#allocation57_spill] sm:$0xff] %v13782_v51  ;;  %v13792_v10 = vadd.f32 %v4155_v16, %v4021_v32  ;;  %v13801_v39 = vrot.slane %v13179_v21, %v12112_v43  ;;  %v4546_v13 = vadd.f32 %v4545_v38, %v4387_v58  ;;  %v4595_v33 = vrot.slane %v4594_v9, 2  ;;  %v18510_v51 = vld [vmem:[#allocation112_spill] sm:$0xff]  ;;  %v18511_v22 = vld [vmem:[#allocation110_spill] sm:$0xff] }
 0x399   : > { %2302 = vbcast.lane.b32.xlu1 %v13662_v27, 264  ;;  %2290 = vbcast.lane.b32.xlu0 %v13671_v5, 264  ;;  %v13804_v27 = vadd.f32 %v4631_v15, %v13688_v19  ;;  %v4275_v18 = vadd.f32 %v4147_v26, %v4013_v53  ;;  %v4284_v0 = vadd.f32 %v4156_v50, %v4022_v36  ;;  %v4635_v17 = vrot.slane %v4402_v14, 4  ;;  %v18514_v19 = vld [vmem:[#allocation115_spill] sm:$0xff]  ;;  %v18515_v53 = vld [vmem:[#allocation113_spill] sm:$0xff] }
 0x39a   : > { %v4276_v32 = vadd.f32 %v4148_v7, %v4014_v60  ;;  %v2362_v49 = vsel %vm2320_vm14, %v18511_v22, %v18510_v51  ;;  %v4684_v25 = vadd.f32 %v4683_v4, %v4410_v62  ;;  %v4166_v54 = vmul.f32 %v13219_v57, %v3898_v6  ;;  %v18516_v7 = vld [vmem:[#allocation111_spill] sm:$0xff] }
 0x39b   : > { %v13806_v16 = vpop.permute.xlu1 %2230  ;;  %v13811_v5 = vpop.permute.xlu0 %2198  ;;  %v3890_v15 = vsel %vm2320_vm14, %v18514_v19, %v18513_v34  ;;  %v13820_v58 = vrot.slane %v13277_v1, %v12082_v29  ;;  %v4599_v38 = vrot.slane %v4396_v24, 4  ;;  %v4551_v26 = vrot.slane %v4388_v52, 4 }
 0x39c   : > { %18509 = vst [vmem:[#allocation82_spill] sm:$0xff] %v13806_v16  ;;  %18512 = vst [vmem:[#allocation78_spill] sm:$0xff] %v13811_v5  ;;  %v4411_v50 = vmax.f32 %v13792_v10, 0.0  ;;  %v13826_v62 = vrot.slane %v13277_v1, %v12085_v30  ;;  %v4403_v22 = vmax.f32 %v4275_v18, 0.0  ;;  %v4412_v4 = vmax.f32 %v4284_v0, 0.0 }
 0x39d   : > { %3210 = vbcast.lane.b32.xlu1 %v13790_v23, 256  ;;  %3154 = vbcast.lane.b32.xlu0 %v13801_v39, 256  ;;  %v4032_v34 = vmul.f32 %v13229_v41, %v2362_v49  ;;  %v2354_v51 = vsel %vm2320_vm14, %v18516_v7, %v18515_v53  ;;  %v4596_v60 = vadd.f32 %v4595_v33, %v4594_v9  ;;  %v4547_v6 = vrot.slane %v4546_v13, 2 }
 0x39e   : > { %v4404_v19 = vmax.f32 %v4276_v32, 0.0  ;;  %v4158_v10 = vmul.f32 %v13219_v57, %v3890_v15  ;;  %v4685_v16 = vrot.slane %v4684_v25, 2  ;;  %v4636_v28 = vadd.f32 %v4635_v17, %v4402_v14 }
 0x39f   : > { %v13832_v36 = vpop.permute.xlu1 %3189  ;;  %v13835_v5 = vpop.permute.xlu0 %3133  ;;  %v4294_v56 = vadd.f32 %v4166_v54, %v4032_v34  ;;  %v13840_v18 = vrot.slane %v13268_v31, %v12082_v29  ;;  %v4600_v0 = vadd.f32 %v4599_v38, %v4396_v24  ;;  %v4689_v49 = vrot.slane %v4411_v50, 4 }
 0x3a0   : > { %18517 = vst [vmem:[#allocation74_spill] sm:$0xff] %v13832_v36  ;;  %18518 = vst [vmem:[#allocation70_spill] sm:$0xff] %v13835_v5  ;;  %v4024_v53 = vmul.f32 %v13229_v41, %v2354_v51  ;;  %v13846_v57 = vrot.slane %v13268_v31, %v12085_v30  ;;  %v4552_v9 = vadd.f32 %v4551_v26, %v4388_v52  ;;  %v4641_v33 = vrot.slane %v4403_v22, 4 }
 0x3a1   : > { %3259 = vbcast.lane.b32.xlu1 %v13820_v58, 256  ;;  %3238 = vbcast.lane.b32.xlu0 %v13826_v62, 256  ;;  %v4695_v14 = vrot.slane %v4412_v4, 4  ;;  %v18520_v17 = vrot.slane %v13673_v59, 1  ;;  %v4548_v24 = vadd.f32 %v4547_v6, %v4546_v13  ;;  %v4647_v15 = vrot.slane %v4404_v19, 4 }
 0x3a2   : > { %v13855_v38 = vadd.f32 %v4158_v10, %v4024_v53  ;;  %v4681_v34 = vrot.slane %v13729_v63, 1  ;;  %v4637_v7 = vrot.slane %v4636_v28, 2  ;;  %v4422_v51 = vmax.f32 %v4294_v56, 0.0 }
 0x3a3   : > { %v13848_v54 = vpop.permute.xlu1 %3767  ;;  %v13853_v32 = vadd.f32 %v18520_v17, %v13673_v59  ;;  %v13857_v41 = vpop.permute.xlu0 %3735  ;;  %v4633_v52 = vrot.slane %v13804_v27, 1  ;;  %v4597_v26 = vrot.slane %v4596_v60, 1  ;;  %v4686_v29 = vadd.f32 %v4685_v16, %v4684_v25 }
 0x3a4   : > { %18519 = vst [vmem:[#allocation83_spill] sm:$0xff] %v13848_v54  ;;  %18522 = vst [vmem:[#allocation75_spill] sm:$0xff] %v13857_v41  ;;  %v4601_v30 = vrot.slane %v4600_v0, 2  ;;  %v4690_v5 = vadd.f32 %v4689_v49, %v4411_v50  ;;  %v4553_v59 = vrot.slane %v4552_v9, 2  ;;  %v4642_v13 = vadd.f32 %v4641_v33, %v4403_v22  ;;  %v18611_v54 = vld [vmem:[#allocation179_spill] sm:$0xff] }
 0x3a5   : > { %18521 = vst [vmem:[#allocation79_spill] sm:$0xff] %v13853_v32  ;;  %3315 = vbcast.lane.b32.xlu1 %v13840_v18, 256  ;;  %3294 = vbcast.lane.b32.xlu0 %v13846_v57, 256  ;;  %v4696_v6 = vadd.f32 %v4695_v14, %v4412_v4  ;;  %v11867_v53 = vmov 0   ;;  %v18524_v56 = vrot.slane %v13679_v3, 1  ;;  %v4648_v41 = vadd.f32 %v4647_v15, %v4404_v19  ;;  %v18530_v19 = vld [vmem:[#allocation130_spill] sm:$0xff] }
 0x3a6   : > { %11557 = vset.pattern.permute.xlu1 %v11867_v53  ;;  %11556 = vset.pattern.permute.xlu0 %v11867_v53  ;;  %v4414_v16 = vmax.f32 %v13855_v38, 0.0  ;;  %v13874_v50 = vadd.f32 %v4681_v34, %v13729_v63  ;;  %v4549_v22 = vrot.slane %v4548_v24, 1  ;;  %v4638_v4 = vadd.f32 %v4637_v7, %v4636_v28  ;;  %v18531_v15 = vld [vmem:[#allocation126_spill] sm:$0xff]  ;;  %v18532_v7 = vld [vmem:[#allocation131_spill] sm:$0xff] }
 0x3a7   : > { %v13863_v10 = vpop.permute.xlu1 %1659  ;;  %v13868_v17 = vadd.f32 %v18524_v56, %v13679_v3  ;;  %v13871_v25 = vpop.permute.xlu0 %1603  ;;  %v4755_v49 = vrot.slane %v4422_v51, 4  ;;  %v13878_v33 = vadd.f32 %v4633_v52, %v13804_v27  ;;  %v13880_v14 = vadd.f32 %v4597_v26, %v4596_v60 }
 0x3a8   : > { %18523 = vst [vmem:[#allocation71_spill] sm:$0xff] %v13863_v10  ;;  %18526 = vst [vmem:[#allocation80_spill] sm:$0xff] %v13871_v25  ;;  %v4602_v3 = vadd.f32 %v4601_v30, %v4600_v0  ;;  %v4691_v53 = vrot.slane %v4690_v5, 2  ;;  %v3899_v38 = vsel %vm2320_vm14, %v18531_v15, %v18530_v19  ;;  %v4687_v63 = vrot.slane %v4686_v29, 1  ;;  %v18533_v25 = vld [vmem:[#allocation127_spill] sm:$0xff]  ;;  %v18535_v30 = vld [vmem:[#allocation122_spill] sm:$0xff] }
 0x3a9   : > { %18525 = vst [vmem:[#allocation84_spill] sm:$0xff] %v13868_v17  ;;  %18527 = vst [vmem:[#allocation76_spill] sm:$0xff] %v13874_v50  ;;  %3779 = vbcast.lane.b32.xlu1 %v13790_v23, 264  ;;  %3747 = vbcast.lane.b32.xlu0 %v13801_v39, 264  ;;  %v4554_v34 = vadd.f32 %v4553_v59, %v4552_v9  ;;  %v4643_v56 = vrot.slane %v4642_v13, 2  ;;  %v4697_v28 = vrot.slane %v4696_v6, 2 }
 0x3aa   : > { %18528 = vst [vmem:[#allocation72_spill] sm:$0xff] %v13878_v33  ;;  %18529 = vst [vmem:[#allocation85_spill] sm:$0xff] %v13880_v14  ;;  %v3891_v23 = vsel %vm2320_vm14, %v18533_v25, %v18532_v7  ;;  %v4649_v60 = vrot.slane %v4648_v41, 2  ;;  %v4707_v52 = vrot.slane %v4414_v16, 4  ;;  %v18536_v0 = vld [vmem:[#allocation118_spill] sm:$0xff]  ;;  %v13896_v19 = vadd.f32 %v4549_v22, %v4548_v24  ;;  %v18539_v9 = vld [vmem:[#allocation123_spill] sm:$0xff] }
 0x3ab   : > { %v13889_v27 = vpop.permute.xlu1 %1764  ;;  %v2363_v26 = vsel %vm2320_vm14, %v18536_v0, %v18535_v30  ;;  %v13894_v10 = vpop.permute.xlu0 %1708  ;;  %v4756_v39 = vadd.f32 %v4755_v49, %v4422_v51  ;;  %v18540_v59 = vld [vmem:[#allocation119_spill] sm:$0xff]  ;;  %v13904_v25 = vld [vmem:[%s17814_s7] ss:$0 sm:$0xff]  ;;  %v4692_v30 = vadd.f32 %v4691_v53, %v4690_v5  ;;  %v13910_v24 = vadd.f32 %v4687_v63, %v4686_v29  ;;  %v18544_v29 = vld [vmem:[#allocation128_spill] sm:$0xff] }
 0x3ac   : > { %18534 = vst [vmem:[#allocation81_spill] sm:$0xff] %v13889_v27  ;;  %18537 = vst [vmem:[#allocation77_spill] sm:$0xff] %v13894_v10  ;;  %v2355_v15 = vsel %vm2320_vm14, %v18540_v59, %v18539_v9  ;;  %v4167_v7 = vmul.f32 %v13904_v25, %v3899_v38  ;;  %v4639_v27 = vrot.slane %v4638_v4, 1  ;;  %v4159_v0 = vmul.f32 %v13904_v25, %v3891_v23  ;;  %v13915_v9 = vld [vmem:[%s17813_s6] ss:$0 sm:$0xff]  ;;  %v18547_v10 = vld [vmem:[#allocation124_spill] sm:$0xff] }
 0x3ad   : > { %18538 = vst [vmem:[#allocation73_spill] sm:$0xff] %v13896_v19  ;;  %3807 = vbcast.lane.b32.xlu1 %v13820_v58, 264  ;;  %3795 = vbcast.lane.b32.xlu0 %v13826_v62, 264  ;;  %18541 = vst [vmem:[#allocation98_spill] sm:$0xff] %v13910_v24  ;;  %v4603_v51 = vrot.slane %v4602_v3, 1  ;;  %v4644_v22 = vadd.f32 %v4643_v56, %v4642_v13  ;;  %v4698_v49 = vadd.f32 %v4697_v28, %v4696_v6  ;;  %v18543_v62 = vld [vmem:[#allocation132_spill] sm:$0xff] }
 0x3ae   : > { %v4033_v38 = vmul.f32 %v13915_v9, %v2363_v26  ;;  %v4555_v58 = vrot.slane %v4554_v34, 1  ;;  %v4650_v5 = vadd.f32 %v4649_v60, %v4648_v41  ;;  %v4708_v53 = vadd.f32 %v4707_v52, %v4414_v16  ;;  %v18548_v41 = vld [vmem:[#allocation120_spill] sm:$0xff]  ;;  %v18588_v19 = vld [vmem:[#allocation139_spill] sm:$0xff]  ;;  %v18612_v50 = vld [vmem:[#allocation173_spill] sm:$0xff] }
 0x3af   : > { %v13918_v59 = vpop.permute.xlu1 %2234  ;;  %v4025_v23 = vmul.f32 %v13915_v9, %v2355_v15  ;;  %v3914_v63 = vsel %vm2320_vm14, %v18544_v29, %v18543_v62  ;;  %v13924_v13 = vpop.permute.xlu0 %2202  ;;  %v4757_v6 = vrot.slane %v4756_v39, 2  ;;  %v1678_v28 = vrot.slane %v13156_v11, %v12163_v8  ;;  %v18552_v29 = vld [vmem:[#allocation133_spill] sm:$0xff] }
 0x3b0   : > { %18542 = vst [vmem:[#allocation94_spill] sm:$0xff] %v13918_v59  ;;  %18545 = vst [vmem:[#allocation99_spill] sm:$0xff] %v13924_v13  ;;  %v4295_v56 = vadd.f32 %v4167_v7, %v4033_v38  ;;  %v13929_v26 = vadd.f32 %v4639_v27, %v4638_v4  ;;  %v2378_v16 = vsel %vm2320_vm14, %v18548_v41, %v18547_v10  ;;  %v4693_v15 = vrot.slane %v4692_v30, 1  ;;  %v18553_v10 = vld [vmem:[#allocation129_spill] sm:$0xff] }
 0x3b1   : > { %3839 = vbcast.lane.b32.xlu1 %v13840_v18, 264  ;;  %v13934_v60 = vadd.f32 %v4159_v0, %v4025_v23  ;;  %3827 = vbcast.lane.b32.xlu0 %v13846_v57, 264  ;;  %v1622_v52 = vrot.slane %v13158_v20, %v12163_v8  ;;  %v4182_v7 = vmul.f32 %v13904_v25, %v3914_v63  ;;  %v4645_v27 = vrot.slane %v4644_v22, 1 }
 0x3b2   : > { %18546 = vst [vmem:[#allocation95_spill] sm:$0xff] %v13929_v26  ;;  %v13942_v38 = vadd.f32 %v4555_v58, %v4554_v34  ;;  %v13944_v4 = vadd.f32 %v4603_v51, %v4602_v3  ;;  %v4709_v62 = vrot.slane %v4708_v53, 2  ;;  %v3906_v0 = vsel %vm2320_vm14, %v18553_v10, %v18552_v29  ;;  %v18555_v34 = vld [vmem:[#allocation125_spill] sm:$0xff] }
 0x3b3   : > { %v13940_v18 = vpop.permute.xlu1 %2294  ;;  %v13949_v23 = vpop.permute.xlu0 %2262  ;;  %v4651_v57 = vrot.slane %v4650_v5, 1  ;;  %v4699_v41 = vrot.slane %v4698_v49, 1  ;;  %v13951_v13 = vadd.f32 %v4757_v6, %v4756_v39  ;;  %v4048_v63 = vmul.f32 %v13915_v9, %v2378_v16  ;;  %v18556_v51 = vld [vmem:[#allocation121_spill] sm:$0xff]  ;;  %v18559_v16 = vld [vmem:[#allocation146_spill] sm:$0xff] }
 0x3b4   : > { %18549 = vst [vmem:[#allocation90_spill] sm:$0xff] %v13940_v18  ;;  %18550 = vst [vmem:[#allocation86_spill] sm:$0xff] %v13942_v38  ;;  %v4423_v59 = vmax.f32 %v4295_v56, 0.0  ;;  %v1783_v3 = vrot.slane %v13198_v40, %v12112_v43  ;;  %v2370_v58 = vsel %vm2320_vm14, %v18556_v51, %v18555_v34  ;;  %v4415_v18 = vmax.f32 %v13934_v60, 0.0  ;;  %v18558_v56 = vld [vmem:[#allocation152_spill] sm:$0xff]  ;;  %v18563_v51 = vld [vmem:[#allocation134_spill] sm:$0xff] }
 0x3b5   : > { %18551 = vst [vmem:[#allocation91_spill] sm:$0xff] %v13944_v4  ;;  %18554 = vst [vmem:[#allocation87_spill] sm:$0xff] %v13949_v23  ;;  %1680 = vbcast.lane.b32.xlu1 %v1678_v28, 256  ;;  %1624 = vbcast.lane.b32.xlu0 %v1622_v52, 256  ;;  %v1727_v29 = vrot.slane %v13202_v61, %v12112_v43  ;;  %v13962_v10 = vadd.f32 %v4693_v15, %v4692_v30  ;;  %v18562_v60 = vld [vmem:[#allocation140_spill] sm:$0xff] }
 0x3b6   : > { %v13964_v39 = vadd.f32 %v4182_v7, %v4048_v63  ;;  %v4174_v6 = vmul.f32 %v13904_v25, %v3906_v0  ;;  %v3892_v23 = vsel %vm2320_vm14, %v18559_v16, %v18558_v56  ;;  %v13972_v38 = vadd.f32 %v4645_v27, %v4644_v22  ;;  %v18567_v56 = vld [vmem:[#allocation153_spill] sm:$0xff]  ;;  %v18568_v16 = vld [vmem:[#allocation147_spill] sm:$0xff] }
 0x3b7   : > { %18557 = vst [vmem:[#allocation100_spill] sm:$0xff] %v13962_v10  ;;  %v13970_v4 = vpop.permute.xlu1 %3196  ;;  %v13974_v34 = vadd.f32 %v4709_v62, %v4708_v53  ;;  %v2356_v24 = vsel %vm2320_vm14, %v18563_v51, %v18562_v60  ;;  %v13979_v30 = vpop.permute.xlu0 %3140  ;;  %v13981_v15 = vadd.f32 %v4651_v57, %v4650_v5  ;;  %v13983_v7 = vadd.f32 %v4699_v41, %v4698_v49  ;;  %v18569_v62 = vld [vmem:[#allocation141_spill] sm:$0xff]  ;;  %v18570_v10 = vld [vmem:[#allocation135_spill] sm:$0xff]  ;;  %v18571_v57 = vld [vmem:[#allocation154_spill] sm:$0xff] }
 0x3b8   : > { %18560 = vst [vmem:[#allocation96_spill] sm:$0xff] %v13970_v4  ;;  %18561 = vst [vmem:[#allocation92_spill] sm:$0xff] %v13972_v38  ;;  %v4040_v0 = vmul.f32 %v13915_v9, %v2370_v58  ;;  %v4761_v63 = vrot.slane %v4423_v59, 4  ;;  %v3889_v22 = vsel %vm2320_vm14, %v18568_v16, %v18567_v56  ;;  %v4759_v53 = vrot.slane %v13951_v13, 1  ;;  %v18572_v49 = vld [vmem:[#allocation148_spill] sm:$0xff]  ;;  %v18573_v16 = vld [vmem:[#allocation155_spill] sm:$0xff] }
 0x3b9   : > { %18564 = vst [vmem:[#allocation88_spill] sm:$0xff] %v13979_v30  ;;  %18565 = vst [vmem:[#allocation101_spill] sm:$0xff] %v13981_v15  ;;  %1785 = vbcast.lane.b32.xlu1 %v1783_v3, 256  ;;  %v4713_v27 = vrot.slane %v4415_v18, 4  ;;  %v2353_v60 = vsel %vm2320_vm14, %v18570_v10, %v18569_v62  ;;  %v4160_v5 = vmul.f32 %v13904_v25, %v3892_v23  ;;  %1729 = vbcast.lane.b32.xlu0 %v1727_v29, 256  ;;  %v18576_v10 = vld [vmem:[#allocation142_spill] sm:$0xff] }
 0x3ba   : > { %18566 = vst [vmem:[#allocation97_spill] sm:$0xff] %v13983_v7  ;;  %v3900_v41 = vsel %vm2320_vm14, %v18572_v49, %v18571_v57  ;;  %v4438_v58 = vmax.f32 %v13964_v39, 0.0  ;;  %v13998_v51 = vadd.f32 %v4174_v6, %v4040_v0  ;;  %v4026_v56 = vmul.f32 %v13915_v9, %v2356_v24  ;;  %v18574_v7 = vld [vmem:[#allocation149_spill] sm:$0xff]  ;;  %v18577_v62 = vld [vmem:[#allocation136_spill] sm:$0xff]  ;;  %v18579_v49 = vld [vmem:[#allocation150_spill] sm:$0xff] }
 0x3bb   : > { %v3897_v15 = vsel %vm2320_vm14, %v18574_v7, %v18573_v16  ;;  %v14004_v30 = vpop.permute.xlu1 %3301  ;;  %v2364_v23 = vsel %vm2320_vm14, %v18577_v62, %v18576_v10  ;;  %v4157_v4 = vmul.f32 %v13904_v25, %v3889_v22  ;;  %v18578_v57 = vld [vmem:[#allocation156_spill] sm:$0xff]  ;;  %v18580_v6 = vld [vmem:[#allocation157_spill] sm:$0xff]  ;;  %v18581_v0 = vld [vmem:[#allocation151_spill] sm:$0xff]  ;;  %v14016_v38 = vpop.permute.xlu0 %3245  ;;  %v4762_v26 = vadd.f32 %v4761_v63, %v4423_v59 }
 0x3bc   : > { %18575 = vst [vmem:[#allocation108_spill] sm:$0xff] %v14004_v30  ;;  %v3915_v39 = vsel %vm2320_vm14, %v18579_v49, %v18578_v57  ;;  %v3907_v24 = vsel %vm2320_vm14, %v18581_v0, %v18580_v6  ;;  %18582 = vst [vmem:[#allocation106_spill] sm:$0xff] %v14016_v38  ;;  %v4023_v7 = vmul.f32 %v13915_v9, %v2353_v60  ;;  %v18583_v16 = vld [vmem:[#allocation143_spill] sm:$0xff]  ;;  %v18584_v30 = vld [vmem:[#allocation137_spill] sm:$0xff] }
 0x3bd   : > { %v2361_v14 = vsel %vm2320_vm14, %v18584_v30, %v18583_v16  ;;  %v4168_v10 = vmul.f32 %v13904_v25, %v3900_v41  ;;  %2246 = vbcast.lane.b32.xlu1 %v1678_v28, 264  ;;  %v18585_v22 = vld [vmem:[#allocation144_spill] sm:$0xff]  ;;  %v18586_v62 = vld [vmem:[#allocation138_spill] sm:$0xff]  ;;  %v18587_v49 = vld [vmem:[#allocation145_spill] sm:$0xff]  ;;  %v4288_v0 = vadd.f32 %v4160_v5, %v4026_v56  ;;  %v4165_v59 = vmul.f32 %v13904_v25, %v3897_v15 }
 0x3be   : > { %v2379_v57 = vsel %vm2320_vm14, %v18586_v62, %v18585_v22  ;;  %v2371_v6 = vsel %vm2320_vm14, %v18588_v19, %v18587_v49  ;;  %2214 = vbcast.lane.b32.xlu0 %v1622_v52, 264  ;;  %v4714_v63 = vadd.f32 %v4713_v27, %v4415_v18  ;;  %v4034_v60 = vmul.f32 %v13915_v9, %v2364_v23  ;;  %v18593_v49 = vld [vmem:[#allocation176_spill] sm:$0xff] }
 0x3bf   : > { %v4183_v30 = vmul.f32 %v13904_v25, %v3915_v39  ;;  %v4175_v41 = vmul.f32 %v13904_v25, %v3907_v24  ;;  %v14033_v28 = vpop.permute.xlu1 %3771  ;;  %v4851_v16 = vrot.slane %v4438_v58, 4  ;;  %v4430_v22 = vmax.f32 %v13998_v51, 0.0  ;;  %v14037_v19 = vpop.permute.xlu0 %3739 }
 0x3c0   : > { %18589 = vst [vmem:[#allocation93_spill] sm:$0xff] %v14033_v28  ;;  %v4031_v62 = vmul.f32 %v13915_v9, %v2361_v14  ;;  %v4285_v38 = vadd.f32 %v4157_v4, %v4023_v7  ;;  %18590 = vst [vmem:[#allocation89_spill] sm:$0xff] %v14037_v19  ;;  %v4049_v15 = vmul.f32 %v13915_v9, %v2379_v57  ;;  %v4416_v5 = vmax.f32 %v4288_v0, 0.0  ;;  %v18597_v19 = vld [vmem:[#allocation171_spill] sm:$0xff] }
 0x3c1   : > { %v4041_v52 = vmul.f32 %v13915_v9, %v2371_v6  ;;  %v4296_v18 = vadd.f32 %v4168_v10, %v4034_v60  ;;  %2306 = vbcast.lane.b32.xlu1 %v1783_v3, 264  ;;  %v3215_v27 = vrot.slane %v13175_v47, %v12163_v8  ;;  %v3159_v51 = vrot.slane %v13179_v21, %v12163_v8  ;;  %v18594_v6 = vld [vmem:[#allocation170_spill] sm:$0xff] }
 0x3c2   : > { %v4293_v56 = vadd.f32 %v4165_v59, %v4031_v62  ;;  %2274 = vbcast.lane.b32.xlu0 %v1727_v29, 264  ;;  %v4711_v14 = vrot.slane %v13974_v34, 1  ;;  %v4763_v4 = vrot.slane %v4762_v26, 2  ;;  %v4311_v23 = vadd.f32 %v4183_v30, %v4049_v15  ;;  %v18596_v62 = vld [vmem:[#allocation177_spill] sm:$0xff]  ;;  %v18598_v15 = vld [vmem:[#allocation164_spill] sm:$0xff] }
 0x3c3   : > { %v4303_v39 = vadd.f32 %v4175_v41, %v4041_v52  ;;  %v14046_v24 = vpop.permute.xlu1 %3831  ;;  %v14049_v7 = vadd.f32 %v4759_v53, %v13951_v13  ;;  %v4715_v3 = vrot.slane %v4714_v63, 2  ;;  %v4803_v10 = vrot.slane %v4430_v22, 4  ;;  %v14054_v0 = vpop.permute.xlu0 %3799 }
 0x3c4   : > { %18591 = vst [vmem:[#allocation109_spill] sm:$0xff] %v14046_v24  ;;  %v4413_v57 = vmax.f32 %v4285_v38, 0.0  ;;  %v3901_v29 = vsel %vm2320_vm14, %v18594_v6, %v18593_v49  ;;  %18595 = vst [vmem:[#allocation104_spill] sm:$0xff] %v14054_v0  ;;  %v4852_v59 = vadd.f32 %v4851_v16, %v4438_v58  ;;  %v4424_v60 = vmax.f32 %v4296_v18, 0.0  ;;  %v18599_v38 = vld [vmem:[#allocation158_spill] sm:$0xff]  ;;  %v18600_v18 = vld [vmem:[#allocation165_spill] sm:$0xff] }
 0x3c5   : > { %18592 = vst [vmem:[#allocation107_spill] sm:$0xff] %v14049_v7  ;;  %v3893_v30 = vsel %vm2320_vm14, %v18597_v19, %v18596_v62  ;;  %3217 = vbcast.lane.b32.xlu1 %v3215_v27, 256  ;;  %v3320_v13 = vrot.slane %v13268_v31, %v12112_v43  ;;  %v4719_v53 = vrot.slane %v4416_v5, 4  ;;  %v4421_v41 = vmax.f32 %v4293_v56, 0.0  ;;  %v18601_v6 = vld [vmem:[#allocation159_spill] sm:$0xff] }
 0x3c6   : > { %v2365_v52 = vsel %vm2320_vm14, %v18599_v38, %v18598_v15  ;;  %3161 = vbcast.lane.b32.xlu0 %v3159_v51, 256  ;;  %v3264_v49 = vrot.slane %v13277_v1, %v12112_v43  ;;  %v4439_v58 = vmax.f32 %v4311_v23, 0.0  ;;  %v4431_v16 = vmax.f32 %v4303_v39, 0.0 }
 0x3c7   : > { %v2357_v19 = vsel %vm2320_vm14, %v18601_v6, %v18600_v18  ;;  %v4169_v62 = vmul.f32 %v13904_v25, %v3901_v29  ;;  %v14070_v0 = vpop.permute.xlu1 %1610  ;;  %v4764_v7 = vadd.f32 %v4763_v4, %v4762_v26  ;;  %v4804_v56 = vadd.f32 %v4803_v10, %v4430_v22  ;;  %v14073_v15 = vpop.permute.xlu0 %1589 }
 0x3c8   : > { %18602 = vst [vmem:[#allocation102_spill] sm:$0xff] %v14070_v0  ;;  %v4701_v24 = vrot.slane %v4413_v57, 4  ;;  %v4161_v28 = vmul.f32 %v13904_v25, %v3893_v30  ;;  %18603 = vst [vmem:[#allocation105_spill] sm:$0xff] %v14073_v15  ;;  %v14075_v38 = vadd.f32 %v4715_v3, %v4714_v63  ;;  %v4767_v43 = vrot.slane %v4424_v60, 4  ;;  %v18605_v30 = vld [vmem:[#allocation178_spill] sm:$0xff]  ;;  %v18606_v15 = vld [vmem:[#allocation172_spill] sm:$0xff] }
 0x3c9   : > { %v4035_v23 = vmul.f32 %v13915_v9, %v2365_v52  ;;  %3322 = vbcast.lane.b32.xlu1 %v3320_v13, 256  ;;  %v14079_v39 = vadd.f32 %v4711_v14, %v13974_v34  ;;  %v4853_v18 = vrot.slane %v4852_v59, 2  ;;  %v4720_v29 = vadd.f32 %v4719_v53, %v4416_v5  ;;  %v18609_v53 = vld [vmem:[#allocation166_spill] sm:$0xff] }
 0x3ca   : > { %v4749_v6 = vrot.slane %v4421_v41, 4  ;;  %v4027_v26 = vmul.f32 %v13915_v9, %v2357_v19  ;;  %3266 = vbcast.lane.b32.xlu0 %v3264_v49, 256  ;;  %v4857_v22 = vrot.slane %v4439_v58, 4  ;;  %v4809_v4 = vrot.slane %v4431_v16, 4 }
 0x3cb   : > { %18604 = vst [vmem:[#allocation103_spill] sm:$0xff] %v14079_v39  ;;  %v4297_v10 = vadd.f32 %v4169_v62, %v4035_v23  ;;  %v3908_v63 = vsel %vm2320_vm14, %v18606_v15, %v18605_v30  ;;  %v14085_v3 = vpop.permute.xlu1 %1666  ;;  %v4805_v52 = vrot.slane %v4804_v56, 2  ;;  %v4702_v0 = vadd.f32 %v4701_v24, %v4413_v57  ;;  %v14087_v34 = vpop.permute.xlu0 %1645  ;;  %v18610_v39 = vld [vmem:[#allocation160_spill] sm:$0xff] }
 0x3cc   : > { %18607 = vst [vmem:[#allocation116_spill] sm:$0xff] %v14085_v3  ;;  %v4289_v36 = vadd.f32 %v4161_v28, %v4027_v26  ;;  %18608 = vst [vmem:[#allocation114_spill] sm:$0xff] %v14087_v34  ;;  %v4765_v14 = vrot.slane %v4764_v7, 1  ;;  %v4768_v5 = vadd.f32 %v4767_v43, %v4424_v60  ;;  %v2372_v19 = vsel %vm2320_vm14, %v18610_v39, %v18609_v53  ;;  %v18613_v60 = vld [vmem:[#allocation167_spill] sm:$0xff]  ;;  %v18614_v26 = vld [vmem:[#allocation161_spill] sm:$0xff] }
 0x3cd   : > { %v3905_v62 = vsel %vm2320_vm14, %v18612_v50, %v18611_v54  ;;  %3783 = vbcast.lane.b32.xlu1 %v3215_v27, 264  ;;  %v14096_v23 = vadd.f32 %v4853_v18, %v4852_v59  ;;  %v4721_v30 = vrot.slane %v4720_v29, 2  ;;  %v4750_v24 = vadd.f32 %v4749_v6, %v4421_v41 }
 0x3ce   : > { %v4176_v28 = vmul.f32 %v13904_v25, %v3908_v63  ;;  %3751 = vbcast.lane.b32.xlu0 %v3159_v51, 264  ;;  %v4858_v57 = vadd.f32 %v4857_v22, %v4439_v58  ;;  %v4810_v43 = vadd.f32 %v4809_v4, %v4431_v16  ;;  %v2369_v39 = vsel %vm2320_vm14, %v18614_v26, %v18613_v60 }
 0x3cf   : > { %v4425_v53 = vmax.f32 %v4297_v10, 0.0  ;;  %v14102_v34 = vpop.permute.xlu1 %1771  ;;  %v4703_v54 = vrot.slane %v4702_v0, 2  ;;  %v4042_v50 = vmul.f32 %v13915_v9, %v2372_v19  ;;  %v4417_v27 = vmax.f32 %v4289_v36, 0.0  ;;  %v14106_v18 = vpop.permute.xlu0 %1715 }
 0x3d0   : > { %18615 = vst [vmem:[#allocation112_spill] sm:$0xff] %v14102_v34  ;;  %v4173_v59 = vmul.f32 %v13904_v25, %v3905_v62  ;;  %18616 = vst [vmem:[#allocation110_spill] sm:$0xff] %v14106_v18  ;;  %v4806_v41 = vadd.f32 %v4805_v52, %v4804_v56  ;;  %v4769_v6 = vrot.slane %v4768_v5, 2  ;;  %v1685_v51 = vrot.slane %v13156_v11, %v12214_v42  ;;  %v18618_v62 = vld [vmem:[#allocation180_spill] sm:$0xff]  ;;  %v18619_v56 = vld [vmem:[#allocation174_spill] sm:$0xff] }
 0x3d1   : > { %3843 = vbcast.lane.b32.xlu1 %v3320_v13, 264  ;;  %v14110_v58 = vadd.f32 %v4765_v14, %v4764_v7  ;;  %v4751_v16 = vrot.slane %v4750_v24, 2  ;;  %v4039_v22 = vmul.f32 %v13915_v9, %v2369_v39  ;;  %v4304_v4 = vadd.f32 %v4176_v28, %v4042_v50  ;;  %v18623_v39 = vld [vmem:[#allocation162_spill] sm:$0xff]  ;;  %v18624_v18 = vld [vmem:[#allocation181_spill] sm:$0xff]  ;;  %v18625_v34 = vld [vmem:[#allocation175_spill] sm:$0xff] }
 0x3d2   : > { %3811 = vbcast.lane.b32.xlu0 %v3264_v49, 264  ;;  %v1629_v36 = vrot.slane %v13158_v20, %v12214_v42  ;;  %v4859_v10 = vrot.slane %v4858_v57, 2  ;;  %v4811_v63 = vrot.slane %v4810_v43, 2  ;;  %v4773_v19 = vrot.slane %v4425_v53, 4  ;;  %v18622_v49 = vld [vmem:[#allocation168_spill] sm:$0xff] }
 0x3d3   : > { %18617 = vst [vmem:[#allocation117_spill] sm:$0xff] %v14110_v58  ;;  %v3916_v13 = vsel %vm2320_vm14, %v18619_v56, %v18618_v62  ;;  %v14118_v52 = vpop.permute.xlu1 %2206  ;;  %v4722_v60 = vadd.f32 %v4721_v30, %v4720_v29  ;;  %v4704_v7 = vadd.f32 %v4703_v54, %v4702_v0  ;;  %v4725_v14 = vrot.slane %v4417_v27, 4  ;;  %v14120_v15 = vpop.permute.xlu0 %2194 }
 0x3d4   : > { %18620 = vst [vmem:[#allocation115_spill] sm:$0xff] %v14118_v52  ;;  %v4301_v26 = vadd.f32 %v4173_v59, %v4039_v22  ;;  %18621 = vst [vmem:[#allocation113_spill] sm:$0xff] %v14120_v15  ;;  %v4770_v28 = vadd.f32 %v4769_v6, %v4768_v5  ;;  %v2380_v50 = vsel %vm2320_vm14, %v18623_v39, %v18622_v49  ;;  %v4432_v29 = vmax.f32 %v4304_v4, 0.0  ;;  %v18626_v59 = vld [vmem:[#allocation169_spill] sm:$0xff]  ;;  %v18627_v6 = vld [vmem:[#allocation163_spill] sm:$0xff] }
 0x3d5   : > { %v3913_v3 = vsel %vm2320_vm14, %v18625_v34, %v18624_v18  ;;  %1687 = vbcast.lane.b32.xlu1 %v1685_v51, 256  ;;  %v1790_v62 = vrot.slane %v13198_v40, %v12163_v8  ;;  %v4752_v56 = vadd.f32 %v4751_v16, %v4750_v24  ;;  %v4184_v0 = vmul.f32 %v13904_v25, %v3916_v13 }
 0x3d6   : > { %1631 = vbcast.lane.b32.xlu0 %v1629_v36, 256  ;;  %v1734_v5 = vrot.slane %v13202_v61, %v12163_v8  ;;  %v4860_v30 = vadd.f32 %v4859_v10, %v4858_v57  ;;  %v4812_v54 = vadd.f32 %v4811_v63, %v4810_v43  ;;  %v2377_v22 = vsel %vm2320_vm14, %v18627_v6, %v18626_v59 }
 0x3d7   : > { %v4774_v49 = vadd.f32 %v4773_v19, %v4425_v53  ;;  %v14136_v34 = vpop.permute.xlu1 %2238  ;;  %v4050_v18 = vmul.f32 %v13915_v9, %v2380_v50  ;;  %v4726_v39 = vadd.f32 %v4725_v14, %v4417_v27  ;;  %v4429_v24 = vmax.f32 %v4301_v26, 0.0  ;;  %v14140_v4 = vpop.permute.xlu0 %2226 }
 0x3d8   : > { %18628 = vst [vmem:[#allocation111_spill] sm:$0xff] %v14136_v34  ;;  %v4181_v16 = vmul.f32 %v13904_v25, %v3913_v3  ;;  %18629 = vst [vmem:[#allocation130_spill] sm:$0xff] %v14140_v4  ;;  %v4807_v13 = vrot.slane %v4806_v41, 1  ;;  %v4855_v57 = vrot.slane %v14096_v23, 1  ;;  %v4705_v43 = vrot.slane %v4704_v7, 1 }
 0x3d9   : > { %1792 = vbcast.lane.b32.xlu1 %v1790_v62, 256  ;;  %v4723_v10 = vrot.slane %v4722_v60, 1  ;;  %v4047_v63 = vmul.f32 %v13915_v9, %v2377_v22  ;;  %v4815_v59 = vrot.slane %v4432_v29, 4  ;;  %v14144_v53 = vadd.f32 %v4184_v0, %v4050_v18 }
 0x3da   : > { %1736 = vbcast.lane.b32.xlu0 %v1734_v5, 256  ;;  %v4771_v19 = vrot.slane %v4770_v28, 1  ;;  %v4775_v50 = vrot.slane %v4774_v49, 2  ;;  %v4753_v14 = vrot.slane %v4752_v56, 1  ;;  %v4813_v3 = vrot.slane %v4812_v54, 1 }
 0x3db   : > { %v14146_v27 = vpop.permute.xlu1 %2298  ;;  %v4861_v26 = vrot.slane %v4860_v30, 1  ;;  %v4727_v6 = vrot.slane %v4726_v39, 2  ;;  %v4797_v4 = vrot.slane %v4429_v24, 4  ;;  %v14148_v34 = vadd.f32 %v4181_v16, %v4047_v63  ;;  %v14150_v15 = vpop.permute.xlu0 %2266  ;;  %v18638_v63 = vld [vmem:[#allocation194_spill] sm:$0xff] }
 0x3dc   : > { %18630 = vst [vmem:[#allocation126_spill] sm:$0xff] %v14146_v27  ;;  %18631 = vst [vmem:[#allocation131_spill] sm:$0xff] %v14150_v15  ;;  %v18632_v22 = vrot.slane %v14075_v38, 1  ;;  %v14157_v0 = vadd.f32 %v4807_v13, %v4806_v41  ;;  %v14160_v18 = vadd.f32 %v4855_v57, %v14096_v23  ;;  %v14162_v27 = vadd.f32 %v4705_v43, %v4704_v7  ;;  %v18639_v15 = vld [vmem:[#allocation190_spill] sm:$0xff] }
 0x3dd   : > { %2250 = vbcast.lane.b32.xlu1 %v1685_v51, 264  ;;  %v14164_v58 = vadd.f32 %v4723_v10, %v4722_v60  ;;  %v4816_v33 = vadd.f32 %v4815_v59, %v4432_v29  ;;  %v4440_v16 = vmax.f32 %v14144_v53, 0.0  ;;  %v3902_v32 = vsel %vm2320_vm14, %v18639_v15, %v18638_v63  ;;  %v18645_v43 = vld [vmem:[#allocation186_spill] sm:$0xff]  ;;  %v18648_v10 = vld [vmem:[#allocation195_spill] sm:$0xff]  ;;  %v18650_v59 = vld [vmem:[#allocation196_spill] sm:$0xff] }
 0x3de   : > { %v14155_v52 = vadd.f32 %v18632_v22, %v14075_v38  ;;  %18634 = vst [vmem:[#allocation122_spill] sm:$0xff] %v14157_v0  ;;  %18635 = vst [vmem:[#allocation118_spill] sm:$0xff] %v14160_v18  ;;  %2218 = vbcast.lane.b32.xlu0 %v1629_v36, 264  ;;  %v14170_v38 = vadd.f32 %v4771_v19, %v4770_v28  ;;  %v14172_v51 = vadd.f32 %v4775_v50, %v4774_v49  ;;  %v18646_v15 = vld [vmem:[#allocation182_spill] sm:$0xff]  ;;  %v18652_v53 = vld [vmem:[#allocation197_spill] sm:$0xff] }
 0x3df   : > { %18636 = vst [vmem:[#allocation123_spill] sm:$0xff] %v14162_v27  ;;  %18637 = vst [vmem:[#allocation119_spill] sm:$0xff] %v14164_v58  ;;  %v14174_v41 = vpop.permute.xlu1 %3147  ;;  %v14176_v23 = vadd.f32 %v4753_v14, %v4752_v56  ;;  %v14178_v7 = vadd.f32 %v4813_v3, %v4812_v54  ;;  %v14180_v60 = vadd.f32 %v4861_v26, %v4860_v30  ;;  %v4437_v57 = vmax.f32 %v14148_v34, 0.0  ;;  %v14188_v28 = vpop.permute.xlu0 %3126  ;;  %v18649_v56 = vld [vmem:[#allocation191_spill] sm:$0xff]  ;;  %v18651_v30 = vld [vmem:[#allocation192_spill] sm:$0xff] }
 0x3e0   : > { %18633 = vst [vmem:[#allocation127_spill] sm:$0xff] %v14155_v52  ;;  %18640 = vst [vmem:[#allocation132_spill] sm:$0xff] %v14170_v38  ;;  %v14182_v29 = vadd.f32 %v4727_v6, %v4726_v39  ;;  %v4798_v13 = vadd.f32 %v4797_v4, %v4429_v24  ;;  %v2366_v36 = vsel %vm2320_vm14, %v18646_v15, %v18645_v43  ;;  %v4817_v24 = vrot.slane %v4816_v33, 2  ;;  %v18653_v19 = vld [vmem:[#allocation193_spill] sm:$0xff]  ;;  %v18654_v3 = vld [vmem:[#allocation187_spill] sm:$0xff] }
 0x3e1   : > { %18641 = vst [vmem:[#allocation128_spill] sm:$0xff] %v14174_v41  ;;  %18642 = vst [vmem:[#allocation124_spill] sm:$0xff] %v14176_v23  ;;  %v4170_v49 = vmul.f32 %v13904_v25, %v3902_v32  ;;  %v3894_v54 = vsel %vm2320_vm14, %v18649_v56, %v18648_v10  ;;  %v3917_v39 = vsel %vm2320_vm14, %v18651_v30, %v18650_v59  ;;  %2310 = vbcast.lane.b32.xlu1 %v1790_v62, 264  ;;  %v18655_v26 = vld [vmem:[#allocation183_spill] sm:$0xff]  ;;  %v18656_v62 = vld [vmem:[#allocation188_spill] sm:$0xff] }
 0x3e2   : > { %18643 = vst [vmem:[#allocation120_spill] sm:$0xff] %v14178_v7  ;;  %18644 = vst [vmem:[#allocation133_spill] sm:$0xff] %v14180_v60  ;;  %v3222_v34 = vrot.slane %v13175_v47, %v12214_v42  ;;  %v4863_v4 = vrot.slane %v4440_v16, 4  ;;  %v3909_v50 = vsel %vm2320_vm14, %v18653_v19, %v18652_v53  ;;  %2278 = vbcast.lane.b32.xlu0 %v1734_v5, 264  ;;  %v18657_v22 = vld [vmem:[#allocation184_spill] sm:$0xff]  ;;  %v4777_v15 = vrot.slane %v14172_v51, 1 }
 0x3e3   : > { %18647 = vst [vmem:[#allocation129_spill] sm:$0xff] %v14188_v28  ;;  %v3166_v32 = vrot.slane %v13179_v21, %v12214_v42  ;;  %v4036_v14 = vmul.f32 %v13915_v9, %v2366_v36  ;;  %v2358_v6 = vsel %vm2320_vm14, %v18655_v26, %v18654_v3  ;;  %v2381_v63 = vsel %vm2320_vm14, %v18657_v22, %v18656_v62  ;;  %v14211_v43 = vpop.permute.xlu1 %3203  ;;  %v18659_v56 = vld [vmem:[#allocation189_spill] sm:$0xff]  ;;  %v14219_v53 = vpop.permute.xlu0 %3182  ;;  %v18664_v7 = vld [vmem:[#allocation211_spill] sm:$0xff]  ;;  %v18668_v58 = vld [vmem:[#allocation208_spill] sm:$0xff] }
 0x3e4   : > { %18658 = vst [vmem:[#allocation125_spill] sm:$0xff] %v14211_v43  ;;  %v4799_v10 = vrot.slane %v4798_v13, 2  ;;  %v18660_v5 = vld [vmem:[#allocation185_spill] sm:$0xff]  ;;  %v4162_v30 = vmul.f32 %v13904_v25, %v3894_v54  ;;  %v4185_v36 = vmul.f32 %v13904_v25, %v3917_v39  ;;  %18661 = vst [vmem:[#allocation121_spill] sm:$0xff] %v14219_v53  ;;  %v4845_v19 = vrot.slane %v4437_v57, 4  ;;  %v18665_v38 = vld [vmem:[#allocation207_spill] sm:$0xff] }
 0x3e5   : > { %v2373_v59 = vsel %vm2320_vm14, %v18660_v5, %v18659_v56  ;;  %v4298_v3 = vadd.f32 %v4170_v49, %v4036_v14  ;;  %v4177_v26 = vmul.f32 %v13904_v25, %v3909_v50  ;;  %3224 = vbcast.lane.b32.xlu1 %v3222_v34, 256  ;;  %v3327_v62 = vrot.slane %v13268_v31, %v12163_v8  ;;  %v18662_v49 = vld [vmem:[#allocation210_spill] sm:$0xff]  ;;  %v18699_v18 = vld [vmem:[#allocation228_spill] sm:$0xff] }
 0x3e6   : > { %v14224_v22 = vadd.f32 %v4817_v24, %v4816_v33  ;;  %v4028_v60 = vmul.f32 %v13915_v9, %v2358_v6  ;;  %v4051_v56 = vmul.f32 %v13915_v9, %v2381_v63  ;;  %3168 = vbcast.lane.b32.xlu0 %v3166_v32, 256  ;;  %v3271_v54 = vrot.slane %v13277_v1, %v12163_v8  ;;  %v18663_v14 = vld [vmem:[#allocation206_spill] sm:$0xff]  ;;  %v18667_v63 = vld [vmem:[#allocation212_spill] sm:$0xff]  ;;  %v18669_v8 = vld [vmem:[#allocation213_spill] sm:$0xff] }
 0x3e7   : > { %v4864_v39 = vadd.f32 %v4863_v4, %v4440_v16  ;;  %v4043_v5 = vmul.f32 %v13915_v9, %v2373_v59  ;;  %v3903_v50 = vsel %vm2320_vm14, %v18663_v14, %v18662_v49  ;;  %v3895_v33 = vsel %vm2320_vm14, %v18665_v38, %v18664_v7  ;;  %v14237_v24 = vpop.permute.xlu1 %3308  ;;  %v18670_v16 = vld [vmem:[#allocation209_spill] sm:$0xff]  ;;  %v14245_v59 = vpop.permute.xlu0 %3252  ;;  %v18672_v14 = vld [vmem:[#allocation202_spill] sm:$0xff]  ;;  %v18674_v7 = vld [vmem:[#allocation203_spill] sm:$0xff] }
 0x3e8   : > { %18666 = vst [vmem:[#allocation152_spill] sm:$0xff] %v14237_v24  ;;  %v4290_v6 = vadd.f32 %v4162_v30, %v4028_v60  ;;  %v4313_v23 = vadd.f32 %v4185_v36, %v4051_v56  ;;  %v3918_v53 = vsel %vm2320_vm14, %v18668_v58, %v18667_v63  ;;  %v3910_v4 = vsel %vm2320_vm14, %v18670_v16, %v18669_v8  ;;  %v18673_v43 = vld [vmem:[#allocation198_spill] sm:$0xff]  ;;  %v18675_v24 = vld [vmem:[#allocation199_spill] sm:$0xff]  ;;  %v18676_v30 = vld [vmem:[#allocation204_spill] sm:$0xff] }
 0x3e9   : > { %18671 = vst [vmem:[#allocation146_spill] sm:$0xff] %v14245_v59  ;;  %v4426_v27 = vmax.f32 %v4298_v3, 0.0  ;;  %v4305_v49 = vadd.f32 %v4177_v26, %v4043_v5  ;;  %v2367_v38 = vsel %vm2320_vm14, %v18673_v43, %v18672_v14  ;;  %v2359_v60 = vsel %vm2320_vm14, %v18675_v24, %v18674_v7  ;;  %3329 = vbcast.lane.b32.xlu1 %v3327_v62, 256  ;;  %v18677_v36 = vld [vmem:[#allocation200_spill] sm:$0xff]  ;;  %v18678_v56 = vld [vmem:[#allocation205_spill] sm:$0xff] }
 0x3ea   : > { %v2382_v58 = vsel %vm2320_vm14, %v18677_v36, %v18676_v30  ;;  %v18679_v63 = vld [vmem:[#allocation201_spill] sm:$0xff]  ;;  %v4171_v3 = vmul.f32 %v13904_v25, %v3903_v50  ;;  %v4163_v26 = vmul.f32 %v13904_v25, %v3895_v33  ;;  %3273 = vbcast.lane.b32.xlu0 %v3271_v54, 256  ;;  %v14261_v5 = vadd.f32 %v4799_v10, %v4798_v13 }
 0x3eb   : > { %v2374_v8 = vsel %vm2320_vm14, %v18679_v63, %v18678_v56  ;;  %v4846_v43 = vadd.f32 %v4845_v19, %v4437_v57  ;;  %v4186_v16 = vmul.f32 %v13904_v25, %v3918_v53  ;;  %v4178_v24 = vmul.f32 %v13904_v25, %v3910_v4  ;;  %v14265_v14 = vpop.permute.xlu1 %3743  ;;  %v14269_v63 = vpop.permute.xlu0 %3731 }
 0x3ec   : > { %18680 = vst [vmem:[#allocation140_spill] sm:$0xff] %v14265_v14  ;;  %v4418_v7 = vmax.f32 %v4290_v6, 0.0  ;;  %v4441_v30 = vmax.f32 %v4313_v23, 0.0  ;;  %v4037_v36 = vmul.f32 %v13915_v9, %v2367_v38  ;;  %v4029_v56 = vmul.f32 %v13915_v9, %v2359_v60  ;;  %18681 = vst [vmem:[#allocation134_spill] sm:$0xff] %v14269_v63  ;;  %v18690_v63 = vld [vmem:[#allocation214_spill] sm:$0xff] }
 0x3ed   : > { %v4779_v50 = vrot.slane %v4426_v27, 4  ;;  %v4433_v33 = vmax.f32 %v4305_v49, 0.0  ;;  %v4052_v13 = vmul.f32 %v13915_v9, %v2382_v58  ;;  %v4044_v57 = vmul.f32 %v13915_v9, %v2374_v8  ;;  %3787 = vbcast.lane.b32.xlu1 %v3222_v34, 264 }
 0x3ee   : > { %v4299_v10 = vadd.f32 %v4171_v3, %v4037_v36  ;;  %v4291_v53 = vadd.f32 %v4163_v26, %v4029_v56  ;;  %3755 = vbcast.lane.b32.xlu0 %v3166_v32, 264  ;;  %v4729_v19 = vrot.slane %v14182_v29, 1  ;;  %v14275_v23 = vadd.f32 %v4777_v15, %v14172_v51  ;;  %v18685_v26 = vld [vmem:[#allocation226_spill] sm:$0xff]  ;;  %v18687_v56 = vld [vmem:[#allocation227_spill] sm:$0xff] }
 0x3ef   : > { %v4865_v6 = vrot.slane %v4864_v39, 2  ;;  %v4314_v4 = vadd.f32 %v4186_v16, %v4052_v13  ;;  %v4306_v38 = vadd.f32 %v4178_v24, %v4044_v57  ;;  %v14277_v60 = vpop.permute.xlu1 %3775  ;;  %v4819_v49 = vrot.slane %v14224_v22, 1  ;;  %v14280_v8 = vpop.permute.xlu0 %3763  ;;  %v18686_v36 = vld [vmem:[#allocation222_spill] sm:$0xff]  ;;  %v18688_v13 = vld [vmem:[#allocation223_spill] sm:$0xff] }
 0x3f0   : > { %18682 = vst [vmem:[#allocation153_spill] sm:$0xff] %v14275_v23  ;;  %18683 = vst [vmem:[#allocation147_spill] sm:$0xff] %v14277_v60  ;;  %v4847_v59 = vrot.slane %v4846_v43, 2  ;;  %v4731_v58 = vrot.slane %v4418_v7, 4  ;;  %v4869_v28 = vrot.slane %v4441_v30, 4  ;;  %v4801_v34 = vrot.slane %v14261_v5, 1 }
 0x3f1   : > { %18684 = vst [vmem:[#allocation141_spill] sm:$0xff] %v14280_v8  ;;  %v4780_v32 = vadd.f32 %v4779_v50, %v4426_v27  ;;  %v4821_v3 = vrot.slane %v4433_v33, 4  ;;  %v3904_v51 = vsel %vm2320_vm14, %v18686_v36, %v18685_v26  ;;  %3847 = vbcast.lane.b32.xlu1 %v3327_v62, 264  ;;  %v1692_v15 = vrot.slane %v13156_v11, %v12265_v44  ;;  %v18689_v60 = vld [vmem:[#allocation218_spill] sm:$0xff]  ;;  %v18693_v36 = vld [vmem:[#allocation215_spill] sm:$0xff] }
 0x3f2   : > { %v4427_v16 = vmax.f32 %v4299_v10, 0.0  ;;  %v4419_v24 = vmax.f32 %v4291_v53, 0.0  ;;  %v3896_v57 = vsel %vm2320_vm14, %v18688_v13, %v18687_v56  ;;  %3815 = vbcast.lane.b32.xlu0 %v3271_v54, 264  ;;  %v1636_v23 = vrot.slane %v13158_v20, %v12265_v44  ;;  %v18692_v53 = vld [vmem:[#allocation219_spill] sm:$0xff] }
 0x3f3   : > { %v4866_v27 = vadd.f32 %v4865_v6, %v4864_v39  ;;  %v4442_v50 = vmax.f32 %v4314_v4, 0.0  ;;  %v4434_v8 = vmax.f32 %v4306_v38, 0.0  ;;  %v2368_v62 = vsel %vm2320_vm14, %v18690_v63, %v18689_v60  ;;  %v14296_v26 = vpop.permute.xlu1 %3835  ;;  %v14302_v56 = vpop.permute.xlu0 %3803 }
 0x3f4   : > { %18691 = vst [vmem:[#allocation135_spill] sm:$0xff] %v14296_v26  ;;  %v4732_v11 = vadd.f32 %v4731_v58, %v4418_v7  ;;  %v4870_v10 = vadd.f32 %v4869_v28, %v4441_v30  ;;  %v2360_v41 = vsel %vm2320_vm14, %v18693_v36, %v18692_v53  ;;  %v4172_v54 = vmul.f32 %v13904_v25, %v3904_v51 }
 0x3f5   : > { %18694 = vst [vmem:[#allocation154_spill] sm:$0xff] %v14302_v56  ;;  %v4781_v20 = vrot.slane %v4780_v32, 2  ;;  %v4822_v39 = vadd.f32 %v4821_v3, %v4433_v33  ;;  %v4164_v6 = vmul.f32 %v13904_v25, %v3896_v57  ;;  %1694 = vbcast.lane.b32.xlu1 %v1692_v15, 256  ;;  %v1797_v63 = vrot.slane %v13198_v40, %v12214_v42 }
 0x3f6   : > { %v4785_v4 = vrot.slane %v4427_v16, 4  ;;  %v4737_v38 = vrot.slane %v4419_v24, 4  ;;  %v4038_v28 = vmul.f32 %v13915_v9, %v2368_v62  ;;  %1638 = vbcast.lane.b32.xlu0 %v1636_v23, 256  ;;  %v1741_v7 = vrot.slane %v13202_v61, %v12214_v42 }
 0x3f7   : > { %v14310_v30 = vadd.f32 %v4847_v59, %v4846_v43  ;;  %v4875_v60 = vrot.slane %v4442_v50, 4  ;;  %v4827_v58 = vrot.slane %v4434_v8, 4  ;;  %v4030_v33 = vmul.f32 %v13915_v9, %v2360_v41  ;;  %v14313_v3 = vpop.permute.xlu1 %1673  ;;  %v14315_v53 = vpop.permute.xlu0 %1617 }
 0x3f8   : > { %18695 = vst [vmem:[#allocation148_spill] sm:$0xff] %v14313_v3  ;;  %v4733_v51 = vrot.slane %v4732_v11, 2  ;;  %v4871_v13 = vrot.slane %v4870_v10, 2  ;;  %v4300_v57 = vadd.f32 %v4172_v54, %v4038_v28  ;;  %18696 = vst [vmem:[#allocation155_spill] sm:$0xff] %v14315_v53  ;;  %v14318_v36 = vadd.f32 %v4729_v19, %v14182_v29  ;;  %v18700_v3 = vld [vmem:[#allocation224_spill] sm:$0xff] }
 0x3f9   : > { %v4823_v62 = vrot.slane %v4822_v39, 2  ;;  %v4292_v56 = vadd.f32 %v4164_v6, %v4030_v33  ;;  %1799 = vbcast.lane.b32.xlu1 %v1797_v63, 256  ;;  %v14321_v59 = vadd.f32 %v4819_v49, %v14224_v22  ;;  %v4867_v43 = vrot.slane %v4866_v27, 1  ;;  %v18702_v6 = vld [vmem:[#allocation220_spill] sm:$0xff] }
 0x3fa   : > { %18697 = vst [vmem:[#allocation149_spill] sm:$0xff] %v14318_v36  ;;  %v4782_v26 = vadd.f32 %v4781_v20, %v4780_v32  ;;  %v4786_v14 = vadd.f32 %v4785_v4, %v4427_v16  ;;  %v4738_v41 = vadd.f32 %v4737_v38, %v4419_v24  ;;  %v3919_v0 = vsel %vm2320_vm14, %v18700_v3, %v18699_v18  ;;  %v18703_v32 = vld [vmem:[#allocation216_spill] sm:$0xff]  ;;  %v18705_v38 = vld [vmem:[#allocation225_spill] sm:$0xff] }
 0x3fb   : > { %18698 = vst [vmem:[#allocation142_spill] sm:$0xff] %v14321_v59  ;;  %1743 = vbcast.lane.b32.xlu0 %v1741_v7, 256  ;;  %v4876_v54 = vadd.f32 %v4875_v60, %v4442_v50  ;;  %v4828_v28 = vadd.f32 %v4827_v58, %v4434_v8  ;;  %v14326_v53 = vpop.permute.xlu1 %1722  ;;  %v14329_v29 = vadd.f32 %v4801_v34, %v14261_v5  ;;  %v4849_v19 = vrot.slane %v14310_v30, 1  ;;  %v14335_v20 = vpop.permute.xlu0 %1701  ;;  %v18704_v50 = vld [vmem:[#allocation229_spill] sm:$0xff] }
 0x3fc   : > { %v4734_v22 = vadd.f32 %v4733_v51, %v4732_v11  ;;  %v4872_v49 = vadd.f32 %v4871_v13, %v4870_v10  ;;  %v2383_v16 = vsel %vm2320_vm14, %v18703_v32, %v18702_v6  ;;  %v4428_v24 = vmax.f32 %v4300_v57, 0.0  ;;  %v18707_v51 = vld [vmem:[#allocation221_spill] sm:$0xff] }
 0x3fd   : > { %18701 = vst [vmem:[#allocation136_spill] sm:$0xff] %v14329_v29  ;;  %v4824_v18 = vadd.f32 %v4823_v62, %v4822_v39  ;;  %v4420_v4 = vmax.f32 %v4292_v56, 0.0  ;;  %v4187_v8 = vmul.f32 %v13904_v25, %v3919_v0  ;;  %v3911_v5 = vsel %vm2320_vm14, %v18705_v38, %v18704_v50  ;;  %2254 = vbcast.lane.b32.xlu1 %v1692_v15, 264  ;;  %v18708_v39 = vld [vmem:[#allocation217_spill] sm:$0xff] }
 0x3fe   : > { %v4787_v34 = vrot.slane %v4786_v14, 2  ;;  %v4739_v60 = vrot.slane %v4738_v41, 2  ;;  %v14341_v11 = vadd.f32 %v4867_v43, %v4866_v27  ;;  %v4783_v10 = vrot.slane %v4782_v26, 1 }
 0x3ff   : > { %2222 = vbcast.lane.b32.xlu0 %v1636_v23, 264  ;;  %v4877_v58 = vrot.slane %v4876_v54, 2  ;;  %v4829_v33 = vrot.slane %v4828_v28, 2  ;;  %v4053_v3 = vmul.f32 %v13915_v9, %v2383_v16  ;;  %v2375_v56 = vsel %vm2320_vm14, %v18708_v39, %v18707_v51  ;;  %v14347_v0 = vpop.permute.xlu1 %1778  ;;  %v14350_v15 = vpop.permute.xlu0 %1757 }
 0x400   : > { %18706 = vst [vmem:[#allocation156_spill] sm:$0xff] %v14341_v11  ;;  %18709 = vst [vmem:[#allocation150_spill] sm:$0xff] %v14347_v0  ;;  %v4791_v13 = vrot.slane %v4428_v24, 4  ;;  %v4179_v57 = vmul.f32 %v13904_v25, %v3911_v5  ;;  %v4735_v62 = vrot.slane %v4734_v22, 1  ;;  %v4873_v23 = vrot.slane %v4872_v49, 1  ;;  %v18738_v0 = vld [vmem:[#allocation255_spill] sm:$0xff] }
 0x401   : > { %18710 = vst [vmem:[#allocation157_spill] sm:$0xff] %v14350_v15  ;;  %v4743_v27 = vrot.slane %v4420_v4, 4  ;;  %v14352_v43 = vadd.f32 %v4187_v8, %v4053_v3  ;;  %2314 = vbcast.lane.b32.xlu1 %v1797_v63, 264  ;;  %v3229_v6 = vrot.slane %v13175_v47, %v12265_v44  ;;  %v4825_v32 = vrot.slane %v4824_v18, 1  ;;  %v18720_v3 = vld [vmem:[#allocation237_spill] sm:$0xff]  ;;  %v18737_v15 = vld [vmem:[#allocation258_spill] sm:$0xff] }
 0x402   : > { %v14356_v16 = vadd.f32 %v4787_v34, %v4786_v14  ;;  %v14358_v50 = vadd.f32 %v4739_v60, %v4738_v41  ;;  %v4045_v38 = vmul.f32 %v13915_v9, %v2375_v56  ;;  %v3173_v5 = vrot.slane %v13179_v21, %v12265_v44  ;;  %v18715_v60 = vld [vmem:[#allocation236_spill] sm:$0xff]  ;;  %v18721_v56 = vld [vmem:[#allocation235_spill] sm:$0xff] }
 0x403   : > { %2282 = vbcast.lane.b32.xlu0 %v1741_v7, 264  ;;  %v14363_v51 = vadd.f32 %v4877_v58, %v4876_v54  ;;  %v14365_v39 = vadd.f32 %v4829_v33, %v4828_v28  ;;  %v14367_v8 = vpop.permute.xlu1 %2242  ;;  %v14370_v63 = vadd.f32 %v4849_v19, %v14310_v30  ;;  %v14372_v47 = vadd.f32 %v4783_v10, %v4782_v26  ;;  %v14378_v34 = vpop.permute.xlu0 %2210  ;;  %v18716_v58 = vld [vmem:[#allocation234_spill] sm:$0xff] }
 0x404   : > { %v14374_v14 = vadd.f32 %v4791_v13, %v4428_v24  ;;  %v14376_v41 = vadd.f32 %v4179_v57, %v4045_v38  ;;  %v14380_v7 = vadd.f32 %v4735_v62, %v4734_v22  ;;  %v14382_v21 = vadd.f32 %v4873_v23, %v4872_v49  ;;  %v18719_v10 = vld [vmem:[#allocation230_spill] sm:$0xff]  ;;  %v18725_v23 = vld [vmem:[#allocation244_spill] sm:$0xff]  ;;  %v18726_v62 = vld [vmem:[#allocation243_spill] sm:$0xff] }
 0x405   : > { %18711 = vst [vmem:[#allocation151_spill] sm:$0xff] %v14370_v63  ;;  %18712 = vst [vmem:[#allocation143_spill] sm:$0xff] %v14372_v47  ;;  %v14384_v54 = vadd.f32 %v4743_v27, %v4420_v4  ;;  %v4443_v28 = vmax.f32 %v14352_v43, 0.0  ;;  %v3920_v30 = vsel %vm2320_vm14, %v18716_v58, %v18715_v60  ;;  %3231 = vbcast.lane.b32.xlu1 %v3229_v6, 256  ;;  %v18718_v4 = vld [vmem:[#allocation232_spill] sm:$0xff]  ;;  %v18722_v27 = vld [vmem:[#allocation233_spill] sm:$0xff] }
 0x406   : > { %18713 = vst [vmem:[#allocation137_spill] sm:$0xff] %v14380_v7  ;;  %18714 = vst [vmem:[#allocation144_spill] sm:$0xff] %v14382_v21  ;;  %v3334_v26 = vrot.slane %v13268_v31, %v12214_v42  ;;  %v3278_v19 = vrot.slane %v13277_v1, %v12214_v42  ;;  %v14394_v22 = vadd.f32 %v4825_v32, %v4824_v18  ;;  %v4435_v18 = vmax.f32 %v14376_v41, 0.0  ;;  %v18723_v43 = vld [vmem:[#allocation231_spill] sm:$0xff]  ;;  %v18724_v60 = vld [vmem:[#allocation242_spill] sm:$0xff] }
 0x407   : > { %3175 = vbcast.lane.b32.xlu0 %v3173_v5, 256  ;;  %v2384_v33 = vsel %vm2320_vm14, %v18719_v10, %v18718_v4  ;;  %v3912_v13 = vsel %vm2320_vm14, %v18721_v56, %v18720_v3  ;;  %v14404_v57 = vpop.permute.xlu1 %2270  ;;  %v2376_v32 = vsel %vm2320_vm14, %v18723_v43, %v18722_v27  ;;  %v4188_v38 = vmul.f32 %v13904_v25, %v3920_v30  ;;  %v14416_v4 = vpop.permute.xlu0 %2258  ;;  %v18727_v43 = vld [vmem:[#allocation240_spill] sm:$0xff]  ;;  %v18728_v24 = vld [vmem:[#allocation238_spill] sm:$0xff]  ;;  %v18730_v21 = vld [vmem:[#allocation241_spill] sm:$0xff] }
 0x408   : > { %18717 = vst [vmem:[#allocation138_spill] sm:$0xff] %v14394_v22  ;;  %v3930_v58 = vsel %vm2320_vm14, %v18724_v60, %v12975_v46  ;;  %v4793_v10 = vrot.slane %v14374_v14, 2  ;;  %v4745_v3 = vrot.slane %v14384_v54, 2  ;;  %v4881_v56 = vrot.slane %v4443_v28, 4  ;;  %v18729_v60 = vld [vmem:[#allocation253_spill] sm:$0xff]  ;;  %v18731_v22 = vld [vmem:[#allocation239_spill] sm:$0xff] }
 0x409   : > { %v3922_v41 = vsel %vm2320_vm14, %v18726_v62, %v18725_v23  ;;  %3336 = vbcast.lane.b32.xlu1 %v3334_v26, 256  ;;  %v4054_v27 = vmul.f32 %v13915_v9, %v2384_v33  ;;  %v4180_v30 = vmul.f32 %v13904_v25, %v3912_v13  ;;  %v2394_v46 = vsel %vm2320_vm14, %v18728_v24, %v18727_v43  ;;  %v18732_v33 = vld [vmem:[#allocation257_spill] sm:$0xff]  ;;  %v18733_v47 = vld [vmem:[#allocation254_spill] sm:$0xff] }
 0x40a   : > { %v3931_v49 = vsel %vm2320_vm14, %v18729_v60, %v13011_v12  ;;  %v4046_v42 = vmul.f32 %v13915_v9, %v2376_v32  ;;  %v2386_v62 = vsel %vm2320_vm14, %v18731_v22, %v18730_v21  ;;  %v4198_v23 = vmul.f32 %v13904_v25, %v3930_v58  ;;  %v18735_v12 = vld [vmem:[#allocation249_spill] sm:$0xff] }
 0x40b   : > { %3280 = vbcast.lane.b32.xlu0 %v3278_v19, 256  ;;  %v3923_v13 = vsel %vm2320_vm14, %v18733_v47, %v18732_v33  ;;  %v14439_v7 = vpop.permute.xlu1 %2302  ;;  %v14441_v24 = vadd.f32 %v4188_v38, %v4054_v27  ;;  %v4190_v43 = vmul.f32 %v13904_v25, %v3922_v41  ;;  %v18736_v60 = vld [vmem:[#allocation245_spill] sm:$0xff]  ;;  %v3946_v21 = vsel %vm2320_vm14, %v18738_v0, %v18737_v15  ;;  %v14450_v22 = vpop.permute.xlu0 %2290  ;;  %v18740_v47 = vld [vmem:[#allocation250_spill] sm:$0xff] }
 0x40c   : > { %18734 = vst [vmem:[#allocation145_spill] sm:$0xff] %v14439_v7  ;;  %v2395_v32 = vsel %vm2320_vm14, %v18736_v60, %v18735_v12  ;;  %18739 = vst [vmem:[#allocation139_spill] sm:$0xff] %v14450_v22  ;;  %v4833_v58 = vrot.slane %v4435_v18, 4  ;;  %v4064_v11 = vmul.f32 %v13915_v9, %v2394_v46  ;;  %v18741_v33 = vld [vmem:[#allocation246_spill] sm:$0xff]  ;;  %v4199_v27 = vmul.f32 %v13904_v25, %v3931_v49  ;;  %v18742_v60 = vld [vmem:[#allocation251_spill] sm:$0xff] }
 0x40d   : > { %v2387_v38 = vsel %vm2320_vm14, %v18741_v33, %v18740_v47  ;;  %3791 = vbcast.lane.b32.xlu1 %v3229_v6, 264  ;;  %v14457_v41 = vadd.f32 %v4180_v30, %v4046_v42  ;;  %v4056_v12 = vmul.f32 %v13915_v9, %v2386_v62  ;;  %v18743_v7 = vld [vmem:[#allocation247_spill] sm:$0xff]  ;;  %v4191_v15 = vmul.f32 %v13904_v25, %v3923_v13  ;;  %v18745_v33 = vld [vmem:[#allocation256_spill] sm:$0xff] }
 0x40e   : > { %v2410_v0 = vsel %vm2320_vm14, %v18743_v7, %v18742_v60  ;;  %v4326_v22 = vadd.f32 %v4198_v23, %v4064_v11  ;;  %v4065_v46 = vmul.f32 %v13915_v9, %v2395_v32  ;;  %v4214_v63 = vmul.f32 %v13904_v25, %v3946_v21  ;;  %v18744_v47 = vld [vmem:[#allocation259_spill] sm:$0xff]  ;;  %v18747_v23 = vld [vmem:[#allocation248_spill] sm:$0xff] }
 0x40f   : > { %3759 = vbcast.lane.b32.xlu0 %v3173_v5, 264  ;;  %v3938_v6 = vsel %vm2320_vm14, %v18745_v33, %v18744_v47  ;;  %v14469_v42 = vpop.permute.xlu1 %3210  ;;  %v4882_v49 = vadd.f32 %v4881_v56, %v4443_v28  ;;  %v4444_v30 = vmax.f32 %v14441_v24, 0.0  ;;  %v14472_v62 = vadd.f32 %v4190_v43, %v4056_v12  ;;  %v14475_v13 = vpop.permute.xlu0 %3154  ;;  %v18746_v5 = vld [vmem:[#allocation252_spill] sm:$0xff] }
 0x410   : > { %v4057_v7 = vmul.f32 %v13915_v9, %v2387_v38  ;;  %v4080_v11 = vmul.f32 %v13915_v9, %v2410_v0  ;;  %v2402_v32 = vsel %vm2320_vm14, %v18747_v23, %v18746_v5  ;;  %v14481_v21 = vadd.f32 %v4199_v27, %v4065_v46 }
 0x411   : > { %3851 = vbcast.lane.b32.xlu1 %v3334_v26, 264  ;;  %v1804_v28 = vrot.slane %v13198_v40, %v12265_v44  ;;  %v4794_v56 = vadd.f32 %v4793_v10, %v14374_v14  ;;  %v4206_v43 = vmul.f32 %v13904_v25, %v3938_v6  ;;  %v1748_v38 = vrot.slane %v13202_v61, %v12265_v44 }
 0x412   : > { %v14486_v24 = vadd.f32 %v4191_v15, %v4057_v7  ;;  %v14492_v12 = vadd.f32 %v4745_v3, %v14384_v54  ;;  %v4436_v27 = vmax.f32 %v14457_v41, 0.0  ;;  %v4454_v60 = vmax.f32 %v4326_v22, 0.0 }
 0x413   : > { %3819 = vbcast.lane.b32.xlu0 %v3278_v19, 264  ;;  %v14495_v26 = vadd.f32 %v4214_v63, %v4080_v11  ;;  %v14497_v0 = vpop.permute.xlu1 %3259  ;;  %v4883_v40 = vrot.slane %v4882_v49, 2  ;;  %v4834_v14 = vadd.f32 %v4833_v58, %v4435_v18  ;;  %v4887_v10 = vrot.slane %v4444_v30, 4  ;;  %v14500_v25 = vpop.permute.xlu0 %3238 }
 0x414   : > { %v4072_v15 = vmul.f32 %v13915_v9, %v2402_v32  ;;  %v4446_v19 = vmax.f32 %v14472_v62, 0.0  ;;  %v4455_v61 = vmax.f32 %v14481_v21, 0.0  ;;  %v18748_v54 = vrot.slane %v14358_v50, 1 }
 0x415   : > { %1806 = vbcast.lane.b32.xlu1 %v1804_v28, 256  ;;  %v18750_v63 = vrot.slane %v14356_v16, 1  ;;  %v4447_v18 = vmax.f32 %v14486_v24, 0.0  ;;  %v18752_v58 = vrot.slane %v14365_v39, 1  ;;  %v18754_v46 = vrot.slane %v14363_v51, 1  ;;  %v18757_v24 = vld [vmem:[#allocation272_spill] sm:$0xff] }
 0x416   : > { %v14507_v3 = vadd.f32 %v18748_v54, %v14358_v50  ;;  %v14515_v9 = vadd.f32 %v4206_v43, %v4072_v15  ;;  %v4839_v47 = vrot.slane %v4436_v27, 4  ;;  %v4947_v33 = vrot.slane %v4454_v60, 4 }
 0x417   : > { %v14512_v22 = vadd.f32 %v18750_v63, %v14356_v16  ;;  %1750 = vbcast.lane.b32.xlu0 %v1748_v38, 256  ;;  %v14520_v41 = vadd.f32 %v18752_v58, %v14365_v39  ;;  %v14525_v50 = vadd.f32 %v18754_v46, %v14363_v51  ;;  %v4470_v16 = vmax.f32 %v14495_v26, 0.0  ;;  %v14528_v6 = vpop.permute.xlu1 %3315  ;;  %v14530_v23 = vpop.permute.xlu0 %3294 }
 0x418   : > { %18749 = vst [vmem:[#allocation176_spill] sm:$0xff] %v14507_v3  ;;  %v4795_v62 = vrot.slane %v4794_v56, 1  ;;  %v4884_v7 = vadd.f32 %v4883_v40, %v4882_v49  ;;  %v4835_v11 = vrot.slane %v4834_v14, 2  ;;  %v4888_v5 = vadd.f32 %v4887_v10, %v4444_v30  ;;  %18756 = vst [vmem:[#allocation164_spill] sm:$0xff] %v14530_v23  ;;  %v18758_v30 = vld [vmem:[#allocation273_spill] sm:$0xff] }
 0x419   : > { %18751 = vst [vmem:[#allocation170_spill] sm:$0xff] %v14512_v22  ;;  %18753 = vst [vmem:[#allocation177_spill] sm:$0xff] %v14520_v41  ;;  %v4747_v39 = vrot.slane %v14492_v12, 1  ;;  %v4899_v32 = vrot.slane %v4446_v19, 4  ;;  %v4953_v21 = vrot.slane %v4455_v61, 4  ;;  %v3924_v51 = vsel %vm2320_vm14, %v18757_v24, %v13079_v2  ;;  %2318 = vbcast.lane.b32.xlu1 %v1804_v28, 264 }
 0x41a   : > { %18755 = vst [vmem:[#allocation171_spill] sm:$0xff] %v14525_v50  ;;  %v3341_v43 = vrot.slane %v13268_v31, %v12265_v44  ;;  %v4905_v26 = vrot.slane %v4447_v18, 4  ;;  %v4462_v49 = vmax.f32 %v14515_v9, 0.0  ;;  %v3921_v40 = vsel %vm2320_vm14, %v18758_v30, %v13081_v45  ;;  %v18759_v2 = vld [vmem:[#allocation266_spill] sm:$0xff]  ;;  %v18760_v28 = vld [vmem:[#allocation260_spill] sm:$0xff]  ;;  %v18761_v9 = vld [vmem:[#allocation267_spill] sm:$0xff] }
 0x41b   : > { %2286 = vbcast.lane.b32.xlu0 %v1748_v38, 264  ;;  %v3285_v10 = vrot.slane %v13277_v1, %v12265_v44  ;;  %v4840_v15 = vadd.f32 %v4839_v47, %v4436_v27  ;;  %v4948_v54 = vadd.f32 %v4947_v33, %v4454_v60  ;;  %v5043_v63 = vrot.slane %v4470_v16, 4  ;;  %v14547_v31 = vpop.permute.xlu1 %3779  ;;  %v18762_v50 = vld [vmem:[#allocation261_spill] sm:$0xff]  ;;  %v14558_v38 = vpop.permute.xlu0 %3747  ;;  %v18769_v44 = vld [vmem:[#allocation275_spill] sm:$0xff]  ;;  %v18771_v22 = vld [vmem:[#allocation262_spill] sm:$0xff] }
 0x41c   : > { %v2388_v58 = vsel %vm2320_vm14, %v18760_v28, %v18759_v2  ;;  %v4836_v46 = vadd.f32 %v4835_v11, %v4834_v14  ;;  %v4889_v24 = vrot.slane %v4888_v5, 2  ;;  %v2385_v41 = vsel %vm2320_vm14, %v18762_v50, %v18761_v9  ;;  %v14555_v45 = vld [vmem:[%s17814_s7] ss:$0 sm:$0xff] }
 0x41d   : > { %v4192_v1 = vmul.f32 %v14555_v45, %v3924_v51  ;;  %v4900_v27 = vadd.f32 %v4899_v32, %v4446_v19  ;;  %v4189_v60 = vmul.f32 %v14555_v45, %v3921_v40  ;;  %3343 = vbcast.lane.b32.xlu1 %v3341_v43, 256  ;;  %v14564_v14 = vadd.f32 %v4795_v62, %v4794_v56  ;;  %v14569_v30 = vld [vmem:[%s17813_s6] ss:$0 sm:$0xff] }
 0x41e   : > { %v4885_v47 = vrot.slane %v4884_v7, 1  ;;  %v4954_v50 = vadd.f32 %v4953_v21, %v4455_v61  ;;  %v4906_v33 = vadd.f32 %v4905_v26, %v4447_v18  ;;  %v4995_v11 = vrot.slane %v4462_v49, 4  ;;  %v18765_v26 = vld [vmem:[#allocation278_spill] sm:$0xff] }
 0x41f   : > { %18763 = vst [vmem:[#allocation158_spill] sm:$0xff] %v14564_v14  ;;  %v4058_v51 = vmul.f32 %v14569_v30, %v2388_v58  ;;  %3287 = vbcast.lane.b32.xlu0 %v3285_v10, 256  ;;  %v4841_v2 = vrot.slane %v4840_v15, 2  ;;  %v4949_v19 = vrot.slane %v4948_v54, 2  ;;  %v5044_v32 = vadd.f32 %v5043_v63, %v4470_v16  ;;  %v14573_v28 = vpop.permute.xlu1 %3807  ;;  %v14583_v18 = vpop.permute.xlu0 %3795  ;;  %v18766_v63 = vld [vmem:[#allocation274_spill] sm:$0xff] }
 0x420   : > { %v4055_v40 = vmul.f32 %v14569_v30, %v2385_v41  ;;  %v4890_v56 = vadd.f32 %v4889_v24, %v4888_v5  ;;  %v14586_v62 = vadd.f32 %v4747_v39, %v14492_v12  ;;  %v4837_v21 = vrot.slane %v4836_v46, 1  ;;  %v648_v39 = vld [vmem:[%s14579_s0 + $0x8] sm:$0xff] }
 0x421   : > { %v14581_v61 = vadd.f32 %v4192_v1, %v4058_v51  ;;  %v4901_v16 = vrot.slane %v4900_v27, 2  ;;  %v3932_v58 = vsel %vm2320_vm14, %v18766_v63, %v18765_v26  ;;  %3855 = vbcast.lane.b32.xlu1 %v3341_v43, 264  ;;  %v14593_v9 = vadd.f32 %v4885_v47, %v4884_v7  ;;  %v18768_v51 = vld [vmem:[#allocation279_spill] sm:$0xff]  ;;  %v647_v7 = vld [vmem:[%s14579_s0] sm:$0xff] }
 0x422   : > { %18764 = vst [vmem:[#allocation165_spill] sm:$0xff] %v14586_v62  ;;  %v14588_v41 = vadd.f32 %v4189_v60, %v4055_v40  ;;  %v4955_v5 = vrot.slane %v4954_v50, 2  ;;  %v4907_v24 = vrot.slane %v4906_v33, 2  ;;  %v4996_v1 = vadd.f32 %v4995_v11, %v4462_v49  ;;  %v18770_v40 = vld [vmem:[#allocation268_spill] sm:$0xff]  ;;  %v18772_v43 = vld [vmem:[#allocation269_spill] sm:$0xff]  ;;  %v18773_v47 = vld [vmem:[#allocation263_spill] sm:$0xff] }
 0x423   : > { %18767 = vst [vmem:[#allocation159_spill] sm:$0xff] %v14593_v9  ;;  %v3929_v12 = vsel %vm2320_vm14, %v18769_v44, %v18768_v51  ;;  %3823 = vbcast.lane.b32.xlu0 %v3285_v10, 264  ;;  %v4842_v14 = vadd.f32 %v4841_v2, %v4840_v15  ;;  %v4950_v62 = vadd.f32 %v4949_v19, %v4948_v54  ;;  %v5045_v60 = vrot.slane %v5044_v32, 2  ;;  %v14602_v26 = vpop.permute.xlu1 %3839  ;;  %v14610_v10 = vpop.permute.xlu0 %3827 }
 0x424   : > { %v2396_v3 = vsel %vm2320_vm14, %v18771_v22, %v18770_v40  ;;  %v2393_v49 = vsel %vm2320_vm14, %v18773_v47, %v18772_v43  ;;  %v4448_v11 = vmax.f32 %v14581_v61, 0.0  ;;  %v4200_v44 = vmul.f32 %v14555_v45, %v3932_v58  ;;  %18774 = vst [vmem:[#allocation178_spill] sm:$0xff] %v14610_v10  ;;  %v649_v61 = vld [vmem:[%s14579_s0 + $0x10] sm:$0xff] }
 0x425   : > { %v4891_v15 = vrot.slane %v4890_v56, 1  ;;  %v4902_v54 = vadd.f32 %v4901_v16, %v4900_v27  ;;  %v4445_v2 = vmax.f32 %v14588_v41, 0.0  ;;  %v4197_v22 = vmul.f32 %v14555_v45, %v3929_v12  ;;  %6052 = vperm.xlu1 %11557, %v648_v39   ;;  %v650_v27 = vld [vmem:[%s14579_s0 + $0x18] sm:$0xff] }
 0x426   : > { %v14614_v19 = vadd.f32 %v4837_v21, %v4836_v46  ;;  %v4956_v63 = vadd.f32 %v4955_v5, %v4954_v50  ;;  %v4908_v51 = vadd.f32 %v4907_v24, %v4906_v33  ;;  %v4997_v40 = vrot.slane %v4996_v1, 2  ;;  %v18777_v46 = vld [vmem:[#allocation280_spill] sm:$0xff]  ;;  %v18781_v5 = vld [vmem:[#allocation270_spill] sm:$0xff] }
 0x427   : > { %v4066_v43 = vmul.f32 %v14569_v30, %v2396_v3  ;;  %6047 = vperm.xlu0 %11556, %v647_v7   ;;  %v5046_v58 = vadd.f32 %v5045_v60, %v5044_v32  ;;  %v4063_v47 = vmul.f32 %v14569_v30, %v2393_v49  ;;  %v14619_v9 = vpop.permute.xlu1 %1680  ;;  %v4843_v16 = vrot.slane %v4842_v14, 1  ;;  %v18778_v21 = vld [vmem:[#allocation276_spill] sm:$0xff]  ;;  %v14627_v33 = vpop.permute.xlu0 %1624 }
 0x428   : > { %18775 = vst [vmem:[#allocation172_spill] sm:$0xff] %v14614_v19  ;;  %18776 = vst [vmem:[#allocation166_spill] sm:$0xff] %v14619_v9  ;;  %v4951_v41 = vrot.slane %v4950_v62, 1  ;;  %v4911_v23 = vrot.slane %v4448_v11, 4  ;;  %v3947_v50 = vsel %vm2320_vm14, %v18778_v21, %v18777_v46  ;;  %v14629_v3 = vadd.f32 %v4891_v15, %v4890_v56  ;;  %v18782_v32 = vld [vmem:[#allocation264_spill] sm:$0xff]  ;;  %v18826_v9 = vld [vmem:[#allocation287_spill] sm:$0xff] }
 0x429   : > { %v14622_v12 = vadd.f32 %v4200_v44, %v4066_v43  ;;  %18779 = vst [vmem:[#allocation160_spill] sm:$0xff] %v14627_v33  ;;  %v2411_v24 = vsel %vm2320_vm14, %v18782_v32, %v18781_v5  ;;  %v4893_v39 = vrot.slane %v4445_v2, 4  ;;  %v14634_v60 = vadd.f32 %v4197_v22, %v4063_v47  ;;  %6057 = vperm.xlu1 %11557, %v649_v61   ;;  %v18783_v44 = vld [vmem:[#allocation281_spill] sm:$0xff]  ;;  %v18823_v33 = vld [vmem:[#allocation286_spill] sm:$0xff] }
 0x42a   : > { %18780 = vst [vmem:[#allocation179_spill] sm:$0xff] %v14629_v3  ;;  %v4903_v7 = vrot.slane %v4902_v54, 1  ;;  %v14636_v49 = vadd.f32 %v4997_v40, %v4996_v1  ;;  %v18784_v43 = vld [vmem:[#allocation277_spill] sm:$0xff]  ;;  %v4909_v46 = vrot.slane %v4908_v51, 1  ;;  %v4957_v21 = vrot.slane %v4956_v63, 1  ;;  %v18788_v1 = vld [vmem:[#allocation271_spill] sm:$0xff] }
 0x42b   : > { %v3939_v19 = vsel %vm2320_vm14, %v18784_v43, %v18783_v44  ;;  %6062 = vperm.xlu0 %11556, %v650_v27   ;;  %v4215_v56 = vmul.f32 %v14555_v45, %v3947_v50  ;;  %v14642_v15 = vpop.permute.xlu1 %1785  ;;  %v14644_v3 = vadd.f32 %v4843_v16, %v4842_v14  ;;  %v14646_v5 = vadd.f32 %v4951_v41, %v4950_v62  ;;  %v18789_v40 = vld [vmem:[#allocation265_spill] sm:$0xff]  ;;  %v14655_v44 = vpop.permute.xlu0 %1729  ;;  %v18791_v16 = vld [vmem:[#allocation300_spill] sm:$0xff]  ;;  %v18792_v41 = vld [vmem:[#allocation294_spill] sm:$0xff] }
 0x42c   : > { %18785 = vst [vmem:[#allocation173_spill] sm:$0xff] %v14642_v15  ;;  %v5047_v22 = vrot.slane %v5046_v58, 1  ;;  %v4081_v61 = vmul.f32 %v14569_v30, %v2411_v24  ;;  %v2403_v47 = vsel %vm2320_vm14, %v18789_v40, %v18788_v1  ;;  %v14652_v32 = vadd.f32 %v4911_v23, %v4448_v11  ;;  %18790 = vst [vmem:[#allocation180_spill] sm:$0xff] %v14655_v44  ;;  %v18793_v23 = vld [vmem:[#allocation28_spill] sm:$0xff]  ;;  %v18798_v40 = vld [vmem:[#allocation282_spill] sm:$0xff] }
 0x42d   : > { %18786 = vst [vmem:[#allocation167_spill] sm:$0xff] %v14644_v3  ;;  %18787 = vst [vmem:[#allocation161_spill] sm:$0xff] %v14646_v5  ;;  %v4456_v27 = vmax.f32 %v14622_v12, 0.0  ;;  %v14657_v50 = vadd.f32 %v4893_v39, %v4445_v2  ;;  %v4207_v62 = vmul.f32 %v14555_v45, %v3939_v19  ;;  %v3933_v24 = vsel %vm2320_vm14, %v18792_v41, %v18791_v16  ;;  %v18797_v1 = vld [vmem:[#allocation288_spill] sm:$0xff]  ;;  %v18817_v44 = vld [vmem:[#allocation305_spill] sm:$0xff] }
 0x42e   : > { %5535 = vrot.lane.b32.xlu1 %v13399_v35, %s11868_s20  ;;  %v14668_v11 = vadd.f32 %v4903_v7, %v4902_v54  ;;  %v14670_v12 = vadd.f32 %v4909_v46, %v4908_v51  ;;  %v14672_v2 = vadd.f32 %v4957_v21, %v4956_v63  ;;  %v4999_v39 = vrot.slane %v14636_v49, 1  ;;  %v18801_v63 = vld [vmem:[#allocation301_spill] sm:$0xff]  ;;  %v18802_v46 = vld [vmem:[#allocation295_spill] sm:$0xff] }
 0x42f   : > { %5551 = vrot.lane.b32.xlu0 %v18793_v23, %s11868_s20  ;;  %v4073_v19 = vmul.f32 %v14569_v30, %v2403_v47  ;;  %v4343_v43 = vadd.f32 %v4215_v56, %v4081_v61  ;;  %v2397_v16 = vsel %vm2320_vm14, %v18798_v40, %v18797_v1  ;;  %v14679_v41 = vpop.permute.xlu1 %2246  ;;  %v14681_v14 = vadd.f32 %v5047_v22, %v5046_v58  ;;  %v18805_v58 = vld [vmem:[#allocation302_spill] sm:$0xff]  ;;  %v18806_v22 = vld [vmem:[#allocation296_spill] sm:$0xff]  ;;  %v18808_v23 = vld [vmem:[#allocation289_spill] sm:$0xff] }
 0x430   : > { %18794 = vst [vmem:[#allocation174_spill] sm:$0xff] %v14668_v11  ;;  %18795 = vst [vmem:[#allocation168_spill] sm:$0xff] %v14670_v12  ;;  %v4913_v54 = vrot.slane %v14652_v32, 2  ;;  %v4959_v7 = vrot.slane %v4456_v27, 4  ;;  %v4201_v51 = vmul.f32 %v14555_v45, %v3933_v24  ;;  %v3925_v21 = vsel %vm2320_vm14, %v18802_v46, %v18801_v63  ;;  %v18809_v63 = vld [vmem:[#allocation283_spill] sm:$0xff]  ;;  %v18811_v12 = vld [vmem:[#allocation297_spill] sm:$0xff] }
 0x431   : > { %18796 = vst [vmem:[#allocation162_spill] sm:$0xff] %v14672_v2  ;;  %18799 = vst [vmem:[#allocation181_spill] sm:$0xff] %v14679_v41  ;;  %v14688_v2 = vpop.permute.xlu0 %2214  ;;  %v4895_v56 = vrot.slane %v14657_v50, 2  ;;  %v18804_v61 = vmax.f32 %v14634_v60, 0.0  ;;  %v14693_v1 = vadd.f32 %v4207_v62, %v4073_v19  ;;  %v3940_v40 = vsel %vm2320_vm14, %v18806_v22, %v18805_v58  ;;  %v18810_v35 = vld [vmem:[#allocation303_spill] sm:$0xff]  ;;  %v18813_v62 = vld [vmem:[#allocation298_spill] sm:$0xff] }
 0x432   : > { %18800 = vst [vmem:[#allocation175_spill] sm:$0xff] %v14681_v14  ;;  %18803 = vst [vmem:[#allocation169_spill] sm:$0xff] %v14688_v2  ;;  %v18807_v14 = vld [vmem:[#allocation21_spill] sm:$0xff]  ;;  %v4067_v24 = vmul.f32 %v14569_v30, %v2397_v16  ;;  %v2389_v46 = vsel %vm2320_vm14, %v18809_v63, %v18808_v23  ;;  %v3937_v5 = vsel %vm2320_vm14, %v18811_v12, %v18810_v35  ;;  %v4471_v58 = vmax.f32 %v4343_v43, 0.0  ;;  %v18815_v22 = vld [vmem:[#allocation290_spill] sm:$0xff] }
 0x433   : > { %v4941_v47 = vrot.slane %v18804_v61, 4  ;;  %5537 = vrot.lane.b32.xlu1 %v18807_v14, %s11868_s20  ;;  %v18812_v61 = vld [vmem:[#allocation304_spill] sm:$0xff]  ;;  %v18814_v11 = vld [vmem:[#allocation17_spill] sm:$0xff]  ;;  %v4193_v3 = vmul.f32 %v14555_v45, %v3925_v21  ;;  %v18818_v23 = vld [vmem:[#allocation299_spill] sm:$0xff]  ;;  %v14719_v15 = vpop.permute.xlu1 %2306  ;;  %v4208_v2 = vmul.f32 %v14555_v45, %v3940_v40  ;;  %v4059_v21 = vmul.f32 %v14569_v30, %v2389_v46 }
 0x434   : > { %v3948_v19 = vsel %vm2320_vm14, %v18813_v62, %v18812_v61  ;;  %5553 = vrot.lane.b32.xlu0 %v18814_v11, %s11868_s20  ;;  %v18816_v14 = vld [vmem:[#allocation284_spill] sm:$0xff]  ;;  %v3945_v63 = vsel %vm2320_vm14, %v18818_v23, %v18817_v44  ;;  %18819 = vst [vmem:[#allocation163_spill] sm:$0xff] %v14719_v15  ;;  %v18820_v35 = vld [vmem:[#allocation291_spill] sm:$0xff]  ;;  %v18821_v12 = vld [vmem:[#allocation285_spill] sm:$0xff]  ;;  %v4329_v11 = vadd.f32 %v4201_v51, %v4067_v24  ;;  %v5049_v46 = vrot.slane %v4471_v58, 4 }
 0x435   : > { %v2404_v16 = vsel %vm2320_vm14, %v18816_v14, %v18815_v22  ;;  %v2401_v61 = vsel %vm2320_vm14, %v18821_v12, %v18820_v35  ;;  %v18822_v62 = vld [vmem:[#allocation292_spill] sm:$0xff]  ;;  %v14728_v14 = vpop.permute.xlu0 %2274  ;;  %v18825_v22 = vld [vmem:[#allocation293_spill] sm:$0xff]  ;;  %v4205_v23 = vmul.f32 %v14555_v45, %v3937_v5  ;;  %v4216_v15 = vmul.f32 %v14555_v45, %v3948_v19  ;;  %v18828_v24 = vld [vmem:[#allocation43_spill] sm:$0xff] }
 0x436   : > { %v2412_v43 = vsel %vm2320_vm14, %v18823_v33, %v18822_v62  ;;  %18824 = vst [vmem:[#allocation194_spill] sm:$0xff] %v14728_v14  ;;  %v2409_v44 = vsel %vm2320_vm14, %v18826_v9, %v18825_v22  ;;  %v18827_v35 = vld [vmem:[#allocation48_spill] sm:$0xff]  ;;  %v4960_v12 = vadd.f32 %v4959_v7, %v4456_v27  ;;  %v4463_v33 = vmax.f32 %v14693_v1, 0.0  ;;  %v18830_v22 = vld [vmem:[#allocation318_spill] sm:$0xff]  ;;  %v18851_v41 = vld [vmem:[#allocation35_spill] sm:$0xff] }
 0x437   : > { %5567 = vrot.lane.b32.xlu1 %v18827_v35, %s11868_s20  ;;  %v4074_v51 = vmul.f32 %v14569_v30, %v2404_v16  ;;  %v4213_v40 = vmul.f32 %v14555_v45, %v3945_v63  ;;  %v4071_v9 = vmul.f32 %v14569_v30, %v2401_v61  ;;  %v4082_v5 = vmul.f32 %v14569_v30, %v2412_v43  ;;  %v14747_v19 = vpop.permute.xlu1 %3217  ;;  %v18831_v16 = vld [vmem:[#allocation314_spill] sm:$0xff] }
 0x438   : > { %5583 = vrot.lane.b32.xlu0 %v18828_v24, %s11868_s20  ;;  %v14745_v62 = vadd.f32 %v4193_v3, %v4059_v21  ;;  %18829 = vst [vmem:[#allocation190_spill] sm:$0xff] %v14747_v19  ;;  %v4079_v27 = vmul.f32 %v14569_v30, %v2409_v44  ;;  %v4457_v7 = vmax.f32 %v4329_v11, 0.0  ;;  %v3934_v63 = vsel %vm2320_vm14, %v18831_v16, %v18830_v22  ;;  %v18833_v3 = vld [vmem:[#allocation33_spill] sm:$0xff]  ;;  %v18837_v22 = vld [vmem:[#allocation306_spill] sm:$0xff] }
 0x439   : > { %v4336_v1 = vadd.f32 %v4208_v2, %v4074_v51  ;;  %v14753_v35 = vpop.permute.xlu0 %3161  ;;  %v14756_v24 = vadd.f32 %v4913_v54, %v14652_v32  ;;  %v4333_v61 = vadd.f32 %v4205_v23, %v4071_v9  ;;  %v4344_v14 = vadd.f32 %v4216_v15, %v4082_v5  ;;  %v18836_v51 = vld [vmem:[#allocation310_spill] sm:$0xff]  ;;  %v18838_v23 = vld [vmem:[#allocation319_spill] sm:$0xff] }
 0x43a   : > { %18832 = vst [vmem:[#allocation186_spill] sm:$0xff] %v14753_v35  ;;  %v14761_v43 = vadd.f32 %v4999_v39, %v14636_v49  ;;  %v18835_v11 = vmax.f32 %v14634_v60, 0.0  ;;  %v5001_v21 = vrot.slane %v4463_v33, 4  ;;  %v4341_v44 = vadd.f32 %v4213_v40, %v4079_v27  ;;  %v18839_v49 = vld [vmem:[#allocation315_spill] sm:$0xff]  ;;  %v18853_v35 = vld [vmem:[#allocation317_spill] sm:$0xff] }
 0x43b   : > { %5533 = vrot.lane.b32.xlu1 %v18833_v3, %s11868_s20  ;;  %v2398_v16 = vsel %vm2320_vm14, %v18837_v22, %v18836_v51  ;;  %v5050_v32 = vadd.f32 %v5049_v46, %v4471_v58  ;;  %v4449_v15 = vmax.f32 %v14745_v62, 0.0  ;;  %v4202_v54 = vmul.f32 %v14555_v45, %v3934_v63  ;;  %v14775_v60 = vpop.permute.xlu1 %3322  ;;  %v18842_v62 = vld [vmem:[#allocation311_spill] sm:$0xff] }
 0x43c   : > { %18834 = vst [vmem:[#allocation182_spill] sm:$0xff] %v14761_v43  ;;  %v4942_v2 = vadd.f32 %v4941_v47, %v18835_v11  ;;  %5539 = vrot.lane.b32.xlu0 %v13591_v55, %s11868_s20  ;;  %v3926_v39 = vsel %vm2320_vm14, %v18839_v49, %v18838_v23  ;;  %18840 = vst [vmem:[#allocation195_spill] sm:$0xff] %v14775_v60  ;;  %v14778_v47 = vadd.f32 %v4895_v56, %v14657_v50  ;;  %v18843_v63 = vld [vmem:[#allocation307_spill] sm:$0xff]  ;;  %v18846_v43 = vld [vmem:[#allocation316_spill] sm:$0xff] }
 0x43d   : > { %v4961_v40 = vrot.slane %v4960_v12, 2  ;;  %v4965_v9 = vrot.slane %v4457_v7, 4  ;;  %v4464_v5 = vmax.f32 %v4336_v1, 0.0  ;;  %v14780_v27 = vpop.permute.xlu0 %3266  ;;  %v4461_v11 = vmax.f32 %v4333_v61, 0.0  ;;  %v18848_v60 = vld [vmem:[#allocation53_spill] sm:$0xff] }
 0x43e   : > { %18841 = vst [vmem:[#allocation191_spill] sm:$0xff] %v14780_v27  ;;  %v4472_v58 = vmax.f32 %v4344_v14, 0.0  ;;  %v4068_v46 = vmul.f32 %v14569_v30, %v2398_v16  ;;  %v2390_v51 = vsel %vm2320_vm14, %v18843_v63, %v18842_v62  ;;  %v4943_v22 = vrot.slane %v4942_v2, 2 }
 0x43f   : > { %5549 = vrot.lane.b32.xlu1 %v13597_v37, %s11868_s20  ;;  %v4469_v23 = vmax.f32 %v4341_v44, 0.0  ;;  %v4194_v50 = vmul.f32 %v14555_v45, %v3926_v39  ;;  %v4915_v56 = vrot.slane %v14756_v24, 1  ;;  %v5051_v1 = vrot.slane %v5050_v32, 2  ;;  %v14792_v49 = vpop.permute.xlu1 %3783  ;;  %v18845_v37 = vld [vmem:[#allocation320_spill] sm:$0xff] }
 0x440   : > { %5555 = vrot.lane.b32.xlu0 %v13608_v48, %s11868_s20  ;;  %v5002_v14 = vadd.f32 %v5001_v21, %v4463_v33  ;;  %v4917_v61 = vrot.slane %v4449_v15, 4  ;;  %v4330_v16 = vadd.f32 %v4202_v54, %v4068_v46  ;;  %18844 = vst [vmem:[#allocation196_spill] sm:$0xff] %v14792_v49  ;;  %v4966_v55 = vadd.f32 %v4965_v9, %v4457_v7  ;;  %v18849_v7 = vld [vmem:[#allocation312_spill] sm:$0xff] }
 0x441   : > { %v5007_v62 = vrot.slane %v4464_v5, 4  ;;  %v4060_v63 = vmul.f32 %v14569_v30, %v2390_v51  ;;  %v3949_v44 = vsel %vm2320_vm14, %v18846_v43, %v18845_v37  ;;  %v14798_v39 = vpop.permute.xlu0 %3751  ;;  %v4962_v3 = vadd.f32 %v4961_v40, %v4960_v12  ;;  %v18850_v9 = vld [vmem:[#allocation308_spill] sm:$0xff]  ;;  %v18852_v40 = vld [vmem:[#allocation321_spill] sm:$0xff] }
 0x442   : > { %18847 = vst [vmem:[#allocation192_spill] sm:$0xff] %v14798_v39  ;;  %v4989_v48 = vrot.slane %v4461_v11, 4  ;;  %v5055_v27 = vrot.slane %v4472_v58, 4  ;;  %v4897_v33 = vrot.slane %v14778_v47, 1  ;;  %v4944_v21 = vadd.f32 %v4943_v22, %v4942_v2 }
 0x443   : > { %5569 = vrot.lane.b32.xlu1 %v18848_v60, %s11868_s20  ;;  %v5037_v54 = vrot.slane %v4469_v23, 4  ;;  %v2413_v46 = vsel %vm2320_vm14, %v18850_v9, %v18849_v7  ;;  %v4322_v51 = vadd.f32 %v4194_v50, %v4060_v63  ;;  %v5003_v37 = vrot.slane %v5002_v14, 2  ;;  %v14812_v39 = vpop.permute.xlu1 %3843  ;;  %v18854_v9 = vld [vmem:[#allocation313_spill] sm:$0xff] }
 0x444   : > { %5585 = vrot.lane.b32.xlu0 %v18851_v41, %s11868_s20  ;;  %v4458_v43 = vmax.f32 %v4330_v16, 0.0  ;;  %v4217_v12 = vmul.f32 %v14555_v45, %v3949_v44  ;;  %v3941_v60 = vsel %vm2320_vm14, %v18853_v35, %v18852_v40  ;;  %v5052_v2 = vadd.f32 %v5051_v1, %v5050_v32  ;;  %v18855_v16 = vld [vmem:[#allocation309_spill] sm:$0xff]  ;;  %v18856_v41 = vld [vmem:[#allocation66_spill] sm:$0xff] }
 0x445   : > { %v4967_v22 = vrot.slane %v4966_v55, 2  ;;  %v4918_v19 = vadd.f32 %v4917_v61, %v4449_v15  ;;  %v5008_v49 = vadd.f32 %v5007_v62, %v4464_v5  ;;  %v14814_v10 = vpop.permute.xlu0 %3811  ;;  %v4990_v50 = vadd.f32 %v4989_v48, %v4461_v11  ;;  %v18857_v15 = vld [vmem:[#allocation62_spill] sm:$0xff] }
 0x446   : > { %v5056_v63 = vadd.f32 %v5055_v27, %v4472_v58  ;;  %v4083_v7 = vmul.f32 %v14569_v30, %v2413_v46  ;;  %v2405_v44 = vsel %vm2320_vm14, %v18855_v16, %v18854_v9  ;;  %v5038_v35 = vadd.f32 %v5037_v54, %v4469_v23  ;;  %v18860_v16 = vld [vmem:[#allocation54_spill] sm:$0xff] }
 0x447   : > { %5541 = vrot.lane.b32.xlu1 %v18856_v41, %s11868_s20  ;;  %v4450_v40 = vmax.f32 %v4322_v51, 0.0  ;;  %v4209_v32 = vmul.f32 %v14555_v45, %v3941_v60  ;;  %v4963_v5 = vrot.slane %v4962_v3, 1  ;;  %v5004_v1 = vadd.f32 %v5003_v37, %v5002_v14  ;;  %v14825_v11 = vpop.permute.xlu1 %1687 }
 0x448   : > { %5557 = vrot.lane.b32.xlu0 %v18857_v15, %s11868_s20  ;;  %v4971_v48 = vrot.slane %v4458_v43, 4  ;;  %v4345_v27 = vadd.f32 %v4217_v12, %v4083_v7  ;;  %18858 = vst [vmem:[#allocation197_spill] sm:$0xff] %v14825_v11  ;;  %v4945_v58 = vrot.slane %v4944_v21, 1  ;;  %v4919_v61 = vrot.slane %v4918_v19, 2  ;;  %v18862_v15 = vld [vmem:[#allocation68_spill] sm:$0xff]  ;;  %v18939_v11 = vld [vmem:[#allocation85_spill] sm:$0xff] }
 0x449   : > { %v5009_v62 = vrot.slane %v5008_v49, 2  ;;  %v4075_v46 = vmul.f32 %v14569_v30, %v2405_v44  ;;  %v14828_v9 = vpop.permute.xlu0 %1631  ;;  %v5053_v23 = vrot.slane %v5052_v2, 1  ;;  %v4968_v54 = vadd.f32 %v4967_v22, %v4966_v55 }
 0x44a   : > { %18859 = vst [vmem:[#allocation193_spill] sm:$0xff] %v14828_v9  ;;  %v4991_v51 = vrot.slane %v4990_v50, 2  ;;  %v5057_v60 = vrot.slane %v5056_v63, 2  ;;  %v14833_v14 = vadd.f32 %v4915_v56, %v14756_v24  ;;  %v5039_v37 = vrot.slane %v5038_v35, 2 }
 0x44b   : > { %5565 = vrot.lane.b32.xlu1 %v18860_v16, %s11868_s20  ;;  %v4923_v12 = vrot.slane %v4450_v40, 4  ;;  %v14835_v7 = vadd.f32 %v4209_v32, %v4075_v46  ;;  %v14840_v44 = vadd.f32 %v4897_v33, %v14778_v47  ;;  %v4972_v41 = vadd.f32 %v4971_v48, %v4458_v43  ;;  %v14842_v22 = vpop.permute.xlu1 %1792  ;;  %v18869_v33 = vld [vmem:[#allocation29_spill] sm:$0xff]  ;;  %v18870_v43 = vld [vmem:[#allocation19_spill] sm:$0xff] }
 0x44c   : > { %18861 = vst [vmem:[#allocation187_spill] sm:$0xff] %v14833_v14  ;;  %5571 = vrot.lane.b32.xlu0 %v18862_v15, %s11868_s20  ;;  %v4473_v55 = vmax.f32 %v4345_v27, 0.0  ;;  %18864 = vst [vmem:[#allocation188_spill] sm:$0xff] %v14842_v22  ;;  %v14844_v9 = vadd.f32 %v4963_v5, %v4962_v3  ;;  %v5005_v16 = vrot.slane %v5004_v1, 1  ;;  %v4920_v24 = vadd.f32 %v4919_v61, %v4918_v19  ;;  %v18871_v3 = vld [vmem:[#allocation64_spill] sm:$0xff]  ;;  %v18872_v61 = vld [vmem:[#allocation22_spill] sm:$0xff] }
 0x44d   : > { %18863 = vst [vmem:[#allocation183_spill] sm:$0xff] %v14840_v44  ;;  %v5010_v56 = vadd.f32 %v5009_v62, %v5008_v49  ;;  %v14846_v14 = vpop.permute.xlu0 %1736  ;;  %v14848_v32 = vadd.f32 %v4945_v58, %v4944_v21  ;;  %v14850_v46 = vadd.f32 %v5053_v23, %v5052_v2  ;;  %v4992_v15 = vadd.f32 %v4991_v51, %v4990_v50  ;;  %v18873_v21 = vld [vmem:[#allocation14_spill] sm:$0xff]  ;;  %v18874_v58 = vld [vmem:[#allocation60_spill] sm:$0xff] }
 0x44e   : > { %18865 = vst [vmem:[#allocation184_spill] sm:$0xff] %v14844_v9  ;;  %18866 = vst [vmem:[#allocation189_spill] sm:$0xff] %v14846_v14  ;;  %v5058_v47 = vadd.f32 %v5057_v60, %v5056_v63  ;;  %v3935_v48 = vsel %vm2320_vm14, %v18870_v43, %v18869_v33  ;;  %v4969_v5 = vrot.slane %v4968_v54, 1  ;;  %v5040_v27 = vadd.f32 %v5039_v37, %v5038_v35  ;;  %v651_v50 = vld [vmem:[%s14579_s0 + $0x20] sm:$0xff]  ;;  %v652_v35 = vld [vmem:[%s14579_s0 + $0x28] sm:$0xff] }
 0x44f   : > { %18867 = vst [vmem:[#allocation185_spill] sm:$0xff] %v14848_v32  ;;  %18868 = vst [vmem:[#allocation210_spill] sm:$0xff] %v14850_v46  ;;  %5581 = vrot.lane.b32.xlu1 %v18871_v3, %s11868_s20  ;;  %v4924_v19 = vadd.f32 %v4923_v12, %v4450_v40  ;;  %v4465_v49 = vmax.f32 %v14835_v7, 0.0  ;;  %v3927_v2 = vsel %vm2320_vm14, %v18873_v21, %v18872_v61  ;;  %v4973_v63 = vrot.slane %v4972_v41, 2  ;;  %v18875_v23 = vld [vmem:[#allocation326_spill] sm:$0xff]  ;;  %v14867_v33 = vpop.permute.xlu1 %2250  ;;  %v18879_v37 = vld [vmem:[#allocation327_spill] sm:$0xff] }
 0x450   : > { %5587 = vrot.lane.b32.xlu0 %v18874_v58, %s11868_s20  ;;  %v5061_v62 = vrot.slane %v4473_v55, 4  ;;  %v18876_v51 = vld [vmem:[#allocation322_spill] sm:$0xff]  ;;  %18877 = vst [vmem:[#allocation206_spill] sm:$0xff] %v14867_v33  ;;  %v14870_v40 = vadd.f32 %v5005_v16, %v5004_v1  ;;  %v18880_v12 = vld [vmem:[#allocation323_spill] sm:$0xff]  ;;  %v4203_v43 = vmul.f32 %v14555_v45, %v3935_v48  ;;  %v4921_v21 = vrot.slane %v4920_v24, 1  ;;  %v18884_v44 = vld [vmem:[#allocation20_spill] sm:$0xff] }
 0x451   : > { %v2399_v60 = vsel %vm2320_vm14, %v18876_v51, %v18875_v23  ;;  %v2391_v7 = vsel %vm2320_vm14, %v18880_v12, %v18879_v37  ;;  %v14876_v61 = vpop.permute.xlu0 %2218  ;;  %v5011_v58 = vrot.slane %v5010_v56, 1  ;;  %v4195_v3 = vmul.f32 %v14555_v45, %v3927_v2  ;;  %v18883_v32 = vld [vmem:[#allocation18_spill] sm:$0xff] }
 0x452   : > { %18878 = vst [vmem:[#allocation211_spill] sm:$0xff] %v14870_v40  ;;  %18881 = vst [vmem:[#allocation207_spill] sm:$0xff] %v14876_v61  ;;  %v14879_v46 = vadd.f32 %v4969_v5, %v4968_v54  ;;  %v4993_v23 = vrot.slane %v4992_v15, 1  ;;  %v5059_v51 = vrot.slane %v5058_v47, 1  ;;  %v4925_v9 = vrot.slane %v4924_v19, 2  ;;  %v18886_v5 = vld [vmem:[#allocation27_spill] sm:$0xff] }
 0x453   : > { %6067 = vperm.xlu1 %11557, %v651_v50   ;;  %v5013_v1 = vrot.slane %v4465_v49, 4  ;;  %v4069_v16 = vmul.f32 %v14569_v30, %v2399_v60  ;;  %v5041_v40 = vrot.slane %v5040_v27, 1  ;;  %v14882_v37 = vadd.f32 %v4973_v63, %v4972_v41  ;;  %v14890_v54 = vpop.permute.xlu1 %2310  ;;  %v18887_v50 = vld [vmem:[#allocation324_spill] sm:$0xff]  ;;  %v18891_v63 = vld [vmem:[#allocation23_spill] sm:$0xff] }
 0x454   : > { %18882 = vst [vmem:[#allocation212_spill] sm:$0xff] %v14879_v46  ;;  %6072 = vperm.xlu0 %11556, %v652_v35   ;;  %v14884_v48 = vadd.f32 %v5061_v62, %v4473_v55  ;;  %v4061_v12 = vmul.f32 %v14569_v30, %v2391_v7  ;;  %v3950_v2 = vsel %vm2320_vm14, %v18884_v44, %v18883_v32  ;;  %18885 = vst [vmem:[#allocation208_spill] sm:$0xff] %v14890_v54  ;;  %v18892_v62 = vld [vmem:[#allocation325_spill] sm:$0xff]  ;;  %v18928_v54 = vld [vmem:[#allocation63_spill] sm:$0xff] }
 0x455   : > { %v2414_v46 = vsel %vm2320_vm14, %v18887_v50, %v18886_v5  ;;  %v14895_v14 = vadd.f32 %v4203_v43, %v4069_v16  ;;  %v14897_v60 = vpop.permute.xlu0 %2278  ;;  %v14899_v41 = vadd.f32 %v4921_v21, %v4920_v24  ;;  %v14901_v55 = vadd.f32 %v5011_v58, %v5010_v56  ;;  %v18895_v21 = vld [vmem:[#allocation24_spill] sm:$0xff]  ;;  %v18896_v56 = vld [vmem:[#allocation15_spill] sm:$0xff]  ;;  %v18903_v50 = vld [vmem:[#allocation50_spill] sm:$0xff] }
 0x456   : > { %18888 = vst [vmem:[#allocation213_spill] sm:$0xff] %v14897_v60  ;;  %v2406_v35 = vsel %vm2320_vm14, %v18892_v62, %v18891_v63  ;;  %v14906_v7 = vadd.f32 %v4195_v3, %v4061_v12  ;;  %v14910_v44 = vadd.f32 %v4993_v23, %v4992_v15  ;;  %v14912_v32 = vadd.f32 %v5059_v51, %v5058_v47  ;;  %v18897_v16 = vld [vmem:[#allocation79_spill] sm:$0xff]  ;;  %v18900_v51 = vld [vmem:[#allocation52_spill] sm:$0xff]  ;;  %v18905_v62 = vld [vmem:[#allocation37_spill] sm:$0xff] }
 0x457   : > { %18889 = vst [vmem:[#allocation209_spill] sm:$0xff] %v14899_v41  ;;  %18890 = vst [vmem:[#allocation202_spill] sm:$0xff] %v14901_v55  ;;  %5543 = vrot.lane.b32.xlu1 %v13868_v17, %s11868_s20  ;;  %v14914_v43 = vadd.f32 %v4925_v9, %v4924_v19  ;;  %v4218_v24 = vmul.f32 %v14555_v45, %v3950_v2  ;;  %v3942_v58 = vsel %vm2320_vm14, %v18896_v56, %v18895_v21  ;;  %v14928_v47 = vpop.permute.xlu1 %3224  ;;  %v18901_v2 = vld [vmem:[#allocation39_spill] sm:$0xff]  ;;  %v18906_v21 = vld [vmem:[#allocation42_spill] sm:$0xff] }
 0x458   : > { %18893 = vst [vmem:[#allocation198_spill] sm:$0xff] %v14910_v44  ;;  %18894 = vst [vmem:[#allocation203_spill] sm:$0xff] %v14912_v32  ;;  %5559 = vrot.lane.b32.xlu0 %v18897_v16, %s11868_s20  ;;  %v14922_v3 = vadd.f32 %v5041_v40, %v5040_v27  ;;  %v5063_v12 = vrot.slane %v14884_v48, 2  ;;  %v14925_v5 = vadd.f32 %v5013_v1, %v4465_v49  ;;  %v4459_v23 = vmax.f32 %v14895_v14, 0.0  ;;  %v18902_v40 = vld [vmem:[#allocation40_spill] sm:$0xff]  ;;  %v18907_v14 = vld [vmem:[#allocation47_spill] sm:$0xff] }
 0x459   : > { %v4084_v15 = vmul.f32 %v14569_v30, %v2414_v46  ;;  %18899 = vst [vmem:[#allocation204_spill] sm:$0xff] %v14928_v47  ;;  %v4076_v19 = vmul.f32 %v14569_v30, %v2406_v35  ;;  %v3936_v27 = vsel %vm2320_vm14, %v18901_v2, %v18900_v51  ;;  %v3928_v49 = vsel %vm2320_vm14, %v18903_v50, %v18902_v40  ;;  %v14939_v1 = vpop.permute.xlu0 %3168  ;;  %v18908_v56 = vld [vmem:[#allocation44_spill] sm:$0xff]  ;;  %v18910_v40 = vld [vmem:[#allocation31_spill] sm:$0xff]  ;;  %v18911_v50 = vld [vmem:[#allocation49_spill] sm:$0xff] }
 0x45a   : > { %18898 = vst [vmem:[#allocation199_spill] sm:$0xff] %v14922_v3  ;;  %18904 = vst [vmem:[#allocation200_spill] sm:$0xff] %v14939_v1  ;;  %v4210_v63 = vmul.f32 %v14555_v45, %v3942_v58  ;;  %v2400_v35 = vsel %vm2320_vm14, %v18906_v21, %v18905_v62  ;;  %v3951_v9 = vsel %vm2320_vm14, %v18908_v56, %v18907_v14  ;;  %v18909_v51 = vld [vmem:[#allocation72_spill] sm:$0xff]  ;;  %v18912_v32 = vld [vmem:[#allocation41_spill] sm:$0xff] }
 0x45b   : > { %5573 = vrot.lane.b32.xlu1 %v18909_v51, %s11868_s20  ;;  %v14951_v2 = vadd.f32 %v4218_v24, %v4084_v15  ;;  %v2392_v46 = vsel %vm2320_vm14, %v18911_v50, %v18910_v40  ;;  %v18913_v3 = vld [vmem:[#allocation38_spill] sm:$0xff]  ;;  %v18914_v55 = vld [vmem:[#allocation69_spill] sm:$0xff]  ;;  %v18915_v44 = vld [vmem:[#allocation55_spill] sm:$0xff]  ;;  %v4204_v15 = vmul.f32 %v14555_v45, %v3936_v27  ;;  %v4196_v40 = vmul.f32 %v14555_v45, %v3928_v49 }
 0x45c   : > { %v3943_v58 = vsel %vm2320_vm14, %v18913_v3, %v18912_v32  ;;  %v3952_v62 = vsel %vm2320_vm14, %v18915_v44, %v18914_v55  ;;  %v18916_v21 = vld [vmem:[#allocation76_spill] sm:$0xff]  ;;  %v18917_v56 = vld [vmem:[#allocation51_spill] sm:$0xff]  ;;  %v18919_v50 = vld [vmem:[#allocation65_spill] sm:$0xff]  ;;  %v14973_v3 = vpop.permute.xlu1 %3329  ;;  %v4070_v55 = vmul.f32 %v14569_v30, %v2400_v35  ;;  %v4219_v60 = vmul.f32 %v14555_v45, %v3951_v9 }
 0x45d   : > { %5589 = vrot.lane.b32.xlu0 %v18916_v21, %s11868_s20  ;;  %v653_v14 = vld [vmem:[%s14579_s0 + $0x30] sm:$0xff]  ;;  %18921 = vst [vmem:[#allocation205_spill] sm:$0xff] %v14973_v3  ;;  %v654_v17 = vld [vmem:[%s14579_s0 + $0x38] sm:$0xff]  ;;  %v18923_v21 = vld [vmem:[#allocation30_spill] sm:$0xff]  ;;  %v14984_v49 = vpop.permute.xlu0 %3273  ;;  %v4062_v22 = vmul.f32 %v14569_v30, %v2392_v46  ;;  %v4220_v61 = vmul.f32 %v14555_v45, %v3952_v62 }
 0x45e   : > { %v18918_v51 = vld [vmem:[#allocation36_spill] sm:$0xff]  ;;  %v18922_v44 = vld [vmem:[#allocation45_spill] sm:$0xff]  ;;  %18926 = vst [vmem:[#allocation201_spill] sm:$0xff] %v14984_v49 }
 0x45f   : > { %v2415_v24 = vsel %vm2320_vm14, %v18918_v51, %v18917_v56  ;;  %v18920_v16 = vld [vmem:[#allocation56_spill] sm:$0xff]  ;;  %v2407_v41 = vsel %vm2320_vm14, %v18923_v21, %v18922_v44  ;;  %v18924_v51 = vld [vmem:[#allocation58_spill] sm:$0xff]  ;;  %v18925_v56 = vld [vmem:[#allocation67_spill] sm:$0xff]  ;;  %6077 = vperm.xlu1 %11557, %v653_v14   ;;  %v4977_v21 = vrot.slane %v4459_v23, 4  ;;  %v4338_v44 = vadd.f32 %v4210_v63, %v4076_v19 }
 0x460   : > { %v3944_v32 = vsel %vm2320_vm14, %v18920_v16, %v18919_v50  ;;  %v2416_v27 = vsel %vm2320_vm14, %v18925_v56, %v18924_v51  ;;  %v4211_v16 = vmul.f32 %v14555_v45, %v3943_v58  ;;  %v18927_v50 = vld [vmem:[#allocation59_spill] sm:$0xff]  ;;  %v4085_v9 = vmul.f32 %v14569_v30, %v2415_v24  ;;  %v15000_v49 = vpop.permute.xlu1 %3787  ;;  %v18930_v63 = vld [vmem:[#allocation74_spill] sm:$0xff]  ;;  %v18958_v47 = vld [vmem:[#allocation96_spill] sm:$0xff] }
 0x461   : > { %v2408_v35 = vsel %vm2320_vm14, %v18928_v54, %v18927_v50  ;;  %v4212_v3 = vmul.f32 %v14555_v45, %v3944_v32  ;;  %6082 = vperm.xlu0 %11556, %v654_v17   ;;  %v4077_v51 = vmul.f32 %v14569_v30, %v2407_v41  ;;  %v14995_v56 = vadd.f32 %v4204_v15, %v4070_v55  ;;  %v18929_v19 = vld [vmem:[#allocation83_spill] sm:$0xff]  ;;  %v18932_v17 = vld [vmem:[#allocation70_spill] sm:$0xff]  ;;  %v15011_v15 = vpop.permute.xlu0 %3755 }
 0x462   : > { %v14997_v46 = vadd.f32 %v4196_v40, %v4062_v22  ;;  %v4086_v58 = vmul.f32 %v14569_v30, %v2416_v27  ;;  %v15002_v54 = vadd.f32 %v4219_v60, %v4085_v9  ;;  %v4078_v62 = vmul.f32 %v14569_v30, %v2408_v35  ;;  %v18931_v24 = vld [vmem:[#allocation75_spill] sm:$0xff]  ;;  %18933 = vst [vmem:[#allocation226_spill] sm:$0xff] %v15011_v15  ;;  %v18934_v60 = vld [vmem:[#allocation73_spill] sm:$0xff]  ;;  %v18935_v35 = vld [vmem:[#allocation82_spill] sm:$0xff] }
 0x463   : > { %v3962_v14 = vsel %vm2320_vm14, %v18930_v63, %v18929_v19  ;;  %v3954_v41 = vsel %vm2320_vm14, %v18932_v17, %v18931_v24  ;;  %v5015_v22 = vrot.slane %v14925_v5, 2  ;;  %v4474_v40 = vmax.f32 %v14951_v2, 0.0  ;;  %5545 = vrot.lane.b32.xlu1 %v18934_v60, %s11868_s20  ;;  %v18936_v9 = vld [vmem:[#allocation61_spill] sm:$0xff]  ;;  %v18937_v63 = vld [vmem:[#allocation78_spill] sm:$0xff] }
 0x464   : > { %v4339_v32 = vadd.f32 %v4211_v16, %v4077_v51  ;;  %v4348_v55 = vadd.f32 %v4220_v61, %v4086_v58  ;;  %v4466_v27 = vmax.f32 %v4338_v44, 0.0  ;;  %v15017_v50 = vadd.f32 %v4212_v3, %v4078_v62  ;;  %v18938_v24 = vld [vmem:[#allocation57_spill] sm:$0xff]  ;;  %v15032_v51 = vpop.permute.xlu1 %3847 }
 0x465   : > { %v2426_v19 = vsel %vm2320_vm14, %v18936_v9, %v18935_v35  ;;  %v2418_v17 = vsel %vm2320_vm14, %v18938_v24, %v18937_v63  ;;  %5561 = vrot.lane.b32.xlu0 %v18939_v11, %s11868_s20  ;;  %v5064_v2 = vadd.f32 %v5063_v12, %v14884_v48  ;;  %v18940_v61 = vmax.f32 %v14906_v7, 0.0  ;;  %18941 = vst [vmem:[#allocation222_spill] sm:$0xff] %v15032_v51  ;;  %v15037_v63 = vpop.permute.xlu0 %3815 }
 0x466   : > { %v4230_v44 = vmul.f32 %v14555_v45, %v3962_v14  ;;  %v4222_v3 = vmul.f32 %v14555_v45, %v3954_v41  ;;  %v4978_v58 = vadd.f32 %v4977_v21, %v4459_v23  ;;  %v4460_v62 = vmax.f32 %v14995_v56, 0.0  ;;  %18942 = vst [vmem:[#allocation227_spill] sm:$0xff] %v15037_v63  ;;  %v18943_v14 = vld [vmem:[#allocation95_spill] sm:$0xff]  ;;  %v18944_v21 = vld [vmem:[#allocation98_spill] sm:$0xff] }
 0x467   : > { %v4929_v16 = vrot.slane %v18940_v61, 4  ;;  %v4452_v35 = vmax.f32 %v14997_v46, 0.0  ;;  %v4475_v9 = vmax.f32 %v15002_v54, 0.0  ;;  %v4467_v24 = vmax.f32 %v4339_v32, 0.0  ;;  %5575 = vrot.lane.b32.xlu1 %v18943_v14, %s11868_s20 }
 0x468   : > { %v4476_v48 = vmax.f32 %v4348_v55, 0.0  ;;  %v4096_v12 = vmul.f32 %v14569_v30, %v2426_v19  ;;  %v4088_v61 = vmul.f32 %v14569_v30, %v2418_v17  ;;  %v5067_v41 = vrot.slane %v4474_v40, 4  ;;  %v15054_v17 = vpop.permute.xlu1 %1694 }
 0x469   : > { %v5019_v11 = vrot.slane %v4466_v27, 4  ;;  %v4468_v23 = vmax.f32 %v15017_v50, 0.0  ;;  %5591 = vrot.lane.b32.xlu0 %v18944_v21, %s11868_s20  ;;  %v4927_v56 = vrot.slane %v14914_v43, 1  ;;  %v5016_v46 = vadd.f32 %v5015_v22, %v14925_v5  ;;  %18946 = vst [vmem:[#allocation223_spill] sm:$0xff] %v15054_v17  ;;  %v15056_v50 = vpop.permute.xlu0 %1638  ;;  %v18948_v5 = vld [vmem:[#allocation86_spill] sm:$0xff] }
 0x46a   : > { %v18945_v54 = vmax.f32 %v14906_v7, 0.0  ;;  %v15050_v55 = vadd.f32 %v4230_v44, %v4096_v12  ;;  %v15052_v19 = vadd.f32 %v4222_v3, %v4088_v61  ;;  %v4983_v14 = vrot.slane %v4460_v62, 4  ;;  %18947 = vst [vmem:[#allocation218_spill] sm:$0xff] %v15056_v50  ;;  %v18951_v12 = vld [vmem:[#allocation91_spill] sm:$0xff] }
 0x46b   : > { %v4935_v60 = vrot.slane %v4452_v35, 4  ;;  %v5073_v63 = vrot.slane %v4475_v9, 4  ;;  %v5065_v51 = vrot.slane %v5064_v2, 1  ;;  %v4979_v21 = vrot.slane %v4978_v58, 2  ;;  %5547 = vrot.lane.b32.xlu1 %v18948_v5, %s11868_s20 }
 0x46c   : > { %v4930_v32 = vadd.f32 %v4929_v16, %v18945_v54  ;;  %v5025_v33 = vrot.slane %v4467_v24, 4  ;;  %v5079_v1 = vrot.slane %v4476_v48, 4  ;;  %v18949_v7 = vrot.slane %v14882_v37, 1  ;;  %v15072_v5 = vpop.permute.xlu1 %1799 }
 0x46d   : > { %v5068_v16 = vadd.f32 %v5067_v41, %v4474_v40  ;;  %v5020_v44 = vadd.f32 %v5019_v11, %v4466_v27  ;;  %v5031_v3 = vrot.slane %v4468_v23, 4  ;;  %5563 = vrot.lane.b32.xlu0 %v18951_v12, %s11868_s20  ;;  %v15068_v61 = vadd.f32 %v4927_v56, %v14914_v43  ;;  %18953 = vst [vmem:[#allocation215_spill] sm:$0xff] %v15072_v5  ;;  %v15077_v41 = vpop.permute.xlu0 %1743  ;;  %v18957_v5 = vld [vmem:[#allocation93_spill] sm:$0xff] }
 0x46e   : > { %v15063_v22 = vadd.f32 %v18949_v7, %v14882_v37  ;;  %v4931_v54 = vrot.slane %v4930_v32, 2  ;;  %v4486_v50 = vmax.f32 %v15050_v55, 0.0  ;;  %v4478_v17 = vmax.f32 %v15052_v19, 0.0  ;;  %v11718_v37 = vld [vmem:[%s17815_s8 + $0x18] sm:$0xff]   ;;  %18954 = vst [vmem:[#allocation228_spill] sm:$0xff] %v15077_v41  ;;  %v18969_v41 = vld [vmem:[#allocation99_spill] sm:$0xff] }
 0x46f   : > { %18952 = vst [vmem:[#allocation219_spill] sm:$0xff] %v15068_v61  ;;  %v5017_v15 = vrot.slane %v5016_v46, 1  ;;  %v4984_v11 = vadd.f32 %v4983_v14, %v4460_v62  ;;  %v4936_v40 = vadd.f32 %v4935_v60, %v4452_v35  ;;  %v5074_v27 = vadd.f32 %v5073_v63, %v4475_v9  ;;  %v18956_v55 = vld [vmem:[#allocation92_spill] sm:$0xff]  ;;  %11091 = vmatprep.subr.bf16.mxu0 %v11718_v37 }
 0x470   : > { %18950 = vst [vmem:[#allocation214_spill] sm:$0xff] %v15063_v22  ;;  %v15079_v7 = vadd.f32 %v5065_v51, %v5064_v2  ;;  %v4980_v43 = vadd.f32 %v4979_v21, %v4978_v58  ;;  %v5026_v56 = vadd.f32 %v5025_v33, %v4467_v24  ;;  %v5080_v22 = vadd.f32 %v5079_v1, %v4476_v48  ;;  %v18959_v60 = vld [vmem:[#allocation100_spill] sm:$0xff]  ;;  %v15090_v1 = vpop.permute.xlu1 %2254  ;;  %v18963_v48 = vld [vmem:[#allocation71_spill] sm:$0xff] }
 0x471   : > { %5577 = vrot.lane.b32.xlu1 %v18956_v55, %s11868_s20  ;;  %v5069_v19 = vrot.slane %v5068_v16, 2  ;;  %v5021_v12 = vrot.slane %v5020_v44, 2  ;;  %v5032_v61 = vadd.f32 %v5031_v3, %v4468_v23  ;;  %v3963_v62 = vsel %vm2320_vm14, %v18958_v47, %v18957_v5  ;;  %5593 = vrot.lane.b32.xlu0 %v18959_v60, %s11868_s20  ;;  %18960 = vst [vmem:[#allocation220_spill] sm:$0xff] %v15090_v1  ;;  %v11719_v35 = vld [vmem:[%s17815_s8 + $0x10] sm:$0xff]   ;;  %v18962_v47 = vld [vmem:[#allocation94_spill] sm:$0xff]  ;;  %v15100_v23 = vpop.permute.xlu0 %2222  ;;  %v18965_v3 = vld [vmem:[#allocation89_spill] sm:$0xff] }
 0x472   : > { %18955 = vst [vmem:[#allocation224_spill] sm:$0xff] %v15079_v7  ;;  %11092 = vmatpush3.bf16.msra.mxu0 %v11718_v37  ;;  %v15088_v2 = vadd.f32 %v4931_v54, %v4930_v32  ;;  %v5139_v51 = vrot.slane %v4486_v50, 4  ;;  %v5091_v33 = vrot.slane %v4478_v17, 4  ;;  %v15092_v58 = vadd.f32 %v5017_v15, %v5016_v46  ;;  %18964 = vst [vmem:[#allocation229_spill] sm:$0xff] %v15100_v23  ;;  %v18966_v15 = vld [vmem:[#allocation88_spill] sm:$0xff]  ;;  %v18967_v54 = vld [vmem:[#allocation101_spill] sm:$0xff] }
 0x473   : > { %v4985_v9 = vrot.slane %v4984_v11, 2  ;;  %v4937_v63 = vrot.slane %v4936_v40, 2  ;;  %v5075_v24 = vrot.slane %v5074_v27, 2  ;;  %v2427_v14 = vsel %vm2320_vm14, %v18963_v48, %v18962_v47  ;;  %11093 = vmatprep.subr.bf16.mxu0 %v11719_v35  ;;  %v18968_v47 = vld [vmem:[#allocation97_spill] sm:$0xff]  ;;  %v18970_v23 = vld [vmem:[#allocation80_spill] sm:$0xff] }
 0x474   : > { %18961 = vst [vmem:[#allocation216_spill] sm:$0xff] %v15092_v58  ;;  %v5027_v21 = vrot.slane %v5026_v56, 2  ;;  %v5081_v32 = vrot.slane %v5080_v22, 2  ;;  %v4231_v5 = vmul.f32 %v14555_v45, %v3963_v62  ;;  %v3955_v46 = vsel %vm2320_vm14, %v18966_v15, %v18965_v3  ;;  %v15116_v15 = vpop.permute.xlu1 %2314 }
 0x475   : > { %5579 = vrot.lane.b32.xlu1 %v18967_v54, %s11868_s20  ;;  %v5070_v37 = vadd.f32 %v5069_v19, %v5068_v16  ;;  %v15108_v7 = vadd.f32 %v5021_v12, %v5020_v44  ;;  %v5033_v60 = vrot.slane %v5032_v61, 2  ;;  %5595 = vrot.lane.b32.xlu0 %v18968_v47, %s11868_s20  ;;  %v4981_v48 = vrot.slane %v4980_v43, 1  ;;  %18971 = vst [vmem:[#allocation225_spill] sm:$0xff] %v15116_v15  ;;  %v11720_v16 = vld [vmem:[%s17815_s8 + $0x8] sm:$0xff]   ;;  %v15122_v47 = vpop.permute.xlu0 %2282  ;;  %v18975_v54 = vld [vmem:[#allocation108_spill] sm:$0xff] }
 0x476   : > { %11094 = vmatpush3.bf16.msra.mxu0 %v11719_v35  ;;  %v5140_v58 = vadd.f32 %v5139_v51, %v4486_v50  ;;  %v5092_v55 = vadd.f32 %v5091_v33, %v4478_v17  ;;  %v4097_v62 = vmul.f32 %v14569_v30, %v2427_v14  ;;  %v2419_v3 = vsel %vm2320_vm14, %v18970_v23, %v18969_v41  ;;  %v18973_v33 = vld [vmem:[#allocation103_spill] sm:$0xff]  ;;  %v18974_v23 = vld [vmem:[#allocation109_spill] sm:$0xff] }
 0x477   : > { %v4986_v44 = vadd.f32 %v4985_v9, %v4984_v11  ;;  %v4938_v12 = vadd.f32 %v4937_v63, %v4936_v40  ;;  %v5076_v19 = vadd.f32 %v5075_v24, %v5074_v27  ;;  %v4223_v35 = vmul.f32 %v14555_v45, %v3955_v46  ;;  %18972 = vst [vmem:[#allocation221_spill] sm:$0xff] %v15122_v47  ;;  %v18976_v40 = vld [vmem:[#allocation107_spill] sm:$0xff] }
 0x478   : > { %v5028_v17 = vadd.f32 %v5027_v21, %v5026_v56  ;;  %v5082_v50 = vadd.f32 %v5081_v32, %v5080_v22  ;;  %v15124_v51 = vadd.f32 %v4231_v5, %v4097_v62  ;;  %11095 = vmatprep.subr.bf16.mxu0 %v11720_v16  ;;  %v5034_v41 = vadd.f32 %v5033_v60, %v5032_v61  ;;  %v15135_v9 = vpop.permute.xlu1 %3231  ;;  %v11721_v61 = vld [vmem:[%s17815_s8] sm:$0xff]  }
 0x479   : > { %5599 = vrot.lane.b32.xlu1 %v18973_v33, %s11868_s20  ;;  %v4089_v14 = vmul.f32 %v14569_v30, %v2419_v3  ;;  %v3978_v11 = vsel %vm2320_vm14, %v18975_v54, %v18974_v23  ;;  %5615 = vrot.lane.b32.xlu0 %v18976_v40, %s11868_s20  ;;  %v4933_v27 = vrot.slane %v15088_v2, 1  ;;  %v5141_v22 = vrot.slane %v5140_v58, 2  ;;  %v18978_v60 = vld [vmem:[#allocation90_spill] sm:$0xff]  ;;  %v18979_v21 = vld [vmem:[#allocation81_spill] sm:$0xff]  ;;  %v15145_v46 = vpop.permute.xlu0 %3175 }
 0x47a   : > { %11096 = vmatpush3.bf16.msra.mxu0 %v11720_v16  ;;  %v5093_v56 = vrot.slane %v5092_v55, 2  ;;  %v15137_v63 = vadd.f32 %v4981_v48, %v4980_v43  ;;  %v5071_v24 = vrot.slane %v5070_v37, 1  ;;  %v2442_v32 = vsel %vm2320_vm14, %v18979_v21, %v18978_v60  ;;  %v18980_v48 = vld [vmem:[#allocation104_spill] sm:$0xff]  ;;  %v18981_v16 = vld [vmem:[#allocation106_spill] sm:$0xff] }
 0x47b   : > { %v4351_v5 = vadd.f32 %v4223_v35, %v4089_v14  ;;  %v5023_v54 = vrot.slane %v15108_v7, 1  ;;  %v4987_v62 = vrot.slane %v4986_v44, 1  ;;  %v4487_v3 = vmax.f32 %v15124_v51, 0.0  ;;  %11097 = vmatprep.subr.bf16.mxu0 %v11721_v61  ;;  %v18982_v35 = vld [vmem:[#allocation117_spill] sm:$0xff] }
 0x47c   : > { %18977 = vst [vmem:[#allocation217_spill] sm:$0xff] %v15137_v63  ;;  %v4246_v43 = vmul.f32 %v14555_v45, %v3978_v11  ;;  %v3970_v23 = vsel %vm2320_vm14, %v18981_v16, %v18980_v48  ;;  %v4939_v40 = vrot.slane %v4938_v12, 1  ;;  %v5029_v14 = vrot.slane %v5028_v17, 1  ;;  %v18983_v48 = vld [vmem:[#allocation87_spill] sm:$0xff]  ;;  %v18984_v16 = vld [vmem:[#allocation77_spill] sm:$0xff]  ;;  %v15165_v47 = vpop.permute.xlu1 %3336 }
 0x47d   : > { %5601 = vrot.lane.b32.xlu1 %v14155_v52, %s11868_s20  ;;  %5617 = vrot.lane.b32.xlu0 %v18982_v35, %s11868_s20  ;;  %v5077_v60 = vrot.slane %v5076_v19, 1  ;;  %v5035_v21 = vrot.slane %v5034_v41, 1  ;;  %v5083_v33 = vrot.slane %v5082_v50, 1  ;;  %v15157_v51 = vadd.f32 %v5141_v22, %v5140_v58 }
 0x47e   : > { %11098 = vmatpush3.bf16.msra.mxu0 %v11721_v61  ;;  %v15159_v11 = vadd.f32 %v5093_v56, %v5092_v55  ;;  %v4112_v63 = vmul.f32 %v14569_v30, %v2442_v32  ;;  %v2434_v52 = vsel %vm2320_vm14, %v18984_v16, %v18983_v48  ;;  %v4479_v15 = vmax.f32 %v4351_v5, 0.0  ;;  %v15168_v61 = vpop.permute.xlu0 %3280  ;;  %v18986_v56 = vld [vmem:[#allocation122_spill] sm:$0xff] }
 0x47f   : > { %v4238_v35 = vmul.f32 %v14555_v45, %v3970_v23  ;;  %v15171_v1 = vadd.f32 %v4933_v27, %v15088_v2  ;;  %v15173_v58 = vadd.f32 %v5071_v24, %v5070_v37  ;;  %v5145_v55 = vrot.slane %v4487_v3, 4  ;;  %v18989_v5 = vld [vmem:[#allocation118_spill] sm:$0xff] }
 0x480   : > { %v15175_v22 = vadd.f32 %v4246_v43, %v4112_v63  ;;  %v15180_v32 = vadd.f32 %v5023_v54, %v15108_v7  ;;  %v15182_v48 = vadd.f32 %v4987_v62, %v4986_v44  ;;  %v4104_v45 = vmul.f32 %v14569_v30, %v2434_v52  ;;  %v15193_v63 = vpop.permute.xlu1 %3791  ;;  %v18995_v54 = vld [vmem:[#allocation140_spill] sm:$0xff]  ;;  %v19008_v7 = vld [vmem:[#allocation141_spill] sm:$0xff] }
 0x481   : > { %18985 = vst [vmem:[#allocation236_spill] sm:$0xff] %v15173_v58  ;;  %5631 = vrot.lane.b32.xlu1 %v18986_v56, %s11868_s20  ;;  %5647 = vrot.lane.b32.xlu0 %v18989_v5, %s11868_s20  ;;  %v15187_v2 = vadd.f32 %v4939_v40, %v4938_v12  ;;  %v15189_v37 = vadd.f32 %v5029_v14, %v5028_v17  ;;  %v5143_v44 = vrot.slane %v15157_v51, 1  ;;  %v5097_v52 = vrot.slane %v4479_v15, 4  ;;  %v18996_v12 = vld [vmem:[#allocation128_spill] sm:$0xff]  ;;  %v18997_v40 = vld [vmem:[#allocation134_spill] sm:$0xff] }
 0x482   : > { %18987 = vst [vmem:[#allocation234_spill] sm:$0xff] %v15180_v32  ;;  %18988 = vst [vmem:[#allocation232_spill] sm:$0xff] %v15182_v48  ;;  %v15191_v27 = vadd.f32 %v5077_v60, %v5076_v19  ;;  %v15195_v24 = vadd.f32 %v5035_v21, %v5034_v41  ;;  %v15197_v43 = vadd.f32 %v5083_v33, %v5082_v50  ;;  %v18998_v19 = vld [vmem:[#allocation129_spill] sm:$0xff]  ;;  %v15209_v23 = vpop.permute.xlu0 %3759  ;;  %v18999_v33 = vld [vmem:[#allocation115_spill] sm:$0xff] }
 0x483   : > { %18990 = vst [vmem:[#allocation230_spill] sm:$0xff] %v15187_v2  ;;  %18991 = vst [vmem:[#allocation237_spill] sm:$0xff] %v15189_v37  ;;  %v15201_v30 = vadd.f32 %v4238_v35, %v4104_v45  ;;  %v3956_v17 = vsel %vm2320_vm14, %v18996_v12, %v18995_v54  ;;  %v3953_v62 = vsel %vm2320_vm14, %v18998_v19, %v18997_v40  ;;  %v19000_v14 = vld [vmem:[#allocation102_spill] sm:$0xff]  ;;  %v19001_v35 = vld [vmem:[#allocation147_spill] sm:$0xff] }
 0x484   : > { %18992 = vst [vmem:[#allocation235_spill] sm:$0xff] %v15191_v27  ;;  %18993 = vst [vmem:[#allocation233_spill] sm:$0xff] %v15195_v24  ;;  %v15211_v41 = vadd.f32 %v5145_v55, %v4487_v3  ;;  %v2420_v60 = vsel %vm2320_vm14, %v19000_v14, %v18999_v33  ;;  %v19002_v21 = vld [vmem:[#allocation125_spill] sm:$0xff]  ;;  %v19003_v45 = vld [vmem:[#allocation123_spill] sm:$0xff] }
 0x485   : > { %18994 = vst [vmem:[#allocation231_spill] sm:$0xff] %v15197_v43  ;;  %v3964_v16 = vsel %vm2320_vm14, %v19002_v21, %v19001_v35  ;;  %5597 = vrot.lane.b32.xlu1 %v19003_v45, %s11868_s20  ;;  %v19004_v54 = vld [vmem:[#allocation113_spill] sm:$0xff]  ;;  %v19006_v19 = vld [vmem:[#allocation111_spill] sm:$0xff]  ;;  %v19007_v3 = vld [vmem:[#allocation116_spill] sm:$0xff] }
 0x486   : > { %v19005_v12 = vld [vmem:[#allocation105_spill] sm:$0xff]  ;;  %v2428_v55 = vsel %vm2320_vm14, %v19007_v3, %v19006_v19  ;;  %v19010_v33 = vld [vmem:[#allocation135_spill] sm:$0xff]  ;;  %v19011_v14 = vld [vmem:[#allocation152_spill] sm:$0xff]  ;;  %v15269_v48 = vpop.permute.xlu0 %3819 }
 0x487   : > { %v2417_v40 = vsel %vm2320_vm14, %v19005_v12, %v19004_v54  ;;  %v19009_v50 = vld [vmem:[#allocation121_spill] sm:$0xff]  ;;  %v3979_v56 = vsel %vm2320_vm14, %v19011_v14, %v19010_v33  ;;  %v19012_v35 = vld [vmem:[#allocation119_spill] sm:$0xff]  ;;  %v19013_v21 = vld [vmem:[#allocation130_spill] sm:$0xff]  ;;  %v15249_v33 = vadd.f32 %v5097_v52, %v4479_v15 }
 0x488   : > { %v3961_v5 = vsel %vm2320_vm14, %v19009_v50, %v19008_v7  ;;  %5603 = vrot.lane.b32.xlu0 %v19012_v35, %s11868_s20  ;;  %v19014_v45 = vld [vmem:[#allocation114_spill] sm:$0xff]  ;;  %v15242_v54 = vld [vmem:[%s17814_s7] ss:$0 sm:$0xff]  ;;  %v19018_v35 = vld [vmem:[#allocation112_spill] sm:$0xff] }
 0x489   : > { %v2425_v43 = vsel %vm2320_vm14, %v19014_v45, %v19013_v21  ;;  %v4224_v12 = vmul.f32 %v15242_v54, %v3956_v17  ;;  %v4221_v7 = vmul.f32 %v15242_v54, %v3953_v62  ;;  %v19015_v50 = vld [vmem:[#allocation154_spill] sm:$0xff]  ;;  %v15254_v14 = vld [vmem:[%s17813_s6] ss:$0 sm:$0xff]  ;;  %v4232_v17 = vmul.f32 %v15242_v54, %v3964_v16  ;;  %v15261_v62 = vpop.permute.xlu1 %3851  ;;  %v19023_v2 = vld [vmem:[#allocation148_spill] sm:$0xff] }
 0x48a   : > { %v19016_v19 = vld [vmem:[#allocation146_spill] sm:$0xff]  ;;  %v4090_v45 = vmul.f32 %v15254_v14, %v2420_v60  ;;  %v4087_v27 = vmul.f32 %v15254_v14, %v2417_v40  ;;  %v4247_v37 = vmul.f32 %v15242_v54, %v3979_v56  ;;  %v19021_v60 = vld [vmem:[#allocation124_spill] sm:$0xff]  ;;  %v4095_v16 = vmul.f32 %v15254_v14, %v2425_v43 }
 0x48b   : > { %v3971_v3 = vsel %vm2320_vm14, %v19016_v19, %v19015_v50  ;;  %v19017_v21 = vld [vmem:[#allocation126_spill] sm:$0xff]  ;;  %v19019_v50 = vld [vmem:[#allocation131_spill] sm:$0xff]  ;;  %v4229_v19 = vmul.f32 %v15242_v54, %v3961_v5  ;;  %5613 = vrot.lane.b32.xlu1 %v19021_v60, %s11868_s20  ;;  %v3965_v40 = vsel %vm2320_vm14, %v14469_v42, %v14547_v31  ;;  %v3957_v60 = vsel %vm2320_vm14, %v14475_v13, %v14558_v38  ;;  %v19025_v13 = vld [vmem:[#allocation120_spill] sm:$0xff] }
 0x48c   : > { %v2443_v24 = vsel %vm2320_vm14, %v19018_v35, %v19017_v21  ;;  %v19020_v15 = vld [vmem:[#allocation110_spill] sm:$0xff]  ;;  %v4098_v35 = vmul.f32 %v15254_v14, %v2428_v55  ;;  %v4239_v21 = vmul.f32 %v15242_v54, %v3971_v3  ;;  %v4352_v5 = vadd.f32 %v4224_v12, %v4090_v45 }
 0x48d   : > { %v2435_v52 = vsel %vm2320_vm14, %v19020_v15, %v19019_v50  ;;  %v19022_v50 = vld [vmem:[#allocation132_spill] sm:$0xff]  ;;  %v4113_v56 = vmul.f32 %v15254_v14, %v2443_v24  ;;  %v4349_v15 = vadd.f32 %v4221_v7, %v4087_v27  ;;  %v4494_v55 = vmax.f32 %v15201_v30, 0.0  ;;  %v19024_v24 = vld [vmem:[#allocation155_spill] sm:$0xff]  ;;  %v15300_v45 = vpop.permute.xlu1 %1806 }
 0x48e   : > { %5619 = vrot.lane.b32.xlu0 %v19022_v50, %s11868_s20  ;;  %v4105_v43 = vmul.f32 %v15254_v14, %v2435_v52  ;;  %v4360_v3 = vadd.f32 %v4232_v17, %v4098_v35  ;;  %v2429_v42 = vsel %vm2320_vm14, %v19023_v2, %v14367_v8  ;;  %v4357_v31 = vadd.f32 %v4229_v19, %v4095_v16  ;;  %v19026_v8 = vld [vmem:[#allocation133_spill] sm:$0xff]  ;;  %v15310_v35 = vpop.permute.xlu0 %1750 }
 0x48f   : > { %v15290_v58 = vadd.f32 %v4247_v37, %v4113_v56  ;;  %v2421_v27 = vsel %vm2320_vm14, %v19024_v24, %v14378_v34  ;;  %v4233_v12 = vmul.f32 %v15242_v54, %v3965_v40  ;;  %5633 = vrot.lane.b32.xlu1 %v19025_v13, %s11868_s20  ;;  %v5147_v38 = vrot.slane %v15211_v41, 2  ;;  %v19040_v13 = vld [vmem:[#allocation157_spill] sm:$0xff] }
 0x490   : > { %v4367_v30 = vadd.f32 %v4239_v21, %v4105_v43  ;;  %v4225_v7 = vmul.f32 %v15242_v54, %v3957_v60  ;;  %v15305_v2 = vadd.f32 %v5143_v44, %v15157_v51  ;;  %v19028_v34 = vmax.f32 %v15175_v22, 0.0 }
 0x491   : > { %v4480_v17 = vmax.f32 %v4352_v5, 0.0  ;;  %v4477_v52 = vmax.f32 %v4349_v15, 0.0  ;;  %v4099_v19 = vmul.f32 %v15254_v14, %v2429_v42  ;;  %v5099_v16 = vrot.slane %v15249_v33, 2 }
 0x492   : > { %5649 = vrot.lane.b32.xlu0 %v19026_v8, %s11868_s20  ;;  %19027 = vst [vmem:[#allocation242_spill] sm:$0xff] %v15305_v2  ;;  %v5235_v37 = vrot.slane %v19028_v34, 4  ;;  %v5187_v60 = vrot.slane %v4494_v55, 4  ;;  %v4488_v21 = vmax.f32 %v4360_v3, 0.0  ;;  %v4091_v40 = vmul.f32 %v15254_v14, %v2421_v27  ;;  %v19029_v3 = vld [vmem:[#allocation153_spill] sm:$0xff] }
 0x493   : > { %v4485_v56 = vmax.f32 %v4357_v31, 0.0  ;;  %v4503_v43 = vmax.f32 %v15290_v58, 0.0  ;;  %v4361_v51 = vadd.f32 %v4233_v12, %v4099_v19  ;;  %v3972_v44 = vsel %vm2320_vm14, %v14497_v0, %v14573_v28  ;;  %5605 = vrot.lane.b32.xlu1 %v14318_v36, %s11868_s20 }
 0x494   : > { %v15321_v5 = vadd.f32 %v5147_v38, %v15211_v41  ;;  %v4495_v15 = vmax.f32 %v4367_v30, 0.0  ;;  %v4353_v42 = vadd.f32 %v4225_v7, %v4091_v40  ;;  %v19030_v31 = vrot.slane %v15159_v11, 1  ;;  %v15344_v40 = vpop.permute.xlu0 %2286 }
 0x495   : > { %v19032_v24 = vmov %v19028_v34  ;;  %v5103_v0 = vrot.slane %v4480_v17, 4  ;;  %v5085_v28 = vrot.slane %v4477_v52, 4  ;;  %v2436_v41 = vsel %vm2320_vm14, %v14326_v53, %v14404_v57  ;;  %v15339_v34 = vpop.permute.xlu1 %2318 }
 0x496   : > { %5621 = vrot.lane.b32.xlu0 %v19029_v3, %s11868_s20  ;;  %v15328_v58 = vadd.f32 %v19030_v31, %v15159_v11  ;;  %v5236_v27 = vadd.f32 %v5235_v37, %v19032_v24  ;;  %v5188_v12 = vadd.f32 %v5187_v60, %v4494_v55  ;;  %v5151_v38 = vrot.slane %v4488_v21, 4 }
 0x497   : > { %v4240_v30 = vmul.f32 %v15242_v54, %v3972_v44  ;;  %v3969_v7 = vsel %vm2320_vm14, %v14500_v25, %v14583_v18  ;;  %v15342_v11 = vadd.f32 %v5099_v16, %v15249_v33  ;;  %v5133_v22 = vrot.slane %v4485_v56, 4  ;;  %5629 = vrot.lane.b32.xlu1 %v14329_v29, %s11868_s20 }
 0x498   : > { %19031 = vst [vmem:[#allocation244_spill] sm:$0xff] %v15328_v58  ;;  %v5241_v37 = vrot.slane %v4503_v43, 4  ;;  %v4489_v19 = vmax.f32 %v4361_v51, 0.0  ;;  %v5193_v53 = vrot.slane %v4495_v15, 4  ;;  %v4106_v57 = vmul.f32 %v15254_v14, %v2436_v41 }
 0x499   : > { %v2433_v25 = vsel %vm2320_vm14, %v14335_v20, %v14416_v4  ;;  %v4481_v18 = vmax.f32 %v4353_v42, 0.0  ;;  %v5237_v33 = vrot.slane %v5236_v27, 2  ;;  %v5104_v55 = vadd.f32 %v5103_v0, %v4480_v17  ;;  %v19033_v4 = vld [vmem:[#allocation151_spill] sm:$0xff] }
 0x49a   : > { %5635 = vrot.lane.b32.xlu0 %v14321_v59, %s11868_s20  ;;  %v5086_v16 = vadd.f32 %v5085_v28, %v4477_v52  ;;  %v4237_v60 = vmul.f32 %v15242_v54, %v3969_v7  ;;  %v5189_v51 = vrot.slane %v5188_v12, 2  ;;  %v5152_v44 = vadd.f32 %v5151_v38, %v4488_v21  ;;  %v15363_v28 = vpop.permute.xlu1 %3343  ;;  %v655_v38 = vld [vmem:[%s14579_s0 + $0x40] sm:$0xff]  ;;  %v656_v59 = vld [vmem:[%s14579_s0 + $0x48] sm:$0xff] }
 0x49b   : > { %v4368_v31 = vadd.f32 %v4240_v30, %v4106_v57  ;;  %v5149_v24 = vrot.slane %v15321_v5, 1  ;;  %v5134_v41 = vadd.f32 %v5133_v22, %v4485_v56  ;;  %v4103_v29 = vmul.f32 %v15254_v14, %v2433_v25  ;;  %5645 = vrot.lane.b32.xlu1 %v19033_v4, %s11868_s20  ;;  %v19034_v56 = vld [vmem:[#allocation156_spill] sm:$0xff]  ;;  %v15368_v25 = vpop.permute.xlu0 %3287 }
 0x49c   : > { %v5157_v20 = vrot.slane %v4489_v19, 4  ;;  %v5101_v42 = vrot.slane %v15342_v11, 1  ;;  %v5242_v17 = vadd.f32 %v5241_v37, %v4503_v43  ;;  %v5194_v52 = vadd.f32 %v5193_v53, %v4495_v15  ;;  %v19035_v15 = vld [vmem:[#allocation145_spill] sm:$0xff]  ;;  %v19036_v37 = vld [vmem:[#allocation150_spill] sm:$0xff] }
 0x49d   : > { %v5109_v0 = vrot.slane %v4481_v18, 4  ;;  %v3980_v21 = vsel %vm2320_vm14, %v14528_v6, %v14602_v26  ;;  %v5238_v30 = vadd.f32 %v5237_v33, %v5236_v27  ;;  %v5105_v7 = vrot.slane %v5104_v55, 2  ;;  %v19037_v6 = vld [vmem:[#allocation178_spill] sm:$0xff]  ;;  %v19038_v26 = vld [vmem:[#allocation164_spill] sm:$0xff] }
 0x49e   : > { %5651 = vrot.lane.b32.xlu0 %v19034_v56, %s11868_s20  ;;  %v5087_v22 = vrot.slane %v5086_v16, 2  ;;  %v4365_v57 = vadd.f32 %v4237_v60, %v4103_v29  ;;  %v5153_v43 = vrot.slane %v5152_v44, 2  ;;  %v2444_v53 = vsel %vm2320_vm14, %v19036_v37, %v19035_v15  ;;  %v19039_v60 = vld [vmem:[#allocation139_spill] sm:$0xff] }
 0x49f   : > { %v4496_v4 = vmax.f32 %v4368_v31, 0.0  ;;  %v3977_v8 = vsel %vm2320_vm14, %v19038_v26, %v19037_v6  ;;  %v5190_v3 = vadd.f32 %v5189_v51, %v5188_v12  ;;  %v5135_v56 = vrot.slane %v5134_v41, 2  ;;  %6087 = vperm.xlu1 %11557, %v655_v38   ;;  %v15386_v32 = vpop.permute.xlu0 %3823 }
 0x4a0   : > { %v5158_v36 = vadd.f32 %v5157_v20, %v4489_v19  ;;  %v4248_v27 = vmul.f32 %v15242_v54, %v3980_v21  ;;  %v5243_v29 = vrot.slane %v5242_v17, 2  ;;  %v5195_v33 = vrot.slane %v5194_v52, 2  ;;  %v15383_v21 = vpop.permute.xlu1 %3855 }
 0x4a1   : > { %v2441_v50 = vsel %vm2320_vm14, %v19040_v13, %v19039_v60  ;;  %v5110_v2 = vadd.f32 %v5109_v0, %v4481_v18  ;;  %v4114_v31 = vmul.f32 %v15254_v14, %v2444_v53  ;;  %v4493_v15 = vmax.f32 %v4365_v57, 0.0 }
 0x4a2   : > { %6092 = vperm.xlu0 %11556, %v656_v59   ;;  %v4245_v37 = vmul.f32 %v15242_v54, %v3977_v8  ;;  %v5239_v6 = vrot.slane %v5238_v30, 1  ;;  %v5106_v12 = vadd.f32 %v5105_v7, %v5104_v55  ;;  %v5088_v51 = vadd.f32 %v5087_v22, %v5086_v16  ;;  %v19041_v59 = vld [vmem:[#allocation137_spill] sm:$0xff]  ;;  %v19042_v55 = vld [vmem:[#allocation143_spill] sm:$0xff] }
 0x4a3   : > { %v5154_v19 = vadd.f32 %v5153_v43, %v5152_v44  ;;  %v5199_v20 = vrot.slane %v4496_v4, 4  ;;  %v4111_v38 = vmul.f32 %v15254_v14, %v2441_v50  ;;  %v5159_v26 = vrot.slane %v5158_v36, 2  ;;  %5607 = vrot.lane.b32.xlu1 %v19041_v59, %s11868_s20 }
 0x4a4   : > { %v4376_v58 = vadd.f32 %v4248_v27, %v4114_v31  ;;  %v5191_v13 = vrot.slane %v5190_v3, 1  ;;  %v5136_v18 = vadd.f32 %v5135_v56, %v5134_v41  ;;  %v5244_v0 = vadd.f32 %v5243_v29, %v5242_v17  ;;  %v15400_v43 = vpop.permute.xlu1 %6052  ;;  %v15402_v27 = vpop.permute.xlu0 %6047  ;;  %v19047_v29 = vld [vmem:[#allocation138_spill] sm:$0xff] }
 0x4a5   : > { %v5196_v8 = vadd.f32 %v5195_v33, %v5194_v52  ;;  %v5111_v57 = vrot.slane %v5110_v2, 2  ;;  %v5181_v16 = vrot.slane %v4493_v15, 4  ;;  %v15392_v44 = vadd.f32 %v4245_v37, %v4111_v38  ;;  %19045 = vst [vmem:[#allocation238_spill] sm:$0xff] %v15400_v43  ;;  %19046 = vst [vmem:[#allocation253_spill] sm:$0xff] %v15402_v27  ;;  %v19051_v37 = vld [vmem:[#allocation196_spill] sm:$0xff] }
 0x4a6   : > { %5623 = vrot.lane.b32.xlu0 %v19042_v55, %s11868_s20  ;;  %v15395_v50 = vadd.f32 %v5101_v42, %v15342_v11  ;;  %v15398_v7 = vadd.f32 %v5149_v24, %v15321_v5  ;;  %v5200_v22 = vadd.f32 %v5199_v20, %v4496_v4  ;;  %v5089_v41 = vrot.slane %v5088_v51, 1  ;;  %v19050_v24 = vld [vmem:[#allocation144_spill] sm:$0xff]  ;;  %v19052_v20 = vld [vmem:[#allocation190_spill] sm:$0xff] }
 0x4a7   : > { %v5107_v17 = vrot.slane %v5106_v12, 1  ;;  %v5155_v52 = vrot.slane %v5154_v19, 1  ;;  %v5160_v56 = vadd.f32 %v5159_v26, %v5158_v36  ;;  %v4504_v53 = vmax.f32 %v4376_v58, 0.0  ;;  %5637 = vrot.lane.b32.xlu1 %v19047_v29, %s11868_s20  ;;  %v657_v4 = vld [vmem:[%s14579_s0 + $0x50] sm:$0xff] }
 0x4a8   : > { %19043 = vst [vmem:[#allocation243_spill] sm:$0xff] %v15395_v50  ;;  %19044 = vst [vmem:[#allocation240_spill] sm:$0xff] %v15398_v7  ;;  %v15406_v33 = vadd.f32 %v5191_v13, %v5190_v3  ;;  %v15408_v11 = vadd.f32 %v5239_v6, %v5238_v30  ;;  %v5112_v5 = vadd.f32 %v5111_v57, %v5110_v2  ;;  %v5137_v42 = vrot.slane %v5136_v18, 1  ;;  %v19053_v26 = vld [vmem:[#allocation192_spill] sm:$0xff]  ;;  %v19054_v3 = vld [vmem:[#allocation186_spill] sm:$0xff]  ;;  %v15421_v13 = vpop.permute.xlu1 %6057 }
 0x4a9   : > { %v5197_v60 = vrot.slane %v5196_v8, 1  ;;  %v5245_v31 = vrot.slane %v5244_v0, 1  ;;  %v5182_v36 = vadd.f32 %v5181_v16, %v4493_v15  ;;  %v4501_v58 = vmax.f32 %v15392_v44, 0.0  ;;  %v658_v6 = vld [vmem:[%s14579_s0 + $0x58] sm:$0xff]  ;;  %19055 = vst [vmem:[#allocation257_spill] sm:$0xff] %v15421_v13  ;;  %v19060_v44 = vld [vmem:[#allocation166_spill] sm:$0xff] }
 0x4aa   : > { %19048 = vst [vmem:[#allocation241_spill] sm:$0xff] %v15406_v33  ;;  %19049 = vst [vmem:[#allocation239_spill] sm:$0xff] %v15408_v11  ;;  %5653 = vrot.lane.b32.xlu0 %v19050_v24, %s11868_s20  ;;  %v3966_v38 = vsel %vm2320_vm14, %v19052_v20, %v19051_v37  ;;  %v3958_v30 = vsel %vm2320_vm14, %v19054_v3, %v19053_v26  ;;  %v5201_v2 = vrot.slane %v5200_v22, 2  ;;  %v5247_v15 = vrot.slane %v4504_v53, 4  ;;  %v19059_v16 = vld [vmem:[#allocation181_spill] sm:$0xff]  ;;  %v19062_v20 = vld [vmem:[#allocation160_spill] sm:$0xff]  ;;  %v15435_v26 = vpop.permute.xlu0 %6062 }
 0x4ab   : > { %v15423_v57 = vadd.f32 %v5089_v41, %v5088_v51  ;;  %v15425_v24 = vadd.f32 %v5107_v17, %v5106_v12  ;;  %v15427_v29 = vadd.f32 %v5155_v52, %v5154_v19  ;;  %v2430_v55 = vsel %vm2320_vm14, %v19060_v44, %v19059_v16  ;;  %v19061_v37 = vld [vmem:[#allocation169_spill] sm:$0xff]  ;;  %19063 = vst [vmem:[#allocation258_spill] sm:$0xff] %v15435_v26  ;;  %v19129_v33 = vld [vmem:[#allocation175_spill] sm:$0xff] }
 0x4ac   : > { %v2422_v59 = vsel %vm2320_vm14, %v19062_v20, %v19061_v37  ;;  %6097 = vperm.xlu1 %11557, %v657_v4   ;;  %v5161_v3 = vrot.slane %v5160_v56, 1  ;;  %v4234_v51 = vmul.f32 %v15242_v54, %v3966_v38  ;;  %v4226_v12 = vmul.f32 %v15242_v54, %v3958_v30  ;;  %v19067_v38 = vld [vmem:[#allocation195_spill] sm:$0xff] }
 0x4ad   : > { %19056 = vst [vmem:[#allocation254_spill] sm:$0xff] %v15423_v57  ;;  %19057 = vst [vmem:[#allocation249_spill] sm:$0xff] %v15425_v24  ;;  %v15439_v19 = vadd.f32 %v5137_v42, %v5136_v18  ;;  %v15441_v41 = vadd.f32 %v5245_v31, %v5244_v0  ;;  %v5183_v17 = vrot.slane %v5182_v36, 2  ;;  %v5229_v52 = vrot.slane %v4501_v58, 4  ;;  %v19068_v0 = vld [vmem:[#allocation163_spill] sm:$0xff]  ;;  %v19069_v42 = vld [vmem:[#allocation173_spill] sm:$0xff] }
 0x4ae   : > { %19058 = vst [vmem:[#allocation245_spill] sm:$0xff] %v15427_v29  ;;  %6102 = vperm.xlu0 %11556, %v658_v6   ;;  %v15443_v16 = vadd.f32 %v5197_v60, %v5196_v8  ;;  %v5113_v44 = vrot.slane %v5112_v5, 1  ;;  %v15445_v29 = vadd.f32 %v5201_v2, %v5200_v22  ;;  %v4100_v37 = vmul.f32 %v15254_v14, %v2430_v55  ;;  %v15452_v6 = vpop.permute.xlu1 %5535  ;;  %v19070_v60 = vld [vmem:[#allocation191_spill] sm:$0xff]  ;;  %v15462_v31 = vpop.permute.xlu0 %5551  ;;  %v19074_v2 = vld [vmem:[#allocation180_spill] sm:$0xff]  ;;  %v19128_v57 = vld [vmem:[#allocation46_spill] sm:$0xff] }
 0x4af   : > { %19064 = vst [vmem:[#allocation255_spill] sm:$0xff] %v15439_v19  ;;  %19065 = vst [vmem:[#allocation250_spill] sm:$0xff] %v15441_v41  ;;  %v4092_v4 = vmul.f32 %v15254_v14, %v2422_v59  ;;  %v3981_v30 = vsel %vm2320_vm14, %v19067_v38, %v14812_v39  ;;  %v15454_v18 = vadd.f32 %v5247_v15, %v4504_v53  ;;  %v19071_v59 = vld [vmem:[#allocation176_spill] sm:$0xff]  ;;  %v19073_v39 = vld [vmem:[#allocation194_spill] sm:$0xff] }
 0x4b0   : > { %19066 = vst [vmem:[#allocation246_spill] sm:$0xff] %v15443_v16  ;;  %v2445_v8 = vsel %vm2320_vm14, %v19069_v42, %v19068_v0  ;;  %v3973_v22 = vsel %vm2320_vm14, %v19070_v60, %v14814_v10  ;;  %5609 = vrot.lane.b32.xlu1 %v19071_v59, %s11868_s20  ;;  %v15466_v55 = vadd.f32 %v5161_v3, %v5160_v56  ;;  %v19075_v38 = vld [vmem:[#allocation204_spill] sm:$0xff]  ;;  %v19076_v10 = vld [vmem:[#allocation170_spill] sm:$0xff] }
 0x4b1   : > { %v2437_v53 = vsel %vm2320_vm14, %v19074_v2, %v19073_v39  ;;  %v15471_v15 = vadd.f32 %v4234_v51, %v4100_v37  ;;  %v15473_v20 = vadd.f32 %v4226_v12, %v4092_v4  ;;  %v3967_v0 = vsel %vm2320_vm14, %v19075_v38, %v15000_v49  ;;  %v19079_v3 = vld [vmem:[#allocation226_spill] sm:$0xff]  ;;  %v19080_v59 = vld [vmem:[#allocation200_spill] sm:$0xff]  ;;  %v19082_v4 = vld [vmem:[#allocation197_spill] sm:$0xff] }
 0x4b2   : > { %19072 = vst [vmem:[#allocation251_spill] sm:$0xff] %v15466_v55  ;;  %5625 = vrot.lane.b32.xlu0 %v19076_v10, %s11868_s20  ;;  %v15480_v42 = vadd.f32 %v5183_v17, %v5182_v36  ;;  %v15482_v60 = vadd.f32 %v5229_v52, %v4501_v58  ;;  %v4249_v56 = vmul.f32 %v15242_v54, %v3981_v30  ;;  %v19081_v37 = vld [vmem:[#allocation206_spill] sm:$0xff]  ;;  %v19084_v2 = vld [vmem:[#allocation205_spill] sm:$0xff]  ;;  %v15495_v36 = vpop.permute.xlu1 %5537  ;;  %v19086_v30 = vld [vmem:[#allocation207_spill] sm:$0xff]  ;;  %v15505_v10 = vpop.permute.xlu0 %5553 }
 0x4b3   : > { %v3959_v51 = vsel %vm2320_vm14, %v19080_v59, %v19079_v3  ;;  %v4241_v12 = vmul.f32 %v15242_v54, %v3973_v22  ;;  %v2431_v39 = vsel %vm2320_vm14, %v19082_v4, %v19081_v37  ;;  %v19083_v49 = vld [vmem:[#allocation222_spill] sm:$0xff]  ;;  %v15497_v58 = vadd.f32 %v5113_v44, %v5112_v5  ;;  %v19087_v59 = vld [vmem:[#allocation193_spill] sm:$0xff]  ;;  %v19089_v44 = vld [vmem:[#allocation208_spill] sm:$0xff] }
 0x4b4   : > { %19077 = vst [vmem:[#allocation247_spill] sm:$0xff] %v15480_v42  ;;  %19078 = vst [vmem:[#allocation259_spill] sm:$0xff] %v15482_v60  ;;  %v3982_v38 = vsel %vm2320_vm14, %v19084_v2, %v19083_v49  ;;  %v4115_v17 = vmul.f32 %v15254_v14, %v2445_v8  ;;  %v4107_v52 = vmul.f32 %v15254_v14, %v2437_v53  ;;  %v19088_v37 = vld [vmem:[#allocation177_spill] sm:$0xff]  ;;  %v19090_v49 = vld [vmem:[#allocation188_spill] sm:$0xff] }
 0x4b5   : > { %19085 = vst [vmem:[#allocation256_spill] sm:$0xff] %v15497_v58  ;;  %v2423_v22 = vsel %vm2320_vm14, %v19087_v59, %v19086_v30  ;;  %v4235_v3 = vmul.f32 %v15242_v54, %v3967_v0  ;;  %5639 = vrot.lane.b32.xlu1 %v19088_v37, %s11868_s20  ;;  %v2446_v8 = vsel %vm2320_vm14, %v19090_v49, %v19089_v44  ;;  %v19091_v2 = vld [vmem:[#allocation171_spill] sm:$0xff]  ;;  %v19093_v55 = vld [vmem:[#allocation201_spill] sm:$0xff] }
 0x4b6   : > { %v4227_v53 = vmul.f32 %v15242_v54, %v3959_v51  ;;  %5655 = vrot.lane.b32.xlu0 %v19091_v2, %s11868_s20  ;;  %v15517_v30 = vadd.f32 %v4249_v56, %v4115_v17  ;;  %v4101_v0 = vmul.f32 %v15254_v14, %v2431_v39  ;;  %v4250_v59 = vmul.f32 %v15242_v54, %v3982_v38  ;;  %v19092_v37 = vld [vmem:[#allocation227_spill] sm:$0xff]  ;;  %v15533_v17 = vpop.permute.xlu1 %5567  ;;  %v19094_v38 = vld [vmem:[#allocation213_spill] sm:$0xff] }
 0x4b7   : > { %v3974_v4 = vsel %vm2320_vm14, %v19093_v55, %v19092_v37  ;;  %v15524_v5 = vadd.f32 %v4241_v12, %v4107_v52  ;;  %v4093_v58 = vmul.f32 %v15254_v14, %v2423_v22  ;;  %v3968_v51 = vsel %vm2320_vm14, %v15135_v9, %v15193_v63  ;;  %v19095_v44 = vld [vmem:[#allocation189_spill] sm:$0xff]  ;;  %v15544_v22 = vpop.permute.xlu0 %5583  ;;  %v19098_v37 = vld [vmem:[#allocation223_spill] sm:$0xff] }
 0x4b8   : > { %v3960_v56 = vsel %vm2320_vm14, %v15145_v46, %v15209_v23  ;;  %v4116_v39 = vmul.f32 %v15254_v14, %v2446_v8  ;;  %v2438_v55 = vsel %vm2320_vm14, %v19095_v44, %v19094_v38  ;;  %v15539_v12 = vadd.f32 %v4235_v3, %v4101_v0  ;;  %v19096_v9 = vld [vmem:[#allocation165_spill] sm:$0xff]  ;;  %v19097_v23 = vld [vmem:[#allocation220_spill] sm:$0xff]  ;;  %v19100_v38 = vld [vmem:[#allocation218_spill] sm:$0xff] }
 0x4b9   : > { %v3983_v52 = vsel %vm2320_vm14, %v15165_v47, %v15261_v62  ;;  %5611 = vrot.lane.b32.xlu1 %v19096_v9, %s11868_s20  ;;  %v4355_v46 = vadd.f32 %v4227_v53, %v4093_v58  ;;  %v4242_v63 = vmul.f32 %v15242_v54, %v3974_v4  ;;  %v2432_v49 = vsel %vm2320_vm14, %v19098_v37, %v19097_v23  ;;  %v19099_v8 = vld [vmem:[#allocation229_spill] sm:$0xff]  ;;  %v19101_v0 = vld [vmem:[#allocation158_spill] sm:$0xff]  ;;  %v19103_v44 = vld [vmem:[#allocation215_spill] sm:$0xff] }
 0x4ba   : > { %v2424_v3 = vsel %vm2320_vm14, %v19100_v38, %v19099_v8  ;;  %5627 = vrot.lane.b32.xlu0 %v19101_v0, %s11868_s20  ;;  %v4378_v47 = vadd.f32 %v4250_v59, %v4116_v39  ;;  %v19102_v62 = vld [vmem:[#allocation225_spill] sm:$0xff]  ;;  %v4236_v58 = vmul.f32 %v15242_v54, %v3968_v51  ;;  %v4228_v4 = vmul.f32 %v15242_v54, %v3960_v56  ;;  %v15568_v38 = vpop.permute.xlu1 %5533 }
 0x4bb   : > { %v2447_v2 = vsel %vm2320_vm14, %v19103_v44, %v19102_v62  ;;  %v4505_v53 = vmax.f32 %v15517_v30, 0.0  ;;  %v4108_v23 = vmul.f32 %v15254_v14, %v2438_v55  ;;  %v4251_v37 = vmul.f32 %v15242_v54, %v3983_v52  ;;  %v15574_v62 = vpop.permute.xlu0 %5539  ;;  %v19104_v30 = vld [vmem:[#allocation172_spill] sm:$0xff] }
 0x4bc   : > { %v3975_v8 = vsel %vm2320_vm14, %v15168_v61, %v15269_v48  ;;  %v4497_v59 = vmax.f32 %v15524_v5, 0.0  ;;  %v4491_v39 = vmax.f32 %v15539_v12, 0.0  ;;  %v4102_v51 = vmul.f32 %v15254_v14, %v2432_v49  ;;  %v19105_v48 = vld [vmem:[#allocation221_spill] sm:$0xff]  ;;  %v19106_v44 = vld [vmem:[#allocation228_spill] sm:$0xff]  ;;  %v19107_v12 = vld [vmem:[#allocation159_spill] sm:$0xff] }
 0x4bd   : > { %v4094_v56 = vmul.f32 %v15254_v14, %v2424_v3  ;;  %5641 = vrot.lane.b32.xlu1 %v19104_v30, %s11868_s20  ;;  %v4483_v55 = vmax.f32 %v4355_v46, 0.0  ;;  %v15578_v52 = vadd.f32 %v4242_v63, %v4108_v23  ;;  %v4117_v61 = vmul.f32 %v15254_v14, %v2447_v2 }
 0x4be   : > { %v2439_v5 = vsel %vm2320_vm14, %v19106_v44, %v19105_v48  ;;  %5657 = vrot.lane.b32.xlu0 %v19107_v12, %s11868_s20  ;;  %v4506_v49 = vmax.f32 %v4378_v47, 0.0  ;;  %v15586_v0 = vadd.f32 %v4236_v58, %v4102_v51  ;;  %v4243_v9 = vmul.f32 %v15242_v54, %v3975_v8  ;;  %v15596_v30 = vpop.permute.xlu1 %5549  ;;  %v19110_v8 = vld [vmem:[#allocation167_spill] sm:$0xff] }
 0x4bf   : > { %v15588_v3 = vadd.f32 %v4228_v4, %v4094_v56  ;;  %v5249_v46 = vrot.slane %v15454_v18, 2  ;;  %v19108_v63 = vmax.f32 %v15471_v15, 0.0  ;;  %v15594_v2 = vadd.f32 %v4251_v37, %v4117_v61  ;;  %v15602_v56 = vpop.permute.xlu0 %5555  ;;  %v19111_v48 = vld [vmem:[#allocation179_spill] sm:$0xff] }
 0x4c0   : > { %v19109_v44 = vmax.f32 %v15473_v20, 0.0  ;;  %v5253_v58 = vrot.slane %v4505_v53, 4  ;;  %v5205_v51 = vrot.slane %v4497_v59, 4  ;;  %v4109_v4 = vmul.f32 %v15254_v14, %v2439_v5 }
 0x4c1   : > { %v5163_v23 = vrot.slane %v19108_v63, 4  ;;  %5643 = vrot.lane.b32.xlu1 %v19110_v8, %s11868_s20  ;;  %v5169_v37 = vrot.slane %v4491_v39, 4  ;;  %v5121_v61 = vrot.slane %v4483_v55, 4  ;;  %v5259_v41 = vrot.slane %v4506_v49, 4 }
 0x4c2   : > { %v5115_v47 = vrot.slane %v19109_v44, 4  ;;  %5659 = vrot.lane.b32.xlu0 %v19111_v48, %s11868_s20  ;;  %v15612_v14 = vadd.f32 %v4243_v9, %v4109_v4  ;;  %v15615_v5 = vadd.f32 %v5249_v46, %v15454_v18  ;;  %v19113_v8 = vmov %v19108_v63  ;;  %v15622_v12 = vpop.permute.xlu1 %5569  ;;  %v19115_v46 = vld [vmem:[#allocation174_spill] sm:$0xff]  ;;  %v19124_v48 = vld [vmem:[#allocation21_spill] sm:$0xff] }
 0x4c3   : > { %v15619_v63 = vadd.f32 %v5163_v23, %v19113_v8  ;;  %v17938_v19 = vmax.f32 %v15594_v2, 0.0  ;;  %v19114_v24 = vmov %v19109_v44  ;;  %v15629_v16 = vadd.f32 %v5253_v58, %v4505_v53  ;;  %v15636_v15 = vpop.permute.xlu0 %5585 }
 0x4c4   : > { %19112 = vst [vmem:[#allocation252_spill] sm:$0xff] %v15615_v5  ;;  %v15627_v44 = vadd.f32 %v5115_v47, %v19114_v24  ;;  %v15631_v9 = vadd.f32 %v5205_v51, %v4497_v59  ;;  %v3984_v18 = vsel %vm2320_vm14, %v15363_v28, %v15383_v21  ;;  %v15640_v23 = vadd.f32 %v5169_v37, %v4491_v39  ;;  %v19117_v59 = vld [vmem:[#allocation161_spill] sm:$0xff] }
 0x4c5   : > { %5663 = vrot.lane.b32.xlu1 %v19115_v46, %s11868_s20  ;;  %v15642_v4 = vadd.f32 %v5121_v61, %v4483_v55  ;;  %v19116_v24 = vmax.f32 %v15578_v52, 0.0  ;;  %v3976_v53 = vsel %vm2320_vm14, %v15368_v25, %v15386_v32  ;;  %v15653_v28 = vadd.f32 %v5259_v41, %v4506_v49  ;;  %v19126_v46 = vld [vmem:[#allocation33_spill] sm:$0xff] }
 0x4c6   : > { %5679 = vrot.lane.b32.xlu0 %v19117_v59, %s11868_s20  ;;  %v19118_v21 = vmax.f32 %v15586_v0, 0.0  ;;  %v19119_v39 = vmax.f32 %v15588_v3, 0.0  ;;  %v15666_v51 = vrot.slane %v17938_v19, 4  ;;  %v15671_v32 = vsel %vm2320_vm14, %v15300_v45, %v15339_v34  ;;  %v15681_v49 = vpop.permute.xlu1 %5541 }
 0x4c7   : > { %v15646_v20 = vrot.slane %v19116_v24, 4  ;;  %v15676_v25 = vsel %vm2320_vm14, %v15310_v35, %v15344_v40  ;;  %v15679_v41 = vmul.f32 %v15242_v54, %v3984_v18  ;;  %v15684_v8 = vmul.f32 %v15242_v54, %v3976_v53  ;;  %v15689_v34 = vpop.permute.xlu0 %5557  ;;  %v19120_v24 = vld [vmem:[#allocation168_spill] sm:$0xff]  ;;  %v19121_v35 = vld [vmem:[#allocation25_spill] sm:$0xff] }
 0x4c8   : > { %v15657_v47 = vrot.slane %v19118_v21, 4  ;;  %v15661_v55 = vrot.slane %v19119_v39, 4  ;;  %v6132_v37 = vrot.slane %v15400_v43, 1  ;;  %v6133_v61 = vrot.slane %v15400_v43, 2  ;;  %v19122_v21 = vld [vmem:[#allocation28_spill] sm:$0xff]  ;;  %v19123_v39 = vld [vmem:[#allocation162_spill] sm:$0xff] }
 0x4c9   : > { %v6134_v45 = vrot.slane %v15400_v43, 3  ;;  %5665 = vrot.lane.b32.xlu1 %v19120_v24, %s11868_s20  ;;  %v5918_v40 = vadd.f32 %v15452_v6, %v19121_v35  ;;  %v6125_v18 = vrot.slane %v15402_v27, 1  ;;  %v5926_v54 = vadd.f32 %v15462_v31, %v19122_v21  ;;  %v19125_v6 = vld [vmem:[#allocation17_spill] sm:$0xff] }
 0x4ca   : > { %v6126_v53 = vrot.slane %v15402_v27, 2  ;;  %5681 = vrot.lane.b32.xlu0 %v19123_v39, %s11868_s20  ;;  %v5919_v58 = vadd.f32 %v15495_v36, %v19124_v48  ;;  %v6127_v19 = vrot.slane %v15402_v27, 3  ;;  %v5927_v35 = vadd.f32 %v15505_v10, %v19125_v6  ;;  %v15710_v21 = vpop.permute.xlu1 %5565  ;;  %v19127_v36 = vld [vmem:[#allocation182_spill] sm:$0xff] }
 0x4cb   : > { %v5917_v31 = vadd.f32 %v15568_v38, %v19126_v46  ;;  %v15714_v11 = vpop.permute.xlu0 %5571  ;;  %v6350_v38 = vmul.f32 %v6125_v18, %v5918_v40  ;;  %v6358_v46 = vmul.f32 %v6132_v37, %v5926_v54  ;;  %v6139_v24 = vrot.slane %v15421_v13, 1  ;;  %v19131_v37 = vld [vmem:[#allocation34_spill] sm:$0xff] }
 0x4cc   : > { %v5925_v39 = vadd.f32 %v15596_v30, %v19128_v57  ;;  %v6351_v7 = vmul.f32 %v6126_v53, %v5919_v58  ;;  %v6140_v59 = vrot.slane %v15421_v13, 2  ;;  %v6359_v50 = vmul.f32 %v6133_v61, %v5927_v35  ;;  %v19132_v30 = vld [vmem:[#allocation48_spill] sm:$0xff]  ;;  %v19137_v57 = vld [vmem:[#allocation53_spill] sm:$0xff] }
 0x4cd   : > { %5695 = vrot.lane.b32.xlu1 %v19127_v36, %s11868_s20  ;;  %v19130_v36 = vld [vmem:[#allocation32_spill] sm:$0xff]  ;;  %v6349_v40 = vmul.f32 %v15402_v27, %v5917_v31  ;;  %v5928_v18 = vadd.f32 %v15602_v56, %v19131_v37  ;;  %v5934_v58 = vadd.f32 %v15533_v17, %v19132_v30  ;;  %v6146_v53 = vrot.slane %v15435_v26, 1  ;;  %v19134_v31 = vld [vmem:[#allocation183_spill] sm:$0xff] }
 0x4ce   : > { %5711 = vrot.lane.b32.xlu0 %v19129_v33, %s11868_s20  ;;  %v5920_v48 = vadd.f32 %v15574_v62, %v19130_v36  ;;  %v15734_v54 = vpop.permute.xlu1 %5581  ;;  %v19133_v62 = vld [vmem:[#allocation43_spill] sm:$0xff]  ;;  %v6147_v61 = vrot.slane %v15435_v26, 2  ;;  %v6478_v56 = vpack.c.bf16 %v6350_v38, %v6350_v38  ;;  %v6486_v37 = vpack.c.bf16 %v6358_v46, %v6358_v46 }
 0x4cf   : > { %v5942_v36 = vadd.f32 %v15544_v22, %v19133_v62  ;;  %v15743_v35 = vpop.permute.xlu0 %5587  ;;  %v6357_v6 = vmul.f32 %v15400_v43, %v5925_v39  ;;  %v19135_v17 = vld [vmem:[#allocation187_spill] sm:$0xff]  ;;  %v6479_v30 = vpack.c.bf16 %v6351_v7, %v6351_v7  ;;  %v6487_v33 = vpack.c.bf16 %v6359_v50, %v6359_v50  ;;  %v19139_v7 = vld [vmem:[#allocation185_spill] sm:$0xff] }
 0x4d0   : > { %v6352_v10 = vmul.f32 %v6127_v19, %v5920_v48  ;;  %v6477_v5 = vpack.c.bf16 %v6349_v40, %v6349_v40  ;;  %v6360_v42 = vmul.f32 %v6134_v45, %v5928_v18  ;;  %v6366_v39 = vmul.f32 %v6139_v24, %v5934_v58  ;;  %v19140_v45 = vld [vmem:[#allocation184_spill] sm:$0xff]  ;;  %v19144_v18 = vld [vmem:[#allocation211_spill] sm:$0xff] }
 0x4d1   : > { %5661 = vrot.lane.b32.xlu1 %v19134_v31, %s11868_s20  ;;  %v6374_v46 = vmul.f32 %v6146_v53, %v5942_v36  ;;  %v5935_v60 = vadd.f32 %v15622_v12, %v19137_v57  ;;  %v6845_v50 = vunpack.c.l.b16 %v6478_v56  ;;  %v6853_v48 = vunpack.c.l.b16 %v6486_v37  ;;  %v19141_v53 = vld [vmem:[#allocation66_spill] sm:$0xff] }
 0x4d2   : > { %5667 = vrot.lane.b32.xlu0 %v19135_v17, %s11868_s20  ;;  %v15753_v31 = vpop.permute.xlu1 %6067  ;;  %v6485_v40 = vpack.c.bf16 %v6357_v6, %v6357_v6  ;;  %v6846_v24 = vunpack.c.l.b16 %v6479_v30  ;;  %v6480_v58 = vpack.c.bf16 %v6352_v10, %v6352_v10  ;;  %v5921_v12 = vadd.f32 %v15681_v49, %v19141_v53  ;;  %v19142_v57 = vld [vmem:[#allocation62_spill] sm:$0xff] }
 0x4d3   : > { %19136 = vst [vmem:[#allocation248_spill] sm:$0xff] %v15753_v31  ;;  %v15758_v17 = vpop.permute.xlu0 %6072  ;;  %v5929_v36 = vadd.f32 %v15689_v34, %v19142_v57  ;;  %v6854_v38 = vunpack.c.l.b16 %v6487_v33  ;;  %v6844_v62 = vunpack.c.l.b16 %v6477_v5  ;;  %v6488_v19 = vpack.c.bf16 %v6360_v42, %v6360_v42  ;;  %v19145_v33 = vld [vmem:[#allocation54_spill] sm:$0xff] }
 0x4d4   : > { %19138 = vst [vmem:[#allocation272_spill] sm:$0xff] %v15758_v17  ;;  %v6494_v37 = vpack.c.bf16 %v6366_v39, %v6366_v39  ;;  %v6502_v22 = vpack.c.bf16 %v6374_v46, %v6374_v46  ;;  %v6972_v49 = vrot.slane %v6845_v50, 7  ;;  %v6993_v53 = vrot.slane %v6853_v48, 7  ;;  %v19146_v42 = vld [vmem:[#allocation210_spill] sm:$0xff]  ;;  %v19149_v48 = vld [vmem:[#allocation64_spill] sm:$0xff] }
 0x4d5   : > { %5677 = vrot.lane.b32.xlu1 %v19139_v7, %s11868_s20  ;;  %v19143_v7 = vld [vmem:[#allocation35_spill] sm:$0xff]  ;;  %v6852_v34 = vunpack.c.l.b16 %v6485_v40  ;;  %v5933_v5 = vadd.f32 %v15710_v21, %v19145_v33  ;;  %v6975_v57 = vrot.slane %v6846_v24, 6  ;;  %v6847_v39 = vunpack.c.l.b16 %v6480_v58 }
 0x4d6   : > { %5683 = vrot.lane.b32.xlu0 %v19140_v45, %s11868_s20  ;;  %v5544_v56 = vpop.permute.xlu1 %5543  ;;  %v6367_v45 = vmul.f32 %v6140_v59, %v5935_v60  ;;  %v5943_v30 = vadd.f32 %v15636_v15, %v19143_v7  ;;  %v19147_v60 = vrot.slane %v15402_v27, 4  ;;  %v19148_v15 = vrot.slane %v15400_v43, 4 }
 0x4d7   : > { %v5560_v10 = vpop.permute.xlu0 %5559  ;;  %v6995_v7 = vrot.slane %v6854_v38, 6  ;;  %v6974_v6 = vsel %vm6973_vm1, %v6972_v49, %v6844_v62  ;;  %v6855_v50 = vunpack.c.l.b16 %v6488_v19  ;;  %v5941_v40 = vadd.f32 %v15734_v54, %v19149_v48  ;;  %v19151_v62 = vld [vmem:[#allocation68_spill] sm:$0xff] }
 0x4d8   : > { %v6353_v59 = vmul.f32 %v19147_v60, %v5921_v12  ;;  %v6361_v46 = vmul.f32 %v19148_v15, %v5929_v36  ;;  %v15786_v21 = vunpack.c.l.b16 %v6494_v37  ;;  %v15788_v33 = vunpack.c.l.b16 %v6502_v22  ;;  %v19150_v12 = vld [vmem:[#allocation209_spill] sm:$0xff]  ;;  %v19152_v49 = vld [vmem:[#allocation84_spill] sm:$0xff] }
 0x4d9   : > { %5697 = vrot.lane.b32.xlu1 %v19144_v18, %s11868_s20  ;;  %v6495_v24 = vpack.c.bf16 %v6367_v45, %v6367_v45  ;;  %v6375_v58 = vmul.f32 %v6147_v61, %v5943_v30  ;;  %v6994_v36 = vsel %vm6973_vm1, %v6993_v53, %v6852_v34  ;;  %v6365_v38 = vmul.f32 %v15421_v13, %v5933_v5  ;;  %v19153_v37 = vld [vmem:[#allocation212_spill] sm:$0xff]  ;;  %v19155_v34 = vld [vmem:[#allocation79_spill] sm:$0xff] }
 0x4da   : > { %5713 = vrot.lane.b32.xlu0 %v19146_v42, %s11868_s20  ;;  %v5574_v18 = vpop.permute.xlu1 %5573  ;;  %v5936_v19 = vadd.f32 %v15714_v11, %v19151_v62  ;;  %v5922_v54 = vadd.f32 %v5544_v56, %v19152_v49  ;;  %v6977_v22 = vsel %vm6976_vm2, %v6975_v57, %v6974_v6  ;;  %v6978_v45 = vrot.slane %v6847_v39, 5  ;;  %v19154_v48 = vld [vmem:[#allocation60_spill] sm:$0xff]  ;;  %v19158_v57 = vld [vmem:[#allocation198_spill] sm:$0xff] }
 0x4db   : > { %v5590_v42 = vpop.permute.xlu0 %5589  ;;  %v6481_v61 = vpack.c.bf16 %v6353_v59, %v6353_v59  ;;  %v6489_v30 = vpack.c.bf16 %v6361_v46, %v6361_v46  ;;  %v6997_v60 = vrot.slane %v6855_v50, 5  ;;  %v6373_v15 = vmul.f32 %v15435_v26, %v5941_v40 }
 0x4dc   : > { %v5944_v53 = vadd.f32 %v15743_v35, %v19154_v48  ;;  %v5930_v5 = vadd.f32 %v5560_v10, %v19155_v34  ;;  %v6996_v56 = vsel %vm6976_vm2, %v6995_v7, %v6994_v36  ;;  %v15807_v62 = vunpack.c.l.b16 %v6495_v24  ;;  %v19161_v7 = vld [vmem:[#allocation202_spill] sm:$0xff] }
 0x4dd   : > { %5669 = vrot.lane.b32.xlu1 %v19150_v12, %s11868_s20  ;;  %v6503_v49 = vpack.c.bf16 %v6375_v58, %v6375_v58  ;;  %v7007_v59 = vrot.slane %v15786_v21, 7  ;;  %v6493_v35 = vpack.c.bf16 %v6365_v38, %v6365_v38  ;;  %v19159_v10 = vrot.slane %v15421_v13, 3 }
 0x4de   : > { %5685 = vrot.lane.b32.xlu0 %v19153_v37, %s11868_s20  ;;  %v15804_v11 = vpop.permute.xlu1 %6077  ;;  %v19160_v50 = vrot.slane %v15402_v27, 5  ;;  %v7021_v24 = vrot.slane %v15788_v33, 7  ;;  %v6980_v58 = vsel %vm6979_vm3, %v6978_v45, %v6977_v22  ;;  %v6848_v36 = vunpack.c.l.b16 %v6481_v61  ;;  %v19165_v22 = vld [vmem:[#allocation73_spill] sm:$0xff]  ;;  %v19169_v37 = vld [vmem:[#allocation76_spill] sm:$0xff] }
 0x4df   : > { %19156 = vst [vmem:[#allocation273_spill] sm:$0xff] %v15804_v11  ;;  %v15809_v6 = vpop.permute.xlu0 %6082  ;;  %v6368_v46 = vmul.f32 %v19159_v10, %v5936_v19  ;;  %v6856_v48 = vunpack.c.l.b16 %v6489_v30  ;;  %v6998_v34 = vsel %vm6979_vm3, %v6997_v60, %v6996_v56  ;;  %v6501_v21 = vpack.c.bf16 %v6373_v15, %v6373_v15  ;;  %v19166_v30 = vld [vmem:[#allocation199_spill] sm:$0xff] }
 0x4e0   : > { %19157 = vst [vmem:[#allocation266_spill] sm:$0xff] %v15809_v6  ;;  %v6354_v40 = vmul.f32 %v19160_v50, %v5922_v54  ;;  %v19162_v38 = vrot.slane %v15435_v26, 3  ;;  %v19163_v19 = vrot.slane %v15400_v43, 5  ;;  %v7009_v50 = vrot.slane %v15807_v62, 6 }
 0x4e1   : > { %5693 = vrot.lane.b32.xlu1 %v19158_v57, %s11868_s20  ;;  %v19164_v57 = vld [vmem:[#allocation72_spill] sm:$0xff]  ;;  %v6860_v60 = vunpack.c.l.b16 %v6493_v35  ;;  %v6496_v15 = vpack.c.bf16 %v6368_v46, %v6368_v46  ;;  %v6981_v62 = vrot.slane %v6848_v36, 4  ;;  %v5945_v12 = vadd.f32 %v5590_v42, %v19169_v37 }
 0x4e2   : > { %5699 = vrot.lane.b32.xlu0 %v19161_v7, %s11868_s20  ;;  %v6376_v39 = vmul.f32 %v19162_v38, %v5944_v53  ;;  %v6362_v10 = vmul.f32 %v19163_v19, %v5930_v5  ;;  %v5546_v54 = vpop.permute.xlu1 %5545  ;;  %v6870_v7 = vunpack.c.l.b16 %v6503_v49  ;;  %v5937_v33 = vadd.f32 %v5574_v18, %v19164_v57  ;;  %v19167_v53 = vld [vmem:[#allocation85_spill] sm:$0xff]  ;;  %v19168_v5 = vld [vmem:[#allocation203_spill] sm:$0xff] }
 0x4e3   : > { %v5923_v45 = vadd.f32 %v5546_v54, %v19165_v22  ;;  %v5562_v61 = vpop.permute.xlu0 %5561  ;;  %v6482_v56 = vpack.c.bf16 %v6354_v40, %v6354_v40  ;;  %v659_v19 = vld [vmem:[%s14579_s0 + $0x60] sm:$0xff]  ;;  %v6999_v49 = vrot.slane %v6856_v48, 4  ;;  %v19170_v18 = vrot.slane %v15402_v27, 6  ;;  %v660_v54 = vld [vmem:[%s14579_s0 + $0x68] sm:$0xff] }
 0x4e4   : > { %v5931_v38 = vadd.f32 %v5562_v61, %v19167_v53  ;;  %v6868_v22 = vunpack.c.l.b16 %v6501_v21  ;;  %v6490_v35 = vpack.c.bf16 %v6362_v10, %v6362_v10  ;;  %v19171_v46 = vrot.slane %v15400_v43, 6  ;;  %v19173_v48 = vld [vmem:[#allocation95_spill] sm:$0xff] }
 0x4e5   : > { %5709 = vrot.lane.b32.xlu1 %v19166_v30, %s11868_s20  ;;  %v6355_v57 = vmul.f32 %v19170_v18, %v5923_v45  ;;  %v6504_v30 = vpack.c.bf16 %v6376_v39, %v6376_v39  ;;  %v7023_v53 = vrot.slane %v6870_v7, 6  ;;  %v7008_v37 = vsel %vm6973_vm1, %v7007_v59, %v6860_v60  ;;  %v19174_v39 = vld [vmem:[#allocation98_spill] sm:$0xff] }
 0x4e6   : > { %5715 = vrot.lane.b32.xlu0 %v19168_v5, %s11868_s20  ;;  %v6363_v40 = vmul.f32 %v19171_v46, %v5931_v38  ;;  %v5576_v61 = vpop.permute.xlu1 %5575  ;;  %v19172_v5 = vrot.slane %v15421_v13, 4  ;;  %v15847_v45 = vunpack.c.l.b16 %v6496_v15  ;;  %v6849_v21 = vunpack.c.l.b16 %v6482_v56 }
 0x4e7   : > { %v6483_v36 = vpack.c.bf16 %v6355_v57, %v6355_v57  ;;  %v5938_v11 = vadd.f32 %v5576_v61, %v19173_v48  ;;  %v5592_v42 = vpop.permute.xlu0 %5591  ;;  %v19175_v38 = vrot.slane %v15435_v26, 4  ;;  %v7022_v57 = vsel %vm6973_vm1, %v7021_v24, %v6868_v22 }
 0x4e8   : > { %v6369_v6 = vmul.f32 %v19172_v5, %v5937_v33  ;;  %v5946_v10 = vadd.f32 %v5592_v42, %v19174_v39  ;;  %v6491_v18 = vpack.c.bf16 %v6363_v40, %v6363_v40  ;;  %v6983_v33 = vsel %vm6982_vm4, %v6981_v62, %v6980_v58  ;;  %v19177_v40 = vld [vmem:[#allocation86_spill] sm:$0xff] }
 0x4e9   : > { %6107 = vperm.xlu1 %11557, %v659_v19   ;;  %v6377_v7 = vmul.f32 %v19175_v38, %v5945_v12  ;;  %v7000_v5 = vsel %vm6982_vm4, %v6999_v49, %v6998_v34  ;;  %v15855_v19 = vunpack.c.l.b16 %v6504_v30  ;;  %v6857_v59 = vunpack.c.l.b16 %v6490_v35  ;;  %v19178_v34 = vld [vmem:[#allocation219_spill] sm:$0xff]  ;;  %v19181_v35 = vld [vmem:[#allocation214_spill] sm:$0xff] }
 0x4ea   : > { %6112 = vperm.xlu0 %11556, %v660_v54   ;;  %v19176_v60 = vrot.slane %v15421_v13, 5  ;;  %v5548_v56 = vpop.permute.xlu1 %5547  ;;  %v15860_v54 = vsel %vm6976_vm2, %v7009_v50, %v7008_v37  ;;  %v6497_v46 = vpack.c.bf16 %v6369_v6, %v6369_v6  ;;  %v6850_v12 = vunpack.c.l.b16 %v6483_v36 }
 0x4eb   : > { %v5924_v61 = vadd.f32 %v5548_v56, %v19177_v40  ;;  %v5564_v58 = vpop.permute.xlu0 %5563  ;;  %v6984_v30 = vrot.slane %v6849_v21, 3  ;;  %v19179_v62 = vrot.slane %v15435_v26, 5  ;;  %v15872_v6 = vsel %vm6976_vm2, %v7023_v53, %v7022_v57  ;;  %v19184_v57 = vld [vmem:[#allocation92_spill] sm:$0xff] }
 0x4ec   : > { %v6370_v15 = vmul.f32 %v19176_v60, %v5938_v11  ;;  %v19180_v11 = vld [vmem:[#allocation91_spill] sm:$0xff]  ;;  %v6505_v50 = vpack.c.bf16 %v6377_v7, %v6377_v7  ;;  %v6858_v36 = vunpack.c.l.b16 %v6491_v18  ;;  %v19182_v48 = vrot.slane %v15402_v27, 7 }
 0x4ed   : > { %5671 = vrot.lane.b32.xlu1 %v19178_v34, %s11868_s20  ;;  %v6378_v49 = vmul.f32 %v19179_v62, %v5946_v10  ;;  %v5932_v22 = vadd.f32 %v5564_v58, %v19180_v11  ;;  %v7001_v21 = vrot.slane %v6857_v59, 3  ;;  %v19183_v10 = vrot.slane %v15400_v43, 7  ;;  %v19185_v58 = vld [vmem:[#allocation216_spill] sm:$0xff] }
 0x4ee   : > { %5687 = vrot.lane.b32.xlu0 %v19181_v35, %s11868_s20  ;;  %v6356_v42 = vmul.f32 %v19182_v48, %v5924_v61  ;;  %v6498_v39 = vpack.c.bf16 %v6370_v15, %v6370_v15  ;;  %v5578_v60 = vpop.permute.xlu1 %5577  ;;  %v15879_v56 = vunpack.c.l.b16 %v6497_v46  ;;  %v6987_v40 = vrot.slane %v6850_v12, 2  ;;  %v19186_v11 = vld [vmem:[#allocation100_spill] sm:$0xff] }
 0x4ef   : > { %v6364_v38 = vmul.f32 %v19183_v10, %v5932_v22  ;;  %v5939_v7 = vadd.f32 %v5578_v60, %v19184_v57  ;;  %v5594_v18 = vpop.permute.xlu0 %5593  ;;  %v6506_v61 = vpack.c.bf16 %v6378_v49, %v6378_v49  ;;  %v19187_v15 = vld [vmem:[#allocation224_spill] sm:$0xff]  ;;  %v6986_v46 = vsel %vm6985_vm5, %v6984_v30, %v6983_v33 }
 0x4f0   : > { %v6484_v53 = vpack.c.bf16 %v6356_v42, %v6356_v42  ;;  %v5947_v59 = vadd.f32 %v5594_v18, %v19186_v11  ;;  %v661_v22 = vld [vmem:[%s14579_s0 + $0x70] sm:$0xff]  ;;  %v6872_v48 = vunpack.c.l.b16 %v6505_v50  ;;  %v7003_v10 = vrot.slane %v6858_v36, 2  ;;  %v662_v57 = vld [vmem:[%s14579_s0 + $0x78] sm:$0xff] }
 0x4f1   : > { %5701 = vrot.lane.b32.xlu1 %v19185_v58, %s11868_s20  ;;  %v6492_v62 = vpack.c.bf16 %v6364_v38, %v6364_v38  ;;  %v19188_v42 = vrot.slane %v15421_v13, 6  ;;  %v6865_v37 = vunpack.c.l.b16 %v6498_v39  ;;  %v19189_v49 = vrot.slane %v15435_v26, 6 }
 0x4f2   : > { %5717 = vrot.lane.b32.xlu0 %v19187_v15, %s11868_s20  ;;  %v6851_v12 = vunpack.c.l.b16 %v6484_v53  ;;  %v5580_v43 = vpop.permute.xlu1 %5579  ;;  %v7002_v18 = vsel %vm6985_vm5, %v7001_v21, %v7000_v5  ;;  %v19190_v15 = vld [vmem:[#allocation101_spill] sm:$0xff]  ;;  %v6989_v30 = vsel %vm6988_vm6, %v6987_v40, %v6986_v46  ;;  %v6873_v50 = vunpack.c.l.b16 %v6506_v61 }
 0x4f3   : > { %v6371_v60 = vmul.f32 %v19188_v42, %v5939_v7  ;;  %v6859_v24 = vunpack.c.l.b16 %v6492_v62  ;;  %v6379_v38 = vmul.f32 %v19189_v49, %v5947_v59  ;;  %v5940_v58 = vadd.f32 %v5580_v43, %v19190_v15  ;;  %v5596_v33 = vpop.permute.xlu0 %5595  ;;  %v19191_v7 = vld [vmem:[#allocation97_spill] sm:$0xff] }
 0x4f4   : > { %v6990_v11 = vrot.slane %v6851_v12, 1  ;;  %v5948_v39 = vadd.f32 %v5596_v33, %v19191_v7  ;;  %v19192_v59 = vrot.slane %v15421_v13, 7  ;;  %v7004_v21 = vsel %vm6988_vm6, %v7003_v10, %v7002_v18  ;;  %v19194_v18 = vld [vmem:[#allocation217_spill] sm:$0xff] }
 0x4f5   : > { %v6499_v27 = vpack.c.bf16 %v6371_v60, %v6371_v60  ;;  %6117 = vperm.xlu1 %11557, %v661_v22   ;;  %v7005_v36 = vrot.slane %v6859_v24, 1  ;;  %v6507_v53 = vpack.c.bf16 %v6379_v38, %v6379_v38  ;;  %v7013_v43 = vrot.slane %v15879_v56, 4  ;;  %v11796_v56 = vld [vmem:[%s17813_s6] ss:$0 sm:$0xff] }
 0x4f6   : > { %6122 = vperm.xlu0 %11556, %v662_v57   ;;  %v6372_v42 = vmul.f32 %v19192_v59, %v5940_v58  ;;  %v6992_v5 = vsel %vm6991_vm7, %v6990_v11, %v6989_v30  ;;  %v19193_v22 = vrot.slane %v15435_v26, 7  ;;  %v15905_v61 = vpop.permute.xlu1 %5599  ;;  %v7027_v46 = vrot.slane %v6872_v48, 4 }
 0x4f7   : > { %v6866_v62 = vunpack.c.l.b16 %v6499_v27  ;;  %v6874_v15 = vunpack.c.l.b16 %v6507_v53  ;;  %v7006_v24 = vsel %vm6991_vm7, %v7005_v36, %v7004_v21  ;;  %v7015_v12 = vrot.slane %v6865_v37, 3  ;;  %v15908_v60 = vpop.permute.xlu0 %5615 }
 0x4f8   : > { %v6380_v40 = vmul.f32 %v19193_v22, %v5948_v39  ;;  %v6500_v27 = vpack.c.bf16 %v6372_v42, %v6372_v42  ;;  %v7203_v58 = vpack.c.b16 %v7006_v24, %v6992_v5  ;;  %v4118_v10 = vmul.f32 %v11796_v56, %v15671_v32 }
 0x4f9   : > { %5673 = vrot.lane.b32.xlu1 %v15171_v1, %s11868_s20  ;;  %v7029_v57 = vrot.slane %v6873_v50, 3  ;;  %v7017_v49 = vrot.slane %v6866_v62, 2  ;;  %v4110_v37 = vmul.f32 %v11796_v56, %v15676_v25  ;;  %v19195_v48 = vrot.slane %v15847_v45, 5 }
 0x4fa   : > { %v6508_v38 = vpack.c.bf16 %v6380_v40, %v6380_v40  ;;  %5689 = vrot.lane.b32.xlu0 %v19194_v18, %s11868_s20  ;;  %v7031_v33 = vrot.slane %v6874_v15, 2  ;;  %v6867_v30 = vunpack.c.l.b16 %v6500_v27  ;;  %11099 = vmatprep.mubr.msk.bf16.mxu0 %vm2320_vm14, %v7203_v58  ;;  %v15925_v36 = vadd.f32 %v15679_v41, %v4118_v10  ;;  %v15932_v7 = vpop.permute.xlu1 %5601  ;;  %v19197_v41 = vld [vmem:[#allocation234_spill] sm:$0xff] }
 0x4fb   : > { %v7012_v11 = vsel %vm6979_vm3, %v19195_v48, %v15860_v54  ;;  %v19196_v32 = vrot.slane %v15855_v19, 5  ;;  %v4372_v45 = vadd.f32 %v15684_v8, %v4110_v37  ;;  %v15937_v59 = vpop.permute.xlu0 %5617  ;;  %v19198_v19 = vmax.f32 %v15578_v52, 0.0  ;;  %v19199_v8 = vld [vmem:[#allocation236_spill] sm:$0xff]  ;;  %v19204_v10 = vld [vmem:[#allocation230_spill] sm:$0xff] }
 0x4fc   : > { %v7014_v53 = vsel %vm6982_vm4, %v7013_v43, %v7012_v11  ;;  %v6875_v25 = vunpack.c.l.b16 %v6508_v38  ;;  %v7019_v62 = vrot.slane %v6867_v30, 1  ;;  %v19200_v43 = vmax.f32 %v15586_v0, 0.0  ;;  %v19207_v11 = vld [vmem:[#allocation232_spill] sm:$0xff] }
 0x4fd   : > { %v7026_v50 = vsel %vm6979_vm3, %v19196_v32, %v15872_v6  ;;  %v7016_v39 = vsel %vm6985_vm5, %v7015_v12, %v7014_v53  ;;  %5703 = vrot.lane.b32.xlu1 %v19197_v41, %s11868_s20  ;;  %v5212_v6 = vadd.f32 %v15646_v20, %v19198_v19  ;;  %v19201_v22 = vmax.f32 %v15588_v3, 0.0 }
 0x4fe   : > { %v7028_v54 = vsel %vm6982_vm4, %v7027_v46, %v7026_v50  ;;  %v7018_v5 = vsel %vm6988_vm6, %v7017_v49, %v7016_v39  ;;  %v7033_v21 = vrot.slane %v6875_v25, 1  ;;  %5719 = vrot.lane.b32.xlu0 %v19199_v8, %s11868_s20  ;;  %v5176_v15 = vadd.f32 %v15657_v47, %v19200_v43  ;;  %v15962_v0 = vpop.permute.xlu1 %5631  ;;  %v19209_v39 = vld [vmem:[#allocation259_spill] sm:$0xff]  ;;  %v19211_v43 = vld [vmem:[#allocation237_spill] sm:$0xff]  ;;  %v19240_v8 = vld [vmem:[#allocation120_spill] sm:$0xff] }
 0x4ff   : > { %v7030_v42 = vsel %vm6985_vm5, %v7029_v57, %v7028_v54  ;;  %v5128_v40 = vadd.f32 %v15661_v55, %v19201_v22  ;;  %v7020_v20 = vsel %vm6991_vm7, %v7019_v62, %v7018_v5  ;;  %v19202_v24 = vmax.f32 %v15594_v2, 0.0  ;;  %v15966_v56 = vpop.permute.xlu0 %5647  ;;  %v19212_v22 = vld [vmem:[#allocation247_spill] sm:$0xff] }
 0x500   : > { %v7032_v52 = vsel %vm6988_vm6, %v7031_v33, %v7030_v42  ;;  %v19203_v12 = vmax.f32 %v15612_v14, 0.0  ;;  %v4508_v58 = vmax.f32 %v15925_v36, 0.0  ;;  %v5165_v3 = vrot.slane %v15619_v63, 2 }
 0x501   : > { %v5266_v46 = vadd.f32 %v15666_v51, %v19202_v24  ;;  %v7034_v47 = vsel %vm6991_vm7, %v7033_v21, %v7032_v52  ;;  %v4500_v55 = vmax.f32 %v4372_v45, 0.0  ;;  %5675 = vrot.lane.b32.xlu1 %v19204_v10, %s11868_s20  ;;  %v19205_v51 = vrot.slane %v15445_v29, 1 }
 0x502   : > { %v5217_v27 = vrot.slane %v19203_v12, 4  ;;  %v7204_v2 = vpack.c.b16 %v7034_v47, %v7020_v20  ;;  %v5117_v49 = vrot.slane %v15627_v44, 2  ;;  %v5255_v38 = vrot.slane %v15629_v16, 2  ;;  %5691 = vrot.lane.b32.xlu0 %v19207_v11, %s11868_s20  ;;  %v15986_v54 = vpop.permute.xlu1 %5597 }
 0x503   : > { %v15973_v57 = vadd.f32 %v19205_v51, %v15445_v29  ;;  %v5207_v37 = vrot.slane %v15631_v9, 2  ;;  %v5123_v48 = vrot.slane %v15642_v4, 2  ;;  %v5171_v33 = vrot.slane %v15640_v23, 2  ;;  %v15992_v21 = vpop.permute.xlu0 %5603 }
 0x504   : > { %v5261_v30 = vrot.slane %v15653_v28, 2  ;;  %v5213_v36 = vrot.slane %v5212_v6, 2  ;;  %v5177_v32 = vrot.slane %v5176_v15, 2  ;;  %11100 = vmatmul.mubr.msk.bf16.vlgmr.msra.gmra.mxu0 %vm2320_vm14, %v7204_v2  ;;  %v5129_v29 = vrot.slane %v5128_v40, 2 }
 0x505   : > { %19206 = vst [vmem:[#allocation260_spill] sm:$0xff] %v15973_v57  ;;  %v5267_v50 = vrot.slane %v5266_v46, 2  ;;  %v19208_v53 = vmov %v19203_v12  ;;  %v5271_v45 = vrot.slane %v4508_v58, 4  ;;  %v19210_v62 = vrot.slane %v19209_v39, 2  ;;  %5705 = vrot.lane.b32.xlu1 %v19211_v43, %s11868_s20 }
 0x506   : > { %v5218_v25 = vadd.f32 %v5217_v27, %v19208_v53  ;;  %v5166_v42 = vadd.f32 %v5165_v3, %v15619_v63  ;;  %v5223_v5 = vrot.slane %v4500_v55, 4  ;;  %v19213_v52 = vrot.slane %v19212_v22, 1  ;;  %v19214_v63 = vld [vmem:[#allocation235_spill] sm:$0xff] }
 0x507   : > { %v5232_v19 = vadd.f32 %v19210_v62, %v19209_v39  ;;  %v5118_v20 = vadd.f32 %v5117_v49, %v15627_v44  ;;  %v5256_v24 = vadd.f32 %v5255_v38, %v15629_v16  ;;  %v5208_v12 = vadd.f32 %v5207_v37, %v15631_v9  ;;  %5721 = vrot.lane.b32.xlu0 %v19214_v63, %s11868_s20  ;;  %v16009_v44 = vpop.permute.xlu1 %5613  ;;  %v16011_v49 = vpop.permute.xlu0 %5619  ;;  %v19215_v9 = vld [vmem:[#allocation233_spill] sm:$0xff]  ;;  %v19216_v38 = vld [vmem:[#allocation252_spill] sm:$0xff] }
 0x508   : > { %v15999_v14 = vadd.f32 %v19213_v52, %v19212_v22  ;;  %v5124_v27 = vadd.f32 %v5123_v48, %v15642_v4  ;;  %v5172_v47 = vadd.f32 %v5171_v33, %v15640_v23  ;;  %v5262_v3 = vadd.f32 %v5261_v30, %v15653_v28  ;;  %v19217_v28 = vld [vmem:[#allocation231_spill] sm:$0xff]  ;;  %v19218_v52 = vld [vmem:[#allocation244_spill] sm:$0xff] }
 0x509   : > { %v5214_v2 = vadd.f32 %v5213_v36, %v5212_v6  ;;  %v5178_v51 = vadd.f32 %v5177_v32, %v5176_v15  ;;  %v5130_v53 = vadd.f32 %v5129_v29, %v5128_v40  ;;  %v5268_v39 = vadd.f32 %v5267_v50, %v5266_v46  ;;  %5707 = vrot.lane.b32.xlu1 %v19215_v9, %s11868_s20 }
 0x50a   : > { %v5219_v62 = vrot.slane %v5218_v25, 2  ;;  %v5272_v22 = vadd.f32 %v5271_v45, %v4508_v58  ;;  %v5224_v16 = vadd.f32 %v5223_v5, %v4500_v55  ;;  %v5233_v4 = vrot.slane %v5232_v19, 1 }
 0x50b   : > { %v5251_v37 = vrot.slane %v19216_v38, 1  ;;  %v5167_v23 = vrot.slane %v5166_v42, 1  ;;  %5723 = vrot.lane.b32.xlu0 %v19217_v28, %s11868_s20  ;;  %v5119_v6 = vrot.slane %v5118_v20, 1  ;;  %v5209_v15 = vrot.slane %v5208_v12, 1  ;;  %v16020_v32 = vpop.permute.xlu1 %5633  ;;  %v16022_v5 = vpop.permute.xlu0 %5649 }
 0x50c   : > { %v5257_v40 = vrot.slane %v5256_v24, 1  ;;  %v5125_v46 = vrot.slane %v5124_v27, 1  ;;  %v5173_v58 = vrot.slane %v5172_v47, 1  ;;  %v5215_v48 = vrot.slane %v5214_v2, 1 }
 0x50d   : > { %v5263_v33 = vrot.slane %v5262_v3, 1  ;;  %v5179_v55 = vrot.slane %v5178_v51, 1  ;;  %v16018_v30 = vadd.f32 %v5219_v62, %v5218_v25  ;;  %v5273_v36 = vrot.slane %v5272_v22, 2  ;;  %5727 = vrot.lane.b32.xlu1 %v19218_v52, %s11868_s20  ;;  %v19221_v25 = vld [vmem:[#allocation242_spill] sm:$0xff] }
 0x50e   : > { %v5131_v29 = vrot.slane %v5130_v53, 1  ;;  %v5269_v50 = vrot.slane %v5268_v39, 1  ;;  %v5225_v45 = vrot.slane %v5224_v16, 2  ;;  %v16026_v26 = vadd.f32 %v5233_v4, %v5232_v19  ;;  %v19236_v52 = vld [vmem:[#allocation122_spill] sm:$0xff] }
 0x50f   : > { %v16029_v13 = vadd.f32 %v5251_v37, %v19216_v38  ;;  %v16031_v28 = vadd.f32 %v5167_v23, %v5166_v42  ;;  %5743 = vrot.lane.b32.xlu0 %v19221_v25, %s11868_s20  ;;  %v16035_v62 = vadd.f32 %v5119_v6, %v5118_v20  ;;  %v16037_v9 = vadd.f32 %v5209_v15, %v5208_v12  ;;  %v16053_v37 = vpop.permute.xlu1 %5605  ;;  %v16066_v23 = vpop.permute.xlu0 %5621  ;;  %v19224_v6 = vld [vmem:[#allocation107_spill] sm:$0xff]  ;;  %v19230_v12 = vld [vmem:[#allocation273_spill] sm:$0xff] }
 0x510   : > { %19219 = vst [vmem:[#allocation267_spill] sm:$0xff] %v16026_v26  ;;  %v16039_v63 = vadd.f32 %v5257_v40, %v5256_v24  ;;  %v16041_v43 = vadd.f32 %v5125_v46, %v5124_v27  ;;  %v16043_v11 = vadd.f32 %v5173_v58, %v5172_v47  ;;  %v16045_v19 = vadd.f32 %v5215_v48, %v5214_v2  ;;  %v19222_v2 = vld [vmem:[#allocation103_spill] sm:$0xff]  ;;  %v19225_v40 = vld [vmem:[#allocation240_spill] sm:$0xff]  ;;  %v19227_v58 = vld [vmem:[#allocation117_spill] sm:$0xff] }
 0x511   : > { %19220 = vst [vmem:[#allocation261_spill] sm:$0xff] %v16029_v13  ;;  %v16047_v4 = vadd.f32 %v5263_v33, %v5262_v3  ;;  %v16049_v38 = vadd.f32 %v5179_v55, %v5178_v51  ;;  %v16051_v42 = vadd.f32 %v5273_v36, %v5272_v22  ;;  %v16055_v20 = vadd.f32 %v5131_v29, %v5130_v53  ;;  %v19223_v22 = vld [vmem:[#allocation243_spill] sm:$0xff]  ;;  %v19231_v55 = vld [vmem:[#allocation124_spill] sm:$0xff] }
 0x512   : > { %v16058_v24 = vadd.f32 %v5269_v50, %v5268_v39  ;;  %v16060_v27 = vadd.f32 %v5225_v45, %v5224_v16  ;;  %v6153_v47 = vrot.slane %v15753_v31, 1  ;;  %v5950_v3 = vadd.f32 %v15905_v61, %v19222_v2  ;;  %5729 = vrot.lane.b32.xlu1 %v19223_v22, %s11868_s20  ;;  %v19226_v61 = vld [vmem:[#allocation127_spill] sm:$0xff] }
 0x513   : > { %v6154_v51 = vrot.slane %v15753_v31, 2  ;;  %v6160_v53 = vrot.slane %v15758_v17, 1  ;;  %v5958_v39 = vadd.f32 %v15908_v60, %v19224_v6  ;;  %v6161_v16 = vrot.slane %v15758_v17, 2  ;;  %5745 = vrot.lane.b32.xlu0 %v19225_v40, %s11868_s20  ;;  %v19228_v36 = vld [vmem:[#allocation123_spill] sm:$0xff]  ;;  %v16086_v50 = vpop.permute.xlu1 %5629 }
 0x514   : > { %v6155_v15 = vrot.slane %v15753_v31, 3  ;;  %v5951_v46 = vadd.f32 %v15932_v7, %v19226_v61  ;;  %v5959_v48 = vadd.f32 %v15937_v59, %v19227_v58  ;;  %v6162_v33 = vrot.slane %v15758_v17, 3  ;;  %v16090_v7 = vpop.permute.xlu0 %5635  ;;  %v19229_v59 = vld [vmem:[#allocation241_spill] sm:$0xff]  ;;  %v19232_v2 = vld [vmem:[#allocation239_spill] sm:$0xff] }
 0x515   : > { %v5949_v60 = vadd.f32 %v15986_v54, %v19228_v36  ;;  %v6382_v6 = vmul.f32 %v6153_v47, %v5950_v3  ;;  %v6390_v36 = vmul.f32 %v6160_v53, %v5958_v39  ;;  %v6167_v29 = vrot.slane %v19230_v12, 1  ;;  %v19234_v54 = vld [vmem:[#allocation119_spill] sm:$0xff]  ;;  %v19235_v39 = vld [vmem:[#allocation132_spill] sm:$0xff] }
 0x516   : > { %5759 = vrot.lane.b32.xlu1 %v19229_v59, %s11868_s20  ;;  %v5957_v45 = vadd.f32 %v16009_v44, %v19231_v55  ;;  %v6383_v3 = vmul.f32 %v6154_v51, %v5951_v46  ;;  %v6391_v40 = vmul.f32 %v6161_v16, %v5959_v48  ;;  %v19233_v59 = vld [vmem:[#allocation266_spill] sm:$0xff]  ;;  %v6168_v61 = vrot.slane %v19230_v12, 2 }
 0x517   : > { %5775 = vrot.lane.b32.xlu0 %v19232_v2, %s11868_s20  ;;  %v6174_v22 = vrot.slane %v19233_v59, 1  ;;  %v6381_v58 = vmul.f32 %v15753_v31, %v5949_v60  ;;  %v5952_v53 = vadd.f32 %v15992_v21, %v19234_v54  ;;  %v5960_v25 = vadd.f32 %v16011_v49, %v19235_v39  ;;  %v5646_v55 = vpop.permute.xlu1 %5645  ;;  %v19237_v60 = vld [vmem:[#allocation254_spill] sm:$0xff] }
 0x518   : > { %v6510_v2 = vpack.c.bf16 %v6382_v6, %v6382_v6  ;;  %v5966_v51 = vadd.f32 %v15962_v0, %v19236_v52  ;;  %v16115_v48 = vpop.permute.xlu0 %5651  ;;  %v6518_v21 = vpack.c.bf16 %v6390_v36, %v6390_v36  ;;  %v19238_v54 = vld [vmem:[#allocation118_spill] sm:$0xff]  ;;  %v6389_v39 = vmul.f32 %v15758_v17, %v5957_v45  ;;  %v19239_v6 = vld [vmem:[#allocation249_spill] sm:$0xff] }
 0x519   : > { %v5974_v49 = vadd.f32 %v15966_v56, %v19238_v54  ;;  %v6511_v52 = vpack.c.bf16 %v6383_v3, %v6383_v3  ;;  %v6519_v47 = vpack.c.bf16 %v6391_v40, %v6391_v40  ;;  %v6509_v44 = vpack.c.bf16 %v6381_v58, %v6381_v58  ;;  %v19242_v40 = vld [vmem:[#allocation255_spill] sm:$0xff] }
 0x51a   : > { %5725 = vrot.lane.b32.xlu1 %v19237_v60, %s11868_s20  ;;  %v6384_v10 = vmul.f32 %v6155_v15, %v5952_v53  ;;  %v6392_v60 = vmul.f32 %v6162_v33, %v5960_v25  ;;  %v6877_v54 = vunpack.c.l.b16 %v6510_v2  ;;  %v6398_v45 = vmul.f32 %v6167_v29, %v5966_v51  ;;  %v19243_v25 = vld [vmem:[#allocation245_spill] sm:$0xff] }
 0x51b   : > { %5731 = vrot.lane.b32.xlu0 %v19239_v6, %s11868_s20  ;;  %v16127_v36 = vpop.permute.xlu1 %6087  ;;  %v5967_v6 = vadd.f32 %v16020_v32, %v19240_v8  ;;  %v6885_v16 = vunpack.c.l.b16 %v6518_v21  ;;  %v6406_v58 = vmul.f32 %v6174_v22, %v5974_v49  ;;  %v6517_v15 = vpack.c.bf16 %v6389_v39, %v6389_v39  ;;  %v19244_v53 = vld [vmem:[#allocation149_spill] sm:$0xff] }
 0x51c   : > { %v6878_v2 = vunpack.c.l.b16 %v6511_v52  ;;  %v6886_v29 = vunpack.c.l.b16 %v6519_v47  ;;  %v5953_v8 = vadd.f32 %v16053_v37, %v19244_v53  ;;  %v19245_v32 = vld [vmem:[#allocation153_spill] sm:$0xff]  ;;  %v6876_v56 = vunpack.c.l.b16 %v6509_v44  ;;  %v19247_v47 = vld [vmem:[#allocation246_spill] sm:$0xff] }
 0x51d   : > { %v16132_v41 = vpop.permute.xlu0 %6092  ;;  %v5961_v51 = vadd.f32 %v16066_v23, %v19245_v32  ;;  %v6512_v46 = vpack.c.bf16 %v6384_v10, %v6384_v10  ;;  %v6520_v0 = vpack.c.bf16 %v6392_v60, %v6392_v60  ;;  %v7035_v21 = vrot.slane %v6877_v54, 7  ;;  %v19248_v23 = vld [vmem:[#allocation136_spill] sm:$0xff]  ;;  %v19249_v44 = vld [vmem:[#allocation250_spill] sm:$0xff] }
 0x51e   : > { %19241 = vst [vmem:[#allocation278_spill] sm:$0xff] %v16132_v41  ;;  %5741 = vrot.lane.b32.xlu1 %v19242_v40, %s11868_s20  ;;  %v6526_v49 = vpack.c.bf16 %v6398_v45, %v6398_v45  ;;  %v6399_v39 = vmul.f32 %v6168_v61, %v5967_v6  ;;  %v7049_v37 = vrot.slane %v6885_v16, 7  ;;  %v6534_v53 = vpack.c.bf16 %v6406_v58, %v6406_v58  ;;  %v19252_v58 = vld [vmem:[#allocation151_spill] sm:$0xff] }
 0x51f   : > { %5747 = vrot.lane.b32.xlu0 %v19243_v25, %s11868_s20  ;;  %v5608_v3 = vpop.permute.xlu1 %5607  ;;  %v19246_v25 = vld [vmem:[#allocation133_spill] sm:$0xff]  ;;  %v6884_v40 = vunpack.c.l.b16 %v6517_v15  ;;  %v5965_v10 = vadd.f32 %v16086_v50, %v19248_v23  ;;  %v7037_v60 = vrot.slane %v6878_v2, 6  ;;  %v7051_v54 = vrot.slane %v6886_v29, 6 }
 0x520   : > { %v5975_v33 = vadd.f32 %v16022_v5, %v19246_v25  ;;  %v19250_v61 = vrot.slane %v15753_v31, 4  ;;  %v19251_v5 = vrot.slane %v15758_v17, 4  ;;  %v7036_v25 = vsel %vm6973_vm1, %v7035_v21, %v6876_v56  ;;  %v19254_v29 = vld [vmem:[#allocation137_spill] sm:$0xff]  ;;  %v19257_v21 = vld [vmem:[#allocation251_spill] sm:$0xff] }
 0x521   : > { %v5624_v52 = vpop.permute.xlu0 %5623  ;;  %v6879_v32 = vunpack.c.l.b16 %v6512_v46  ;;  %v6887_v16 = vunpack.c.l.b16 %v6520_v0  ;;  %v5973_v15 = vadd.f32 %v5646_v55, %v19252_v58  ;;  %v6527_v50 = vpack.c.bf16 %v6399_v39, %v6399_v39  ;;  %v19256_v55 = vld [vmem:[#allocation142_spill] sm:$0xff]  ;;  %v19258_v39 = vld [vmem:[#allocation143_spill] sm:$0xff] }
 0x522   : > { %5761 = vrot.lane.b32.xlu1 %v19247_v47, %s11868_s20  ;;  %v6385_v6 = vmul.f32 %v19250_v61, %v5953_v8  ;;  %v6393_v45 = vmul.f32 %v19251_v5, %v5961_v51  ;;  %v16159_v47 = vunpack.c.l.b16 %v6526_v49  ;;  %v19253_v23 = vrot.slane %v19233_v59, 2  ;;  %v19255_v8 = vld [vmem:[#allocation256_spill] sm:$0xff] }
 0x523   : > { %5777 = vrot.lane.b32.xlu0 %v19249_v44, %s11868_s20  ;;  %v5638_v22 = vpop.permute.xlu1 %5637  ;;  %v5954_v44 = vadd.f32 %v5608_v3, %v19254_v29  ;;  %v16166_v51 = vunpack.c.l.b16 %v6534_v53  ;;  %v7050_v46 = vsel %vm6973_vm1, %v7049_v37, %v6884_v40  ;;  %v6397_v0 = vmul.f32 %v19230_v12, %v5965_v10 }
 0x524   : > { %v6407_v2 = vmul.f32 %v19253_v23, %v5975_v33  ;;  %v5968_v56 = vadd.f32 %v16090_v7, %v19256_v55  ;;  %v7038_v33 = vsel %vm6976_vm2, %v7037_v60, %v7036_v25  ;;  %v6513_v49 = vpack.c.bf16 %v6385_v6, %v6385_v6  ;;  %v19259_v23 = vld [vmem:[#allocation156_spill] sm:$0xff] }
 0x525   : > { %v5654_v18 = vpop.permute.xlu0 %5653  ;;  %v6521_v3 = vpack.c.bf16 %v6393_v45, %v6393_v45  ;;  %v5962_v61 = vadd.f32 %v5624_v52, %v19258_v39  ;;  %v7039_v5 = vrot.slane %v6879_v32, 5  ;;  %v7053_v58 = vrot.slane %v6887_v16, 5 }
 0x526   : > { %5733 = vrot.lane.b32.xlu1 %v19255_v8, %s11868_s20  ;;  %v6405_v53 = vmul.f32 %v19233_v59, %v5973_v15  ;;  %v5976_v40 = vadd.f32 %v16115_v48, %v19259_v23  ;;  %v7052_v7 = vsel %vm6976_vm2, %v7051_v54, %v7050_v46  ;;  %v6894_v10 = vunpack.c.l.b16 %v6527_v50  ;;  %v19265_v54 = vld [vmem:[#allocation176_spill] sm:$0xff] }
 0x527   : > { %5749 = vrot.lane.b32.xlu0 %v19257_v21, %s11868_s20  ;;  %v16179_v37 = vpop.permute.xlu1 %6097  ;;  %v6535_v29 = vpack.c.bf16 %v6407_v2, %v6407_v2  ;;  %v19261_v55 = vrot.slane %v15753_v31, 5  ;;  %v7063_v52 = vrot.slane %v16159_v47, 7  ;;  %v6525_v45 = vpack.c.bf16 %v6397_v0, %v6397_v0 }
 0x528   : > { %19260 = vst [vmem:[#allocation274_spill] sm:$0xff] %v16179_v37  ;;  %v19262_v25 = vrot.slane %v19230_v12, 3  ;;  %v7077_v32 = vrot.slane %v16166_v51, 7  ;;  %v6880_v16 = vunpack.c.l.b16 %v6513_v49  ;;  %v19263_v15 = vrot.slane %v15758_v17, 5 }
 0x529   : > { %v6386_v60 = vmul.f32 %v19261_v55, %v5954_v44  ;;  %v16184_v6 = vpop.permute.xlu0 %6102  ;;  %v6888_v44 = vunpack.c.l.b16 %v6521_v3  ;;  %v7040_v2 = vsel %vm6979_vm3, %v7039_v5, %v7038_v33  ;;  %v7054_v47 = vsel %vm6979_vm3, %v7053_v58, %v7052_v7  ;;  %v19267_v5 = vld [vmem:[#allocation170_spill] sm:$0xff] }
 0x52a   : > { %5757 = vrot.lane.b32.xlu1 %v15999_v14, %s11868_s20  ;;  %v6400_v48 = vmul.f32 %v19262_v25, %v5968_v56  ;;  %v6394_v50 = vmul.f32 %v19263_v15, %v5962_v61  ;;  %v6533_v46 = vpack.c.bf16 %v6405_v53, %v6405_v53  ;;  %v19264_v0 = vrot.slane %v19233_v59, 3  ;;  %v19266_v61 = vld [vmem:[#allocation138_spill] sm:$0xff]  ;;  %v19269_v15 = vld [vmem:[#allocation144_spill] sm:$0xff] }
 0x52b   : > { %5763 = vrot.lane.b32.xlu0 %v15973_v57, %s11868_s20  ;;  %v5610_v39 = vpop.permute.xlu1 %5609  ;;  %v7065_v23 = vrot.slane %v6894_v10, 6  ;;  %v6902_v55 = vunpack.c.l.b16 %v6535_v29  ;;  %v6514_v25 = vpack.c.bf16 %v6386_v60, %v6386_v60  ;;  %v6892_v49 = vunpack.c.l.b16 %v6525_v45 }
 0x52c   : > { %v6408_v56 = vmul.f32 %v19264_v0, %v5976_v40  ;;  %v5955_v57 = vadd.f32 %v5610_v39, %v19265_v54  ;;  %v6528_v3 = vpack.c.bf16 %v6400_v48, %v6400_v48  ;;  %v5969_v33 = vadd.f32 %v5638_v22, %v19266_v61 }
 0x52d   : > { %v5626_v51 = vpop.permute.xlu0 %5625  ;;  %v7041_v53 = vrot.slane %v6880_v16, 4  ;;  %v7055_v40 = vrot.slane %v6888_v44, 4  ;;  %v6522_v7 = vpack.c.bf16 %v6394_v50, %v6394_v50  ;;  %v19268_v10 = vrot.slane %v15753_v31, 6  ;;  %v19273_v50 = vld [vmem:[#allocation171_spill] sm:$0xff] }
 0x52e   : > { %5773 = vrot.lane.b32.xlu1 %v16026_v26, %s11868_s20  ;;  %v5963_v58 = vadd.f32 %v5626_v51, %v19267_v5  ;;  %v6900_v60 = vunpack.c.l.b16 %v6533_v46  ;;  %v6536_v54 = vpack.c.bf16 %v6408_v56, %v6408_v56  ;;  %v5977_v0 = vadd.f32 %v5654_v18, %v19269_v15  ;;  %v19271_v5 = vld [vmem:[#allocation177_spill] sm:$0xff] }
 0x52f   : > { %5779 = vrot.lane.b32.xlu0 %v16029_v13, %s11868_s20  ;;  %v6387_v29 = vmul.f32 %v19268_v10, %v5955_v57  ;;  %v19270_v45 = vrot.slane %v15758_v17, 6  ;;  %v5640_v39 = vpop.permute.xlu1 %5639  ;;  %v7079_v22 = vrot.slane %v6902_v55, 6  ;;  %v6881_v61 = vunpack.c.l.b16 %v6514_v25 }
 0x530   : > { %v5970_v26 = vadd.f32 %v5640_v39, %v19271_v5  ;;  %v7064_v16 = vsel %vm6973_vm1, %v7063_v52, %v6892_v49  ;;  %v16217_v57 = vunpack.c.l.b16 %v6528_v3  ;;  %v19272_v44 = vrot.slane %v19230_v12, 4 }
 0x531   : > { %v6395_v48 = vmul.f32 %v19270_v45, %v5963_v58  ;;  %v6515_v51 = vpack.c.bf16 %v6387_v29, %v6387_v29  ;;  %v5656_v13 = vpop.permute.xlu0 %5655  ;;  %v7042_v56 = vsel %vm6982_vm4, %v7041_v53, %v7040_v2  ;;  %v7056_v55 = vsel %vm6982_vm4, %v7055_v40, %v7054_v47  ;;  %v19276_v53 = vld [vmem:[#allocation165_spill] sm:$0xff] }
 0x532   : > { %5735 = vrot.lane.b32.xlu1 %v16035_v62, %s11868_s20  ;;  %v6401_v18 = vmul.f32 %v19272_v44, %v5969_v33  ;;  %v5978_v46 = vadd.f32 %v5656_v13, %v19273_v50  ;;  %v6889_v25 = vunpack.c.l.b16 %v6522_v7  ;;  %v7078_v10 = vsel %vm6973_vm1, %v7077_v32, %v6900_v60 }
 0x533   : > { %5751 = vrot.lane.b32.xlu0 %v16031_v28, %s11868_s20  ;;  %v6523_v58 = vpack.c.bf16 %v6395_v48, %v6395_v48  ;;  %v16227_v29 = vunpack.c.l.b16 %v6536_v54  ;;  %v19274_v52 = vrot.slane %v19233_v59, 4  ;;  %v6882_v3 = vunpack.c.l.b16 %v6515_v51  ;;  %v5612_v33 = vpop.permute.xlu1 %5611 }
 0x534   : > { %v16232_v13 = vsel %vm6976_vm2, %v7065_v23, %v7064_v16  ;;  %v7043_v15 = vrot.slane %v6881_v61, 3  ;;  %v19275_v45 = vrot.slane %v19230_v12, 5  ;;  %v5956_v47 = vadd.f32 %v5612_v33, %v19276_v53  ;;  %v19281_v53 = vld [vmem:[#allocation172_spill] sm:$0xff] }
 0x535   : > { %v6409_v49 = vmul.f32 %v19274_v52, %v5977_v0  ;;  %v5628_v40 = vpop.permute.xlu0 %5627  ;;  %v7067_v32 = vrot.slane %v16217_v57, 5  ;;  %v6529_v7 = vpack.c.bf16 %v6401_v18, %v6401_v18  ;;  %v19277_v60 = vrot.slane %v19233_v59, 5  ;;  %v19278_v0 = vld [vmem:[#allocation158_spill] sm:$0xff] }
 0x536   : > { %v6402_v2 = vmul.f32 %v19275_v45, %v5970_v26  ;;  %5765 = vrot.lane.b32.xlu1 %v16037_v9, %s11868_s20  ;;  %v5964_v48 = vadd.f32 %v5628_v40, %v19278_v0  ;;  %v16246_v23 = vsel %vm6976_vm2, %v7079_v22, %v7078_v10  ;;  %v7057_v26 = vrot.slane %v6889_v25, 3 }
 0x537   : > { %v6410_v54 = vmul.f32 %v19277_v60, %v5978_v46  ;;  %5781 = vrot.lane.b32.xlu0 %v16039_v63, %s11868_s20  ;;  %v6890_v39 = vunpack.c.l.b16 %v6523_v58  ;;  %v19279_v61 = vrot.slane %v15753_v31, 7  ;;  %v7081_v5 = vrot.slane %v16227_v29, 5  ;;  %v5642_v46 = vpop.permute.xlu1 %5641  ;;  %v19282_v29 = vld [vmem:[#allocation159_spill] sm:$0xff] }
 0x538   : > { %v6537_v16 = vpack.c.bf16 %v6409_v49, %v6409_v49  ;;  %v7045_v44 = vrot.slane %v6882_v3, 2  ;;  %v19280_v18 = vrot.slane %v15758_v17, 7  ;;  %v7044_v52 = vsel %vm6985_vm5, %v7043_v15, %v7042_v56 }
 0x539   : > { %v6388_v51 = vmul.f32 %v19279_v61, %v5956_v47  ;;  %v6530_v33 = vpack.c.bf16 %v6402_v2, %v6402_v2  ;;  %v5971_v22 = vadd.f32 %v5642_v46, %v19281_v53  ;;  %v5658_v10 = vpop.permute.xlu0 %5657  ;;  %v6896_v25 = vunpack.c.l.b16 %v6529_v7  ;;  %v19285_v46 = vld [vmem:[#allocation167_spill] sm:$0xff] }
 0x53a   : > { %v6396_v50 = vmul.f32 %v19280_v18, %v5964_v48  ;;  %5737 = vrot.lane.b32.xlu1 %v16041_v43, %s11868_s20  ;;  %v6538_v58 = vpack.c.bf16 %v6410_v54, %v6410_v54  ;;  %v5979_v49 = vadd.f32 %v5658_v10, %v19282_v29  ;;  %v7058_v3 = vsel %vm6985_vm5, %v7057_v26, %v7056_v55 }
 0x53b   : > { %v6516_v45 = vpack.c.bf16 %v6388_v51, %v6388_v51  ;;  %5753 = vrot.lane.b32.xlu0 %v16043_v11, %s11868_s20  ;;  %v7059_v40 = vrot.slane %v6890_v39, 2  ;;  %v19283_v15 = vrot.slane %v19230_v12, 6  ;;  %v6904_v60 = vunpack.c.l.b16 %v6537_v16  ;;  %v5644_v61 = vpop.permute.xlu1 %5643  ;;  %v19286_v16 = vld [vmem:[#allocation179_spill] sm:$0xff] }
 0x53c   : > { %v6524_v47 = vpack.c.bf16 %v6396_v50, %v6396_v50  ;;  %v7046_v0 = vsel %vm6988_vm6, %v7045_v44, %v7044_v52  ;;  %v19284_v7 = vrot.slane %v19233_v59, 6  ;;  %v6897_v51 = vunpack.c.l.b16 %v6530_v33 }
 0x53d   : > { %v6883_v56 = vunpack.c.l.b16 %v6516_v45  ;;  %v6403_v2 = vmul.f32 %v19283_v15, %v5971_v22  ;;  %v5972_v53 = vadd.f32 %v5644_v61, %v19285_v46  ;;  %v5660_v10 = vpop.permute.xlu0 %5659  ;;  %v6905_v55 = vunpack.c.l.b16 %v6538_v58 }
 0x53e   : > { %v6891_v48 = vunpack.c.l.b16 %v6524_v47  ;;  %v6411_v54 = vmul.f32 %v19284_v7, %v5979_v49  ;;  %5767 = vrot.lane.b32.xlu1 %v16045_v19, %s11868_s20  ;;  %v5980_v45 = vadd.f32 %v5660_v10, %v19286_v16  ;;  %v7060_v44 = vsel %vm6988_vm6, %v7059_v40, %v7058_v3 }
 0x53f   : > { %v7047_v18 = vrot.slane %v6883_v56, 1  ;;  %v6531_v50 = vpack.c.bf16 %v6403_v2, %v6403_v2  ;;  %5783 = vrot.lane.b32.xlu0 %v16047_v4, %s11868_s20  ;;  %v19287_v33 = vrot.slane %v19230_v12, 7  ;;  %v7069_v29 = vrot.slane %v6896_v25, 4  ;;  %v16278_v15 = vpop.permute.xlu1 %5663 }
 0x540   : > { %v7061_v26 = vrot.slane %v6891_v48, 1  ;;  %v6539_v39 = vpack.c.bf16 %v6411_v54, %v6411_v54  ;;  %v19288_v56 = vrot.slane %v19233_v59, 7  ;;  %v7083_v48 = vrot.slane %v6904_v60, 4 }
 0x541   : > { %v6898_v52 = vunpack.c.l.b16 %v6531_v50  ;;  %v6404_v22 = vmul.f32 %v19287_v33, %v5972_v53  ;;  %v7048_v47 = vsel %vm6991_vm7, %v7047_v18, %v7046_v0  ;;  %v7071_v7 = vrot.slane %v6897_v51, 3  ;;  %v16281_v61 = vpop.permute.xlu0 %5679 }
 0x542   : > { %v6906_v49 = vunpack.c.l.b16 %v6539_v39  ;;  %v6412_v58 = vmul.f32 %v19288_v56, %v5980_v45  ;;  %v7062_v2 = vsel %vm6991_vm7, %v7061_v26, %v7060_v44  ;;  %5739 = vrot.lane.b32.xlu1 %v16055_v20, %s11868_s20  ;;  %v7085_v40 = vrot.slane %v6905_v55, 3  ;;  %v679_v56 = vld [vmem:[%s16319_s21] sm:$0xff] }
 0x543   : > { %v6532_v54 = vpack.c.bf16 %v6404_v22, %v6404_v22  ;;  %v7205_v3 = vpack.c.b16 %v7062_v2, %v7048_v47  ;;  %v7073_v0 = vrot.slane %v6898_v52, 2  ;;  %5755 = vrot.lane.b32.xlu0 %v16049_v38, %s11868_s20  ;;  %v19289_v18 = vrot.slane %v16018_v30, 1 }
 0x544   : > { %v6540_v25 = vpack.c.bf16 %v6412_v58, %v6412_v58  ;;  %v7068_v60 = vsel %vm6979_vm3, %v7067_v32, %v16232_v13  ;;  %v7087_v51 = vrot.slane %v6906_v49, 2  ;;  %v5227_v53 = vrot.slane %v16060_v27, 1  ;;  %v680_v58 = vld [vmem:[%s16319_s21 + $0x8] sm:$0xff] }
 0x545   : > { %v16290_v50 = vadd.f32 %v19289_v18, %v16018_v30  ;;  %v6899_v46 = vunpack.c.l.b16 %v6532_v54  ;;  %11103 = vmatprep.mubr.msk.bf16.mxu0 %vm2320_vm14, %v7205_v3  ;;  %v7082_v10 = vsel %vm6979_vm3, %v7081_v5, %v16246_v23  ;;  %v7070_v55 = vsel %vm6982_vm4, %v7069_v29, %v7068_v60  ;;  %v5666_v30 = vpop.permute.xlu1 %5665  ;;  %v5682_v16 = vpop.permute.xlu0 %5681 }
 0x546   : > { %v6907_v26 = vunpack.c.l.b16 %v6540_v25  ;;  %v5275_v39 = vrot.slane %v16051_v42, 1  ;;  %v7084_v57 = vsel %vm6982_vm4, %v7083_v48, %v7082_v10  ;;  %v7072_v13 = vsel %vm6985_vm5, %v7071_v7, %v7070_v55  ;;  %v681_v48 = vld [vmem:[%s16319_s21 + $0x10] sm:$0xff]  ;;  %v682_v7 = vld [vmem:[%s16319_s21 + $0x18] sm:$0xff]  ;;  %v19291_v55 = vld [vmem:[#allocation174_spill] sm:$0xff] }
 0x547   : > { %v7075_v32 = vrot.slane %v6899_v46, 1  ;;  %5769 = vrot.lane.b32.xlu1 %v16290_v50, %s11868_s20  ;;  %v7086_v45 = vsel %vm6985_vm5, %v7085_v40, %v7084_v57  ;;  %v7074_v23 = vsel %vm6988_vm6, %v7073_v0, %v7072_v13  ;;  %5785 = vrot.lane.b32.xlu0 %v16058_v24, %s11868_s20  ;;  %v16312_v52 = vadd.f32 %v5227_v53, %v16060_v27  ;;  %v683_v40 = vld [vmem:[%s16319_s21 + $0x20] sm:$0xff]  ;;  %v684_v0 = vld [vmem:[%s16319_s21 + $0x28] sm:$0xff] }
 0x548   : > { %v7089_v5 = vrot.slane %v6907_v26, 1  ;;  %v7088_v44 = vsel %vm6988_vm6, %v7087_v51, %v7086_v45  ;;  %v16324_v47 = vadd.f32 %v5275_v39, %v16051_v42  ;;  %v17962_v25 = vmov 0.0   ;;  %v685_v51 = vld [vmem:[%s16319_s21 + $0x30] sm:$0xff]  ;;  %v686_v46 = vld [vmem:[%s16319_s21 + $0x38] sm:$0xff] }
 0x549   : > { %v7076_v33 = vsel %vm6991_vm7, %v7075_v32, %v7074_v23  ;;  %v16321_v22 = vpop.permute.xlu1 %5695  ;;  %v16327_v27 = vpop.permute.xlu0 %5711  ;;  %11115 = vmatprep.subr.bf16.mxu1 %v17962_v25  ;;  %11151 = vmatprep.subr.bf16.mxu0 %v17962_v25  ;;  %v6181_v10 = vrot.slane %v16127_v36, 1  ;;  %v5982_v26 = vadd.f32 %v16278_v15, %v19291_v55  ;;  %v6182_v39 = vrot.slane %v16127_v36, 2  ;;  %v19292_v32 = vld [vmem:[#allocation161_spill] sm:$0xff] }
 0x54a   : > { %v7090_v29 = vsel %vm6991_vm7, %v7089_v5, %v7088_v44  ;;  %11117 = vmatprep.mubr.msk.bf16.mxu1 %vm11870_vm8, %v17962_v25  ;;  %v6188_v13 = vrot.slane %v16132_v41, 1  ;;  %v5990_v45 = vadd.f32 %v16281_v61, %v19292_v32  ;;  %v6189_v23 = vrot.slane %v16132_v41, 2  ;;  %v687_v44 = vld [vmem:[%s16319_s21 + $0x40] sm:$0xff] }
 0x54b   : > { %5771 = vrot.lane.b32.xlu1 %v16312_v52, %s11868_s20  ;;  %v7206_v49 = vpack.c.b16 %v7090_v29, %v7076_v33  ;;  %5787 = vrot.lane.b32.xlu0 %v16324_v47, %s11868_s20  ;;  %v6183_v5 = vrot.slane %v16127_v36, 3  ;;  %v19293_v33 = vld [vmem:[#allocation168_spill] sm:$0xff]  ;;  %v6414_v55 = vmul.f32 %v6181_v10, %v5982_v26  ;;  %v6202_v61 = vrot.slane %v16184_v6, 1 }
 0x54c   : > { %v5983_v29 = vadd.f32 %v5666_v30, %v19293_v33  ;;  %v19297_v33 = vld [vmem:[#allocation187_spill] sm:$0xff] }
 0x54d   : > { %11104 = vmatmul.mubr.msk.bf16.gmra.mxu0 %vm2320_vm14, %v7206_v49  ;;  %v5662_v2 = vpop.permute.xlu1 %5661  ;;  %v5668_v42 = vpop.permute.xlu0 %5667  ;;  %v19294_v49 = vld [vmem:[#allocation162_spill] sm:$0xff] }
 0x54e   : > { %v5991_v15 = vadd.f32 %v5682_v16, %v19294_v49  ;;  %v6195_v49 = vrot.slane %v16179_v37, 1  ;;  %v6415_v10 = vmul.f32 %v6182_v39, %v5983_v29  ;;  %v690_v16 = vld [vmem:[%s16319_s21 + $0x58] sm:$0xff]  ;;  %v19299_v39 = vld [vmem:[#allocation182_spill] sm:$0xff] }
 0x54f   : > { %698 = vperm.xlu1 %11557, %v679_v56   ;;  %703 = vperm.xlu0 %11556, %v680_v58   ;;  %v6190_v56 = vrot.slane %v16132_v41, 3 }
 0x550   : > { %v6423_v26 = vmul.f32 %v6189_v23, %v5991_v15  ;;  %v5998_v23 = vadd.f32 %v16321_v22, %v19299_v39  ;;  %v692_v22 = vld [vmem:[%s16319_s21 + $0x68] sm:$0xff] }
 0x551   : > { %v5678_v54 = vpop.permute.xlu1 %5677  ;;  %v5684_v3 = vpop.permute.xlu0 %5683 }
 0x552   : > { %v6551_v59 = vpack.c.bf16 %v6423_v26, %v6423_v26 }
 0x553   : > { %708 = vperm.xlu1 %11557, %v681_v48   ;;  %713 = vperm.xlu0 %11556, %v682_v7   ;;  %v688_v48 = vld [vmem:[%s16319_s21 + $0x48] sm:$0xff] }
 0x554   : > { %v19295_v7 = vld [vmem:[#allocation183_spill] sm:$0xff] }
 0x555   : > { %v16342_v18 = vpop.permute.xlu1 %5697  ;;  %v16344_v60 = vpop.permute.xlu0 %5713 }
 0x557   : > { %718 = vperm.xlu1 %11557, %v683_v40   ;;  %723 = vperm.xlu0 %11556, %v684_v0   ;;  %v5981_v40 = vadd.f32 %v5662_v2, %v19295_v7  ;;  %v6422_v2 = vmul.f32 %v6188_v13, %v5990_v45  ;;  %v19296_v7 = vld [vmem:[#allocation185_spill] sm:$0xff]  ;;  %v5984_v13 = vadd.f32 %v5668_v42, %v19297_v33  ;;  %v19298_v45 = vld [vmem:[#allocation184_spill] sm:$0xff]  ;;  %v19300_v42 = vld [vmem:[#allocation175_spill] sm:$0xff] }
 0x558   : > { %v5989_v25 = vadd.f32 %v5678_v54, %v19296_v7  ;;  %v5992_v58 = vadd.f32 %v5684_v3, %v19298_v45  ;;  %v6542_v7 = vpack.c.bf16 %v6414_v55, %v6414_v55  ;;  %v6006_v3 = vadd.f32 %v16327_v27, %v19300_v42  ;;  %v691_v45 = vld [vmem:[%s16319_s21 + $0x60] sm:$0xff]  ;;  %v19301_v42 = vld [vmem:[#allocation211_spill] sm:$0xff] }
 0x559   : > { %v16348_v53 = vpop.permute.xlu1 %5669  ;;  %v16356_v57 = vpop.permute.xlu0 %5685  ;;  %v6413_v32 = vmul.f32 %v16127_v36, %v5981_v40  ;;  %v6550_v40 = vpack.c.bf16 %v6422_v2, %v6422_v2  ;;  %v6543_v54 = vpack.c.bf16 %v6415_v10, %v6415_v10  ;;  %v5999_v10 = vadd.f32 %v16342_v18, %v19301_v42  ;;  %v19303_v27 = vld [vmem:[#allocation209_spill] sm:$0xff]  ;;  %v19306_v55 = vld [vmem:[#allocation198_spill] sm:$0xff] }
 0x55a   : > { %v6421_v33 = vmul.f32 %v16132_v41, %v5989_v25  ;;  %v6424_v2 = vmul.f32 %v6190_v56, %v5992_v58  ;;  %v6909_v25 = vunpack.c.l.b16 %v6542_v7  ;;  %v693_v56 = vld [vmem:[%s16319_s21 + $0x70] sm:$0xff]  ;;  %v6918_v7 = vunpack.c.l.b16 %v6551_v59  ;;  %v694_v42 = vld [vmem:[%s16319_s21 + $0x78] sm:$0xff] }
 0x55b   : > { %728 = vperm.xlu1 %11557, %v685_v51   ;;  %733 = vperm.xlu0 %11556, %v686_v46   ;;  %v689_v51 = vld [vmem:[%s16319_s21 + $0x50] sm:$0xff]  ;;  %v6541_v29 = vpack.c.bf16 %v6413_v32, %v6413_v32  ;;  %v6917_v39 = vunpack.c.l.b16 %v6550_v40  ;;  %v6438_v32 = vmul.f32 %v6202_v61, %v6006_v3 }
 0x55c   : > { %v6552_v3 = vpack.c.bf16 %v6424_v2, %v6424_v2  ;;  %v7091_v59 = vrot.slane %v6909_v25, 7  ;;  %v7107_v17 = vrot.slane %v6918_v7, 6  ;;  %v19307_v25 = vrot.slane %v16127_v36, 4 }
 0x55d   : > { %v16371_v0 = vpop.permute.xlu1 %5693  ;;  %v16375_v30 = vpop.permute.xlu0 %5699  ;;  %v6908_v61 = vunpack.c.l.b16 %v6541_v29  ;;  %v6566_v58 = vpack.c.bf16 %v6438_v32, %v6438_v32  ;;  %v19310_v7 = vrot.slane %v16184_v6, 2 }
 0x55e   : > { %v5997_v29 = vadd.f32 %v16371_v0, %v19306_v55  ;;  %v6919_v32 = vunpack.c.l.b16 %v6552_v3  ;;  %v19311_v3 = vld [vmem:[#allocation202_spill] sm:$0xff] }
 0x55f   : > { %738 = vperm.xlu1 %11557, %v687_v44   ;;  %743 = vperm.xlu0 %11556, %v688_v48   ;;  %v6196_v44 = vrot.slane %v16179_v37, 2 }
 0x561   : > { %v16391_v48 = vpop.permute.xlu1 %5709  ;;  %v16397_v46 = vpop.permute.xlu0 %5715 }
 0x563   : > { %748 = vperm.xlu1 %11557, %v689_v51   ;;  %753 = vperm.xlu0 %11556, %v690_v16   ;;  %v6416_v51 = vmul.f32 %v6183_v5, %v5984_v13  ;;  %v6430_v16 = vmul.f32 %v6195_v49, %v5998_v23  ;;  %v6549_v5 = vpack.c.bf16 %v6421_v33, %v6421_v33  ;;  %v6910_v13 = vunpack.c.l.b16 %v6543_v54  ;;  %v19304_v23 = vld [vmem:[#allocation212_spill] sm:$0xff] }
 0x564   : > { %v5985_v49 = vadd.f32 %v16348_v53, %v19303_v27  ;;  %v5993_v18 = vadd.f32 %v16356_v57, %v19304_v23  ;;  %v6431_v53 = vmul.f32 %v6196_v44, %v5999_v10  ;;  %v7105_v23 = vrot.slane %v6917_v39, 7  ;;  %v664_v10 = vld [vmem:[%s16426_s29 + $0x8] sm:$0xff] }
 0x565   : > { %v16407_v12 = vpop.permute.xlu1 %6107  ;;  %v16412_v26 = vpop.permute.xlu0 %6112  ;;  %v6544_v40 = vpack.c.bf16 %v6416_v51, %v6416_v51  ;;  %v6916_v15 = vunpack.c.l.b16 %v6549_v5  ;;  %v663_v51 = vld [vmem:[%s16426_s29] sm:$0xff]  ;;  %v7093_v2 = vrot.slane %v6910_v13, 6  ;;  %v19308_v44 = vrot.slane %v16132_v41, 4  ;;  %v19309_v5 = vld [vmem:[#allocation199_spill] sm:$0xff] }
 0x566   : > { %19302 = vst [vmem:[#allocation279_spill] sm:$0xff] %v16412_v26  ;;  %v6417_v54 = vmul.f32 %v19307_v25, %v5985_v49  ;;  %v6559_v13 = vpack.c.bf16 %v6431_v53, %v6431_v53 }
 0x567   : > { %758 = vperm.xlu1 %11557, %v691_v45   ;;  %763 = vperm.xlu0 %11556, %v692_v22   ;;  %v6558_v45 = vpack.c.bf16 %v6430_v16, %v6430_v16  ;;  %v19305_v22 = vld [vmem:[#allocation210_spill] sm:$0xff]  ;;  %v6425_v16 = vmul.f32 %v19308_v44, %v5993_v18  ;;  %v6911_v39 = vunpack.c.l.b16 %v6544_v40  ;;  %v6429_v40 = vmul.f32 %v16179_v37, %v5997_v29 }
 0x568   : > { %v6007_v57 = vadd.f32 %v16344_v60, %v19305_v22  ;;  %v7092_v60 = vsel %vm6973_vm1, %v7091_v59, %v6908_v61  ;;  %v16447_v22 = vunpack.c.l.b16 %v6566_v58  ;;  %v7106_v61 = vsel %vm6973_vm1, %v7105_v23, %v6916_v15  ;;  %v665_v59 = vld [vmem:[%s16426_s29 + $0x10] sm:$0xff] }
 0x569   : > { %v5672_v33 = vpop.permute.xlu1 %5671  ;;  %v5688_v27 = vpop.permute.xlu0 %5687  ;;  %v16442_v55 = vunpack.c.l.b16 %v6558_v45  ;;  %v7094_v45 = vsel %vm6976_vm2, %v7093_v2, %v7092_v60  ;;  %v6545_v53 = vpack.c.bf16 %v6417_v54, %v6417_v54  ;;  %v6553_v25 = vpack.c.bf16 %v6425_v16, %v6425_v16  ;;  %v19312_v15 = vld [vmem:[#allocation203_spill] sm:$0xff] }
 0x56a   : > { %v6439_v49 = vmul.f32 %v19310_v7, %v6007_v57  ;;  %v5994_v57 = vadd.f32 %v5688_v27, %v19181_v35  ;;  %v7109_v58 = vrot.slane %v6919_v32, 5  ;;  %v6008_v23 = vadd.f32 %v16397_v46, %v19312_v15 }
 0x56b   : > { %768 = vperm.xlu1 %11557, %v693_v56   ;;  %773 = vperm.xlu0 %11556, %v694_v42   ;;  %v6005_v56 = vadd.f32 %v16391_v48, %v19309_v5  ;;  %v5986_v42 = vadd.f32 %v5672_v33, %v19178_v34  ;;  %v6000_v48 = vadd.f32 %v16375_v30, %v19311_v3  ;;  %v666_v34 = vld [vmem:[%s16426_s29 + $0x18] sm:$0xff]  ;;  %v7095_v33 = vrot.slane %v6911_v39, 5  ;;  %v667_v39 = vld [vmem:[%s16426_s29 + $0x20] sm:$0xff] }
 0x56c   : > { %v7108_v30 = vsel %vm6976_vm2, %v7107_v17, %v7106_v61  ;;  %v16463_v44 = vunpack.c.l.b16 %v6559_v13  ;;  %v6567_v54 = vpack.c.bf16 %v6439_v49, %v6439_v49  ;;  %v19314_v2 = vrot.slane %v16127_v36, 5  ;;  %v668_v49 = vld [vmem:[%s16426_s29 + $0x28] sm:$0xff] }
 0x56d   : > { %v5702_v0 = vpop.permute.xlu1 %5701  ;;  %v5718_v18 = vpop.permute.xlu0 %5717  ;;  %v7119_v16 = vrot.slane %v16442_v55, 7  ;;  %v19316_v60 = vrot.slane %v16179_v37, 3  ;;  %v6208_v17 = vrot.slane %v16184_v6, 7  ;;  %v7133_v32 = vrot.slane %v16447_v22, 7 }
 0x56e   : > { %v6418_v35 = vmul.f32 %v19314_v2, %v5986_v42  ;;  %v6912_v5 = vunpack.c.l.b16 %v6545_v53  ;;  %v19317_v13 = vrot.slane %v16132_v41, 5  ;;  %v7096_v42 = vsel %vm6979_vm3, %v7095_v33, %v7094_v45  ;;  %v19319_v45 = vld [vmem:[#allocation216_spill] sm:$0xff]  ;;  %v19320_v2 = vld [vmem:[#allocation217_spill] sm:$0xff] }
 0x56f   : > { %6616 = vperm.xlu1 %11557, %v663_v51   ;;  %6621 = vperm.xlu0 %11556, %v664_v10   ;;  %v6437_v51 = vmul.f32 %v16184_v6, %v6005_v56  ;;  %v6557_v10 = vpack.c.bf16 %v6429_v40, %v6429_v40  ;;  %v6432_v46 = vmul.f32 %v19316_v60, %v6000_v48  ;;  %v6920_v56 = vunpack.c.l.b16 %v6553_v25 }
 0x570   : > { %v6426_v7 = vmul.f32 %v19317_v13, %v5994_v57  ;;  %v7110_v55 = vsel %vm6979_vm3, %v7109_v58, %v7108_v30  ;;  %v19318_v40 = vrot.slane %v16184_v6, 3  ;;  %v6934_v22 = vunpack.c.l.b16 %v6567_v54  ;;  %v670_v54 = vld [vmem:[%s16426_s29 + $0x38] sm:$0xff] }
 0x571   : > { %v16460_v29 = vpop.permute.xlu1 %6117  ;;  %v16467_v27 = vpop.permute.xlu0 %6122  ;;  %v6565_v61 = vpack.c.bf16 %v6437_v51, %v6437_v51  ;;  %v6546_v53 = vpack.c.bf16 %v6418_v35, %v6418_v35  ;;  %v6924_v57 = vunpack.c.l.b16 %v6557_v10  ;;  %v6560_v15 = vpack.c.bf16 %v6432_v46, %v6432_v46  ;;  %v669_v51 = vld [vmem:[%s16426_s29 + $0x30] sm:$0xff] }
 0x572   : > { %19313 = vst [vmem:[#allocation275_spill] sm:$0xff] %v16460_v29  ;;  %19315 = vst [vmem:[#allocation268_spill] sm:$0xff] %v16467_v27  ;;  %v6440_v3 = vmul.f32 %v19318_v40, %v6008_v23  ;;  %v6001_v33 = vadd.f32 %v5702_v0, %v19319_v45  ;;  %v7097_v30 = vrot.slane %v6912_v5, 4  ;;  %v7111_v23 = vrot.slane %v6920_v56, 4  ;;  %v19322_v40 = vld [vmem:[#allocation224_spill] sm:$0xff]  ;;  %v19324_v5 = vld [vmem:[#allocation234_spill] sm:$0xff] }
 0x573   : > { %6626 = vperm.xlu1 %11557, %v665_v59   ;;  %6631 = vperm.xlu0 %11556, %v666_v34   ;;  %v7121_v59 = vrot.slane %v16463_v44, 6  ;;  %v6554_v60 = vpack.c.bf16 %v6426_v7, %v6426_v7  ;;  %v19321_v44 = vrot.slane %v16127_v36, 6  ;;  %v6932_v35 = vunpack.c.l.b16 %v6565_v61 }
 0x574   : > { %v19323_v10 = vrot.slane %v16132_v41, 6  ;;  %v16495_v45 = vunpack.c.l.b16 %v6560_v15  ;;  %v19325_v61 = vrot.slane %v16179_v37, 4 }
 0x575   : > { %v5674_v48 = vpop.permute.xlu1 %5673  ;;  %v5690_v34 = vpop.permute.xlu0 %5689 }
 0x576   : > { %v5987_v25 = vadd.f32 %v5674_v48, %v15171_v1  ;;  %v5995_v58 = vadd.f32 %v5690_v34, %v19320_v2  ;;  %v6568_v1 = vpack.c.bf16 %v6440_v3, %v6440_v3  ;;  %v7135_v48 = vrot.slane %v6934_v22, 6 }
 0x577   : > { %6636 = vperm.xlu1 %11557, %v667_v39   ;;  %6641 = vperm.xlu0 %11556, %v668_v49   ;;  %v6009_v39 = vadd.f32 %v5718_v18, %v19322_v40  ;;  %v6913_v49 = vunpack.c.l.b16 %v6546_v53  ;;  %v6433_v3 = vmul.f32 %v19325_v61, %v6001_v33  ;;  %v19326_v18 = vld [vmem:[#allocation236_spill] sm:$0xff]  ;;  %v7098_v22 = vsel %vm6982_vm4, %v7097_v30, %v7096_v42  ;;  %v672_v40 = vld [vmem:[%s16426_s29 + $0x48] sm:$0xff] }
 0x578   : > { %v6419_v13 = vmul.f32 %v19321_v44, %v5987_v25  ;;  %v6427_v46 = vmul.f32 %v19323_v10, %v5995_v58  ;;  %v7120_v25 = vsel %vm6973_vm1, %v7119_v16, %v6924_v57  ;;  %v671_v58 = vld [vmem:[%s16426_s29 + $0x40] sm:$0xff]  ;;  %v7112_v53 = vsel %vm6982_vm4, %v7111_v23, %v7110_v55  ;;  %v674_v61 = vld [vmem:[%s16426_s29 + $0x58] sm:$0xff] }
 0x579   : > { %v5704_v0 = vpop.permute.xlu1 %5703  ;;  %v5720_v7 = vpop.permute.xlu0 %5719  ;;  %v6921_v44 = vunpack.c.l.b16 %v6554_v60  ;;  %v16505_v16 = vunpack.c.l.b16 %v6568_v1  ;;  %v19327_v57 = vrot.slane %v16184_v6, 4  ;;  %v7099_v42 = vrot.slane %v6913_v49, 3  ;;  %v19329_v23 = vld [vmem:[#allocation230_spill] sm:$0xff] }
 0x57a   : > { %v6547_v34 = vpack.c.bf16 %v6419_v13, %v6419_v13  ;;  %v6002_v56 = vadd.f32 %v5704_v0, %v19324_v5  ;;  %v6010_v2 = vadd.f32 %v5720_v7, %v19326_v18  ;;  %v6555_v13 = vpack.c.bf16 %v6427_v46, %v6427_v46  ;;  %v19331_v0 = vld [vmem:[#allocation232_spill] sm:$0xff] }
 0x57b   : > { %6646 = vperm.xlu1 %11557, %v669_v51   ;;  %6651 = vperm.xlu0 %11556, %v670_v54   ;;  %v7134_v51 = vsel %vm6973_vm1, %v7133_v32, %v6932_v35  ;;  %v6441_v15 = vmul.f32 %v19327_v57, %v6009_v39  ;;  %v16510_v54 = vsel %vm6976_vm2, %v7121_v59, %v7120_v25  ;;  %v19328_v55 = vrot.slane %v16179_v37, 5  ;;  %v673_v59 = vld [vmem:[%s16426_s29 + $0x50] sm:$0xff] }
 0x57c   : > { %v6914_v33 = vunpack.c.l.b16 %v6547_v34  ;;  %v7123_v32 = vrot.slane %v16495_v45, 5  ;;  %v6561_v35 = vpack.c.bf16 %v6433_v3, %v6433_v3  ;;  %v19330_v1 = vrot.slane %v16184_v6, 5 }
 0x57d   : > { %v5676_v10 = vpop.permute.xlu1 %5675  ;;  %v6434_v30 = vmul.f32 %v19328_v55, %v6002_v56  ;;  %v5692_v46 = vpop.permute.xlu0 %5691  ;;  %v16521_v5 = vsel %vm6976_vm2, %v7135_v48, %v7134_v51  ;;  %v7113_v49 = vrot.slane %v6921_v44, 3  ;;  %v6922_v7 = vunpack.c.l.b16 %v6555_v13  ;;  %v19334_v44 = vld [vmem:[#allocation237_spill] sm:$0xff] }
 0x57e   : > { %v5988_v60 = vadd.f32 %v5676_v10, %v19329_v23  ;;  %v6442_v39 = vmul.f32 %v19330_v1, %v6010_v2  ;;  %v5996_v34 = vadd.f32 %v5692_v46, %v19331_v0  ;;  %v19332_v56 = vrot.slane %v16127_v36, 7  ;;  %v19335_v1 = vld [vmem:[#allocation235_spill] sm:$0xff] }
 0x57f   : > { %6656 = vperm.xlu1 %11557, %v671_v58   ;;  %6661 = vperm.xlu0 %11556, %v672_v40   ;;  %v7137_v18 = vrot.slane %v16505_v16, 5  ;;  %v6569_v3 = vpack.c.bf16 %v6441_v15, %v6441_v15  ;;  %v7101_v58 = vrot.slane %v6914_v33, 2  ;;  %v19333_v2 = vrot.slane %v16132_v41, 7  ;;  %v675_v15 = vld [vmem:[%s16426_s29 + $0x60] sm:$0xff] }
 0x580   : > { %v6420_v25 = vmul.f32 %v19332_v56, %v5988_v60  ;;  %v7100_v40 = vsel %vm6985_vm5, %v7099_v42, %v7098_v22  ;;  %v6562_v48 = vpack.c.bf16 %v6434_v30, %v6434_v30  ;;  %v6928_v23 = vunpack.c.l.b16 %v6561_v35  ;;  %v676_v30 = vld [vmem:[%s16426_s29 + $0x68] sm:$0xff] }
 0x581   : > { %v6428_v57 = vmul.f32 %v19333_v2, %v5996_v34  ;;  %v5706_v10 = vpop.permute.xlu1 %5705  ;;  %v5722_v55 = vpop.permute.xlu0 %5721  ;;  %v6570_v60 = vpack.c.bf16 %v6442_v39, %v6442_v39  ;;  %v7114_v33 = vsel %vm6985_vm5, %v7113_v49, %v7112_v53  ;;  %v7115_v34 = vrot.slane %v6922_v7, 2  ;;  %v19338_v53 = vld [vmem:[#allocation233_spill] sm:$0xff] }
 0x582   : > { %v6548_v51 = vpack.c.bf16 %v6420_v25, %v6420_v25  ;;  %v6003_v13 = vadd.f32 %v5706_v10, %v19334_v44  ;;  %v6011_v0 = vadd.f32 %v5722_v55, %v19335_v1  ;;  %v19336_v22 = vrot.slane %v16179_v37, 6 }
 0x583   : > { %6666 = vperm.xlu1 %11557, %v673_v59   ;;  %v6556_v46 = vpack.c.bf16 %v6428_v57, %v6428_v57  ;;  %6671 = vperm.xlu0 %11556, %v674_v61   ;;  %v6936_v25 = vunpack.c.l.b16 %v6569_v3  ;;  %v7102_v2 = vsel %vm6988_vm6, %v7101_v58, %v7100_v40  ;;  %v19337_v35 = vrot.slane %v16184_v6, 6  ;;  %v19339_v3 = vld [vmem:[#allocation231_spill] sm:$0xff] }
 0x584   : > { %v6915_v56 = vunpack.c.l.b16 %v6548_v51  ;;  %v6435_v42 = vmul.f32 %v19336_v22, %v6003_v13  ;;  %v6929_v61 = vunpack.c.l.b16 %v6562_v48  ;;  %v6937_v51 = vunpack.c.l.b16 %v6570_v60  ;;  %v677_v58 = vld [vmem:[%s16426_s29 + $0x70] sm:$0xff]  ;;  %v678_v48 = vld [vmem:[%s16426_s29 + $0x78] sm:$0xff]  ;;  %s585_s29 = sand.u32 1, %s11857_s24  }
 0x585   : > { %v6923_v59 = vunpack.c.l.b16 %v6556_v46  ;;  %v6443_v39 = vmul.f32 %v19337_v35, %v6011_v0  ;;  %v5708_v57 = vpop.permute.xlu1 %5707  ;;  %v5724_v7 = vpop.permute.xlu0 %5723  ;;  %v7116_v40 = vsel %vm6988_vm6, %v7115_v34, %v7114_v33  ;;  %v19340_v0 = vrot.slane %v16179_v37, 7  ;;  %s10708_s22 = sshll.u32 %s585_s29, 3  ;;  %s17767_s15 = scalar_lea.sflag [#allocation4], %s585_s29 }
 0x586   : > { %v7103_v10 = vrot.slane %v6915_v56, 1  ;;  %v6563_v44 = vpack.c.bf16 %v6435_v42, %v6435_v42  ;;  %v6004_v49 = vadd.f32 %v5708_v57, %v19338_v53  ;;  %v6012_v1 = vadd.f32 %v5724_v7, %v19339_v3  ;;  %s587_s30 = scalar_lea.vmem [#allocation3], %s10708_s22  ;;  %s11871_s22 = smov [#allocation3]  }
 0x587   : > { %6676 = vperm.xlu1 %11557, %v675_v15   ;;  %v7117_v13 = vrot.slane %v6923_v59, 1  ;;  %v6571_v55 = vpack.c.bf16 %v6443_v39, %v6443_v39  ;;  %6681 = vperm.xlu0 %11556, %v676_v30   ;;  %v7125_v42 = vrot.slane %v6928_v23, 4  ;;  %v7139_v39 = vrot.slane %v6936_v25, 4  ;;  %s11809_s19 = sshll.u32 %s11871_s22, 4  ;;  %s11810_s19 = int_to_ptr.vmem [resolvable:$false] %s11809_s19 }
 0x588   : > { %v6930_v46 = vunpack.c.l.b16 %v6563_v44  ;;  %v6436_v22 = vmul.f32 %v19340_v0, %v6004_v49  ;;  %v7104_v56 = vsel %vm6991_vm7, %v7103_v10, %v7102_v2  ;;  %v6444_v60 = vmul.f32 %v6208_v17, %v6012_v1  ;;  %s11811_s21 = scalar_lea.vmem %s11810_s19, 256 }
 0x589   : > { %v6938_v35 = vunpack.c.l.b16 %v6571_v55  ;;  %v5728_v15 = vpop.permute.xlu1 %5727  ;;  %v7118_v59 = vsel %vm6991_vm7, %v7117_v13, %v7116_v40  ;;  %v7127_v30 = vrot.slane %v6929_v61, 3  ;;  %v5744_v53 = vpop.permute.xlu0 %5743  ;;  %v7141_v34 = vrot.slane %v6937_v51, 3 }
 0x58a   : > { %v6564_v57 = vpack.c.bf16 %v6436_v22, %v6436_v22  ;;  %v7207_v33 = vpack.c.b16 %v7118_v59, %v7104_v56  ;;  %v7129_v44 = vrot.slane %v6930_v46, 2  ;;  %v6572_v49 = vpack.c.bf16 %v6444_v60, %v6444_v60  ;;  %v19341_v56 = vld [vmem:[#allocation244_spill] sm:$0xff]  ;;  %v19342_v60 = vld [vmem:[#allocation242_spill] sm:$0xff] }
 0x58b   : > { %6686 = vperm.xlu1 %11557, %v677_v58   ;;  %6691 = vperm.xlu0 %11556, %v678_v48   ;;  %v7124_v23 = vsel %vm6979_vm3, %v7123_v32, %v16510_v54  ;;  %v7143_v2 = vrot.slane %v6938_v35, 2  ;;  %v7138_v25 = vsel %vm6979_vm3, %v7137_v18, %v16521_v5  ;;  %v6209_v22 = vrot.slane %v16407_v12, 1 }
 0x58c   : > { %v6931_v17 = vunpack.c.l.b16 %v6564_v57  ;;  %11107 = vmatprep.mubr.msk.bf16.mxu0 %vm2320_vm14, %v7207_v33  ;;  %v7126_v61 = vsel %vm6982_vm4, %v7125_v42, %v7124_v23  ;;  %v6939_v10 = vunpack.c.l.b16 %v6572_v49  ;;  %v7140_v51 = vsel %vm6982_vm4, %v7139_v39, %v7138_v25  ;;  %v19343_v57 = vld [vmem:[#allocation243_spill] sm:$0xff] }
 0x58d   : > { %v5730_v7 = vpop.permute.xlu1 %5729  ;;  %v7128_v13 = vsel %vm6985_vm5, %v7127_v30, %v7126_v61  ;;  %v5746_v55 = vpop.permute.xlu0 %5745  ;;  %v7142_v54 = vsel %vm6985_vm5, %v7141_v34, %v7140_v51  ;;  %v6014_v42 = vadd.f32 %v5728_v15, %v19341_v56  ;;  %v6216_v35 = vrot.slane %v16412_v26, 1 }
 0x58e   : > { %v7131_v45 = vrot.slane %v6931_v17, 1  ;;  %v7130_v32 = vsel %vm6988_vm6, %v7129_v44, %v7128_v13  ;;  %v7145_v3 = vrot.slane %v6939_v10, 1  ;;  %v7144_v1 = vsel %vm6988_vm6, %v7143_v2, %v7142_v54  ;;  %v19345_v54 = vld [vmem:[#allocation254_spill] sm:$0xff] }
 0x58f   : > { %v6022_v59 = vadd.f32 %v5744_v53, %v19342_v60  ;;  %v6210_v39 = vrot.slane %v16407_v12, 2  ;;  %v6015_v33 = vadd.f32 %v5730_v7, %v19343_v57  ;;  %v6217_v34 = vrot.slane %v16412_v26, 2  ;;  %v19344_v53 = vld [vmem:[#allocation240_spill] sm:$0xff]  ;;  %v19347_v60 = vld [vmem:[#allocation241_spill] sm:$0xff] }
 0x590   : > { %v7132_v16 = vsel %vm6991_vm7, %v7131_v45, %v7130_v32  ;;  %v7146_v18 = vsel %vm6991_vm7, %v7145_v3, %v7144_v1  ;;  %v6211_v44 = vrot.slane %v16407_v12, 3  ;;  %v6218_v49 = vrot.slane %v16412_v26, 3  ;;  %v19348_v7 = vld [vmem:[#allocation249_spill] sm:$0xff] }
 0x591   : > { %v5760_v5 = vpop.permute.xlu1 %5759  ;;  %v5776_v58 = vpop.permute.xlu0 %5775  ;;  %v7208_v40 = vpack.c.b16 %v7146_v18, %v7132_v16  ;;  %v6212_v23 = vrot.slane %v16407_v12, 4  ;;  %v6219_v2 = vrot.slane %v16412_v26, 4  ;;  %v6023_v25 = vadd.f32 %v5746_v55, %v19344_v53 }
 0x592   : > { %v6446_v13 = vmul.f32 %v6209_v22, %v6014_v42  ;;  %v6454_v45 = vmul.f32 %v6216_v35, %v6022_v59  ;;  %v6447_v16 = vmul.f32 %v6210_v39, %v6015_v33  ;;  %v6223_v18 = vrot.slane %v16460_v29, 1  ;;  %v19350_v59 = vld [vmem:[#allocation245_spill] sm:$0xff] }
 0x593   : > { %11108 = vmatmul.mubr.msk.bf16.gmra.mxu0 %vm2320_vm14, %v7208_v40  ;;  %v19346_v40 = vld [vmem:[#allocation255_spill] sm:$0xff]  ;;  %v6224_v55 = vrot.slane %v16460_v29, 2  ;;  %v6030_v57 = vadd.f32 %v5760_v5, %v19347_v60  ;;  %v6230_v53 = vrot.slane %v16467_v27, 1  ;;  %v6231_v22 = vrot.slane %v16467_v27, 2 }
 0x594   : > { %v6455_v42 = vmul.f32 %v6217_v34, %v6023_v25  ;;  %v6574_v1 = vpack.c.bf16 %v6446_v13, %v6446_v13  ;;  %v6575_v60 = vpack.c.bf16 %v6447_v16, %v6447_v16 }
 0x595   : > { %v5726_v46 = vpop.permute.xlu1 %5725  ;;  %v5732_v0 = vpop.permute.xlu0 %5731 }
 0x596   : > { %v6013_v32 = vadd.f32 %v5726_v46, %v19345_v54  ;;  %v6016_v51 = vadd.f32 %v5732_v0, %v19348_v7  ;;  %v19349_v46 = vld [vmem:[#allocation239_spill] sm:$0xff]  ;;  %v6583_v13 = vpack.c.bf16 %v6455_v42, %v6455_v42  ;;  %v6941_v5 = vunpack.c.l.b16 %v6574_v1 }
 0x597   : > { %v6038_v35 = vadd.f32 %v5776_v58, %v19349_v46  ;;  %v6462_v58 = vmul.f32 %v6223_v18, %v6030_v57  ;;  %v6942_v33 = vunpack.c.l.b16 %v6575_v60  ;;  %v19351_v18 = vld [vmem:[#allocation246_spill] sm:$0xff] }
 0x598   : > { %v6448_v25 = vmul.f32 %v6211_v44, %v6016_v51  ;;  %v6950_v42 = vunpack.c.l.b16 %v6583_v13 }
 0x599   : > { %v5742_v48 = vpop.permute.xlu1 %5741  ;;  %v5748_v30 = vpop.permute.xlu0 %5747  ;;  %v6590_v57 = vpack.c.bf16 %v6462_v58, %v6462_v58 }
 0x59a   : > { %v6021_v56 = vadd.f32 %v5742_v48, %v19346_v40  ;;  %v6024_v54 = vadd.f32 %v5748_v30, %v19350_v59  ;;  %v6582_v48 = vpack.c.bf16 %v6454_v45, %v6454_v45  ;;  %v6445_v40 = vmul.f32 %v16407_v12, %v6013_v32 }
 0x59b   : > { %v6227_v30 = vrot.slane %v16460_v29, 5  ;;  %v6470_v45 = vmul.f32 %v6230_v53, %v6038_v35  ;;  %v6576_v46 = vpack.c.bf16 %v6448_v25, %v6448_v25 }
 0x59c   : > { %v6453_v0 = vmul.f32 %v16412_v26, %v6021_v56  ;;  %v6456_v59 = vmul.f32 %v6218_v49, %v6024_v54  ;;  %v6949_v16 = vunpack.c.l.b16 %v6582_v48  ;;  %v6573_v15 = vpack.c.bf16 %v6445_v40, %v6445_v40 }
 0x59d   : > { %v5762_v61 = vpop.permute.xlu1 %5761  ;;  %v5778_v3 = vpop.permute.xlu0 %5777  ;;  %v6598_v35 = vpack.c.bf16 %v6470_v45, %v6470_v45  ;;  %v6236_v48 = vrot.slane %v16467_v27, 7  ;;  %v7147_v40 = vrot.slane %v6941_v5, 7  ;;  %v7163_v5 = vrot.slane %v6950_v42, 6 }
 0x59e   : > { %v6581_v34 = vpack.c.bf16 %v6453_v0, %v6453_v0  ;;  %v6031_v44 = vadd.f32 %v5762_v61, %v19351_v18  ;;  %v6584_v1 = vpack.c.bf16 %v6456_v59, %v6456_v59  ;;  %v7161_v7 = vrot.slane %v6949_v16, 7  ;;  %v19352_v0 = vld [vmem:[#allocation250_spill] sm:$0xff] }
 0x59f   : > { %v6940_v60 = vunpack.c.l.b16 %v6573_v15  ;;  %v6039_v17 = vadd.f32 %v5778_v3, %v19352_v0  ;;  %v7149_v18 = vrot.slane %v6942_v33, 6  ;;  %v16620_v13 = vunpack.c.l.b16 %v6598_v35  ;;  %v19353_v3 = vld [vmem:[#allocation267_spill] sm:$0xff] }
 0x5a0   : > { %v6948_v51 = vunpack.c.l.b16 %v6581_v34  ;;  %v6463_v58 = vmul.f32 %v6224_v55, %v6031_v44  ;;  %v6951_v15 = vunpack.c.l.b16 %v6584_v1 }
 0x5a1   : > { %v5734_v39 = vpop.permute.xlu1 %5733  ;;  %v5750_v10 = vpop.permute.xlu0 %5749  ;;  %v7148_v55 = vsel %vm6973_vm1, %v7147_v40, %v6940_v60  ;;  %v6471_v34 = vmul.f32 %v6231_v22, %v6039_v17 }
 0x5a2   : > { %v6017_v53 = vadd.f32 %v5734_v39, %v19255_v8  ;;  %v6025_v49 = vadd.f32 %v5750_v10, %v19257_v21  ;;  %v16614_v8 = vunpack.c.l.b16 %v6590_v57  ;;  %v6943_v21 = vunpack.c.l.b16 %v6576_v46 }
 0x5a3   : > { %v6591_v16 = vpack.c.bf16 %v6463_v58, %v6463_v58  ;;  %v7150_v35 = vsel %vm6976_vm2, %v7149_v18, %v7148_v55  ;;  %v7165_v17 = vrot.slane %v6951_v15, 5  ;;  %v7189_v58 = vrot.slane %v16620_v13, 7 }
 0x5a4   : > { %v6449_v10 = vmul.f32 %v6212_v23, %v6017_v53  ;;  %v6457_v39 = vmul.f32 %v6219_v2, %v6025_v49  ;;  %v7162_v23 = vsel %vm6973_vm1, %v7161_v7, %v6948_v51  ;;  %v7175_v57 = vrot.slane %v16614_v8, 7 }
 0x5a5   : > { %v5758_v32 = vpop.permute.xlu1 %5757  ;;  %v5764_v56 = vpop.permute.xlu0 %5763  ;;  %v7151_v53 = vrot.slane %v6943_v21, 5  ;;  %v7164_v7 = vsel %vm6976_vm2, %v7163_v5, %v7162_v23  ;;  %v6599_v51 = vpack.c.bf16 %v6471_v34, %v6471_v34  ;;  %v19358_v8 = vrot.slane %v16412_v26, 5 }
 0x5a6   : > { %v6029_v25 = vadd.f32 %v5758_v32, %v15999_v14  ;;  %v19354_v14 = vld [vmem:[#allocation260_spill] sm:$0xff]  ;;  %v6577_v49 = vpack.c.bf16 %v6449_v10, %v6449_v10  ;;  %v6585_v42 = vpack.c.bf16 %v6457_v39, %v6457_v39  ;;  %v7166_v15 = vsel %vm6979_vm3, %v7165_v17, %v7164_v7 }
 0x5a7   : > { %v6032_v59 = vadd.f32 %v5764_v56, %v19354_v14  ;;  %v19355_v56 = vld [vmem:[#allocation261_spill] sm:$0xff]  ;;  %v6966_v34 = vunpack.c.l.b16 %v6599_v51 }
 0x5a8   : > { %v6461_v2 = vmul.f32 %v16460_v29, %v6029_v25  ;;  %v6958_v25 = vunpack.c.l.b16 %v6591_v16  ;;  %v6944_v10 = vunpack.c.l.b16 %v6577_v49  ;;  %v6952_v39 = vunpack.c.l.b16 %v6585_v42 }
 0x5a9   : > { %v5774_v54 = vpop.permute.xlu1 %5773  ;;  %v5780_v61 = vpop.permute.xlu0 %5779  ;;  %v19360_v49 = vrot.slane %v16460_v29, 4  ;;  %v7191_v51 = vrot.slane %v6966_v34, 6 }
 0x5aa   : > { %v6037_v45 = vadd.f32 %v5774_v54, %v19353_v3  ;;  %v19356_v54 = vrot.slane %v16460_v29, 3  ;;  %v6589_v18 = vpack.c.bf16 %v6461_v2, %v6461_v2  ;;  %v7177_v23 = vrot.slane %v6958_v25, 6 }
 0x5ac   : > { %v6469_v22 = vmul.f32 %v16467_v27, %v6037_v45  ;;  %v6464_v40 = vmul.f32 %v19356_v54, %v6032_v59  ;;  %v19359_v45 = vrot.slane %v16467_v27, 3  ;;  %v6956_v16 = vunpack.c.l.b16 %v6589_v18 }
 0x5ad   : > { %v5736_v33 = vpop.permute.xlu1 %5735  ;;  %v5752_v32 = vpop.permute.xlu0 %5751 }
 0x5ae   : > { %v6018_v46 = vadd.f32 %v5736_v33, %v16035_v62  ;;  %v6026_v44 = vadd.f32 %v5752_v32, %v16031_v28  ;;  %v6040_v62 = vadd.f32 %v5780_v61, %v19355_v56  ;;  %v19357_v28 = vrot.slane %v16407_v12, 5 }
 0x5af   : > { %v7152_v61 = vsel %vm6979_vm3, %v7151_v53, %v7150_v35  ;;  %v6597_v3 = vpack.c.bf16 %v6469_v22, %v6469_v22  ;;  %v6592_v14 = vpack.c.bf16 %v6464_v40, %v6464_v40  ;;  %v7167_v53 = vrot.slane %v6952_v39, 4 }
 0x5b0   : > { %v6450_v60 = vmul.f32 %v19357_v28, %v6018_v46  ;;  %v6458_v21 = vmul.f32 %v19358_v8, %v6026_v44  ;;  %v6472_v33 = vmul.f32 %v19359_v45, %v6040_v62  ;;  %v7153_v44 = vrot.slane %v6944_v10, 4 }
 0x5b1   : > { %v5766_v1 = vpop.permute.xlu1 %5765  ;;  %v5782_v0 = vpop.permute.xlu0 %5781  ;;  %v19361_v35 = vrot.slane %v16407_v12, 6  ;;  %v6964_v17 = vunpack.c.l.b16 %v6597_v3  ;;  %v19362_v56 = vrot.slane %v16467_v27, 4  ;;  %v16657_v54 = vunpack.c.l.b16 %v6592_v14 }
 0x5b2   : > { %v6033_v5 = vadd.f32 %v5766_v1, %v16037_v9  ;;  %v6041_v55 = vadd.f32 %v5782_v0, %v16039_v63  ;;  %v6578_v59 = vpack.c.bf16 %v6450_v60, %v6450_v60  ;;  %v6586_v2 = vpack.c.bf16 %v6458_v21, %v6458_v21 }
 0x5b3   : > { %v6600_v22 = vpack.c.bf16 %v6472_v33, %v6472_v33  ;;  %v7176_v60 = vsel %vm6973_vm1, %v7175_v57, %v6956_v16  ;;  %v7154_v8 = vsel %vm6982_vm4, %v7153_v44, %v7152_v61  ;;  %v7168_v21 = vsel %vm6982_vm4, %v7167_v53, %v7166_v15 }
 0x5b4   : > { %v6465_v42 = vmul.f32 %v19360_v49, %v6033_v5  ;;  %v6473_v62 = vmul.f32 %v19362_v56, %v6041_v55  ;;  %v6953_v0 = vunpack.c.l.b16 %v6586_v2  ;;  %v7190_v5 = vsel %vm6973_vm1, %v7189_v58, %v6964_v17 }
 0x5b5   : > { %v5738_v13 = vpop.permute.xlu1 %5737  ;;  %v5754_v32 = vpop.permute.xlu0 %5753  ;;  %v16665_v3 = vunpack.c.l.b16 %v6600_v22  ;;  %v7178_v57 = vsel %vm6976_vm2, %v7177_v23, %v7176_v60  ;;  %v7179_v34 = vrot.slane %v16657_v54, 5  ;;  %v19365_v16 = vrot.slane %v16407_v12, 7 }
 0x5b6   : > { %v6019_v46 = vadd.f32 %v5738_v13, %v16041_v43  ;;  %v6027_v9 = vadd.f32 %v5754_v32, %v16043_v11  ;;  %v19363_v43 = vrot.slane %v16412_v26, 6  ;;  %v6945_v11 = vunpack.c.l.b16 %v6578_v59 }
 0x5b7   : > { %v6593_v10 = vpack.c.bf16 %v6465_v42, %v6465_v42  ;;  %v6601_v45 = vpack.c.bf16 %v6473_v62, %v6473_v62  ;;  %v7169_v14 = vrot.slane %v6953_v0, 3  ;;  %v7193_v2 = vrot.slane %v16665_v3, 5 }
 0x5b8   : > { %v6451_v63 = vmul.f32 %v19361_v35, %v6019_v46  ;;  %v6459_v1 = vmul.f32 %v19363_v43, %v6027_v9  ;;  %v7155_v55 = vrot.slane %v6945_v11, 3  ;;  %v7192_v46 = vsel %vm6976_vm2, %v7191_v51, %v7190_v5 }
 0x5b9   : > { %v5768_v7 = vpop.permute.xlu1 %5767  ;;  %v5784_v28 = vpop.permute.xlu0 %5783  ;;  %v6960_v32 = vunpack.c.l.b16 %v6593_v10  ;;  %v6968_v9 = vunpack.c.l.b16 %v6601_v45  ;;  %v7170_v22 = vsel %vm6985_vm5, %v7169_v14, %v7168_v21  ;;  %v19367_v54 = vrot.slane %v16460_v29, 6 }
 0x5ba   : > { %v6034_v40 = vadd.f32 %v5768_v7, %v16045_v19  ;;  %v6579_v25 = vpack.c.bf16 %v6451_v63, %v6451_v63  ;;  %v6042_v18 = vadd.f32 %v5784_v28, %v16047_v4  ;;  %v6587_v39 = vpack.c.bf16 %v6459_v1, %v6459_v1 }
 0x5bb   : > { %v19364_v4 = vrot.slane %v16467_v27, 5  ;;  %v7156_v42 = vsel %vm6985_vm5, %v7155_v55, %v7154_v8  ;;  %v7181_v1 = vrot.slane %v6960_v32, 4  ;;  %v19368_v0 = vrot.slane %v16467_v27, 6 }
 0x5bc   : > { %v6466_v19 = vmul.f32 %v6227_v30, %v6034_v40  ;;  %v6946_v58 = vunpack.c.l.b16 %v6579_v25  ;;  %v6954_v30 = vunpack.c.l.b16 %v6587_v39  ;;  %v7195_v40 = vrot.slane %v6968_v9, 4 }
 0x5bd   : > { %v5740_v33 = vpop.permute.xlu1 %5739  ;;  %v6474_v13 = vmul.f32 %v19364_v4, %v6042_v18  ;;  %v5756_v15 = vpop.permute.xlu0 %5755  ;;  %v19369_v4 = vrot.slane %v16460_v29, 7  ;;  %v7180_v9 = vsel %vm6979_vm3, %v7179_v34, %v7178_v57 }
 0x5be   : > { %v6020_v61 = vadd.f32 %v5740_v33, %v16055_v20  ;;  %v6028_v59 = vadd.f32 %v5756_v15, %v16049_v38  ;;  %v6594_v44 = vpack.c.bf16 %v6466_v19, %v6466_v19  ;;  %v19366_v20 = vrot.slane %v16412_v26, 7  ;;  %v16695_v19 = vld [vmem:[%s17812_s5] ss:$0 sm:$0xff] }
 0x5bf   : > { %v6602_v35 = vpack.c.bf16 %v6474_v13, %v6474_v13  ;;  %v7157_v56 = vrot.slane %v6946_v58, 2  ;;  %v7171_v7 = vrot.slane %v6954_v30, 2 }
 0x5c0   : > { %v6452_v23 = vmul.f32 %v19365_v16, %v6020_v61  ;;  %v6460_v53 = vmul.f32 %v19366_v20, %v6028_v59  ;;  %v6961_v28 = vunpack.c.l.b16 %v6594_v44 }
 0x5c1   : > { %v5770_v49 = vpop.permute.xlu1 %5769  ;;  %v5786_v17 = vpop.permute.xlu0 %5785  ;;  %v6969_v18 = vunpack.c.l.b16 %v6602_v35  ;;  %v7172_v33 = vsel %vm6988_vm6, %v7171_v7, %v7170_v22 }
 0x5c2   : > { %v6580_v63 = vpack.c.bf16 %v6452_v23, %v6452_v23  ;;  %v6035_v38 = vadd.f32 %v5770_v49, %v16290_v50  ;;  %v6588_v62 = vpack.c.bf16 %v6460_v53, %v6460_v53  ;;  %v6043_v43 = vadd.f32 %v5786_v17, %v16058_v24 }
 0x5c3   : > { %v7158_v24 = vsel %vm6988_vm6, %v7157_v56, %v7156_v42  ;;  %v7183_v61 = vrot.slane %v6961_v28, 3  ;;  %v7197_v59 = vrot.slane %v6969_v18, 3  ;;  %v7194_v49 = vsel %vm6979_vm3, %v7193_v2, %v7192_v46  ;;  %v16734_v28 = vld [vmem:[%s12025_s25] sm:$0xff]  }
 0x5c4   : > { %v6947_v51 = vunpack.c.l.b16 %v6580_v63  ;;  %v6467_v11 = vmul.f32 %v19367_v54, %v6035_v38  ;;  %v6955_v60 = vunpack.c.l.b16 %v6588_v62  ;;  %v6475_v25 = vmul.f32 %v19368_v0, %v6043_v43 }
 0x5c5   : > { %v5772_v50 = vpop.permute.xlu1 %5771  ;;  %v5788_v39 = vpop.permute.xlu0 %5787  ;;  %v7182_v63 = vsel %vm6982_vm4, %v7181_v1, %v7180_v9  ;;  %v7196_v38 = vsel %vm6982_vm4, %v7195_v40, %v7194_v49 }
 0x5c6   : > { %v7159_v8 = vrot.slane %v6947_v51, 1  ;;  %v6595_v21 = vpack.c.bf16 %v6467_v11, %v6467_v11  ;;  %v6036_v10 = vadd.f32 %v5772_v50, %v16312_v52  ;;  %v7173_v5 = vrot.slane %v6955_v60, 1 }
 0x5c7   : > { %v6603_v3 = vpack.c.bf16 %v6475_v25, %v6475_v25  ;;  %v6044_v45 = vadd.f32 %v5788_v39, %v16324_v47  ;;  %v7184_v22 = vsel %vm6985_vm5, %v7183_v61, %v7182_v63  ;;  %v7198_v56 = vsel %vm6985_vm5, %v7197_v59, %v7196_v38  ;;  %v11101_v59 = vpop.f32.mrf.mxu0 }
 0x5c8   : > { %v6962_v55 = vunpack.c.l.b16 %v6595_v21  ;;  %v6468_v13 = vmul.f32 %v19369_v4, %v6036_v10  ;;  %v7160_v52 = vsel %vm6991_vm7, %v7159_v8, %v7158_v24  ;;  %v7174_v47 = vsel %vm6991_vm7, %v7173_v5, %v7172_v33  ;;  %v16760_v33 = vld [vmem:[%s12025_s25 + $0x8] sm:$0xff]  }
 0x5c9   : > { %v6970_v15 = vunpack.c.l.b16 %v6603_v3  ;;  %v6476_v14 = vmul.f32 %v6236_v48, %v6044_v45  ;;  %v7209_v23 = vpack.c.b16 %v7174_v47, %v7160_v52  ;;  %v19370_v8 = vmov 0.0  }
 0x5ca   : > { %v699_v58 = vpop.permute.xlu1 %698  ;;  %v6596_v32 = vpack.c.bf16 %v6468_v13, %v6468_v13  ;;  %v704_v16 = vpop.permute.xlu0 %703  ;;  %v7185_v44 = vrot.slane %v6962_v55, 2 }
 0x5cb   : > { %v16705_v30 = vmul.f32 %v16695_v19, %v699_v58  ;;  %v6604_v20 = vpack.c.bf16 %v6476_v14, %v6476_v14  ;;  %v16709_v53 = vmul.f32 %v16695_v19, %v704_v16  ;;  %v7199_v48 = vrot.slane %v6970_v15, 2  ;;  %11111 = vmatprep.mubr.msk.bf16.mxu0 %vm2320_vm14, %v7209_v23 }
 0x5cc   : > { %v6963_v42 = vunpack.c.l.b16 %v6596_v32  ;;  %v7186_v43 = vsel %vm6988_vm6, %v7185_v44, %v7184_v22  ;;  %v16780_v32 = vld [vmem:[%s12025_s25 + $0x10] sm:$0xff]  }
 0x5cd   : > { %v17981_v35 = vmax.f32 %v16705_v30, 0.0  ;;  %v6971_v17 = vunpack.c.l.b16 %v6604_v20  ;;  %v17980_v57 = vmax.f32 %v16709_v53, 0.0  ;;  %v7200_v54 = vsel %vm6988_vm6, %v7199_v48, %v7198_v56 }
 0x5ce   : > { %v709_v34 = vpop.permute.xlu1 %708  ;;  %v7187_v46 = vrot.slane %v6963_v42, 1  ;;  %v714_v62 = vpop.permute.xlu0 %713 }
 0x5cf   : > { %v16720_v2 = vmul.f32 %v16695_v19, %v709_v34  ;;  %v7201_v7 = vrot.slane %v6971_v17, 1  ;;  %v16724_v1 = vmul.f32 %v16695_v19, %v714_v62  ;;  %v7372_v51 = vpack.c.bf16 %v17980_v57, %v17981_v35  ;;  %v7293_v42 = vpop.f32.mrf.mxu0  ;;  %v16814_v62 = vld [vmem:[%s17816_s9] ss:$0 sm:$0xff] }
 0x5d0   : > { %v7188_v40 = vsel %vm6991_vm7, %v7187_v46, %v7186_v43 }
 0x5d1   : > { %v17982_v11 = vmax.f32 %v16720_v2, 0.0  ;;  %v17983_v60 = vmax.f32 %v16724_v1, 0.0  ;;  %11116 = vmatpush3.bf16.msra.mxu1 %v7372_v51  ;;  %v7202_v25 = vsel %vm6991_vm7, %v7201_v7, %v7200_v54  ;;  %v11102_v43 = vpop.f32.mrf.mxu0  ;;  %v16817_v7 = vld [vmem:[%s12025_s25 + $0x18] sm:$0xff]   ;;  %v16820_v51 = vld [vmem:[%s12025_s25 + $0x30] sm:$0xff]  }
 0x5d2   : > { %v719_v0 = vpop.permute.xlu1 %718  ;;  %v724_v50 = vpop.permute.xlu0 %723  ;;  %v7210_v18 = vpack.c.b16 %v7202_v25, %v7188_v40  ;;  %11121 = vmatprep.subr.bf16.mxu1 %v19370_v8  ;;  %v11730_v25 = vld [vmem:[%s17817_s10 + $0x38] sm:$0xff]  }
 0x5d3   : > { %v7373_v21 = vpack.c.bf16 %v17983_v60, %v17982_v11  ;;  %v16744_v10 = vmul.f32 %v16695_v19, %v719_v0  ;;  %v16747_v39 = vmul.f32 %v16695_v19, %v724_v50 }
 0x5d4   : > { %11112 = vmatmul.mubr.msk.bf16.gmra.mxu0 %vm2320_vm14, %v7210_v18  ;;  %11118 = vmatmul.mubr.msk.bf16.vlgmr.msra.gmra.mxu1 %vm7385_vm9, %v16734_v28 }
 0x5d5   : > { %11122 = vmatpush3.bf16.msra.mxu1 %v7373_v21  ;;  %11123 = vmatprep.mubr.msk.bf16.mxu1 %vm11870_vm8, %v19370_v8  ;;  %v17977_v3 = vmax.f32 %v16744_v10, 0.0  ;;  %v17976_v45 = vmax.f32 %v16747_v39, 0.0 }
 0x5d6   : > { %v729_v24 = vpop.permute.xlu1 %728  ;;  %v734_v5 = vpop.permute.xlu0 %733  ;;  %11127 = vmatprep.subr.bf16.mxu1 %v19370_v8  ;;  %11153 = vmatprep.mubr.msk.bf16.mxu0 %vm11870_vm8, %v19370_v8 }
 0x5d7   : > { %v7374_v13 = vpack.c.bf16 %v17976_v45, %v17977_v3  ;;  %v16767_v52 = vmul.f32 %v16695_v19, %v729_v24  ;;  %v16770_v61 = vmul.f32 %v16695_v19, %v734_v5  ;;  %v7296_v5 = vpop.f32.mrf.mxu0 }
 0x5d9   : > { %v17979_v58 = vmax.f32 %v16767_v52, 0.0  ;;  %v17978_v47 = vmax.f32 %v16770_v61, 0.0 }
 0x5da   : > { %v739_v55 = vpop.permute.xlu1 %738  ;;  %v744_v4 = vpop.permute.xlu0 %743 }
 0x5db   : > { %v7375_v44 = vpack.c.bf16 %v17978_v47, %v17979_v58  ;;  %v16790_v20 = vmul.f32 %v16695_v19, %v739_v55  ;;  %v16793_v49 = vmul.f32 %v16695_v19, %v744_v4 }
 0x5dc   : > { %11124 = vmatmul.mubr.msk.bf16.vlgmr.msra.gmra.mxu1 %vm7385_vm9, %v16760_v33 }
 0x5dd   : > { %11128 = vmatpush3.bf16.msra.mxu1 %v7374_v13  ;;  %11129 = vmatprep.mubr.msk.bf16.mxu1 %vm11870_vm8, %v19370_v8  ;;  %v17973_v22 = vmax.f32 %v16790_v20, 0.0  ;;  %v17972_v56 = vmax.f32 %v16793_v49, 0.0 }
 0x5de   : > { %v749_v15 = vpop.permute.xlu1 %748  ;;  %v754_v14 = vpop.permute.xlu0 %753  ;;  %11133 = vmatprep.subr.bf16.mxu1 %v19370_v8 }
 0x5df   : > { %v7376_v50 = vpack.c.bf16 %v17972_v56, %v17973_v22  ;;  %v16831_v18 = vmul.f32 %v16695_v19, %v749_v15  ;;  %v16834_v21 = vmul.f32 %v16695_v19, %v754_v14 }
 0x5e2   : > { %v759_v16 = vpop.permute.xlu1 %758  ;;  %v764_v9 = vpop.permute.xlu0 %763 }
 0x5e3   : > { %v16783_v23 = vmul.f32 %v16695_v19, %v759_v16  ;;  %v16796_v48 = vmul.f32 %v16695_v19, %v764_v9  ;;  %v17975_v9 = vmax.f32 %v16831_v18, 0.0 }
 0x5e4   : > { %11130 = vmatmul.mubr.msk.bf16.vlgmr.msra.gmra.mxu1 %vm7385_vm9, %v16780_v32 }
 0x5e5   : > { %v17969_v63 = vmax.f32 %v16783_v23, 0.0  ;;  %v17968_v38 = vmax.f32 %v16796_v48, 0.0  ;;  %11134 = vmatpush3.bf16.msra.mxu1 %v7375_v44  ;;  %11135 = vmatprep.mubr.msk.bf16.mxu1 %vm11870_vm8, %v19370_v8  ;;  %v17974_v44 = vmax.f32 %v16834_v21, 0.0 }
 0x5e6   : > { %v769_v17 = vpop.permute.xlu1 %768  ;;  %v774_v34 = vpop.permute.xlu0 %773  ;;  %11139 = vmatprep.subr.bf16.mxu1 %v19370_v8 }
 0x5e7   : > { %v7378_v46 = vpack.c.bf16 %v17968_v38, %v17969_v63 }
 0x5e9   : > { %11152 = vmatpush3.bf16.msra.mxu0 %v7378_v46 }
 0x5ea   : > { %v6617_v54 = vpop.permute.xlu1 %6616  ;;  %v6622_v0 = vpop.permute.xlu0 %6621  ;;  %11163 = vmatprep.subr.bf16.mxu0 %v11730_v25 }
 0x5eb   : > { %v6700_v40 = vmul.f32 %v16814_v62, %v6617_v54  ;;  %v6701_v24 = vmul.f32 %v16814_v62, %v6622_v0 }
 0x5ec   : > { %11136 = vmatmul.mubr.msk.bf16.vlgmr.msra.gmra.mxu1 %vm7385_vm9, %v16817_v7  ;;  %11154 = vmatmul.mubr.msk.bf16.vlgmr.msra.gmra.mxu0 %vm7385_vm9, %v16820_v51 }
 0x5ed   : > { %v7294_v55 = vadd.f32 %v7293_v42, %v6700_v40  ;;  %v7297_v4 = vadd.f32 %v7296_v5, %v6701_v24  ;;  %11140 = vmatpush3.bf16.msra.mxu1 %v7376_v50  ;;  %11141 = vmatprep.mubr.msk.bf16.mxu1 %vm11870_vm8, %v19370_v8  ;;  %v16849_v40 = vld [vmem:[%s12025_s25 + $0x20] sm:$0xff]   ;;  %v7377_v5 = vpack.c.bf16 %v17974_v44, %v17975_v9 }
 0x5ee   : > { %v6627_v13 = vpop.permute.xlu1 %6626  ;;  %v6632_v16 = vpop.permute.xlu0 %6631  ;;  %11145 = vmatprep.subr.bf16.mxu1 %v19370_v8  ;;  %11164 = vmatpush3.bf16.msra.mxu0 %v11730_v25 }
 0x5ef   : > { %v7356_v15 = vmax.f32 %v7294_v55, 0.0  ;;  %v6702_v14 = vmul.f32 %v16814_v62, %v6627_v13  ;;  %v7357_v42 = vmax.f32 %v7297_v4, 0.0  ;;  %v6703_v46 = vmul.f32 %v16814_v62, %v6632_v16  ;;  %v16882_v13 = vld [vmem:[%s12025_s25 + $0x38] sm:$0xff]  }
 0x5f0   : > { %v16856_v55 = vmul.f32 %v16695_v19, %v769_v17  ;;  %v16859_v4 = vmul.f32 %v16695_v19, %v774_v34  ;;  %v16871_v19 = vld [vmem:[%s12025_s25 + $0x28] sm:$0xff]   ;;  %s10597_s25 = sshll.u32 %s587_s30, 4  ;;  %s17755_s25 = int_to_ptr.vmem [resolvable:$true] %s10597_s25 }
 0x5f1   : > { %v7302_v54 = vadd.f32 %v11101_v59, %v6702_v14  ;;  %v11558_v0 = vpack.i.bf16 %v7357_v42, %v7356_v15  ;;  %v7305_v50 = vadd.f32 %v11102_v43, %v6703_v46  ;;  %v11731_v42 = vld [vmem:[%s17817_s10 + $0x30] sm:$0xff]   ;;  %s11805_s0 = scalar_lea.vmem %s17755_s25, 128  ;;  %p11812_p0 = scmp.lt.s32.totalorder %s17755_s25, %s11810_s19 }
 0x5f2   : > { %v17971_v17 = vmax.f32 %v16856_v55, 0.0  ;;  %v17970_v43 = vmax.f32 %v16859_v4, 0.0  ;;  %v6637_v15 = vpop.permute.xlu1 %6636  ;;  %v6642_v14 = vpop.permute.xlu0 %6641  ;;  %11165 = vmatprep.subr.bf16.mxu0 %v11731_v42  ;;  %p11806_p11 = scmp.ne.s32.totalorder %s17755_s25, %s11805_s0  ;;  %p11813_p1 = scmp.lt.s32.totalorder %s11811_s21, %s11805_s0 }
 0x5f3   : > { %v7358_v24 = vmax.f32 %v7302_v54, 0.0  ;;  %v7359_v25 = vmax.f32 %v7305_v50, 0.0  ;;  %11559 = vrot.lane.b32.xlu1 %v11558_v0, %s11868_s20  ;;  %v11732_v0 = vld [vmem:[%s17817_s10 + $0x28] sm:$0xff]   ;;  %11166 = vmatpush3.bf16.msra.mxu0 %v11731_v42  ;;  %v6705_v63 = vmul.f32 %v16814_v62, %v6642_v14 }
 0x5f4   : > { %11142 = vmatmul.mubr.msk.bf16.vlgmr.msra.gmra.mxu1 %vm7385_vm9, %v16849_v40  ;;  %v7379_v34 = vpack.c.bf16 %v17970_v43, %v17971_v17  ;;  %11167 = vmatprep.subr.bf16.mxu0 %v11732_v0  ;;  %p11807_p12 = pnand %p11806_p11, %p12000_p5  ;;  %p11814_p2 = por %p11813_p1, %p11812_p0 }
 0x5f5   : > { %v11563_v59 = vpack.i.bf16 %v7359_v25, %v7358_v24  ;;  %11146 = vmatpush3.bf16.msra.mxu1 %v7377_v5  ;;  %11147 = vmatprep.mubr.msk.bf16.mxu1 %vm11870_vm8, %v19370_v8  ;;  %v11733_v5 = vld [vmem:[%s17817_s10 + $0x20] sm:$0xff]   ;;  %v6704_v25 = vmul.f32 %v16814_v62, %v6637_v15  ;;  %v11734_v15 = vld [vmem:[%s17817_s10 + $0x18] sm:$0xff]  }
 0x5f6   : > { %11157 = vmatprep.subr.bf16.mxu1 %v19370_v8  ;;  %v6647_v16 = vpop.permute.xlu1 %6646  ;;  %v6652_v46 = vpop.permute.xlu0 %6651  ;;  %p11808_p13 = pneg %p11807_p12 }
 0x5f7   : > { %11564 = vrot.lane.b32.xlu0 %v11563_v59, %s11868_s20  ;;  %v6706_v50 = vmul.f32 %v16814_v62, %v6647_v16  ;;  %v6707_v59 = vmul.f32 %v16814_v62, %v6652_v46  ;;  %11168 = vmatpush3.bf16.msra.mxu0 %v11732_v0 }
 0x5f8   : > { %11169 = vmatprep.subr.bf16.mxu0 %v11733_v5  ;;  %p11815_p3 = pnand %p11814_p2, %p11808_p13 }
 0x5fb   : > { %11170 = vmatpush3.bf16.msra.mxu0 %v11733_v5 }
 0x5fc   : > { %11148 = vmatmul.mubr.msk.bf16.vlgmr.msra.gmra.mxu1 %vm7385_vm9, %v16871_v19  ;;  %11171 = vmatprep.subr.bf16.mxu0 %v11734_v15 }
 0x5fd   : > { %11158 = vmatpush3.bf16.msra.mxu1 %v7379_v34  ;;  %11159 = vmatprep.mubr.msk.bf16.mxu1 %vm11870_vm8, %v19370_v8 }
 0x5ff   : > { %11172 = vmatpush3.bf16.msra.mxu0 %v11734_v15 }
 0x604   : > { %11160 = vmatmul.mubr.msk.bf16.vlgmr.msra.gmra.mxu1 %vm7385_vm9, %v16882_v13 }
 0x60d   : > { %v11105_v54 = vpop.f32.mrf.mxu0 }
 0x60e   : > { %v7318_v34 = vadd.f32 %v11105_v54, %v6706_v50 }
 0x60f   : > { %v7309_v24 = vpop.f32.mrf.mxu0 }
 0x610   : > { %v7310_v43 = vadd.f32 %v7309_v24, %v6704_v25  ;;  %v7362_v16 = vmax.f32 %v7318_v34, 0.0 }
 0x611   : > { %v11106_v38 = vpop.f32.mrf.mxu0 }
 0x612   : > { %v7321_v17 = vadd.f32 %v11106_v38, %v6707_v59  ;;  %v7360_v44 = vmax.f32 %v7310_v43, 0.0  ;;  %v11735_v38 = vld [vmem:[%s17817_s10 + $0x10] sm:$0xff]  }
 0x613   : > { %v7312_v56 = vpop.f32.mrf.mxu0  ;;  %11173 = vmatprep.subr.bf16.mxu0 %v11735_v38 }
 0x614   : > { %v7363_v42 = vmax.f32 %v7321_v17, 0.0  ;;  %v7313_v22 = vadd.f32 %v7312_v56, %v6705_v63  ;;  %v11736_v63 = vld [vmem:[%s17817_s10 + $0x8] sm:$0xff]   ;;  %11174 = vmatpush3.bf16.msra.mxu0 %v11735_v38 }
 0x615   : > { %11175 = vmatprep.subr.bf16.mxu0 %v11736_v63 }
 0x616   : > { %v11573_v9 = vpack.i.bf16 %v7363_v42, %v7362_v16  ;;  %v7361_v45 = vmax.f32 %v7313_v22, 0.0  ;;  %v6662_v22 = vpop.permute.xlu0 %6661 }
 0x617   : > { %v6709_v50 = vmul.f32 %v16814_v62, %v6662_v22 }
 0x618   : > { %v11568_v3 = vpack.i.bf16 %v7361_v45, %v7360_v44  ;;  %11574 = vrot.lane.b32.xlu0 %v11573_v9, %s11868_s20  ;;  %11176 = vmatpush3.bf16.msra.mxu0 %v11736_v63  ;;  %v6657_v45 = vpop.permute.xlu1 %6656 }
 0x619   : > { %v6708_v14 = vmul.f32 %v16814_v62, %v6657_v45 }
 0x61a   : > { %11569 = vrot.lane.b32.xlu1 %v11568_v3, %s11868_s20  ;;  %v11737_v3 = vld [vmem:[%s17817_s10] sm:$0xff]   ;;  %v6672_v9 = vpop.permute.xlu0 %6671 }
 0x61b   : > { %11177 = vmatprep.subr.bf16.mxu0 %v11737_v3  ;;  %v6711_v46 = vmul.f32 %v16814_v62, %v6672_v9 }
 0x61c   : > { %11178 = vmatpush3.bf16.msra.mxu0 %v11737_v3  ;;  %v6667_v56 = vpop.permute.xlu1 %6666 }
 0x61d   : > { %11227 = vmatprep.subr.bf16.mxu0 %v19370_v8  ;;  %v6710_v17 = vmul.f32 %v16814_v62, %v6667_v56 }
 0x61e   : > { %v6682_v45 = vpop.permute.xlu0 %6681 }
 0x620   : > { %v6677_v3 = vpop.permute.xlu1 %6676 }
 0x622   : > { %v6692_v9 = vpop.permute.xlu0 %6691 }
 0x624   : > { %v6687_v56 = vpop.permute.xlu1 %6686 }
 0x625   : > { %v6714_v22 = vmul.f32 %v16814_v62, %v6687_v56 }
 0x653   : > { %v11109_v44 = vpop.f32.mrf.mxu0 }
 0x654   : > { %v7334_v54 = vadd.f32 %v11109_v44, %v6710_v17 }
 0x655   : > { %v7325_v43 = vpop.f32.mrf.mxu0 }
 0x656   : > { %v7326_v24 = vadd.f32 %v7325_v43, %v6708_v14  ;;  %v7366_v59 = vmax.f32 %v7334_v54, 0.0 }
 0x657   : > { %v11110_v0 = vpop.f32.mrf.mxu0 }
 0x658   : > { %v7337_v5 = vadd.f32 %v11110_v0, %v6711_v46  ;;  %v7364_v42 = vmax.f32 %v7326_v24, 0.0  ;;  %v6712_v0 = vmul.f32 %v16814_v62, %v6677_v3  ;;  %v19371_v24 = vld [vmem:[#allocation253_spill] sm:$0xff] }
 0x659   : > { %v7328_v25 = vpop.f32.mrf.mxu0 }
 0x65a   : > { %v7367_v34 = vmax.f32 %v7337_v5, 0.0  ;;  %v7329_v16 = vadd.f32 %v7328_v25, %v6709_v50  ;;  %v6715_v50 = vmul.f32 %v16814_v62, %v6692_v9  ;;  %v6713_v25 = vmul.f32 %v16814_v62, %v6682_v45 }
 0x65c   : > { %v11583_v15 = vpack.i.bf16 %v7367_v34, %v7366_v59  ;;  %v7365_v38 = vmax.f32 %v7329_v16, 0.0 }
 0x65e   : > { %v11578_v63 = vpack.i.bf16 %v7365_v38, %v7364_v42  ;;  %11584 = vrot.lane.b32.xlu0 %v11583_v15, %s11868_s20 }
 0x660   : > { %11579 = vrot.lane.b32.xlu1 %v11578_v63, %s11868_s20  ;;  %v19374_v63 = vld [vmem:[#allocation238_spill] sm:$0xff] }
 0x665   : > { %v11560_v43 = vpop.permute.xlu1 %11559 }
 0x666   : > { %v16925_v59 = vunpack.i.h.bf16 %v11560_v43  ;;  %v16927_v42 = vunpack.i.l.bf16 %v11560_v43 }
 0x668   : > { %19372 = vst [vmem:[#allocation262_spill] sm:$0xff] %v16925_v59  ;;  %19373 = vst [vmem:[#allocation269_spill] sm:$0xff] %v16927_v42 }
 0x694   : > { %v11113_v44 = vpop.f32.mrf.mxu0  ;;  %v7423_v17 = vpop.f32.mrf.mxu1 }
 0x695   : > { %v7350_v14 = vadd.f32 %v11113_v44, %v6714_v22  ;;  %v7773_v5 = vmul.f32 %v7423_v17, %v19371_v24 }
 0x696   : > { %v7341_v46 = vpop.f32.mrf.mxu0  ;;  %v11119_v54 = vpop.f32.mrf.mxu1 }
 0x697   : > { %v7342_v15 = vadd.f32 %v7341_v46, %v6712_v0  ;;  %v7370_v22 = vmax.f32 %v7350_v14, 0.0  ;;  %v7853_v9 = vsel %vm2320_vm14, %v7773_v5, %v16927_v42  ;;  %v11565_v46 = vpop.permute.xlu0 %11564  ;;  %v19375_v14 = vld [vmem:[#allocation257_spill] sm:$0xff] }
 0x698   : > { %v11114_v34 = vpop.f32.mrf.mxu0  ;;  %v7426_v16 = vpop.f32.mrf.mxu1  ;;  %v16938_v5 = vunpack.i.l.bf16 %v11565_v46 }
 0x699   : > { %v7353_v38 = vadd.f32 %v11114_v34, %v6715_v50  ;;  %v7774_v56 = vmul.f32 %v7426_v16, %v19374_v63  ;;  %v7368_v58 = vmax.f32 %v7342_v15, 0.0  ;;  %v16936_v16 = vunpack.i.h.bf16 %v11565_v46 }
 0x69a   : > { %v7344_v44 = vpop.f32.mrf.mxu0  ;;  %v11120_v54 = vpop.f32.mrf.mxu1 }
 0x69b   : > { %v7371_v3 = vmax.f32 %v7353_v38, 0.0  ;;  %v7345_v47 = vadd.f32 %v7344_v44, %v6713_v25  ;;  %v7854_v62 = vsel %vm2320_vm14, %v7774_v56, %v16925_v59  ;;  %v19376_v38 = vld [vmem:[#allocation258_spill] sm:$0xff]  ;;  %v11570_v44 = vpop.permute.xlu1 %11569 }
 0x69c   : > { %v7472_v45 = vpop.f32.mrf.mxu1  ;;  %v7869_v17 = vpack.c.bf16 %v7854_v62, %v7853_v9  ;;  %v16947_v62 = vunpack.i.h.bf16 %v11570_v44 }
 0x69d   : > { %v11593_v43 = vpack.i.bf16 %v7371_v3, %v7370_v22  ;;  %v7369_v57 = vmax.f32 %v7345_v47, 0.0  ;;  %v7775_v34 = vmul.f32 %v7472_v45, %v19375_v14  ;;  %v16949_v45 = vunpack.i.l.bf16 %v11570_v44 }
 0x69e   : > { %v11125_v0 = vpop.f32.mrf.mxu1  ;;  %11179 = vmatprep.mubr.bf16.mxu0 %v7869_v17  ;;  %19377 = vst [vmem:[#allocation263_spill] sm:$0xff] %v16947_v62  ;;  %v19379_v17 = vld [vmem:[#allocation272_spill] sm:$0xff] }
 0x69f   : > { %v11588_v50 = vpack.i.bf16 %v7369_v57, %v7368_v58  ;;  %11594 = vrot.lane.b32.xlu0 %v11593_v43, %s11868_s20  ;;  %v7855_v47 = vsel %vm2320_vm14, %v7775_v34, %v16938_v5  ;;  %19378 = vst [vmem:[#allocation280_spill] sm:$0xff] %v16949_v45 }
 0x6a0   : > { %v7475_v25 = vpop.f32.mrf.mxu1 }
 0x6a1   : > { %v7776_v56 = vmul.f32 %v7475_v25, %v19376_v38  ;;  %11589 = vrot.lane.b32.xlu1 %v11588_v50, %s11868_s20 }
 0x6a2   : > { %v11126_v15 = vpop.f32.mrf.mxu1 }
 0x6a3   : > { %v7856_v57 = vsel %vm2320_vm14, %v7776_v56, %v16936_v16  ;;  %v11575_v15 = vpop.permute.xlu0 %11574 }
 0x6a4   : > { %v7870_v58 = vpack.c.bf16 %v7856_v57, %v7855_v47  ;;  %v7521_v22 = vpop.f32.mrf.mxu1  ;;  %v16957_v35 = vunpack.i.h.bf16 %v11575_v15 }
 0x6a5   : > { %v7777_v3 = vmul.f32 %v7521_v22, %v15753_v31 }
 0x6a6   : > { %v11131_v54 = vpop.f32.mrf.mxu1  ;;  %11180 = vmatmul.mubr.bf16.vlgmr.msra.gmra.mxu0 %v7870_v58  ;;  %v19380_v58 = vld [vmem:[#allocation273_spill] sm:$0xff] }
 0x6a7   : > { %v7857_v0 = vsel %vm2320_vm14, %v7777_v3, %v16949_v45 }
 0x6a8   : > { %v7524_v9 = vpop.f32.mrf.mxu1 }
 0x6a9   : > { %v7778_v43 = vmul.f32 %v7524_v9, %v19379_v17  ;;  %v16959_v9 = vunpack.i.l.bf16 %v11575_v15 }
 0x6aa   : > { %v11132_v46 = vpop.f32.mrf.mxu1 }
 0x6ab   : > { %v7858_v50 = vsel %vm2320_vm14, %v7778_v43, %v16947_v62  ;;  %v19381_v46 = vld [vmem:[#allocation266_spill] sm:$0xff] }
 0x6ac   : > { %v7570_v34 = vpop.f32.mrf.mxu1  ;;  %v7717_v25 = vpop.f32.mrf.mxu0  ;;  %v7871_v56 = vpack.c.bf16 %v7858_v50, %v7857_v0 }
 0x6ad   : > { %v7779_v22 = vmul.f32 %v7570_v34, %v19380_v58 }
 0x6ae   : > { %v11137_v47 = vpop.f32.mrf.mxu1  ;;  %v11155_v57 = vpop.f32.mrf.mxu0  ;;  %11183 = vmatprep.mubr.bf16.mxu0 %v7871_v56 }
 0x6af   : > { %v7859_v43 = vsel %vm2320_vm14, %v7779_v22, %v16959_v9 }
 0x6b0   : > { %v7573_v44 = vpop.f32.mrf.mxu1  ;;  %v7720_v54 = vpop.f32.mrf.mxu0 }
 0x6b1   : > { %v7780_v3 = vmul.f32 %v7573_v44, %v19381_v46 }
 0x6b2   : > { %v11138_v11 = vpop.f32.mrf.mxu1  ;;  %v11156_v60 = vpop.f32.mrf.mxu0 }
 0x6b3   : > { %v7860_v0 = vsel %vm2320_vm14, %v7780_v3, %v16957_v35 }
 0x6b4   : > { %v7619_v50 = vpop.f32.mrf.mxu1  ;;  %v7872_v56 = vpack.c.bf16 %v7860_v0, %v7859_v43 }
 0x6b6   : > { %v11143_v47 = vpop.f32.mrf.mxu1  ;;  %11184 = vmatmul.mubr.bf16.gmra.mxu0 %v7872_v56  ;;  %v7781_v56 = vmul.f32 %v7619_v50, %v16127_v36 }
 0x6b8   : > { %v7622_v34 = vpop.f32.mrf.mxu1 }
 0x6ba   : > { %v11144_v57 = vpop.f32.mrf.mxu1 }
 0x6bc   : > { %v7668_v62 = vpop.f32.mrf.mxu1 }
 0x6bd   : > { %v7783_v3 = vmul.f32 %v7668_v62, %v16179_v37 }
 0x6be   : > { %v11149_v45 = vpop.f32.mrf.mxu1 }
 0x6bf   : > { %v7782_v45 = vmul.f32 %v7622_v34, %v16132_v41 }
 0x6c0   : > { %v7671_v15 = vpop.f32.mrf.mxu1 }
 0x6c1   : > { %v7784_v43 = vmul.f32 %v7671_v15, %v16184_v6 }
 0x6c2   : > { %v11150_v17 = vpop.f32.mrf.mxu1 }
 0x6c4   : > { %v7766_v58 = vpop.f32.mrf.mxu1 }
 0x6c6   : > { %v11161_v44 = vpop.f32.mrf.mxu1 }
 0x6c8   : > { %v7769_v11 = vpop.f32.mrf.mxu1 }
 0x6ca   : > { %v11162_v60 = vpop.f32.mrf.mxu1 }
 0x6cb   : > { %v7787_v60 = vmul.f32 %v7766_v58, %v16460_v29 }
 0x6d0   : > { %v11585_v46 = vpop.permute.xlu0 %11584 }
 0x6d1   : > { %v16966_v31 = vunpack.i.h.bf16 %v11585_v46  ;;  %v16968_v22 = vunpack.i.l.bf16 %v11585_v46 }
 0x6d2   : > { %v11580_v0 = vpop.permute.xlu1 %11579 }
 0x6d3   : > { %19382 = vst [vmem:[#allocation276_spill] sm:$0xff] %v16968_v22  ;;  %v16974_v47 = vunpack.i.h.bf16 %v11580_v0  ;;  %v16976_v17 = vunpack.i.l.bf16 %v11580_v0  ;;  %v7863_v57 = vsel %vm2320_vm14, %v7783_v3, %v16968_v22  ;;  %v7864_v46 = vsel %vm2320_vm14, %v7784_v43, %v16966_v31 }
 0x6d4   : > { %v7874_v50 = vpack.c.bf16 %v7864_v46, %v7863_v57  ;;  %v7788_v0 = vmul.f32 %v7769_v11, %v16467_v27  ;;  %v7785_v43 = vmul.f32 %v7717_v25, %v16407_v12 }
 0x6d5   : > { %19383 = vst [vmem:[#allocation270_spill] sm:$0xff] %v16976_v17  ;;  %v7861_v62 = vsel %vm2320_vm14, %v7781_v56, %v16976_v17  ;;  %v7862_v15 = vsel %vm2320_vm14, %v7782_v45, %v16974_v47  ;;  %v7786_v56 = vmul.f32 %v7720_v54, %v16412_v26  ;;  %v11738_v54 = vld [vmem:[%s17818_s11 + $0x38] sm:$0xff]  }
 0x6d6   : > { %v7873_v44 = vpack.c.bf16 %v7862_v15, %v7861_v62  ;;  %11195 = vmatprep.subr.bf16.mxu1 %v11738_v54  ;;  %v11740_v15 = vld [vmem:[%s17818_s11 + $0x28] sm:$0xff]  }
 0x6d7   : > { %11196 = vmatpush3.bf16.msra.mxu1 %v11738_v54 }
 0x6d8   : > { %11187 = vmatprep.mubr.bf16.mxu0 %v7873_v44  ;;  %v11741_v44 = vld [vmem:[%s17818_s11 + $0x20] sm:$0xff]  }
 0x6d9   : > { %11188 = vmatmul.mubr.bf16.gmra.mxu0 %v7874_v50  ;;  %v11742_v50 = vld [vmem:[%s17818_s11 + $0x18] sm:$0xff]  }
 0x711   : > { %v11595_v34 = vpop.permute.xlu0 %11594 }
 0x712   : > { %v16988_v41 = vunpack.i.h.bf16 %v11595_v34  ;;  %v16990_v3 = vunpack.i.l.bf16 %v11595_v34  ;;  %v11743_v34 = vld [vmem:[%s17818_s11 + $0x10] sm:$0xff]  }
 0x713   : > { %v11590_v22 = vpop.permute.xlu1 %11589 }
 0x714   : > { %19384 = vst [vmem:[#allocation264_spill] sm:$0xff] %v16988_v41  ;;  %19385 = vst [vmem:[#allocation281_spill] sm:$0xff] %v16990_v3  ;;  %v16994_v17 = vunpack.i.h.bf16 %v11590_v22  ;;  %v16996_v45 = vunpack.i.l.bf16 %v11590_v22  ;;  %v7867_v57 = vsel %vm2320_vm14, %v7787_v60, %v16990_v3  ;;  %v7868_v58 = vsel %vm2320_vm14, %v7788_v0, %v16988_v41  ;;  %v11739_v22 = vld [vmem:[%s17818_s11 + $0x30] sm:$0xff]   ;;  %v11744_v60 = vld [vmem:[%s17818_s11 + $0x8] sm:$0xff]  }
 0x715   : > { %v7876_v11 = vpack.c.bf16 %v7868_v58, %v7867_v57  ;;  %11197 = vmatprep.subr.bf16.mxu1 %v11739_v22  ;;  %v11745_v0 = vld [vmem:[%s17818_s11] sm:$0xff]  }
 0x716   : > { %19386 = vst [vmem:[#allocation277_spill] sm:$0xff] %v16994_v17  ;;  %19387 = vst [vmem:[#allocation271_spill] sm:$0xff] %v16996_v45  ;;  %v7865_v46 = vsel %vm2320_vm14, %v7785_v43, %v16996_v45  ;;  %v7866_v25 = vsel %vm2320_vm14, %v7786_v56, %v16994_v17  ;;  %11198 = vmatpush3.bf16.msra.mxu1 %v11739_v22 }
 0x717   : > { %v7875_v62 = vpack.c.bf16 %v7866_v25, %v7865_v46  ;;  %11199 = vmatprep.subr.bf16.mxu1 %v11740_v15 }
 0x719   : > { %11191 = vmatprep.mubr.bf16.mxu0 %v7875_v62 }
 0x71a   : > { %11192 = vmatmul.mubr.bf16.gmra.mxu0 %v7876_v11  ;;  %11200 = vmatpush3.bf16.msra.mxu1 %v11740_v15 }
 0x71b   : > { %11229 = vmatprep.mubr.msk.bf16.mxu0 %vm11870_vm8, %v19370_v8  ;;  %11201 = vmatprep.subr.bf16.mxu1 %v11741_v44 }
 0x71e   : > { %11202 = vmatpush3.bf16.msra.mxu1 %v11741_v44 }
 0x71f   : > { %11203 = vmatprep.subr.bf16.mxu1 %v11742_v50 }
 0x722   : > { %11204 = vmatpush3.bf16.msra.mxu1 %v11742_v50 }
 0x723   : > { %11205 = vmatprep.subr.bf16.mxu1 %v11743_v34 }
 0x726   : > { %11206 = vmatpush3.bf16.msra.mxu1 %v11743_v34 }
 0x727   : > { %11207 = vmatprep.subr.bf16.mxu1 %v11744_v60 }
 0x72a   : > { %11208 = vmatpush3.bf16.msra.mxu1 %v11744_v60 }
 0x72b   : > { %11209 = vmatprep.subr.bf16.mxu1 %v11745_v0 }
 0x72e   : > { %11210 = vmatpush3.bf16.msra.mxu1 %v11745_v0 }
 0x72f   : > { %11233 = vmatprep.subr.bf16.mxu1 %v19370_v8 }
 0x766   : > { %v11181_v43 = vpop.f32.mrf.mxu0 }
 0x767   : > { %v8040_v58 = vmax.f32 %v11181_v43, 0.0 }
 0x768   : > { %v7975_v56 = vpop.f32.mrf.mxu0 }
 0x769   : > { %v8038_v25 = vmax.f32 %v7975_v56, 0.0 }
 0x76a   : > { %v11182_v57 = vpop.f32.mrf.mxu0 }
 0x76b   : > { %v8041_v11 = vmax.f32 %v11182_v57, 0.0 }
 0x76c   : > { %v7978_v46 = vpop.f32.mrf.mxu0 }
 0x76d   : > { %v11603_v62 = vpack.i.bf16 %v8041_v11, %v8040_v58  ;;  %v8039_v54 = vmax.f32 %v7978_v46, 0.0 }
 0x76f   : > { %v11598_v22 = vpack.i.bf16 %v8039_v54, %v8038_v25  ;;  %11604 = vrot.lane.b32.xlu0 %v11603_v62, %s11868_s20 }
 0x771   : > { %11599 = vrot.lane.b32.xlu1 %v11598_v22, %s11868_s20 }
 0x776   : > { %v11185_v15 = vpop.f32.mrf.mxu0 }
 0x777   : > { %v8044_v34 = vmax.f32 %v11185_v15, 0.0 }
 0x778   : > { %v7991_v44 = vpop.f32.mrf.mxu0 }
 0x779   : > { %v8042_v43 = vmax.f32 %v7991_v44, 0.0 }
 0x77a   : > { %v11186_v50 = vpop.f32.mrf.mxu0 }
 0x77b   : > { %v8045_v60 = vmax.f32 %v11186_v50, 0.0 }
 0x77c   : > { %v7994_v3 = vpop.f32.mrf.mxu0 }
 0x77d   : > { %v11613_v57 = vpack.i.bf16 %v8045_v60, %v8044_v34  ;;  %v8043_v17 = vmax.f32 %v7994_v3, 0.0 }
 0x77f   : > { %v11608_v0 = vpack.i.bf16 %v8043_v17, %v8042_v43  ;;  %11614 = vrot.lane.b32.xlu0 %v11613_v57, %s11868_s20 }
 0x781   : > { %11609 = vrot.lane.b32.xlu1 %v11608_v0, %s11868_s20 }
 0x799   : > { %v11189_v56 = vpop.f32.mrf.mxu0 }
 0x79a   : > { %v8048_v46 = vmax.f32 %v11189_v56, 0.0 }
 0x79b   : > { %v8007_v58 = vpop.f32.mrf.mxu0 }
 0x79c   : > { %v8046_v54 = vmax.f32 %v8007_v58, 0.0 }
 0x79d   : > { %v11190_v11 = vpop.f32.mrf.mxu0 }
 0x79e   : > { %v8049_v25 = vmax.f32 %v11190_v11, 0.0 }
 0x79f   : > { %v8010_v62 = vpop.f32.mrf.mxu0 }
 0x7a0   : > { %v11623_v22 = vpack.i.bf16 %v8049_v25, %v8048_v46  ;;  %v8047_v45 = vmax.f32 %v8010_v62, 0.0  ;;  %v19388_v62 = vmax.f32 %v16724_v1, 0.0 }
 0x7a2   : > { %v11618_v15 = vpack.i.bf16 %v8047_v45, %v8046_v54  ;;  %11624 = vrot.lane.b32.xlu0 %v11623_v22, %s11868_s20  ;;  %v19389_v22 = vmax.f32 %v16720_v2, 0.0 }
 0x7a4   : > { %11619 = vrot.lane.b32.xlu1 %v11618_v15, %s11868_s20 }
 0x7da   : > { %v11193_v3 = vpop.f32.mrf.mxu0 }
 0x7db   : > { %v8052_v50 = vmax.f32 %v11193_v3, 0.0  ;;  %v19390_v3 = vmax.f32 %v16705_v30, 0.0 }
 0x7dc   : > { %v8023_v17 = vpop.f32.mrf.mxu0 }
 0x7dd   : > { %v8050_v43 = vmax.f32 %v8023_v17, 0.0 }
 0x7de   : > { %v11194_v44 = vpop.f32.mrf.mxu0 }
 0x7df   : > { %v8053_v34 = vmax.f32 %v11194_v44, 0.0  ;;  %v19391_v44 = vmax.f32 %v16709_v53, 0.0 }
 0x7e0   : > { %v8026_v60 = vpop.f32.mrf.mxu0 }
 0x7e1   : > { %v11633_v57 = vpack.i.bf16 %v8053_v34, %v8052_v50  ;;  %v8051_v0 = vmax.f32 %v8026_v60, 0.0  ;;  %v11605_v56 = vpop.permute.xlu0 %11604 }
 0x7e2   : > { %v11607_v11 = vunpack.i.h.bf16 %v11605_v56  ;;  %v11606_v41 = vunpack.i.l.bf16 %v11605_v56  ;;  %v19392_v56 = vmax.f32 %v16767_v52, 0.0 }
 0x7e3   : > { %v11628_v58 = vpack.i.bf16 %v8051_v0, %v8050_v43  ;;  %v11600_v46 = vpop.permute.xlu1 %11599  ;;  %11634 = vrot.lane.b32.xlu0 %v11633_v57, %s11868_s20 }
 0x7e4   : > { %v11602_v45 = vunpack.i.h.bf16 %v11600_v46  ;;  %v11601_v25 = vunpack.i.l.bf16 %v11600_v46  ;;  %v8121_v54 = vsel %vm2320_vm14, %v19388_v62, %v11607_v11  ;;  %v8120_v15 = vsel %vm2320_vm14, %v19389_v22, %v11606_v41 }
 0x7e5   : > { %11629 = vrot.lane.b32.xlu1 %v11628_v58, %s11868_s20  ;;  %v8135_v60 = vpack.c.bf16 %v8121_v54, %v8120_v15  ;;  %v19393_v11 = vmax.f32 %v16770_v61, 0.0  ;;  %v19394_v58 = vmax.f32 %v16744_v10, 0.0 }
 0x7e6   : > { %v8118_v17 = vsel %vm2320_vm14, %v19390_v3, %v11601_v25  ;;  %v8119_v50 = vsel %vm2320_vm14, %v19391_v44, %v11602_v45  ;;  %v19395_v45 = vmax.f32 %v16747_v39, 0.0  ;;  %v19396_v44 = vmax.f32 %v16831_v18, 0.0 }
 0x7e7   : > { %v8134_v34 = vpack.c.bf16 %v8119_v50, %v8118_v17  ;;  %v19397_v50 = vmax.f32 %v16834_v21, 0.0 }
 0x7e9   : > { %11211 = vmatprep.mubr.bf16.mxu1 %v8134_v34  ;;  %v19398_v34 = vmax.f32 %v16790_v20, 0.0 }
 0x7ea   : > { %11212 = vmatmul.mubr.bf16.vlgmr.msra.gmra.mxu1 %v8135_v60 }
 0x7f1   : > { %v11615_v1 = vpop.permute.xlu0 %11614 }
 0x7f2   : > { %v11617_v43 = vunpack.i.h.bf16 %v11615_v1  ;;  %v11616_v57 = vunpack.i.l.bf16 %v11615_v1  ;;  %v19399_v1 = vmax.f32 %v16793_v49, 0.0 }
 0x7f3   : > { %v11610_v2 = vpop.permute.xlu1 %11609 }
 0x7f4   : > { %v11612_v0 = vunpack.i.h.bf16 %v11610_v2  ;;  %v11611_v41 = vunpack.i.l.bf16 %v11610_v2  ;;  %v8124_v30 = vsel %vm2320_vm14, %v19392_v56, %v11616_v57  ;;  %v8125_v53 = vsel %vm2320_vm14, %v19393_v11, %v11617_v43 }
 0x7f5   : > { %v8137_v54 = vpack.c.bf16 %v8125_v53, %v8124_v30  ;;  %v19400_v11 = vmax.f32 %v16856_v55, 0.0  ;;  %v19401_v53 = vmax.f32 %v16859_v4, 0.0 }
 0x7f6   : > { %v8122_v46 = vsel %vm2320_vm14, %v19394_v58, %v11611_v41  ;;  %v8123_v25 = vsel %vm2320_vm14, %v19395_v45, %v11612_v0  ;;  %v19402_v58 = vmax.f32 %v16783_v23, 0.0  ;;  %v19403_v45 = vmax.f32 %v16796_v48, 0.0 }
 0x7f7   : > { %v8136_v62 = vpack.c.bf16 %v8123_v25, %v8122_v46 }
 0x7f9   : > { %11215 = vmatprep.mubr.bf16.mxu1 %v8136_v62 }
 0x7fa   : > { %11216 = vmatmul.mubr.bf16.gmra.mxu1 %v8137_v54 }
 0x814   : > { %v11625_v22 = vpop.permute.xlu0 %11624 }
 0x815   : > { %v11627_v52 = vunpack.i.h.bf16 %v11625_v22  ;;  %v11626_v15 = vunpack.i.l.bf16 %v11625_v22 }
 0x816   : > { %v11620_v3 = vpop.permute.xlu1 %11619 }
 0x817   : > { %v11622_v17 = vunpack.i.h.bf16 %v11620_v3  ;;  %v11621_v61 = vunpack.i.l.bf16 %v11620_v3  ;;  %v8128_v10 = vsel %vm2320_vm14, %v19396_v44, %v11626_v15  ;;  %v8129_v39 = vsel %vm2320_vm14, %v19397_v50, %v11627_v52 }
 0x818   : > { %v8139_v2 = vpack.c.bf16 %v8129_v39, %v8128_v10 }
 0x819   : > { %v8126_v60 = vsel %vm2320_vm14, %v19398_v34, %v11621_v61  ;;  %v8127_v43 = vsel %vm2320_vm14, %v19399_v1, %v11622_v17 }
 0x81a   : > { %v8138_v57 = vpack.c.bf16 %v8127_v43, %v8126_v60 }
 0x81c   : > { %11219 = vmatprep.mubr.bf16.mxu1 %v8138_v57 }
 0x81d   : > { %11220 = vmatmul.mubr.bf16.gmra.mxu1 %v8139_v2 }
 0x855   : > { %v11635_v0 = vpop.permute.xlu0 %11634 }
 0x856   : > { %v11637_v18 = vunpack.i.h.bf16 %v11635_v0  ;;  %v11636_v41 = vunpack.i.l.bf16 %v11635_v0 }
 0x857   : > { %v11630_v56 = vpop.permute.xlu1 %11629 }
 0x858   : > { %v11632_v30 = vunpack.i.h.bf16 %v11630_v56  ;;  %v11631_v21 = vunpack.i.l.bf16 %v11630_v56  ;;  %v8132_v20 = vsel %vm2320_vm14, %v19400_v11, %v11636_v41  ;;  %v8133_v49 = vsel %vm2320_vm14, %v19401_v53, %v11637_v18 }
 0x859   : > { %v8141_v54 = vpack.c.bf16 %v8133_v49, %v8132_v20 }
 0x85a   : > { %v8130_v46 = vsel %vm2320_vm14, %v19402_v58, %v11631_v21  ;;  %v8131_v25 = vsel %vm2320_vm14, %v19403_v45, %v11632_v30 }
 0x85b   : > { %v8140_v62 = vpack.c.bf16 %v8131_v25, %v8130_v46 }
 0x85d   : > { %11223 = vmatprep.mubr.bf16.mxu1 %v8140_v62 }
 0x85e   : > { %11224 = vmatmul.mubr.bf16.gmra.mxu1 %v8141_v54 }
 0x85f   : > { %11235 = vmatprep.mubr.msk.bf16.mxu1 %vm11870_vm8, %v19370_v8 }
 0x8aa   : > { %v17091_v55 = vpop.f32.mrf.mxu1 }
 0x8ab   : > { %v18018_v23 = vmax.f32 %v17091_v55, 0.0 }
 0x8ac   : > { %v17093_v4 = vpop.f32.mrf.mxu1 }
 0x8ad   : > { %v18017_v15 = vmax.f32 %v17093_v4, 0.0 }
 0x8ae   : > { %v17095_v22 = vpop.f32.mrf.mxu1 }
 0x8af   : > { %v18019_v52 = vmax.f32 %v17095_v22, 0.0 }
 0x8b0   : > { %v17099_v48 = vpop.f32.mrf.mxu1 }
 0x8b1   : > { %v8320_v3 = vpack.c.bf16 %v18019_v52, %v18018_v23  ;;  %v18016_v17 = vmax.f32 %v17099_v48, 0.0 }
 0x8b3   : > { %v8319_v61 = vpack.c.bf16 %v18016_v17, %v18017_v15  ;;  %11234 = vmatpush3.bf16.msra.mxu1 %v8320_v3  ;;  %v19405_v17 = vld [vmem:[#allocation266_spill] sm:$0xff] }
 0x8b4   : > { %11245 = vmatprep.subr.bf16.mxu1 %v19370_v8 }
 0x8b5   : > { %11228 = vmatpush3.bf16.msra.mxu0 %v8319_v61 }
 0x8b6   : > { %11236 = vmatmul.mubr.msk.bf16.vlgmr.msra.gmra.mxu1 %vm7385_vm9, %v16760_v33  ;;  %11239 = vmatprep.subr.bf16.mxu0 %v19370_v8 }
 0x8b7   : > { %11247 = vmatprep.mubr.msk.bf16.mxu1 %vm11870_vm8, %v19370_v8 }
 0x8b8   : > { %11230 = vmatmul.mubr.msk.bf16.vlgmr.msra.gmra.mxu0 %vm7385_vm9, %v16734_v28 }
 0x8b9   : > { %11241 = vmatprep.mubr.msk.bf16.mxu0 %vm11870_vm8, %v19370_v8 }
 0x8ba   : > { %v17121_v44 = vpop.f32.mrf.mxu1 }
 0x8bb   : > { %v18015_v39 = vmax.f32 %v17121_v44, 0.0 }
 0x8bc   : > { %v17123_v10 = vpop.f32.mrf.mxu1 }
 0x8bd   : > { %v18013_v1 = vmax.f32 %v17123_v10, 0.0 }
 0x8be   : > { %v17125_v50 = vpop.f32.mrf.mxu1 }
 0x8bf   : > { %v18014_v34 = vmax.f32 %v17125_v50, 0.0 }
 0x8c0   : > { %v17129_v60 = vpop.f32.mrf.mxu1 }
 0x8c1   : > { %v8322_v43 = vpack.c.bf16 %v18014_v34, %v18015_v39  ;;  %v18012_v57 = vmax.f32 %v17129_v60, 0.0 }
 0x8c3   : > { %v8321_v2 = vpack.c.bf16 %v18012_v57, %v18013_v1  ;;  %11246 = vmatpush3.bf16.msra.mxu1 %v8322_v43 }
 0x8c4   : > { %11257 = vmatprep.subr.bf16.mxu1 %v19370_v8 }
 0x8c5   : > { %11240 = vmatpush3.bf16.msra.mxu0 %v8321_v2  ;;  %v11746_v2 = vld [vmem:[%s17817_s10 + $0x78] sm:$0xff]  }
 0x8c6   : > { %11248 = vmatmul.mubr.msk.bf16.vlgmr.msra.gmra.mxu1 %vm7385_vm9, %v16817_v7  ;;  %11251 = vmatprep.subr.bf16.mxu0 %v19370_v8 }
 0x8c7   : > { %11259 = vmatprep.mubr.msk.bf16.mxu1 %vm11870_vm8, %v19370_v8 }
 0x8c8   : > { %11242 = vmatmul.mubr.msk.bf16.vlgmr.msra.gmra.mxu0 %vm7385_vm9, %v16780_v32 }
 0x8c9   : > { %11253 = vmatprep.mubr.msk.bf16.mxu0 %vm11870_vm8, %v19370_v8 }
 0x8dd   : > { %v17151_v0 = vpop.f32.mrf.mxu1 }
 0x8de   : > { %v18011_v56 = vmax.f32 %v17151_v0, 0.0 }
 0x8df   : > { %v17153_v18 = vpop.f32.mrf.mxu1 }
 0x8e0   : > { %v18009_v11 = vmax.f32 %v17153_v18, 0.0 }
 0x8e1   : > { %v17155_v41 = vpop.f32.mrf.mxu1 }
 0x8e2   : > { %v18010_v30 = vmax.f32 %v17155_v41, 0.0 }
 0x8e3   : > { %v17159_v21 = vpop.f32.mrf.mxu1 }
 0x8e4   : > { %v8324_v20 = vpack.c.bf16 %v18010_v30, %v18011_v56  ;;  %v18008_v53 = vmax.f32 %v17159_v21, 0.0 }
 0x8e6   : > { %v8323_v49 = vpack.c.bf16 %v18008_v53, %v18009_v11  ;;  %11258 = vmatpush3.bf16.msra.mxu1 %v8324_v20 }
 0x8e7   : > { %11269 = vmatprep.subr.bf16.mxu1 %v19370_v8 }
 0x8e8   : > { %11252 = vmatpush3.bf16.msra.mxu0 %v8323_v49  ;;  %v11747_v49 = vld [vmem:[%s17817_s10 + $0x70] sm:$0xff]  }
 0x8e9   : > { %11260 = vmatmul.mubr.msk.bf16.vlgmr.msra.gmra.mxu1 %vm7385_vm9, %v16871_v19  ;;  %11263 = vmatprep.subr.bf16.mxu0 %v19370_v8 }
 0x8ea   : > { %11271 = vmatprep.mubr.msk.bf16.mxu1 %vm11870_vm8, %v19370_v8 }
 0x8eb   : > { %11254 = vmatmul.mubr.msk.bf16.vlgmr.msra.gmra.mxu0 %vm7385_vm9, %v16849_v40 }
 0x8ec   : > { %11265 = vmatprep.mubr.msk.bf16.mxu0 %vm11870_vm8, %v19370_v8 }
 0x91e   : > { %v17181_v58 = vpop.f32.mrf.mxu1 }
 0x91f   : > { %v18007_v25 = vmax.f32 %v17181_v58, 0.0 }
 0x920   : > { %v17183_v46 = vpop.f32.mrf.mxu1 }
 0x921   : > { %v18006_v3 = vmax.f32 %v17183_v46, 0.0 }
 0x922   : > { %v17185_v45 = vpop.f32.mrf.mxu1 }
 0x923   : > { %v18004_v62 = vmax.f32 %v17185_v45, 0.0 }
 0x924   : > { %v17189_v54 = vpop.f32.mrf.mxu1 }
 0x925   : > { %v8326_v61 = vpack.c.bf16 %v18004_v62, %v18007_v25  ;;  %v18005_v43 = vmax.f32 %v17189_v54, 0.0  ;;  %v11748_v62 = vld [vmem:[%s17817_s10 + $0x68] sm:$0xff]  }
 0x927   : > { %v8325_v20 = vpack.c.bf16 %v18005_v43, %v18006_v3  ;;  %11270 = vmatpush3.bf16.msra.mxu1 %v8326_v61  ;;  %v11749_v61 = vld [vmem:[%s17817_s10 + $0x60] sm:$0xff]  }
 0x929   : > { %11264 = vmatpush3.bf16.msra.mxu0 %v8325_v20  ;;  %v11750_v20 = vld [vmem:[%s17817_s10 + $0x58] sm:$0xff]  }
 0x92a   : > { %11272 = vmatmul.mubr.msk.bf16.vlgmr.msra.gmra.mxu1 %vm7385_vm9, %v16882_v13  ;;  %11275 = vmatprep.subr.bf16.mxu0 %v11746_v2 }
 0x92c   : > { %11266 = vmatmul.mubr.msk.bf16.vlgmr.msra.gmra.mxu0 %vm7385_vm9, %v16820_v51 }
 0x92d   : > { %11276 = vmatpush3.bf16.msra.mxu0 %v11746_v2  ;;  %v11751_v2 = vld [vmem:[%s17817_s10 + $0x50] sm:$0xff]  }
 0x92e   : > { %11277 = vmatprep.subr.bf16.mxu0 %v11747_v49 }
 0x931   : > { %11278 = vmatpush3.bf16.msra.mxu0 %v11747_v49  ;;  %v11752_v49 = vld [vmem:[%s17817_s10 + $0x48] sm:$0xff]  }
 0x932   : > { %11279 = vmatprep.subr.bf16.mxu0 %v11748_v62 }
 0x935   : > { %11280 = vmatpush3.bf16.msra.mxu0 %v11748_v62  ;;  %v11753_v62 = vld [vmem:[%s17817_s10 + $0x40] sm:$0xff]  }
 0x936   : > { %11281 = vmatprep.subr.bf16.mxu0 %v11749_v61 }
 0x939   : > { %11282 = vmatpush3.bf16.msra.mxu0 %v11749_v61 }
 0x93a   : > { %11283 = vmatprep.subr.bf16.mxu0 %v11750_v20 }
 0x93d   : > { %11284 = vmatpush3.bf16.msra.mxu0 %v11750_v20 }
 0x93e   : > { %11285 = vmatprep.subr.bf16.mxu0 %v11751_v2 }
 0x941   : > { %11286 = vmatpush3.bf16.msra.mxu0 %v11751_v2 }
 0x942   : > { %11287 = vmatprep.subr.bf16.mxu0 %v11752_v49 }
 0x945   : > { %11288 = vmatpush3.bf16.msra.mxu0 %v11752_v49 }
 0x946   : > { %11289 = vmatprep.subr.bf16.mxu0 %v11753_v62 }
 0x949   : > { %11290 = vmatpush3.bf16.msra.mxu0 %v11753_v62 }
 0x94a   : > { %11339 = vmatprep.subr.bf16.mxu0 %v19370_v8 }
 0x976   : > { %v8402_v61 = vpop.f32.mrf.mxu1 }
 0x977   : > { %v8657_v2 = vmul.f32 %v8402_v61, %v19375_v14 }
 0x978   : > { %v8361_v43 = vpop.f32.mrf.mxu0  ;;  %v11237_v3 = vpop.f32.mrf.mxu1 }
 0x979   : > { %v8655_v53 = vmul.f32 %v8361_v43, %v19371_v24  ;;  %v8673_v43 = vsel %vm2320_vm14, %v8657_v2, %v16938_v5 }
 0x97a   : > { %v11231_v20 = vpop.f32.mrf.mxu0  ;;  %v8405_v25 = vpop.f32.mrf.mxu1 }
 0x97b   : > { %v8658_v11 = vmul.f32 %v8405_v25, %v19376_v38  ;;  %v8671_v1 = vsel %vm2320_vm14, %v8655_v53, %v16927_v42  ;;  %v19406_v53 = vld [vmem:[#allocation273_spill] sm:$0xff] }
 0x97c   : > { %v8364_v30 = vpop.f32.mrf.mxu0  ;;  %v11238_v56 = vpop.f32.mrf.mxu1 }
 0x97d   : > { %v8656_v57 = vmul.f32 %v8364_v30, %v19374_v63  ;;  %v8674_v49 = vsel %vm2320_vm14, %v8658_v11, %v16936_v16  ;;  %v19404_v11 = vld [vmem:[#allocation248_spill] sm:$0xff] }
 0x97e   : > { %v11232_v62 = vpop.f32.mrf.mxu0  ;;  %v8688_v20 = vpack.c.bf16 %v8674_v49, %v8673_v43  ;;  %v19408_v49 = vld [vmem:[#allocation280_spill] sm:$0xff]  ;;  %v19409_v43 = vld [vmem:[#allocation263_spill] sm:$0xff] }
 0x97f   : > { %v8672_v3 = vsel %vm2320_vm14, %v8656_v57, %v16925_v59  ;;  %v19407_v59 = vld [vmem:[#allocation272_spill] sm:$0xff] }
 0x980   : > { %v8687_v25 = vpack.c.bf16 %v8672_v3, %v8671_v1 }
 0x982   : > { %11291 = vmatprep.mubr.bf16.mxu0 %v8687_v25 }
 0x983   : > { %11292 = vmatmul.mubr.bf16.vlgmr.msra.gmra.mxu0 %v8688_v20 }
 0x986   : > { %v8484_v56 = vpop.f32.mrf.mxu1 }
 0x987   : > { %v8661_v23 = vmul.f32 %v8484_v56, %v19406_v53 }
 0x988   : > { %v8443_v61 = vpop.f32.mrf.mxu0  ;;  %v11249_v30 = vpop.f32.mrf.mxu1 }
 0x989   : > { %v8659_v62 = vmul.f32 %v8443_v61, %v19404_v11 }
 0x98a   : > { %v11243_v34 = vpop.f32.mrf.mxu0  ;;  %v8487_v39 = vpop.f32.mrf.mxu1 }
 0x98b   : > { %v8662_v15 = vmul.f32 %v8487_v39, %v19405_v17  ;;  %v8675_v3 = vsel %vm2320_vm14, %v8659_v62, %v19408_v49  ;;  %v8677_v39 = vsel %vm2320_vm14, %v8661_v23, %v16959_v9 }
 0x98c   : > { %v8446_v52 = vpop.f32.mrf.mxu0  ;;  %v11250_v57 = vpop.f32.mrf.mxu1 }
 0x98d   : > { %v8660_v42 = vmul.f32 %v8446_v52, %v19407_v59  ;;  %v8678_v1 = vsel %vm2320_vm14, %v8662_v15, %v16957_v35 }
 0x98e   : > { %v11244_v2 = vpop.f32.mrf.mxu0  ;;  %v8690_v20 = vpack.c.bf16 %v8678_v1, %v8677_v39 }
 0x98f   : > { %v8676_v34 = vsel %vm2320_vm14, %v8660_v42, %v19409_v43 }
 0x990   : > { %v8689_v25 = vpack.c.bf16 %v8676_v34, %v8675_v3  ;;  %v19410_v3 = vld [vmem:[#allocation278_spill] sm:$0xff] }
 0x992   : > { %11295 = vmatprep.mubr.bf16.mxu0 %v8689_v25  ;;  %v19411_v25 = vld [vmem:[#allocation270_spill] sm:$0xff] }
 0x993   : > { %11296 = vmatmul.mubr.bf16.gmra.mxu0 %v8690_v20 }
 0x9a9   : > { %v8566_v56 = vpop.f32.mrf.mxu1 }
 0x9aa   : > { %v8665_v62 = vmul.f32 %v8566_v56, %v16179_v37 }
 0x9ab   : > { %v8525_v61 = vpop.f32.mrf.mxu0  ;;  %v11261_v52 = vpop.f32.mrf.mxu1 }
 0x9ac   : > { %v8663_v15 = vmul.f32 %v8525_v61, %v16127_v36  ;;  %v19412_v61 = vld [vmem:[#allocation276_spill] sm:$0xff] }
 0x9ad   : > { %v11255_v30 = vpop.f32.mrf.mxu0  ;;  %v8569_v57 = vpop.f32.mrf.mxu1 }
 0x9ae   : > { %v8666_v2 = vmul.f32 %v8569_v57, %v16184_v6  ;;  %v8679_v39 = vsel %vm2320_vm14, %v8663_v15, %v19411_v25  ;;  %v8681_v30 = vsel %vm2320_vm14, %v8665_v62, %v19412_v61  ;;  %v19413_v62 = vld [vmem:[#allocation264_spill] sm:$0xff] }
 0x9af   : > { %v8528_v49 = vpop.f32.mrf.mxu0  ;;  %v11262_v42 = vpop.f32.mrf.mxu1 }
 0x9b0   : > { %v8664_v34 = vmul.f32 %v8528_v49, %v19410_v3  ;;  %v8682_v23 = vsel %vm2320_vm14, %v8666_v2, %v16966_v31 }
 0x9b1   : > { %v11256_v1 = vpop.f32.mrf.mxu0  ;;  %v8692_v57 = vpack.c.bf16 %v8682_v23, %v8681_v30 }
 0x9b2   : > { %v8680_v20 = vsel %vm2320_vm14, %v8664_v34, %v16974_v47 }
 0x9b3   : > { %v8691_v52 = vpack.c.bf16 %v8680_v20, %v8679_v39 }
 0x9b5   : > { %11299 = vmatprep.mubr.bf16.mxu0 %v8691_v52  ;;  %v19414_v52 = vld [vmem:[#allocation271_spill] sm:$0xff] }
 0x9b6   : > { %11300 = vmatmul.mubr.bf16.gmra.mxu0 %v8692_v57  ;;  %v19415_v57 = vld [vmem:[#allocation277_spill] sm:$0xff] }
 0x9ea   : > { %v8648_v56 = vpop.f32.mrf.mxu1 }
 0x9eb   : > { %v8669_v15 = vmul.f32 %v8648_v56, %v16460_v29  ;;  %v11755_v56 = vld [vmem:[%s17818_s11 + $0x70] sm:$0xff]  }
 0x9ec   : > { %v8607_v42 = vpop.f32.mrf.mxu0  ;;  %v11273_v49 = vpop.f32.mrf.mxu1 }
 0x9ed   : > { %v8667_v2 = vmul.f32 %v8607_v42, %v16407_v12  ;;  %v19416_v42 = vld [vmem:[#allocation281_spill] sm:$0xff] }
 0x9ee   : > { %v11267_v3 = vpop.f32.mrf.mxu0  ;;  %v8651_v37 = vpop.f32.mrf.mxu1 }
 0x9ef   : > { %v8670_v1 = vmul.f32 %v8651_v37, %v16467_v27  ;;  %v8683_v30 = vsel %vm2320_vm14, %v8667_v2, %v19414_v52  ;;  %v8685_v37 = vsel %vm2320_vm14, %v8669_v15, %v19416_v42  ;;  %v11756_v2 = vld [vmem:[%s17818_s11 + $0x68] sm:$0xff]   ;;  %v11759_v15 = vld [vmem:[%s17818_s11 + $0x50] sm:$0xff]  }
 0x9f0   : > { %v8610_v25 = vpop.f32.mrf.mxu0  ;;  %v11274_v34 = vpop.f32.mrf.mxu1 }
 0x9f1   : > { %v8668_v39 = vmul.f32 %v8610_v25, %v16412_v26  ;;  %v8686_v23 = vsel %vm2320_vm14, %v8670_v1, %v19413_v62  ;;  %v11754_v25 = vld [vmem:[%s17818_s11 + $0x78] sm:$0xff]   ;;  %v11760_v34 = vld [vmem:[%s17818_s11 + $0x48] sm:$0xff]  }
 0x9f2   : > { %v11268_v20 = vpop.f32.mrf.mxu0  ;;  %v8694_v27 = vpack.c.bf16 %v8686_v23, %v8685_v37  ;;  %11307 = vmatprep.subr.bf16.mxu1 %v11754_v25  ;;  %v11758_v1 = vld [vmem:[%s17818_s11 + $0x58] sm:$0xff]  }
 0x9f3   : > { %v8684_v3 = vsel %vm2320_vm14, %v8668_v39, %v19415_v57  ;;  %11308 = vmatpush3.bf16.msra.mxu1 %v11754_v25  ;;  %v11761_v39 = vld [vmem:[%s17818_s11 + $0x40] sm:$0xff]  }
 0x9f4   : > { %v8693_v49 = vpack.c.bf16 %v8684_v3, %v8683_v30  ;;  %11309 = vmatprep.subr.bf16.mxu1 %v11755_v56 }
 0x9f6   : > { %11303 = vmatprep.mubr.bf16.mxu0 %v8693_v49 }
 0x9f7   : > { %11304 = vmatmul.mubr.bf16.gmra.mxu0 %v8694_v27  ;;  %11310 = vmatpush3.bf16.msra.mxu1 %v11755_v56  ;;  %v11757_v27 = vld [vmem:[%s17818_s11 + $0x60] sm:$0xff]  }
 0x9f8   : > { %11341 = vmatprep.mubr.msk.bf16.mxu0 %vm11870_vm8, %v19370_v8  ;;  %11311 = vmatprep.subr.bf16.mxu1 %v11756_v2 }
 0x9fb   : > { %11312 = vmatpush3.bf16.msra.mxu1 %v11756_v2 }
 0x9fc   : > { %11313 = vmatprep.subr.bf16.mxu1 %v11757_v27 }
 0x9ff   : > { %11314 = vmatpush3.bf16.msra.mxu1 %v11757_v27 }
 0xa00   : > { %11315 = vmatprep.subr.bf16.mxu1 %v11758_v1 }
 0xa03   : > { %11316 = vmatpush3.bf16.msra.mxu1 %v11758_v1 }
 0xa04   : > { %11317 = vmatprep.subr.bf16.mxu1 %v11759_v15 }
 0xa07   : > { %11318 = vmatpush3.bf16.msra.mxu1 %v11759_v15 }
 0xa08   : > { %11319 = vmatprep.subr.bf16.mxu1 %v11760_v34 }
 0xa0b   : > { %11320 = vmatpush3.bf16.msra.mxu1 %v11760_v34 }
 0xa0c   : > { %11321 = vmatprep.subr.bf16.mxu1 %v11761_v39 }
 0xa0f   : > { %11322 = vmatpush3.bf16.msra.mxu1 %v11761_v39 }
 0xa10   : > { %11345 = vmatprep.subr.bf16.mxu1 %v19370_v8 }
 0xa43   : > { %v11293_v20 = vpop.f32.mrf.mxu0 }
 0xa44   : > { %v8859_v3 = vmax.f32 %v11293_v20, 0.0 }
 0xa45   : > { %v8794_v23 = vpop.f32.mrf.mxu0 }
 0xa46   : > { %v8857_v25 = vmax.f32 %v8794_v23, 0.0 }
 0xa47   : > { %v11294_v30 = vpop.f32.mrf.mxu0 }
 0xa48   : > { %v8860_v49 = vmax.f32 %v11294_v30, 0.0 }
 0xa49   : > { %v8797_v37 = vpop.f32.mrf.mxu0 }
 0xa4a   : > { %v11643_v56 = vpack.i.bf16 %v8860_v49, %v8859_v3  ;;  %v8858_v2 = vmax.f32 %v8797_v37, 0.0 }
 0xa4c   : > { %v11638_v27 = vpack.i.bf16 %v8858_v2, %v8857_v25  ;;  %11644 = vrot.lane.b32.xlu0 %v11643_v56, %s11868_s20 }
 0xa4e   : > { %11639 = vrot.lane.b32.xlu1 %v11638_v27, %s11868_s20 }
 0xa53   : > { %v11297_v1 = vpop.f32.mrf.mxu0 }
 0xa54   : > { %v8863_v34 = vmax.f32 %v11297_v1, 0.0 }
 0xa55   : > { %v8810_v15 = vpop.f32.mrf.mxu0 }
 0xa56   : > { %v8861_v20 = vmax.f32 %v8810_v15, 0.0 }
 0xa57   : > { %v11298_v42 = vpop.f32.mrf.mxu0 }
 0xa58   : > { %v8864_v57 = vmax.f32 %v11298_v42, 0.0 }
 0xa59   : > { %v8813_v52 = vpop.f32.mrf.mxu0 }
 0xa5a   : > { %v11653_v30 = vpack.i.bf16 %v8864_v57, %v8863_v34  ;;  %v8862_v62 = vmax.f32 %v8813_v52, 0.0 }
 0xa5c   : > { %v11648_v39 = vpack.i.bf16 %v8862_v62, %v8861_v20  ;;  %11654 = vrot.lane.b32.xlu0 %v11653_v30, %s11868_s20 }
 0xa5e   : > { %11649 = vrot.lane.b32.xlu1 %v11648_v39, %s11868_s20 }
 0xa76   : > { %v11301_v23 = vpop.f32.mrf.mxu0 }
 0xa77   : > { %v8867_v37 = vmax.f32 %v11301_v23, 0.0 }
 0xa78   : > { %v8826_v3 = vpop.f32.mrf.mxu0 }
 0xa79   : > { %v8865_v2 = vmax.f32 %v8826_v3, 0.0 }
 0xa7a   : > { %v11302_v49 = vpop.f32.mrf.mxu0 }
 0xa7b   : > { %v8868_v25 = vmax.f32 %v11302_v49, 0.0 }
 0xa7c   : > { %v8829_v56 = vpop.f32.mrf.mxu0 }
 0xa7d   : > { %v11663_v27 = vpack.i.bf16 %v8868_v25, %v8867_v37  ;;  %v8866_v26 = vmax.f32 %v8829_v56, 0.0  ;;  %v19417_v56 = vmax.f32 %v17095_v22, 0.0 }
 0xa7f   : > { %v11658_v1 = vpack.i.bf16 %v8866_v26, %v8865_v2  ;;  %11664 = vrot.lane.b32.xlu0 %v11663_v27, %s11868_s20  ;;  %v19418_v27 = vmax.f32 %v17091_v55, 0.0 }
 0xa81   : > { %11659 = vrot.lane.b32.xlu1 %v11658_v1, %s11868_s20 }
 0xab7   : > { %v11305_v52 = vpop.f32.mrf.mxu0 }
 0xab8   : > { %v8871_v42 = vmax.f32 %v11305_v52, 0.0  ;;  %v19419_v52 = vmax.f32 %v17093_v4, 0.0 }
 0xab9   : > { %v8842_v62 = vpop.f32.mrf.mxu0 }
 0xaba   : > { %v8869_v20 = vmax.f32 %v8842_v62, 0.0 }
 0xabb   : > { %v11306_v57 = vpop.f32.mrf.mxu0 }
 0xabc   : > { %v8872_v15 = vmax.f32 %v11306_v57, 0.0  ;;  %v19420_v57 = vmax.f32 %v17099_v48, 0.0 }
 0xabd   : > { %v8845_v34 = vpop.f32.mrf.mxu0 }
 0xabe   : > { %v11673_v30 = vpack.i.bf16 %v8872_v15, %v8871_v42  ;;  %v8870_v39 = vmax.f32 %v8845_v34, 0.0  ;;  %v11645_v23 = vpop.permute.xlu0 %11644 }
 0xabf   : > { %v11647_v49 = vunpack.i.h.bf16 %v11645_v23  ;;  %v11646_v29 = vunpack.i.l.bf16 %v11645_v23  ;;  %v19421_v23 = vmax.f32 %v17121_v44, 0.0 }
 0xac0   : > { %v11668_v3 = vpack.i.bf16 %v8870_v39, %v8869_v20  ;;  %v11640_v37 = vpop.permute.xlu1 %11639  ;;  %11674 = vrot.lane.b32.xlu0 %v11673_v30, %s11868_s20 }
 0xac1   : > { %v11642_v26 = vunpack.i.h.bf16 %v11640_v37  ;;  %v11641_v25 = vunpack.i.l.bf16 %v11640_v37  ;;  %v8940_v2 = vsel %vm2320_vm14, %v19417_v56, %v11647_v49  ;;  %v8939_v1 = vsel %vm2320_vm14, %v19418_v27, %v11646_v29 }
 0xac2   : > { %11669 = vrot.lane.b32.xlu1 %v11668_v3, %s11868_s20  ;;  %v8954_v34 = vpack.c.bf16 %v8940_v2, %v8939_v1  ;;  %v19422_v49 = vmax.f32 %v17125_v50, 0.0  ;;  %v19423_v3 = vmax.f32 %v17123_v10, 0.0 }
 0xac3   : > { %v8937_v62 = vsel %vm2320_vm14, %v19419_v52, %v11641_v25  ;;  %v8938_v42 = vsel %vm2320_vm14, %v19420_v57, %v11642_v26  ;;  %v19424_v26 = vmax.f32 %v17129_v60, 0.0  ;;  %v19425_v57 = vmax.f32 %v17151_v0, 0.0 }
 0xac4   : > { %v8953_v15 = vpack.c.bf16 %v8938_v42, %v8937_v62  ;;  %v19426_v42 = vmax.f32 %v17155_v41, 0.0 }
 0xac6   : > { %11323 = vmatprep.mubr.bf16.mxu1 %v8953_v15  ;;  %v19427_v15 = vmax.f32 %v17153_v18, 0.0 }
 0xac7   : > { %11324 = vmatmul.mubr.bf16.vlgmr.msra.gmra.mxu1 %v8954_v34 }
 0xace   : > { %v11655_v22 = vpop.permute.xlu0 %11654 }
 0xacf   : > { %v11657_v20 = vunpack.i.h.bf16 %v11655_v22  ;;  %v11656_v30 = vunpack.i.l.bf16 %v11655_v22  ;;  %v19428_v22 = vmax.f32 %v17159_v21, 0.0 }
 0xad0   : > { %v11650_v55 = vpop.permute.xlu1 %11649 }
 0xad1   : > { %v11652_v39 = vunpack.i.h.bf16 %v11650_v55  ;;  %v11651_v29 = vunpack.i.l.bf16 %v11650_v55  ;;  %v8943_v4 = vsel %vm2320_vm14, %v19421_v23, %v11656_v30  ;;  %v8944_v48 = vsel %vm2320_vm14, %v19422_v49, %v11657_v20 }
 0xad2   : > { %v8956_v2 = vpack.c.bf16 %v8944_v48, %v8943_v4  ;;  %v19429_v49 = vmax.f32 %v17181_v58, 0.0  ;;  %v19430_v48 = vmax.f32 %v17185_v45, 0.0 }
 0xad3   : > { %v8941_v37 = vsel %vm2320_vm14, %v19423_v3, %v11651_v29  ;;  %v8942_v25 = vsel %vm2320_vm14, %v19424_v26, %v11652_v39  ;;  %v19431_v3 = vmax.f32 %v17183_v46, 0.0  ;;  %v19432_v26 = vmax.f32 %v17189_v54, 0.0 }
 0xad4   : > { %v8955_v56 = vpack.c.bf16 %v8942_v25, %v8941_v37 }
 0xad6   : > { %11327 = vmatprep.mubr.bf16.mxu1 %v8955_v56 }
 0xad7   : > { %11328 = vmatmul.mubr.bf16.gmra.mxu1 %v8956_v2 }
 0xaf1   : > { %v11665_v27 = vpop.permute.xlu0 %11664 }
 0xaf2   : > { %v11667_v44 = vunpack.i.h.bf16 %v11665_v27  ;;  %v11666_v1 = vunpack.i.l.bf16 %v11665_v27 }
 0xaf3   : > { %v11660_v52 = vpop.permute.xlu1 %11659 }
 0xaf4   : > { %v11662_v62 = vunpack.i.h.bf16 %v11660_v52  ;;  %v11661_v50 = vunpack.i.l.bf16 %v11660_v52  ;;  %v8947_v10 = vsel %vm2320_vm14, %v19425_v57, %v11666_v1  ;;  %v8948_v60 = vsel %vm2320_vm14, %v19426_v42, %v11667_v44 }
 0xaf5   : > { %v8958_v55 = vpack.c.bf16 %v8948_v60, %v8947_v10 }
 0xaf6   : > { %v8945_v34 = vsel %vm2320_vm14, %v19427_v15, %v11661_v50  ;;  %v8946_v20 = vsel %vm2320_vm14, %v19428_v22, %v11662_v62 }
 0xaf7   : > { %v8957_v30 = vpack.c.bf16 %v8946_v20, %v8945_v34 }
 0xaf9   : > { %11331 = vmatprep.mubr.bf16.mxu1 %v8957_v30 }
 0xafa   : > { %11332 = vmatmul.mubr.bf16.gmra.mxu1 %v8958_v55 }
 0xb32   : > { %v11675_v39 = vpop.permute.xlu0 %11674 }
 0xb33   : > { %v11677_v0 = vunpack.i.h.bf16 %v11675_v39  ;;  %v11676_v29 = vunpack.i.l.bf16 %v11675_v39 }
 0xb34   : > { %v11670_v23 = vpop.permute.xlu1 %11669 }
 0xb35   : > { %v11672_v4 = vunpack.i.h.bf16 %v11670_v23  ;;  %v11671_v41 = vunpack.i.l.bf16 %v11670_v23  ;;  %v8951_v18 = vsel %vm2320_vm14, %v19429_v49, %v11676_v29  ;;  %v8952_v21 = vsel %vm2320_vm14, %v19430_v48, %v11677_v0 }
 0xb36   : > { %v8960_v2 = vpack.c.bf16 %v8952_v21, %v8951_v18 }
 0xb37   : > { %v8949_v37 = vsel %vm2320_vm14, %v19431_v3, %v11671_v41  ;;  %v8950_v25 = vsel %vm2320_vm14, %v19432_v26, %v11672_v4 }
 0xb38   : > { %v8959_v56 = vpack.c.bf16 %v8950_v25, %v8949_v37  ;;  %v11762_v25 = vld [vmem:[%s17817_s10 + $0xb8] sm:$0xff]  }
 0xb3a   : > { %11335 = vmatprep.mubr.bf16.mxu1 %v8959_v56 }
 0xb3b   : > { %11336 = vmatmul.mubr.bf16.gmra.mxu1 %v8960_v2  ;;  %v11763_v2 = vld [vmem:[%s17817_s10 + $0xb0] sm:$0xff]  }
 0xb3c   : > { %11347 = vmatprep.mubr.msk.bf16.mxu1 %vm11870_vm8, %v19370_v8 }
 0xb87   : > { %v17363_v58 = vpop.f32.mrf.mxu1 }
 0xb88   : > { %v9125_v46 = vmax.f32 %v17363_v58, 0.0 }
 0xb89   : > { %v17365_v45 = vpop.f32.mrf.mxu1 }
 0xb8a   : > { %v9123_v1 = vmax.f32 %v17365_v45, 0.0 }
 0xb8b   : > { %v17367_v27 = vpop.f32.mrf.mxu1 }
 0xb8c   : > { %v9126_v44 = vmax.f32 %v17367_v27, 0.0 }
 0xb8d   : > { %v17371_v54 = vpop.f32.mrf.mxu1 }
 0xb8e   : > { %v9140_v52 = vpack.c.bf16 %v9126_v44, %v9125_v46  ;;  %v9124_v62 = vmax.f32 %v17371_v54, 0.0 }
 0xb90   : > { %v9139_v50 = vpack.c.bf16 %v9124_v62, %v9123_v1  ;;  %11346 = vmatpush3.bf16.msra.mxu1 %v9140_v52  ;;  %v11764_v52 = vld [vmem:[%s17817_s10 + $0xa8] sm:$0xff]  }
 0xb91   : > { %11357 = vmatprep.subr.bf16.mxu1 %v19370_v8 }
 0xb92   : > { %11340 = vmatpush3.bf16.msra.mxu0 %v9139_v50  ;;  %v11766_v50 = vld [vmem:[%s17817_s10 + $0x98] sm:$0xff]  }
 0xb93   : > { %11348 = vmatmul.mubr.msk.bf16.vlgmr.msra.gmra.mxu1 %vm7385_vm9, %v16760_v33  ;;  %11351 = vmatprep.subr.bf16.mxu0 %v19370_v8 }
 0xb94   : > { %11359 = vmatprep.mubr.msk.bf16.mxu1 %vm11870_vm8, %v19370_v8 }
 0xb95   : > { %11342 = vmatmul.mubr.msk.bf16.vlgmr.msra.gmra.mxu0 %vm7385_vm9, %v16734_v28 }
 0xb96   : > { %11353 = vmatprep.mubr.msk.bf16.mxu0 %vm11870_vm8, %v19370_v8 }
 0xb97   : > { %v17393_v57 = vpop.f32.mrf.mxu1 }
 0xb98   : > { %v9129_v60 = vmax.f32 %v17393_v57, 0.0 }
 0xb99   : > { %v17395_v10 = vpop.f32.mrf.mxu1 }
 0xb9a   : > { %v9127_v34 = vmax.f32 %v17395_v10, 0.0 }
 0xb9b   : > { %v17397_v42 = vpop.f32.mrf.mxu1 }
 0xb9c   : > { %v9130_v33 = vmax.f32 %v17397_v42, 0.0 }
 0xb9d   : > { %v17401_v15 = vpop.f32.mrf.mxu1 }
 0xb9e   : > { %v9142_v28 = vpack.c.bf16 %v9130_v33, %v9129_v60  ;;  %v9128_v22 = vmax.f32 %v17401_v15, 0.0 }
 0xba0   : > { %v9141_v20 = vpack.c.bf16 %v9128_v22, %v9127_v34  ;;  %11358 = vmatpush3.bf16.msra.mxu1 %v9142_v28  ;;  %v11768_v28 = vld [vmem:[%s17817_s10 + $0x88] sm:$0xff]  }
 0xba1   : > { %11369 = vmatprep.subr.bf16.mxu1 %v19370_v8 }
 0xba2   : > { %11352 = vmatpush3.bf16.msra.mxu0 %v9141_v20  ;;  %v11769_v20 = vld [vmem:[%s17817_s10 + $0x80] sm:$0xff]  }
 0xba3   : > { %11360 = vmatmul.mubr.msk.bf16.vlgmr.msra.gmra.mxu1 %vm7385_vm9, %v16817_v7  ;;  %11363 = vmatprep.subr.bf16.mxu0 %v19370_v8 }
 0xba4   : > { %11371 = vmatprep.mubr.msk.bf16.mxu1 %vm11870_vm8, %v19370_v8 }
 0xba5   : > { %11354 = vmatmul.mubr.msk.bf16.vlgmr.msra.gmra.mxu0 %vm7385_vm9, %v16780_v32 }
 0xba6   : > { %11365 = vmatprep.mubr.msk.bf16.mxu0 %vm11870_vm8, %v19370_v8 }
 0xbba   : > { %v17423_v30 = vpop.f32.mrf.mxu1 }
 0xbbb   : > { %v9133_v0 = vmax.f32 %v17423_v30, 0.0 }
 0xbbc   : > { %v17425_v55 = vpop.f32.mrf.mxu1 }
 0xbbd   : > { %v9131_v23 = vmax.f32 %v17425_v55, 0.0 }
 0xbbe   : > { %v17427_v39 = vpop.f32.mrf.mxu1 }
 0xbbf   : > { %v9134_v7 = vmax.f32 %v17427_v39, 0.0 }
 0xbc0   : > { %v17431_v29 = vpop.f32.mrf.mxu1 }
 0xbc1   : > { %v9144_v32 = vpack.c.bf16 %v9134_v7, %v9133_v0  ;;  %v9132_v4 = vmax.f32 %v17431_v29, 0.0 }
 0xbc3   : > { %v9143_v41 = vpack.c.bf16 %v9132_v4, %v9131_v23  ;;  %11370 = vmatpush3.bf16.msra.mxu1 %v9144_v32 }
 0xbc4   : > { %11381 = vmatprep.subr.bf16.mxu1 %v19370_v8 }
 0xbc5   : > { %11364 = vmatpush3.bf16.msra.mxu0 %v9143_v41 }
 0xbc6   : > { %11372 = vmatmul.mubr.msk.bf16.vlgmr.msra.gmra.mxu1 %vm7385_vm9, %v16871_v19  ;;  %11375 = vmatprep.subr.bf16.mxu0 %v19370_v8 }
 0xbc7   : > { %11383 = vmatprep.mubr.msk.bf16.mxu1 %vm11870_vm8, %v19370_v8 }
 0xbc8   : > { %11366 = vmatmul.mubr.msk.bf16.vlgmr.msra.gmra.mxu0 %vm7385_vm9, %v16849_v40 }
 0xbc9   : > { %11377 = vmatprep.mubr.msk.bf16.mxu0 %vm11870_vm8, %v19370_v8 }
 0xbfb   : > { %v17453_v49 = vpop.f32.mrf.mxu1 }
 0xbfc   : > { %v9137_v21 = vmax.f32 %v17453_v49, 0.0 }
 0xbfd   : > { %v17455_v18 = vpop.f32.mrf.mxu1 }
 0xbfe   : > { %v18027_v37 = vmax.f32 %v17455_v18, 0.0 }
 0xbff   : > { %v17457_v48 = vpop.f32.mrf.mxu1 }
 0xc00   : > { %v18028_v19 = vmax.f32 %v17457_v48, 0.0 }
 0xc01   : > { %v17461_v3 = vpop.f32.mrf.mxu1 }
 0xc02   : > { %v9146_v40 = vpack.c.bf16 %v18028_v19, %v9137_v21  ;;  %v18026_v26 = vmax.f32 %v17461_v3, 0.0 }
 0xc04   : > { %v9145_v56 = vpack.c.bf16 %v18026_v26, %v18027_v37  ;;  %11382 = vmatpush3.bf16.msra.mxu1 %v9146_v40  ;;  %v19433_v37 = vld [vmem:[#allocation269_spill] sm:$0xff] }
 0xc06   : > { %11376 = vmatpush3.bf16.msra.mxu0 %v9145_v56 }
 0xc07   : > { %11384 = vmatmul.mubr.msk.bf16.vlgmr.msra.gmra.mxu1 %vm7385_vm9, %v16882_v13  ;;  %11387 = vmatprep.subr.bf16.mxu0 %v11762_v25  ;;  %v11765_v13 = vld [vmem:[%s17817_s10 + $0xa0] sm:$0xff]  }
 0xc09   : > { %11378 = vmatmul.mubr.msk.bf16.vlgmr.msra.gmra.mxu0 %vm7385_vm9, %v16820_v51  ;;  %v11767_v51 = vld [vmem:[%s17817_s10 + $0x90] sm:$0xff]  }
 0xc0a   : > { %11388 = vmatpush3.bf16.msra.mxu0 %v11762_v25 }
 0xc0b   : > { %11389 = vmatprep.subr.bf16.mxu0 %v11763_v2 }
 0xc0e   : > { %11390 = vmatpush3.bf16.msra.mxu0 %v11763_v2 }
 0xc0f   : > { %11391 = vmatprep.subr.bf16.mxu0 %v11764_v52 }
 0xc12   : > { %11392 = vmatpush3.bf16.msra.mxu0 %v11764_v52 }
 0xc13   : > { %11393 = vmatprep.subr.bf16.mxu0 %v11765_v13 }
 0xc16   : > { %11394 = vmatpush3.bf16.msra.mxu0 %v11765_v13 }
 0xc17   : > { %11395 = vmatprep.subr.bf16.mxu0 %v11766_v50 }
 0xc1a   : > { %11396 = vmatpush3.bf16.msra.mxu0 %v11766_v50 }
 0xc1b   : > { %11397 = vmatprep.subr.bf16.mxu0 %v11767_v51 }
 0xc1e   : > { %11398 = vmatpush3.bf16.msra.mxu0 %v11767_v51 }
 0xc1f   : > { %11399 = vmatprep.subr.bf16.mxu0 %v11768_v28 }
 0xc22   : > { %11400 = vmatpush3.bf16.msra.mxu0 %v11768_v28 }
 0xc23   : > { %11401 = vmatprep.subr.bf16.mxu0 %v11769_v20 }
 0xc26   : > { %11402 = vmatpush3.bf16.msra.mxu0 %v11769_v20 }
 0xc27   : > { %11451 = vmatprep.subr.bf16.mxu0 %v19370_v8 }
 0xc53   : > { %v9222_v32 = vpop.f32.mrf.mxu1 }
 0xc54   : > { %v9477_v13 = vmul.f32 %v9222_v32, %v19375_v14 }
 0xc55   : > { %v9181_v41 = vpop.f32.mrf.mxu0  ;;  %v11349_v40 = vpop.f32.mrf.mxu1 }
 0xc56   : > { %v9475_v2 = vmul.f32 %v9181_v41, %v19371_v24  ;;  %v19434_v40 = vld [vmem:[#allocation262_spill] sm:$0xff]  ;;  %v9493_v24 = vsel %vm2320_vm14, %v9477_v13, %v16938_v5  ;;  %v19435_v13 = vld [vmem:[#allocation280_spill] sm:$0xff] }
 0xc57   : > { %v11343_v25 = vpop.f32.mrf.mxu0  ;;  %v9225_v56 = vpop.f32.mrf.mxu1 }
 0xc58   : > { %v9478_v52 = vmul.f32 %v9225_v56, %v19376_v38  ;;  %v9491_v19 = vsel %vm2320_vm14, %v9475_v2, %v19433_v37 }
 0xc59   : > { %v9184_v50 = vpop.f32.mrf.mxu0  ;;  %v11350_v51 = vpop.f32.mrf.mxu1 }
 0xc5a   : > { %v9476_v26 = vmul.f32 %v9184_v50, %v19374_v63  ;;  %v9494_v28 = vsel %vm2320_vm14, %v9478_v52, %v16936_v16 }
 0xc5b   : > { %v11344_v20 = vpop.f32.mrf.mxu0  ;;  %v9508_v41 = vpack.c.bf16 %v9494_v28, %v9493_v24 }
 0xc5c   : > { %v9492_v25 = vsel %vm2320_vm14, %v9476_v26, %v19434_v40 }
 0xc5d   : > { %v9507_v38 = vpack.c.bf16 %v9492_v25, %v9491_v19 }
 0xc5f   : > { %11403 = vmatprep.mubr.bf16.mxu0 %v9507_v38 }
 0xc60   : > { %11404 = vmatmul.mubr.bf16.vlgmr.msra.gmra.mxu0 %v9508_v41 }
 0xc63   : > { %v9304_v14 = vpop.f32.mrf.mxu1 }
 0xc64   : > { %v9481_v37 = vmul.f32 %v9304_v14, %v19406_v53  ;;  %v19436_v14 = vld [vmem:[#allocation274_spill] sm:$0xff] }
 0xc65   : > { %v9263_v32 = vpop.f32.mrf.mxu0  ;;  %v11361_v63 = vpop.f32.mrf.mxu1 }
 0xc66   : > { %v9479_v16 = vmul.f32 %v9263_v32, %v19404_v11 }
 0xc67   : > { %v11355_v56 = vpop.f32.mrf.mxu0  ;;  %v9307_v50 = vpop.f32.mrf.mxu1 }
 0xc68   : > { %v9482_v52 = vmul.f32 %v9307_v50, %v19405_v17  ;;  %v9495_v28 = vsel %vm2320_vm14, %v9479_v16, %v19435_v13  ;;  %v9497_v17 = vsel %vm2320_vm14, %v9481_v37, %v16959_v9  ;;  %v19437_v56 = vld [vmem:[#allocation278_spill] sm:$0xff] }
 0xc69   : > { %v9266_v2 = vpop.f32.mrf.mxu0  ;;  %v11362_v26 = vpop.f32.mrf.mxu1 }
 0xc6a   : > { %v9480_v51 = vmul.f32 %v9266_v2, %v19407_v59  ;;  %v9498_v5 = vsel %vm2320_vm14, %v9482_v52, %v16957_v35  ;;  %v19438_v52 = vld [vmem:[#allocation270_spill] sm:$0xff] }
 0xc6b   : > { %v11356_v19 = vpop.f32.mrf.mxu0  ;;  %v9510_v11 = vpack.c.bf16 %v9498_v5, %v9497_v17  ;;  %v19440_v17 = vld [vmem:[#allocation275_spill] sm:$0xff] }
 0xc6c   : > { %v9496_v20 = vsel %vm2320_vm14, %v9480_v51, %v19409_v43 }
 0xc6d   : > { %v9509_v40 = vpack.c.bf16 %v9496_v20, %v9495_v28  ;;  %v19439_v20 = vld [vmem:[#allocation268_spill] sm:$0xff] }
 0xc6f   : > { %11407 = vmatprep.mubr.bf16.mxu0 %v9509_v40 }
 0xc70   : > { %11408 = vmatmul.mubr.bf16.gmra.mxu0 %v9510_v11 }
 0xc86   : > { %v9386_v53 = vpop.f32.mrf.mxu1 }
 0xc87   : > { %v9485_v32 = vmul.f32 %v9386_v53, %v19436_v14  ;;  %v19444_v14 = vld [vmem:[#allocation277_spill] sm:$0xff] }
 0xc88   : > { %v9345_v25 = vpop.f32.mrf.mxu0  ;;  %v11373_v59 = vpop.f32.mrf.mxu1 }
 0xc89   : > { %v9483_v35 = vmul.f32 %v9345_v25, %v16127_v36  ;;  %v9501_v36 = vsel %vm2320_vm14, %v9485_v32, %v19412_v61  ;;  %v19441_v25 = vld [vmem:[#allocation279_spill] sm:$0xff]  ;;  %v19442_v61 = vld [vmem:[#allocation264_spill] sm:$0xff] }
 0xc8a   : > { %v11367_v24 = vpop.f32.mrf.mxu0  ;;  %v9389_v38 = vpop.f32.mrf.mxu1 }
 0xc8b   : > { %v9486_v41 = vmul.f32 %v9389_v38, %v16184_v6  ;;  %v9499_v37 = vsel %vm2320_vm14, %v9483_v35, %v19438_v52  ;;  %v19443_v35 = vld [vmem:[#allocation271_spill] sm:$0xff]  ;;  %v11773_v52 = vld [vmem:[%s17818_s11 + $0xa0] sm:$0xff]  }
 0xc8c   : > { %v9348_v63 = vpop.f32.mrf.mxu0  ;;  %v11374_v43 = vpop.f32.mrf.mxu1 }
 0xc8d   : > { %v9484_v50 = vmul.f32 %v9348_v63, %v19437_v56  ;;  %v9502_v9 = vsel %vm2320_vm14, %v9486_v41, %v16966_v31 }
 0xc8e   : > { %v11368_v16 = vpop.f32.mrf.mxu0  ;;  %v9512_v6 = vpack.c.bf16 %v9502_v9, %v9501_v36  ;;  %v11771_v9 = vld [vmem:[%s17818_s11 + $0xb0] sm:$0xff]   ;;  %v11777_v36 = vld [vmem:[%s17818_s11 + $0x80] sm:$0xff]  }
 0xc8f   : > { %v9500_v2 = vsel %vm2320_vm14, %v9484_v50, %v16974_v47  ;;  %v11770_v50 = vld [vmem:[%s17818_s11 + $0xb8] sm:$0xff]   ;;  %v11772_v16 = vld [vmem:[%s17818_s11 + $0xa8] sm:$0xff]  }
 0xc90   : > { %v9511_v26 = vpack.c.bf16 %v9500_v2, %v9499_v37  ;;  %11419 = vmatprep.subr.bf16.mxu1 %v11770_v50  ;;  %v11774_v37 = vld [vmem:[%s17818_s11 + $0x98] sm:$0xff]   ;;  %v11775_v2 = vld [vmem:[%s17818_s11 + $0x90] sm:$0xff]  }
 0xc91   : > { %11420 = vmatpush3.bf16.msra.mxu1 %v11770_v50 }
 0xc92   : > { %11411 = vmatprep.mubr.bf16.mxu0 %v9511_v26  ;;  %11421 = vmatprep.subr.bf16.mxu1 %v11771_v9  ;;  %v11776_v26 = vld [vmem:[%s17818_s11 + $0x88] sm:$0xff]  }
 0xc93   : > { %11412 = vmatmul.mubr.bf16.gmra.mxu0 %v9512_v6 }
 0xc95   : > { %11422 = vmatpush3.bf16.msra.mxu1 %v11771_v9 }
 0xc96   : > { %11423 = vmatprep.subr.bf16.mxu1 %v11772_v16 }
 0xc99   : > { %11424 = vmatpush3.bf16.msra.mxu1 %v11772_v16 }
 0xc9a   : > { %11425 = vmatprep.subr.bf16.mxu1 %v11773_v52 }
 0xc9d   : > { %11426 = vmatpush3.bf16.msra.mxu1 %v11773_v52 }
 0xc9e   : > { %11427 = vmatprep.subr.bf16.mxu1 %v11774_v37 }
 0xca1   : > { %11428 = vmatpush3.bf16.msra.mxu1 %v11774_v37 }
 0xca2   : > { %11429 = vmatprep.subr.bf16.mxu1 %v11775_v2 }
 0xca5   : > { %11430 = vmatpush3.bf16.msra.mxu1 %v11775_v2 }
 0xca6   : > { %11431 = vmatprep.subr.bf16.mxu1 %v11776_v26 }
 0xca9   : > { %11432 = vmatpush3.bf16.msra.mxu1 %v11776_v26 }
 0xcaa   : > { %11433 = vmatprep.subr.bf16.mxu1 %v11777_v36 }
 0xcad   : > { %11434 = vmatpush3.bf16.msra.mxu1 %v11777_v36 }
 0xcae   : > { %11463 = vmatprep.subr.bf16.mxu1 %v19370_v8 }
 0xcc7   : > { %v9468_v51 = vpop.f32.mrf.mxu1 }
 0xcc8   : > { %v9489_v11 = vmul.f32 %v9468_v51, %v19440_v17 }
 0xcc9   : > { %v9427_v5 = vpop.f32.mrf.mxu0  ;;  %v11385_v19 = vpop.f32.mrf.mxu1 }
 0xcca   : > { %v9487_v31 = vmul.f32 %v9427_v5, %v16407_v12  ;;  %v19445_v12 = vld [vmem:[#allocation281_spill] sm:$0xff] }
 0xccb   : > { %v11379_v13 = vpop.f32.mrf.mxu0  ;;  %v9471_v28 = vpop.f32.mrf.mxu1  ;;  %v9505_v43 = vsel %vm2320_vm14, %v9489_v11, %v19445_v12 }
 0xccc   : > { %v9490_v40 = vmul.f32 %v9471_v28, %v19439_v20  ;;  %v9503_v41 = vsel %vm2320_vm14, %v9487_v31, %v19443_v35 }
 0xccd   : > { %v9430_v53 = vpop.f32.mrf.mxu0  ;;  %v11386_v47 = vpop.f32.mrf.mxu1 }
 0xcce   : > { %v9488_v59 = vmul.f32 %v9430_v53, %v19441_v25  ;;  %v9506_v38 = vsel %vm2320_vm14, %v9490_v40, %v19442_v61 }
 0xccf   : > { %v11380_v24 = vpop.f32.mrf.mxu0  ;;  %v9514_v56 = vpack.c.bf16 %v9506_v38, %v9505_v43 }
 0xcd0   : > { %v9504_v32 = vsel %vm2320_vm14, %v9488_v59, %v19444_v14 }
 0xcd1   : > { %v9513_v63 = vpack.c.bf16 %v9504_v32, %v9503_v41 }
 0xcd3   : > { %11415 = vmatprep.mubr.bf16.mxu0 %v9513_v63 }
 0xcd4   : > { %11416 = vmatmul.mubr.bf16.gmra.mxu0 %v9514_v56 }
 0xcd5   : > { %11459 = vmatprep.mubr.msk.bf16.mxu0 %vm11870_vm8, %v19370_v8 }
 0xd20   : > { %v11405_v6 = vpop.f32.mrf.mxu0 }
 0xd21   : > { %v9679_v19 = vmax.f32 %v11405_v6, 0.0 }
 0xd22   : > { %v9614_v51 = vpop.f32.mrf.mxu0 }
 0xd23   : > { %v9677_v31 = vmax.f32 %v9614_v51, 0.0 }
 0xd24   : > { %v11406_v5 = vpop.f32.mrf.mxu0 }
 0xd25   : > { %v9680_v13 = vmax.f32 %v11406_v5, 0.0 }
 0xd26   : > { %v9617_v28 = vpop.f32.mrf.mxu0 }
 0xd27   : > { %v11683_v20 = vpack.i.bf16 %v9680_v13, %v9679_v19  ;;  %v9678_v40 = vmax.f32 %v9617_v28, 0.0 }
 0xd29   : > { %v11678_v17 = vpack.i.bf16 %v9678_v40, %v9677_v31  ;;  %11684 = vrot.lane.b32.xlu0 %v11683_v20, %s11868_s20 }
 0xd2b   : > { %11679 = vrot.lane.b32.xlu1 %v11678_v17, %s11868_s20 }
 0xd30   : > { %v11409_v11 = vpop.f32.mrf.mxu0 }
 0xd31   : > { %v9683_v25 = vmax.f32 %v11409_v11, 0.0 }
 0xd32   : > { %v9630_v53 = vpop.f32.mrf.mxu0 }
 0xd33   : > { %v9681_v61 = vmax.f32 %v9630_v53, 0.0 }
 0xd34   : > { %v11410_v47 = vpop.f32.mrf.mxu0 }
 0xd35   : > { %v9684_v59 = vmax.f32 %v11410_v47, 0.0  ;;  %v10556_v47 = vld [vmem:[#allocation2] sm:$0x1] }
 0xd36   : > { %v9633_v24 = vpop.f32.mrf.mxu0 }
 0xd37   : > { %v11693_v38 = vpack.i.bf16 %v9684_v59, %v9683_v25  ;;  %v9682_v35 = vmax.f32 %v9633_v24, 0.0 }
 0xd39   : > { %v11688_v41 = vpack.i.bf16 %v9682_v35, %v9681_v61  ;;  %11694 = vrot.lane.b32.xlu0 %v11693_v38, %s11868_s20 }
 0xd3b   : > { %11689 = vrot.lane.b32.xlu1 %v11688_v41, %s11868_s20 }
 0xd53   : > { %v11413_v14 = vpop.f32.mrf.mxu0 }
 0xd54   : > { %v9687_v12 = vmax.f32 %v11413_v14, 0.0 }
 0xd55   : > { %v9646_v32 = vpop.f32.mrf.mxu0 }
 0xd56   : > { %v9685_v50 = vmax.f32 %v9646_v32, 0.0 }
 0xd57   : > { %v11414_v63 = vpop.f32.mrf.mxu0 }
 0xd58   : > { %v9688_v43 = vmax.f32 %v11414_v63, 0.0 }
 0xd59   : > { %v9649_v56 = vpop.f32.mrf.mxu0 }
 0xd5a   : > { %v11703_v9 = vpack.i.bf16 %v9688_v43, %v9687_v12  ;;  %v9686_v16 = vmax.f32 %v9649_v56, 0.0 }
 0xd5c   : > { %v11698_v52 = vpack.i.bf16 %v9686_v16, %v9685_v50  ;;  %11704 = vrot.lane.b32.xlu0 %v11703_v9, %s11868_s20 }
 0xd5e   : > { %11699 = vrot.lane.b32.xlu1 %v11698_v52, %s11868_s20 }
 0xd94   : > { %v11417_v37 = vpop.f32.mrf.mxu0 }
 0xd95   : > { %v9691_v36 = vmax.f32 %v11417_v37, 0.0  ;;  %v19448_v37 = vmax.f32 %v17461_v3, 0.0 }
 0xd96   : > { %v9662_v2 = vpop.f32.mrf.mxu0 }
 0xd97   : > { %v9689_v5 = vmax.f32 %v9662_v2, 0.0 }
 0xd98   : > { %v11418_v26 = vpop.f32.mrf.mxu0 }
 0xd99   : > { %v9692_v6 = vmax.f32 %v11418_v26, 0.0 }
 0xd9a   : > { %v9665_v51 = vpop.f32.mrf.mxu0 }
 0xd9b   : > { %v11713_v19 = vpack.i.bf16 %v9692_v6, %v9691_v36  ;;  %v9690_v13 = vmax.f32 %v9665_v51, 0.0  ;;  %v11685_v28 = vpop.permute.xlu0 %11684 }
 0xd9c   : > { %v11687_v31 = vunpack.i.h.bf16 %v11685_v28  ;;  %v11686_v20 = vunpack.i.l.bf16 %v11685_v28 }
 0xd9d   : > { %v11708_v40 = vpack.i.bf16 %v9690_v13, %v9689_v5  ;;  %v11680_v17 = vpop.permute.xlu1 %11679  ;;  %11714 = vrot.lane.b32.xlu0 %v11713_v19, %s11868_s20 }
 0xd9e   : > { %v11682_v11 = vunpack.i.h.bf16 %v11680_v17  ;;  %v11681_v53 = vunpack.i.l.bf16 %v11680_v17  ;;  %v9760_v25 = vsel %vm2320_vm14, %v9126_v44, %v11687_v31  ;;  %v9759_v59 = vsel %vm2320_vm14, %v9125_v46, %v11686_v20 }
 0xd9f   : > { %11709 = vrot.lane.b32.xlu1 %v11708_v40, %s11868_s20  ;;  %v9774_v35 = vpack.c.bf16 %v9760_v25, %v9759_v59 }
 0xda0   : > { %v9757_v24 = vsel %vm2320_vm14, %v9123_v1, %v11681_v53  ;;  %v9758_v61 = vsel %vm2320_vm14, %v9124_v62, %v11682_v11  ;;  %v11778_v11 = vld [vmem:[%s17819_s12 + $0x18] sm:$0xff]  }
 0xda1   : > { %10559 = vperm.xlu0 %11556, %v10556_v47   ;;  %v9773_v38 = vpack.c.bf16 %v9758_v61, %v9757_v24  ;;  %11452 = vmatpush3.bf16.msra.mxu0 %v11778_v11  ;;  %v10158_v61 = vld [vmem:[%s17821_s14] sm:$0x1] }
 0xda2   : > { %11453 = vmatprep.subr.bf16.mxu0 %v19370_v8 }
 0xda3   : > { %11435 = vmatprep.mubr.bf16.mxu1 %v9773_v38  ;;  %v11779_v38 = vld [vmem:[%s17819_s12 + $0x10] sm:$0xff]  }
 0xda4   : > { %11436 = vmatmul.mubr.bf16.vlgmr.msra.gmra.mxu1 %v9774_v35 }
 0xda5   : > { %11454 = vmatpush3.bf16.msra.mxu0 %v11779_v38 }
 0xda6   : > { %11455 = vmatprep.subr.bf16.mxu0 %v19370_v8 }
 0xdab   : > { %v11695_v27 = vpop.permute.xlu0 %11694 }
 0xdac   : > { %v11697_v44 = vunpack.i.h.bf16 %v11695_v27  ;;  %v11696_v58 = vunpack.i.l.bf16 %v11695_v27 }
 0xdad   : > { %v11690_v41 = vpop.permute.xlu1 %11689 }
 0xdae   : > { %v11692_v46 = vunpack.i.h.bf16 %v11690_v41  ;;  %v11691_v14 = vunpack.i.l.bf16 %v11690_v41  ;;  %v9763_v45 = vsel %vm2320_vm14, %v9129_v60, %v11696_v58  ;;  %v9764_v54 = vsel %vm2320_vm14, %v9130_v33, %v11697_v44 }
 0xdaf   : > { %v9776_v63 = vpack.c.bf16 %v9764_v54, %v9763_v45  ;;  %v17653_v44 = vpack.c.bf16 %v10158_v61, %v10158_v61 }
 0xdb0   : > { %v9761_v1 = vsel %vm2320_vm14, %v9127_v34, %v11691_v14  ;;  %v9762_v62 = vsel %vm2320_vm14, %v9128_v22, %v11692_v46  ;;  %v11780_v14 = vld [vmem:[%s17819_s12 + $0x8] sm:$0xff]  }
 0xdb1   : > { %v9775_v32 = vpack.c.bf16 %v9762_v62, %v9761_v1  ;;  %11456 = vmatpush3.bf16.msra.mxu0 %v11780_v14 }
 0xdb2   : > { %11457 = vmatprep.subr.bf16.mxu0 %v19370_v8 }
 0xdb3   : > { %11439 = vmatprep.mubr.bf16.mxu1 %v9775_v32  ;;  %v11781_v32 = vld [vmem:[%s17819_s12] sm:$0xff]  }
 0xdb4   : > { %11440 = vmatmul.mubr.bf16.gmra.mxu1 %v9776_v63 }
 0xdb5   : > { %11458 = vmatpush3.bf16.msra.mxu0 %v11781_v32 }
 0xdb6   : > { %11469 = vmatprep.subr.bf16.mxu0 %v19370_v8 }
 0xdce   : > { %v11705_v12 = vpop.permute.xlu0 %11704 }
 0xdcf   : > { %v11707_v57 = vunpack.i.h.bf16 %v11705_v12  ;;  %v11706_v43 = vunpack.i.l.bf16 %v11705_v12 }
 0xdd0   : > { %v11700_v60 = vpop.permute.xlu1 %11699 }
 0xdd1   : > { %v11702_v56 = vunpack.i.h.bf16 %v11700_v60  ;;  %v11701_v42 = vunpack.i.l.bf16 %v11700_v60  ;;  %v9767_v10 = vsel %vm2320_vm14, %v9133_v0, %v11706_v43  ;;  %v9768_v33 = vsel %vm2320_vm14, %v9134_v7, %v11707_v57 }
 0xdd2   : > { %v9778_v50 = vpack.c.bf16 %v9768_v33, %v9767_v10  ;;  %v19446_v7 = vmax.f32 %v17457_v48, 0.0 }
 0xdd3   : > { %v9765_v15 = vsel %vm2320_vm14, %v9131_v23, %v11701_v42  ;;  %v9766_v34 = vsel %vm2320_vm14, %v9132_v4, %v11702_v56  ;;  %v19447_v23 = vmax.f32 %v17455_v18, 0.0 }
 0xdd4   : > { %v9777_v22 = vpack.c.bf16 %v9766_v34, %v9765_v15 }
 0xdd6   : > { %11443 = vmatprep.mubr.bf16.mxu1 %v9777_v22 }
 0xdd7   : > { %11444 = vmatmul.mubr.bf16.gmra.mxu1 %v9778_v50 }
 0xe0f   : > { %v11715_v9 = vpop.permute.xlu0 %11714 }
 0xe10   : > { %v11717_v30 = vunpack.i.h.bf16 %v11715_v9  ;;  %v11716_v16 = vunpack.i.l.bf16 %v11715_v9 }
 0xe11   : > { %v11710_v0 = vpop.permute.xlu1 %11709 }
 0xe12   : > { %v11712_v52 = vunpack.i.h.bf16 %v11710_v0  ;;  %v11711_v39 = vunpack.i.l.bf16 %v11710_v0  ;;  %v9771_v55 = vsel %vm2320_vm14, %v9137_v21, %v11716_v16  ;;  %v9772_v29 = vsel %vm2320_vm14, %v19446_v7, %v11717_v30 }
 0xe13   : > { %v9780_v36 = vpack.c.bf16 %v9772_v29, %v9771_v55 }
 0xe14   : > { %v9769_v4 = vsel %vm2320_vm14, %v19447_v23, %v11711_v39  ;;  %v9770_v2 = vsel %vm2320_vm14, %v19448_v37, %v11712_v52 }
 0xe15   : > { %v9779_v26 = vpack.c.bf16 %v9770_v2, %v9769_v4 }
 0xe17   : > { %11447 = vmatprep.mubr.bf16.mxu1 %v9779_v26 }
 0xe18   : > { %11448 = vmatmul.mubr.bf16.gmra.mxu1 %v9780_v36 }
 0xe19   : > { %11465 = vmatprep.mubr.msk.bf16.mxu1 %vm11870_vm8, %v19370_v8 }
 0xe64   : > { %v11437_v49 = vpop.f32.mrf.mxu1 }
 0xe65   : > { %v9945_v48 = vmax.f32 %v11437_v49, 0.0 }
 0xe66   : > { %v9880_v21 = vpop.f32.mrf.mxu1 }
 0xe67   : > { %v9943_v51 = vmax.f32 %v9880_v21, 0.0  ;;  %v9968_v19 = vsel %vm2320_vm14, %v9945_v48, 0.0 }
 0xe68   : > { %v11438_v6 = vpop.f32.mrf.mxu1 }
 0xe69   : > { %v9946_v5 = vmax.f32 %v11438_v6, 0.0  ;;  %v9959_v20 = vsel %vm2320_vm14, %v9943_v51, 0.0 }
 0xe6a   : > { %v9883_v18 = vpop.f32.mrf.mxu1 }
 0xe6b   : > { %v9969_v3 = vsel %vm2320_vm14, %v9946_v5, 0.0  ;;  %v17637_v13 = vpack.c.bf16 %v9946_v5, %v9945_v48  ;;  %v9944_v28 = vmax.f32 %v9883_v18, 0.0 }
 0xe6c   : > { %v9970_v31 = vadd.f32 %v9969_v3, %v9968_v19 }
 0xe6d   : > { %v9960_v40 = vsel %vm2320_vm14, %v9944_v28, 0.0  ;;  %v10160_v17 = vpack.c.bf16 %v9944_v28, %v9943_v51 }
 0xe6e   : > { %v9971_v53 = vrot.slane %v9970_v31, 4  ;;  %v9961_v47 = vadd.f32 %v9960_v40, %v9959_v20 }
 0xe6f   : > { %v10213_v25 = vsel %vm2320_vm14, %v10160_v17, 0 }
 0xe70   : > { %v9972_v59 = vadd.f32 %v9971_v53, %v9970_v31  ;;  %v9962_v24 = vrot.slane %v9961_v47, 4  ;;  %11464 = vmatpush3.bf16.xpose.msra.mxu1 %v10213_v25 }
 0xe71   : > { %11475 = vmatprep.subr.bf16.mxu1 %v19370_v8 }
 0xe72   : > { %v9973_v35 = vrot.slane %v9972_v59, 2  ;;  %v9963_v27 = vadd.f32 %v9962_v24, %v9961_v47 }
 0xe74   : > { %v9974_v58 = vadd.f32 %v9973_v35, %v9972_v59  ;;  %v9964_v41 = vrot.slane %v9963_v27, 2  ;;  %v11441_v46 = vpop.f32.mrf.mxu1 }
 0xe75   : > { %v9949_v62 = vmax.f32 %v11441_v46, 0.0 }
 0xe76   : > { %v9975_v45 = vrot.slane %v9974_v58, 1  ;;  %v9965_v54 = vadd.f32 %v9964_v41, %v9963_v27  ;;  %v9896_v1 = vpop.f32.mrf.mxu1 }
 0xe77   : > { %11466 = vmatmul.mubr.msk.bf16.vlgmr.msra.gmra.mxu1 %vm2320_vm14, %v17653_v44  ;;  %v9947_v43 = vmax.f32 %v9896_v1, 0.0  ;;  %v9986_v33 = vsel %vm2320_vm14, %v9949_v62, 0.0 }
 0xe78   : > { %v9976_v63 = vadd.f32 %v9975_v45, %v9974_v58  ;;  %v9966_v12 = vrot.slane %v9965_v54, 1  ;;  %v11442_v57 = vpop.f32.mrf.mxu1  ;;  %11477 = vmatprep.mubr.msk.bf16.mxu1 %vm11870_vm8, %v19370_v8 }
 0xe79   : > { %v9950_v60 = vmax.f32 %v11442_v57, 0.0  ;;  %v9977_v16 = vsel %vm2320_vm14, %v9947_v43, 0.0 }
 0xe7a   : > { %v10032_v56 = vmul.f32 0.0625, %v9976_v63  ;;  %v9967_v42 = vadd.f32 %v9966_v12, %v9965_v54  ;;  %v9899_v10 = vpop.f32.mrf.mxu1 }
 0xe7b   : > { %v9987_v15 = vsel %vm2320_vm14, %v9950_v60, 0.0  ;;  %v17669_v34 = vpack.c.bf16 %v9950_v60, %v9949_v62  ;;  %v9948_v22 = vmax.f32 %v9899_v10, 0.0 }
 0xe7c   : > { %v10040_v50 = vpack.c.bf16 %v10032_v56, %v10032_v56  ;;  %v10031_v9 = vmul.f32 0.0625, %v9967_v42  ;;  %v9988_v30 = vadd.f32 %v9987_v15, %v9986_v33 }
 0xe7d   : > { %v9978_v0 = vsel %vm2320_vm14, %v9948_v22, 0.0  ;;  %v10162_v52 = vpack.c.bf16 %v9948_v22, %v9947_v43 }
 0xe7e   : > { %v10039_v39 = vpack.c.bf16 %v10031_v9, %v10031_v9  ;;  %v9989_v55 = vrot.slane %v9988_v30, 4  ;;  %v9979_v7 = vadd.f32 %v9978_v0, %v9977_v16  ;;  %v10064_v23 = vunpack.c.l.b16 %v10040_v50 }
 0xe7f   : > { %v10299_v29 = vsel %vm2320_vm14, %v10162_v52, 0 }
 0xe80   : > { %v10063_v4 = vunpack.c.l.b16 %v10039_v39  ;;  %v9990_v37 = vadd.f32 %v9989_v55, %v9988_v30  ;;  %v9980_v2 = vrot.slane %v9979_v7, 4  ;;  %11476 = vmatpush3.bf16.xpose.msra.mxu1 %v10299_v29 }
 0xe81   : > { %11487 = vmatprep.subr.bf16.mxu1 %v19370_v8 }
 0xe82   : > { %v10071_v26 = vsel %vm6973_vm1, %v10064_v23, %v10063_v4  ;;  %v9991_v36 = vrot.slane %v9990_v37, 2  ;;  %v9981_v49 = vadd.f32 %v9980_v2, %v9979_v7 }
 0xe84   : > { %v9992_v21 = vadd.f32 %v9991_v36, %v9990_v37  ;;  %v9982_v48 = vrot.slane %v9981_v49, 2 }
 0xe86   : > { %v9993_v6 = vrot.slane %v9992_v21, 1  ;;  %v9983_v51 = vadd.f32 %v9982_v48, %v9981_v49 }
 0xe87   : > { %11478 = vmatmul.mubr.msk.bf16.vlgmr.msra.gmra.mxu1 %vm2320_vm14, %v17653_v44 }
 0xe88   : > { %v9994_v5 = vadd.f32 %v9993_v6, %v9992_v21  ;;  %v9984_v18 = vrot.slane %v9983_v51, 1  ;;  %11489 = vmatprep.mubr.msk.bf16.mxu1 %vm11870_vm8, %v19370_v8 }
 0xe8a   : > { %v10034_v19 = vmul.f32 0.0625, %v9994_v5  ;;  %v9985_v3 = vadd.f32 %v9984_v18, %v9983_v51 }
 0xe8c   : > { %v10033_v28 = vmul.f32 0.0625, %v9985_v3  ;;  %v10042_v31 = vpack.c.bf16 %v10034_v19, %v10034_v19 }
 0xe8e   : > { %v10041_v20 = vpack.c.bf16 %v10033_v28, %v10033_v28  ;;  %v10066_v17 = vunpack.c.l.b16 %v10042_v31 }
 0xe90   : > { %v10065_v40 = vunpack.c.l.b16 %v10041_v20 }
 0xe92   : > { %v10072_v11 = vsel %vm6976_vm2, %v10065_v40, %v10071_v26 }
 0xe93   : > { %v10073_v53 = vsel %vm6979_vm3, %v10066_v17, %v10072_v11 }
 0xe97   : > { %v11445_v47 = vpop.f32.mrf.mxu1 }
 0xe98   : > { %v9953_v59 = vmax.f32 %v11445_v47, 0.0 }
 0xe99   : > { %v9912_v25 = vpop.f32.mrf.mxu1 }
 0xe9a   : > { %v9951_v61 = vmax.f32 %v9912_v25, 0.0  ;;  %v10004_v27 = vsel %vm2320_vm14, %v9953_v59, 0.0 }
 0xe9b   : > { %v11446_v24 = vpop.f32.mrf.mxu1 }
 0xe9c   : > { %v9954_v38 = vmax.f32 %v11446_v24, 0.0  ;;  %v9995_v45 = vsel %vm2320_vm14, %v9951_v61, 0.0 }
 0xe9d   : > { %v9915_v35 = vpop.f32.mrf.mxu1 }
 0xe9e   : > { %v10005_v58 = vsel %vm2320_vm14, %v9954_v38, 0.0  ;;  %v17685_v41 = vpack.c.bf16 %v9954_v38, %v9953_v59  ;;  %v9952_v46 = vmax.f32 %v9915_v35, 0.0 }
 0xe9f   : > { %v10006_v14 = vadd.f32 %v10005_v58, %v10004_v27 }
 0xea0   : > { %v9996_v54 = vsel %vm2320_vm14, %v9952_v46, 0.0  ;;  %v10164_v1 = vpack.c.bf16 %v9952_v46, %v9951_v61 }
 0xea1   : > { %v10007_v62 = vrot.slane %v10006_v14, 4  ;;  %v9997_v32 = vadd.f32 %v9996_v54, %v9995_v45 }
 0xea2   : > { %v10385_v63 = vsel %vm2320_vm14, %v10164_v1, 0 }
 0xea3   : > { %v10008_v12 = vadd.f32 %v10007_v62, %v10006_v14  ;;  %v9998_v57 = vrot.slane %v9997_v32, 4  ;;  %11488 = vmatpush3.bf16.xpose.msra.mxu1 %v10385_v63  ;;  %v10256_v62 = vsel %vm2320_vm14, %v17637_v13, 0  ;;  %v10428_v13 = vsel %vm2320_vm14, %v17685_v41, 0 }
 0xea4   : > { %11499 = vmatprep.subr.bf16.mxu1 %v19370_v8 }
 0xea5   : > { %v10009_v43 = vrot.slane %v10008_v12, 2  ;;  %v9999_v60 = vadd.f32 %v9998_v57, %v9997_v32  ;;  %v10342_v32 = vsel %vm2320_vm14, %v17669_v34, 0 }
 0xea7   : > { %v10010_v56 = vadd.f32 %v10009_v43, %v10008_v12  ;;  %v10000_v42 = vrot.slane %v9999_v60, 2 }
 0xea9   : > { %v10011_v10 = vrot.slane %v10010_v56, 1  ;;  %v10001_v33 = vadd.f32 %v10000_v42, %v9999_v60 }
 0xeaa   : > { %11490 = vmatmul.mubr.msk.bf16.vlgmr.msra.gmra.mxu1 %vm2320_vm14, %v17653_v44 }
 0xeab   : > { %v10012_v15 = vadd.f32 %v10011_v10, %v10010_v56  ;;  %v10002_v22 = vrot.slane %v10001_v33, 1  ;;  %11501 = vmatprep.mubr.msk.bf16.mxu1 %vm11870_vm8, %v19370_v8 }
 0xead   : > { %v10036_v50 = vmul.f32 0.0625, %v10012_v15  ;;  %v10003_v9 = vadd.f32 %v10002_v22, %v10001_v33 }
 0xeaf   : > { %v10035_v30 = vmul.f32 0.0625, %v10003_v9  ;;  %v10044_v16 = vpack.c.bf16 %v10036_v50, %v10036_v50 }
 0xeb1   : > { %v10043_v0 = vpack.c.bf16 %v10035_v30, %v10035_v30  ;;  %v10068_v39 = vunpack.c.l.b16 %v10044_v16 }
 0xeb3   : > { %v10067_v52 = vunpack.c.l.b16 %v10043_v0 }
 0xeb5   : > { %v10074_v55 = vsel %vm6982_vm4, %v10067_v52, %v10073_v53 }
 0xeb6   : > { %v10075_v7 = vsel %vm6985_vm5, %v10068_v39, %v10074_v55 }
 0xed8   : > { %v11449_v29 = vpop.f32.mrf.mxu1 }
 0xed9   : > { %v9957_v4 = vmax.f32 %v11449_v29, 0.0 }
 0xeda   : > { %v9928_v23 = vpop.f32.mrf.mxu1 }
 0xedb   : > { %v9955_v2 = vmax.f32 %v9928_v23, 0.0  ;;  %v10022_v49 = vsel %vm2320_vm14, %v9957_v4, 0.0 }
 0xedc   : > { %v11450_v37 = vpop.f32.mrf.mxu1 }
 0xedd   : > { %v9958_v26 = vmax.f32 %v11450_v37, 0.0  ;;  %v10013_v51 = vsel %vm2320_vm14, %v9955_v2, 0.0 }
 0xede   : > { %v9931_v36 = vpop.f32.mrf.mxu1 }
 0xedf   : > { %v10023_v21 = vsel %vm2320_vm14, %v9958_v26, 0.0  ;;  %v9956_v48 = vmax.f32 %v9931_v36, 0.0  ;;  %v10167_v63 = vpack.c.bf16 %v9958_v26, %v9957_v4 }
 0xee0   : > { %v10024_v6 = vadd.f32 %v10023_v21, %v10022_v49 }
 0xee1   : > { %v10014_v5 = vsel %vm2320_vm14, %v9956_v48, 0.0  ;;  %v10166_v18 = vpack.c.bf16 %v9956_v48, %v9955_v2  ;;  %v10514_v34 = vsel %vm2320_vm14, %v10167_v63, 0 }
 0xee2   : > { %v10025_v19 = vrot.slane %v10024_v6, 4  ;;  %v10015_v3 = vadd.f32 %v10014_v5, %v10013_v51 }
 0xee3   : > { %v10471_v28 = vsel %vm2320_vm14, %v10166_v18, 0 }
 0xee4   : > { %v10026_v31 = vadd.f32 %v10025_v19, %v10024_v6  ;;  %v10016_v20 = vrot.slane %v10015_v3, 4  ;;  %11500 = vmatpush3.bf16.xpose.msra.mxu1 %v10471_v28 }
 0xee6   : > { %v10027_v40 = vrot.slane %v10026_v31, 2  ;;  %v10017_v17 = vadd.f32 %v10016_v20, %v10015_v3  ;;  %v10560_v20 = vpop.permute.xlu0 %10559 }
 0xee8   : > { %v10028_v11 = vadd.f32 %v10027_v40, %v10026_v31  ;;  %v10018_v53 = vrot.slane %v10017_v17, 2  ;;  %v19449_v40 = vld [vmem:[#allocation11_spill] sm:$0xff] }
 0xeea   : > { %v10029_v47 = vrot.slane %v10028_v11, 1  ;;  %v10019_v25 = vadd.f32 %v10018_v53, %v10017_v17  ;;  %v10565_v17 = vrot.slane %v10560_v20, %v19449_v40 }
 0xeeb   : > { %11502 = vmatmul.mubr.msk.bf16.vlgmr.msra.gmra.mxu1 %vm2320_vm14, %v17653_v44 }
 0xeec   : > { %v10030_v59 = vadd.f32 %v10029_v47, %v10028_v11  ;;  %v10020_v24 = vrot.slane %v10019_v25, 1  ;;  %v19450_v47 = vld [vmem:[#allocation8_spill] sm:$0xff] }
 0xeee   : > { %v10038_v61 = vmul.f32 0.0625, %v10030_v59  ;;  %v10021_v38 = vadd.f32 %v10020_v24, %v10019_v25  ;;  %v19451_v59 = vld [vmem:[#allocation9_spill] sm:$0xff] }
 0xef0   : > { %v10037_v35 = vmul.f32 0.0625, %v10021_v38  ;;  %v10046_v27 = vpack.c.bf16 %v10038_v61, %v10038_v61  ;;  %v19452_v61 = vld [vmem:[#allocation10_spill] sm:$0xff] }
 0xef2   : > { %v10045_v58 = vpack.c.bf16 %v10037_v35, %v10037_v35  ;;  %v10070_v14 = vunpack.c.l.b16 %v10046_v27  ;;  %v19453_v35 = vld [vmem:[#allocation12_spill] sm:$0xff] }
 0xef4   : > { %v10069_v46 = vunpack.c.l.b16 %v10045_v58  ;;  %v19454_v58 = vld [vmem:[#allocation13_spill] sm:$0xff] }
 0xef6   : > { %v10076_v45 = vsel %vm6988_vm6, %v10069_v46, %v10075_v7 }
 0xef7   : > { %v10077_v54 = vsel %vm6991_vm7, %v10070_v14, %v10076_v45  ;;  %v19455_v14 = vld [vmem:[#allocation16_spill] sm:$0xff] }
 0xef8   : > { %v10078_v1 = vpack.c.b16 %v10077_v54, %v10077_v54  ;;  %v19456_v54 = vld [vmem:[#allocation26_spill] sm:$0xff] }
 0xefa   : > { %11460 = vmatmul.mubr.msk.bf16.vlgmr.msra.gmra.mxu0 %vm2320_vm14, %v10078_v1 }
 0xefb   : > { %11470 = vmatpush3.bf16.xpose.msra.mxu0 %v10256_v62  ;;  %11471 = vmatprep.mubr.msk.bf16.mxu0 %vm11870_vm8, %v19370_v8 }
 0xefc   : > { %11481 = vmatprep.subr.bf16.mxu0 %v19370_v8 }
 0xf02   : > { %11472 = vmatmul.mubr.msk.bf16.vlgmr.msra.gmra.mxu0 %vm2320_vm14, %v17653_v44 }
 0xf03   : > { %11482 = vmatpush3.bf16.xpose.msra.mxu0 %v10342_v32  ;;  %11483 = vmatprep.mubr.msk.bf16.mxu0 %vm11870_vm8, %v19370_v8 }
 0xf04   : > { %11493 = vmatprep.subr.bf16.mxu0 %v19370_v8 }
 0xf0a   : > { %11484 = vmatmul.mubr.msk.bf16.vlgmr.msra.gmra.mxu0 %vm2320_vm14, %v17653_v44 }
 0xf0b   : > { %11494 = vmatpush3.bf16.xpose.msra.mxu0 %v10428_v13  ;;  %11495 = vmatprep.mubr.msk.bf16.mxu0 %vm11870_vm8, %v19370_v8 }
 0xf0c   : > { %11505 = vmatprep.subr.bf16.mxu0 %v19370_v8 }
 0xf12   : > { %11496 = vmatmul.mubr.msk.bf16.vlgmr.msra.gmra.mxu0 %vm2320_vm14, %v17653_v44 }
 0xf13   : > { %11506 = vmatpush3.bf16.xpose.msra.mxu0 %v10514_v34  ;;  %11507 = vmatprep.mubr.msk.bf16.mxu0 %vm11870_vm8, %v19370_v8  ;;  %v10895_v8 = vld [vmem:[%s17820_s13] ss:$0 sm:$0xff] }
 0xf1a   : > { %11508 = vmatmul.mubr.msk.bf16.vlgmr.msra.gmra.mxu0 %vm2320_vm14, %v17653_v44 }
 0xf37   : > { %v10249_v41 = vpop.f32.mrf.mxu1 }
 0xf39   : > { %v11467_v12 = vpop.f32.mrf.mxu1 }
 0xf3b   : > { %v10252_v57 = vpop.f32.mrf.mxu1 }
 0xf3d   : > { %v11468_v43 = vpop.f32.mrf.mxu1 }
 0xf47   : > { %v10335_v60 = vpop.f32.mrf.mxu1 }
 0xf49   : > { %v11479_v56 = vpop.f32.mrf.mxu1 }
 0xf4b   : > { %v10338_v42 = vpop.f32.mrf.mxu1 }
 0xf4d   : > { %v11480_v10 = vpop.f32.mrf.mxu1 }
 0xf6a   : > { %v10421_v33 = vpop.f32.mrf.mxu1 }
 0xf6c   : > { %v11491_v15 = vpop.f32.mrf.mxu1 }
 0xf6e   : > { %v10424_v22 = vpop.f32.mrf.mxu1 }
 0xf70   : > { %v11492_v50 = vpop.f32.mrf.mxu1 }
 0xfab   : > { %v10507_v37 = vpop.f32.mrf.mxu1 }
 0xfad   : > { %v11503_v26 = vpop.f32.mrf.mxu1 }
 0xfaf   : > { %v10510_v49 = vpop.f32.mrf.mxu1 }
 0xfb1   : > { %v11504_v48 = vpop.f32.mrf.mxu1 }
 0xfba   : > { %v10140_v9 = vpop.f32.mrf.mxu0 }
 0xfbb   : > { %v10146_v30 = vmax.f32 %v10140_v9, 0.0 }
 0xfbc   : > { %v11461_v16 = vpop.f32.mrf.mxu0 }
 0xfbd   : > { %v10154_v44 = vmul.f32 %v10895_v8, %v10146_v30 }
 0xfbe   : > { %v10143_v0 = vpop.f32.mrf.mxu0 }
 0xfbf   : > { %v10155_v52 = vsel %vm2320_vm14, %v10154_v44, 0.0 }
 0xfc0   : > { %10156 = vadd.xlane.f32.xlu1 %v10155_v52  ;;  %v11462_v39 = vpop.f32.mrf.mxu0 }
 0xfc2   : > { %v10292_v55 = vpop.f32.mrf.mxu0 }
 0xfc4   : > { %v11473_v7 = vpop.f32.mrf.mxu0 }
 0xfc6   : > { %v10295_v29 = vpop.f32.mrf.mxu0 }
 0xfc8   : > { %v11474_v23 = vpop.f32.mrf.mxu0 }
 0xfca   : > { %v10378_v4 = vpop.f32.mrf.mxu0 }
 0xfcc   : > { %v11485_v2 = vpop.f32.mrf.mxu0 }
 0xfce   : > { %v10381_v36 = vpop.f32.mrf.mxu0 }
 0xfd0   : > { %v11486_v21 = vpop.f32.mrf.mxu0 }
 0xfd2   : > { %v10464_v6 = vpop.f32.mrf.mxu0 }
 0xfd4   : > { %v11497_v51 = vpop.f32.mrf.mxu0 }
 0xfd6   : > { %v10467_v5 = vpop.f32.mrf.mxu0 }
 0xfd8   : > { %v11498_v18 = vpop.f32.mrf.mxu0 }
 0xfda   : > { %v10550_v19 = vpop.f32.mrf.mxu0 }
 0xfdc   : > { %v11509_v3 = vpop.f32.mrf.mxu0 }
 0xfde   : > { %v10553_v28 = vpop.f32.mrf.mxu0 }
 0xfe0   : > { %v11510_v31 = vpop.f32.mrf.mxu0 }
0x1049   : > { %v10157_v11 = vpop.xlane.xlu1 %10156 }
0x104a   : > { %v10172_v53 = vrot.slane %v10157_v11, %v19449_v40  ;;  %v10176_v25 = vrot.slane %v10157_v11, %v19450_v47  ;;  %v10180_v24 = vrot.slane %v10157_v11, %v19451_v59  ;;  %v10184_v38 = vrot.slane %v10157_v11, %v19452_v61 }
0x104b   : > { %v10188_v27 = vrot.slane %v10157_v11, %v19453_v35  ;;  %v10192_v46 = vrot.slane %v10157_v11, %v19454_v58  ;;  %v10196_v45 = vrot.slane %v10157_v11, %v19455_v14  ;;  %v10200_v1 = vrot.slane %v10157_v11, %v19456_v54 }
0x104c   : > { %v10250_v62 = vadd.f32 %v10249_v41, %v10172_v53  ;;  %v10293_v32 = vadd.f32 %v10292_v55, %v10176_v25  ;;  %v10336_v13 = vadd.f32 %v10335_v60, %v10180_v24  ;;  %v10379_v63 = vadd.f32 %v10378_v4, %v10184_v38 }
0x104d   : > { %v10422_v34 = vadd.f32 %v10421_v33, %v10188_v27  ;;  %v10465_v12 = vadd.f32 %v10464_v6, %v10192_v46  ;;  %v10508_v57 = vadd.f32 %v10507_v37, %v10196_v45  ;;  %v10551_v43 = vadd.f32 %v10550_v19, %v10200_v1 }
0x104e   : > { %v10566_v56 = vadd.f32 %v10565_v17, %v10250_v62  ;;  %v10567_v42 = vadd.f32 %v10565_v17, %v10293_v32  ;;  %v10568_v10 = vadd.f32 %v10565_v17, %v10336_v13  ;;  %v10569_v15 = vadd.f32 %v10565_v17, %v10379_v63 }
0x104f   : > { %v10570_v41 = vadd.f32 %v10565_v17, %v10422_v34  ;;  %v10571_v60 = vadd.f32 %v10565_v17, %v10465_v12  ;;  %v10572_v33 = vadd.f32 %v10565_v17, %v10508_v57  ;;  %v10573_v22 = vadd.f32 %v10565_v17, %v10551_v43 }
0x1050   : > { %10575 = vst.msk [vmem:[%s587_s30] sm:$0x1] %vm10574_vm10, %v10566_v56  ;;  %10576 = vst.msk [vmem:[%s587_s30 + $0x1] sm:$0x1] %vm10574_vm10, %v10567_v42 }
0x1051   : > { %10577 = vst.msk [vmem:[%s587_s30 + $0x2] sm:$0x1] %vm10574_vm10, %v10568_v10  ;;  %10578 = vst.msk [vmem:[%s587_s30 + $0x3] sm:$0x1] %vm10574_vm10, %v10569_v15 }
0x1052   : > { %10579 = vst.msk [vmem:[%s587_s30 + $0x4] sm:$0x1] %vm10574_vm10, %v10570_v41  ;;  %10580 = vst.msk [vmem:[%s587_s30 + $0x5] sm:$0x1] %vm10574_vm10, %v10571_v60 }
0x1053   : > { %10581 = vst.msk [vmem:[%s587_s30 + $0x6] sm:$0x1] %vm10574_vm10, %v10572_v33  ;;  %10582 = vst.msk [vmem:[%s587_s30 + $0x7] sm:$0x1] %vm10574_vm10, %v10573_v22 }
0x1054   : > { %11818 = shalt.err (!%p11815_p3)
}
0x1055   : > { %s11819_s29 = scalar_lea.hbm %s17753_s27, 128  ;;  %s11823_s22 = scalar_lea.hbm %s17823_s16, 256 }
0x1056   : > { %p11820_p4 = scmp.ne.s32.totalorder %s17753_s27, %s11819_s29  ;;  %p11824_p9 = scmp.lt.s32.totalorder %s17753_s27, %s17823_s16 }
0x1057   : > { %p11825_p10 = scmp.lt.s32.totalorder %s11823_s22, %s11819_s29 }
0x1058   : > { %p11821_p7 = pnand %p11820_p4, %p12000_p5 }
0x1059   : > { %p11826_p11 = por %p11825_p10, %p11824_p9 }
0x105a   : > { %p11822_p8 = pneg %p11821_p7 }
0x105c   : > { %p11827_p12 = pnand %p11826_p11, %p11822_p8 }
0x105e   : > { %11830 = shalt.err (!%p11827_p12)
}
0x105f   : > { %s11872_s0 = smov 16   ;;  %s11873_s19 = smov 1  }
0x1060   : > { %11511 = dma.vmem_to_hbm [thread:$0]  (%p12000_p5), %s17755_s25, 128, %s17753_s27, %s17767_s15, %s11872_s0, %s11872_s0, %s11873_s19  }
0x1061 PF: > { %p11517_p13 = scmp.ge.s32.totalorder %s11865_s26, 2  ;;  %s10612_s21 = sand.u32 1, %s11853_s23  }
0x1062   : > { %s10613_s1 = scalar_lea.sflag [#allocation4], %s10612_s21 }
0x1063   : > { %p11514_p0 = pnand %p11517_p13, %p12004_p6 }
0x1065   : > { %p11515_p1 = pneg %p11514_p0 }
0x1067   : > { %11848 = dma.done.wait (%p11515_p1), %s10613_s1, 128  }
0x1068   : > { %11850 = vsyncadd (%p11515_p1), %s10613_s1, 4294967168  ;;  %s19457_s2 = sld [smem:[#allocation6_spill]]  ;;  %p28_p2 = scmp.ge.s32.totalorder %s11987_s28, 4  }
0x1069   : > { %s19458_s25 = sld [smem:[#allocation7_spill]]  ;;  %s19459_s23 = smov %s11857_s24 }
0x106a   : > { %s19461_s26 = smov %s11987_s28  ;;  %30 = sbr.rel (!%p28_p2) target bundleno = 7 (0x7), region = 135 }
0x106e   : > { %s19460_s24 = smov %s19457_s2 }
0x106f   :  { %10618 = vsyncpa [#allocation4], 1 }
0x1070   :  { %10620 = vsyncpa [#allocation4 + $0x1], 1 }

</bundles_post_ra>
